<compile_context>
chip_gen: v6e
topology: v6e:2x2x1
jax: 0.10.0
libtpu: 0.0.40
codegen_flags: <defaults>
</compile_context>

<pallas_src>
import math
from functools import partial

import jax
import jax.numpy as jnp
from jax import lax
from jax.experimental import pallas as pl
from jax.experimental.pallas import tpu as pltpu


def _round_up(v, m):
    return ((v + m - 1) // m) * m


def _num_grid_steps(bt):
    # 2 steps -> one per v7x TensorCore; costs only ~0.35us extra on v5e/v6e.
    return 2 if (bt % 2 == 0 and bt >= 2) else 1


def frame_ffn_forward(x, params, *, kernel_size, num_steps=None):
    """x: (B, C, H, W, T) float32.  Conv kernel is (kh, kw, 1), padding 'same'."""
    kh, kw = kernel_size
    B, C, H, W, T = x.shape
    w1, b1 = params["w1"], params["b1"]          # (Ce, C, kh, kw, 1), (Ce,)
    w2, b2 = params["w2"], params["b2"]          # (Cout, Ce, kh, kw, 1), (Cout,)
    beta = params["beta"]                        # (1,)
    Ce, Cout = w1.shape[0], w2.shape[0]

    lo_h, hi_h = (kh - 1) // 2, (kh - 1) - (kh - 1) // 2      # PyTorch 'same' split
    lo_w, hi_w = (kw - 1) // 2, (kw - 1) - (kw - 1) // 2
    Hp, Wp = H + kh - 1, W + kw - 1
    KK = kh * kw
    taps = [dh * Wp + dw for dh in range(kh) for dw in range(kw)]   # static offsets
    START = lo_h * Wp + lo_w                 # interior origin inside a padded frame
    P = _round_up(Hp * Wp, 128)              # lanes per frame (128-aligned slab)
    BT = B * T
    NS = num_steps or _num_grid_steps(BT)
    assert BT % NS == 0, "BT must be divisible by the number of grid steps"
    G = BT // NS
    NCOLS = G * P                            # matmul N per grid step (multiple of 128)
    K1 = KK * C + 1                          # conv1 contraction (+1 bias/mask row)
    K1p = _round_up(K1, 16)                  # pad K to a bf16 sublane multiple
    K2 = KK * Ce                             # conv2 contraction
    FRONT = _round_up(START, 128)            # aligned store offset into conv2 scratch
    BACK = _round_up(max(taps) - START, 128)

    # ---------------- host-side layout plumbing (cheap XLA glue) ----------------
    xt = jnp.transpose(x, (0, 4, 1, 2, 3)).reshape(BT, C, H, W)
    xbig = jnp.pad(xt, ((0, 0), (0, 0),
                        (2 * lo_h, 2 * hi_h), (2 * lo_w, 2 * hi_w)))
    # interior mask over the padded (Hp, Wp) output grid
    rr = jnp.arange(Hp * Wp) // Wp
    cc = jnp.arange(Hp * Wp) % Wp
    interior = ((rr >= lo_h) & (rr < lo_h + H) &
                (cc >= lo_w) & (cc < lo_w + W)).astype(jnp.float32)   # (Hp*Wp,)

    # conv1 im2col: rows = (tap, in-channel), cols = padded-grid output position.
    taps_x = [xbig[:, :, dh:dh + Hp, dw:dw + Wp]
              for dh in range(kh) for dw in range(kw)]                # each (BT,C,Hp,Wp)
    x_im2col = jnp.stack(taps_x, axis=1).reshape(BT, KK * C, Hp * Wp)
    x_im2col = x_im2col * interior[None, None, :]   # zero non-interior output columns
    bias_row = jnp.broadcast_to(interior[None, None, :], (BT, 1, Hp * Wp))
    x_aug = jnp.concatenate(
        [x_im2col, bias_row,
         jnp.zeros((BT, K1p - K1, Hp * Wp), x_im2col.dtype)], axis=1)  # (BT,K1p,Hp*Wp)
    x_aug = jnp.pad(x_aug, ((0, 0), (0, 0), (0, P - Hp * Wp)))
    x_aug = jnp.transpose(x_aug, (1, 0, 2)).reshape(K1p, BT * P).astype(jnp.bfloat16)

    # conv1 weights with bias folded in as the extra column (matches bias_row).
    w1r = jnp.transpose(w1[..., 0], (0, 2, 3, 1)).reshape(Ce, KK * C)
    w1_aug = jnp.concatenate(
        [w1r, b1[:, None], jnp.zeros((Ce, K1p - K1), w1r.dtype)],
        axis=1).astype(jnp.bfloat16)                                   # (Ce, K1p)
    w2r = jnp.transpose(w2[..., 0], (0, 2, 3, 1)).reshape(Cout, K2).astype(jnp.bfloat16)
    b2c = b2.reshape(Cout, 1).astype(jnp.float32)

    # ------------------------------- kernel -------------------------------------
    def kernel(x_ref, w1_ref, w2_ref, b2_ref, beta_ref, o_ref, scr_ref, stk_ref):
        beta_s = beta_ref[0]                                   # scalar from SMEM
        # conv1 (+bias, +border zeroing folded into operands): ONE matmul, K=K1p.
        y = jnp.dot(w1_ref[...], x_ref[...],
                    preferred_element_type=jnp.float32)        # (Ce, NCOLS) f32
        # Swish: y * sigmoid(beta*y); exp + approx reciprocal both run on EUP.
        sig = pl.reciprocal(1.0 + jnp.exp(-beta_s * y), approx=True)
        act = (y * sig).astype(scr_ref.dtype)                  # zero outside interior
        # Zero the guard bands every step (scratch is per-core, parallel-safe),
        # then one fully lane-aligned store of the whole Swish slab.
        if FRONT:
            scr_ref[:, :FRONT] = jnp.zeros((Ce, FRONT), scr_ref.dtype)
        if BACK:
            scr_ref[:, FRONT + NCOLS:] = jnp.zeros((Ce, BACK), scr_ref.dtype)
        scr_ref[:, FRONT:FRONT + NCOLS] = act
        # conv2 im2col: KK shifted views stacked on sublanes, then ONE matmul (K=K2).
        for k in range(KK):                                    # static, KK small
            off = FRONT + taps[k] - START
            stk_ref[k * Ce:(k + 1) * Ce, :] = scr_ref[:, off:off + NCOLS]
        out = jnp.dot(w2_ref[...], stk_ref[...],
                      preferred_element_type=jnp.float32)      # (Cout, NCOLS) f32
        o_ref[...] = (out + b2_ref[...]).astype(o_ref.dtype)

    out = pl.pallas_call(
        kernel,
        out_shape=jax.ShapeDtypeStruct((Cout, BT * P), jnp.float32),
        grid=(NS,),
        in_specs=[
            pl.BlockSpec((K1p, NCOLS), lambda i: (0, i)),        # conv1 im2col slab
            pl.BlockSpec((Ce, K1p), lambda i: (0, 0)),           # conv1 weights (+bias)
            pl.BlockSpec((Cout, K2), lambda i: (0, 0)),          # conv2 weights
            pl.BlockSpec((Cout, 1), lambda i: (0, 0)),           # conv2 bias
            pl.BlockSpec(memory_space=pltpu.MemorySpace.SMEM),   # swish beta scalar
        ],
        out_specs=pl.BlockSpec((Cout, NCOLS), lambda i: (0, i)),
        scratch_shapes=[
            pltpu.VMEM((Ce, FRONT + NCOLS + BACK), jnp.bfloat16),   # padded Swish slab
            pltpu.VMEM((K2, NCOLS), jnp.bfloat16),                  # conv2 im2col stack
        ],
        compiler_params=pltpu.CompilerParams(
            dimension_semantics=("parallel",),
            vmem_limit_bytes=32 * 1024 * 1024),
    )(x_aug, w1_aug, w2r, b2c, beta.astype(jnp.float32))

    # Strip the padded-grid border/slack columns and restore (B, C, H, W, T).
    out = out.reshape(Cout, B, T, P)[..., :Hp * Wp].reshape(Cout, B, T, Hp, Wp)
    out = out[:, :, :, lo_h:lo_h + H, lo_w:lo_w + W]
    return jnp.transpose(out, (1, 0, 3, 4, 2))


def reference_frame_ffn(x, params, kernel_size):
    """Pure-JAX reference (same bf16 operand rounding as the kernel)."""
    kh, kw = kernel_size
    B, C, H, W, T = x.shape
    rnd = lambda a: a.astype(jnp.bfloat16).astype(jnp.float32)
    w1 = rnd(params["w1"][..., 0])
    w2 = rnd(params["w2"][..., 0])
    pad = [((kh - 1) // 2, (kh - 1) - (kh - 1) // 2),
           ((kw - 1) // 2, (kw - 1) - (kw - 1) // 2)]
    dn = ("NCHW", "OIHW", "NCHW")
    xi = rnd(jnp.transpose(x, (0, 4, 1, 2, 3)).reshape(B * T, C, H, W))
    y = lax.conv_general_dilated(xi, w1, (1, 1), pad, dimension_numbers=dn,
                                 precision=lax.Precision.HIGHEST)
    y = y + params["b1"].reshape(1, -1, 1, 1)
    y = y * jax.nn.sigmoid(y * params["beta"][0])
    y = rnd(y)
    y = lax.conv_general_dilated(y, w2, (1, 1), pad, dimension_numbers=dn,
                                 precision=lax.Precision.HIGHEST)
    y = y + params["b2"].reshape(1, -1, 1, 1)
    y = y.reshape(B, T, -1, H, W)
    return jnp.transpose(y, (0, 2, 3, 4, 1))


if __name__ == "__main__":
    # Small shapes consistent with FrameFFN: x is (B, inchans, H, W, T).
    B, C, H, W, T = 2, 8, 16, 16, 8
    expansion = 4
    kernel_size = (3, 3)
    kh, kw = kernel_size
    Ce = C * expansion

    key = jax.random.PRNGKey(0)
    kx, k1, k2, k3, k4 = jax.random.split(key, 5)
    params = dict(
        w1=jax.random.normal(k1, (Ce, C, kh, kw, 1), jnp.float32)
           * (1.0 / math.sqrt(C * kh * kw)),
        b1=jax.random.normal(k2, (Ce,), jnp.float32) * 0.01,
        w2=jax.random.normal(k3, (C, Ce, kh, kw, 1), jnp.float32)
           * (1.0 / math.sqrt(Ce * kh * kw)),
        b2=jax.random.normal(k4, (C,), jnp.float32) * 0.01,
        beta=jnp.ones((1,), jnp.float32),          # Swish beta (init 1.0, as in PyTorch)
    )
    x = jax.random.normal(kx, (B, C, H, W, T), jnp.float32)

    fwd = jax.jit(partial(frame_ffn_forward, kernel_size=kernel_size))
    y = fwd(x, params)
    jax.block_until_ready(y)

    assert y.shape == (B, C, H, W, T)
    assert bool(jnp.all(jnp.isfinite(y)))
    y_ref = reference_frame_ffn(x, params, kernel_size)
    err = float(jnp.max(jnp.abs(y - y_ref)))
    assert err < 3e-2, f"max abs error vs reference: {err}"
    print("KERNEL_OK")
</pallas_src>

<mosaic_0001>
module attributes {stable_mosaic.version = 11 : i64} {
  func.func @kernel(%arg0: i32, %arg1: memref<80x3072xbf16, #tpu.memory_space<vmem>>, %arg2: memref<32x80xbf16, #tpu.memory_space<vmem>>, %arg3: memref<8x288xbf16, #tpu.memory_space<vmem>>, %arg4: memref<8x1xf32, #tpu.memory_space<vmem>>, %arg5: memref<1xf32, #tpu.memory_space<smem>>, %arg6: memref<8x3072xf32, #tpu.memory_space<vmem>>, %arg7: memref<32x3328xbf16, #tpu.memory_space<vmem>>, %arg8: memref<288x3072xbf16, #tpu.memory_space<vmem>>) attributes {dimension_semantics = [#tpu.dimension_semantics<parallel>], iteration_bounds = array<i64: 2>, scalar_prefetch = 0 : i64, scratch_operands = 2 : i64, tpu.core_type = #tpu.core_type<tc>, window_params = [{transform_indices = @transform_0, window_bounds = array<i64: 80, 3072>}, {pipeline_mode = #tpu.pipeline_mode<synchronous>, transform_indices = @transform_1, window_bounds = array<i64: 32, 80>}, {pipeline_mode = #tpu.pipeline_mode<synchronous>, transform_indices = @transform_2, window_bounds = array<i64: 8, 288>}, {pipeline_mode = #tpu.pipeline_mode<synchronous>, transform_indices = @transform_3, window_bounds = array<i64: 8, 1>}, {transform_indices = @transform_4, window_bounds = array<i64: 1>}, {transform_indices = @transform_5, window_bounds = array<i64: 8, 3072>}]} {
    %c0 = arith.constant 0 : index
    %0 = memref.load %arg5[%c0] : memref<1xf32, #tpu.memory_space<smem>>
    %c0_0 = arith.constant 0 : index
    %c0_1 = arith.constant 0 : index
    %1 = vector.load %arg2[%c0_0, %c0_1] : memref<32x80xbf16, #tpu.memory_space<vmem>>, vector<32x80xbf16>
    %c0_2 = arith.constant 0 : index
    %c0_3 = arith.constant 0 : index
    %2 = vector.load %arg1[%c0_2, %c0_3] : memref<80x3072xbf16, #tpu.memory_space<vmem>>, vector<80x3072xbf16>
    %cst = arith.constant dense<0.000000e+00> : vector<32x3072xf32>
    %3 = tpu.matmul %1, %2, %cst {dimension_numbers = #tpu.dot_dimension_numbers<[1], [0], [0], [1], [0, 0, 1, 1], [], []>} : vector<32x80xbf16>, vector<80x3072xbf16>, vector<32x3072xf32> -> vector<32x3072xf32>
    %cst_4 = arith.constant 0.000000e+00 : f32
    %4 = arith.subf %cst_4, %0 : f32
    %5 = vector.broadcast %4 : f32 to vector<32x3072xf32>
    %6 = arith.mulf %5, %3 : vector<32x3072xf32>
    %7 = math.exp %6 : vector<32x3072xf32>
    %cst_5 = arith.constant 1.000000e+00 : f32
    %8 = vector.broadcast %cst_5 : f32 to vector<32x3072xf32>
    %9 = arith.addf %8, %7 : vector<32x3072xf32>
    %10 = tpu.reciprocal %9 {approx = true} : vector<32x3072xf32> -> vector<32x3072xf32>
    %11 = arith.mulf %3, %10 : vector<32x3072xf32>
    %12 = arith.truncf %11 : vector<32x3072xf32> to vector<32x3072xbf16>
    %cst_6 = arith.constant 0.000000e+00 : bf16
    %13 = vector.broadcast %cst_6 : bf16 to vector<32x128xbf16>
    %c0_7 = arith.constant 0 : index
    %c0_8 = arith.constant 0 : index
    %14 = vector.load %arg7[%c0_7, %c0_8] : memref<32x3328xbf16, #tpu.memory_space<vmem>>, vector<32x128xbf16>
    tpu.vector_store %arg7[%c0_7, %c0_8], %13 {strides = array<i32>} : memref<32x3328xbf16, #tpu.memory_space<vmem>>, vector<32x128xbf16>,
    %cst_9 = arith.constant 0.000000e+00 : bf16
    %15 = vector.broadcast %cst_9 : bf16 to vector<32x128xbf16>
    %c0_10 = arith.constant 0 : index
    %c3200 = arith.constant 3200 : index
    %16 = vector.load %arg7[%c0_10, %c3200] : memref<32x3328xbf16, #tpu.memory_space<vmem>>, vector<32x128xbf16>
    tpu.vector_store %arg7[%c0_10, %c3200], %15 {strides = array<i32>} : memref<32x3328xbf16, #tpu.memory_space<vmem>>, vector<32x128xbf16>,
    %c0_11 = arith.constant 0 : index
    %c128 = arith.constant 128 : index
    %17 = vector.load %arg7[%c0_11, %c128] : memref<32x3328xbf16, #tpu.memory_space<vmem>>, vector<32x3072xbf16>
    tpu.vector_store %arg7[%c0_11, %c128], %12 {strides = array<i32>} : memref<32x3328xbf16, #tpu.memory_space<vmem>>, vector<32x3072xbf16>,
    %c0_12 = arith.constant 0 : index
    %c109 = arith.constant 109 : index
    %18 = vector.load %arg7[%c0_12, %c109] : memref<32x3328xbf16, #tpu.memory_space<vmem>>, vector<32x3072xbf16>
    %c0_13 = arith.constant 0 : index
    %c0_14 = arith.constant 0 : index
    %19 = vector.load %arg8[%c0_13, %c0_14] : memref<288x3072xbf16, #tpu.memory_space<vmem>>, vector<32x3072xbf16>
    tpu.vector_store %arg8[%c0_13, %c0_14], %18 {strides = array<i32>} : memref<288x3072xbf16, #tpu.memory_space<vmem>>, vector<32x3072xbf16>,
    %c0_15 = arith.constant 0 : index
    %c110 = arith.constant 110 : index
    %20 = vector.load %arg7[%c0_15, %c110] : memref<32x3328xbf16, #tpu.memory_space<vmem>>, vector<32x3072xbf16>
    %c32 = arith.constant 32 : index
    %c0_16 = arith.constant 0 : index
    %21 = vector.load %arg8[%c32, %c0_16] : memref<288x3072xbf16, #tpu.memory_space<vmem>>, vector<32x3072xbf16>
    tpu.vector_store %arg8[%c32, %c0_16], %20 {strides = array<i32>} : memref<288x3072xbf16, #tpu.memory_space<vmem>>, vector<32x3072xbf16>,
    %c0_17 = arith.constant 0 : index
    %c111 = arith.constant 111 : index
    %22 = vector.load %arg7[%c0_17, %c111] : memref<32x3328xbf16, #tpu.memory_space<vmem>>, vector<32x3072xbf16>
    %c64 = arith.constant 64 : index
    %c0_18 = arith.constant 0 : index
    %23 = vector.load %arg8[%c64, %c0_18] : memref<288x3072xbf16, #tpu.memory_space<vmem>>, vector<32x3072xbf16>
    tpu.vector_store %arg8[%c64, %c0_18], %22 {strides = array<i32>} : memref<288x3072xbf16, #tpu.memory_space<vmem>>, vector<32x3072xbf16>,
    %c0_19 = arith.constant 0 : index
    %c127 = arith.constant 127 : index
    %24 = vector.load %arg7[%c0_19, %c127] : memref<32x3328xbf16, #tpu.memory_space<vmem>>, vector<32x3072xbf16>
    %c96 = arith.constant 96 : index
    %c0_20 = arith.constant 0 : index
    %25 = vector.load %arg8[%c96, %c0_20] : memref<288x3072xbf16, #tpu.memory_space<vmem>>, vector<32x3072xbf16>
    tpu.vector_store %arg8[%c96, %c0_20], %24 {strides = array<i32>} : memref<288x3072xbf16, #tpu.memory_space<vmem>>, vector<32x3072xbf16>,
    %c0_21 = arith.constant 0 : index
    %c128_22 = arith.constant 128 : index
    %26 = vector.load %arg7[%c0_21, %c128_22] : memref<32x3328xbf16, #tpu.memory_space<vmem>>, vector<32x3072xbf16>
    %c128_23 = arith.constant 128 : index
    %c0_24 = arith.constant 0 : index
    %27 = vector.load %arg8[%c128_23, %c0_24] : memref<288x3072xbf16, #tpu.memory_space<vmem>>, vector<32x3072xbf16>
    tpu.vector_store %arg8[%c128_23, %c0_24], %26 {strides = array<i32>} : memref<288x3072xbf16, #tpu.memory_space<vmem>>, vector<32x3072xbf16>,
    %c0_25 = arith.constant 0 : index
    %c129 = arith.constant 129 : index
    %28 = vector.load %arg7[%c0_25, %c129] : memref<32x3328xbf16, #tpu.memory_space<vmem>>, vector<32x3072xbf16>
    %c160 = arith.constant 160 : index
    %c0_26 = arith.constant 0 : index
    %29 = vector.load %arg8[%c160, %c0_26] : memref<288x3072xbf16, #tpu.memory_space<vmem>>, vector<32x3072xbf16>
    tpu.vector_store %arg8[%c160, %c0_26], %28 {strides = array<i32>} : memref<288x3072xbf16, #tpu.memory_space<vmem>>, vector<32x3072xbf16>,
    %c0_27 = arith.constant 0 : index
    %c145 = arith.constant 145 : index
    %30 = vector.load %arg7[%c0_27, %c145] : memref<32x3328xbf16, #tpu.memory_space<vmem>>, vector<32x3072xbf16>
    %c192 = arith.constant 192 : index
    %c0_28 = arith.constant 0 : index
    %31 = vector.load %arg8[%c192, %c0_28] : memref<288x3072xbf16, #tpu.memory_space<vmem>>, vector<32x3072xbf16>
    tpu.vector_store %arg8[%c192, %c0_28], %30 {strides = array<i32>} : memref<288x3072xbf16, #tpu.memory_space<vmem>>, vector<32x3072xbf16>,
    %c0_29 = arith.constant 0 : index
    %c146 = arith.constant 146 : index
    %32 = vector.load %arg7[%c0_29, %c146] : memref<32x3328xbf16, #tpu.memory_space<vmem>>, vector<32x3072xbf16>
    %c224 = arith.constant 224 : index
    %c0_30 = arith.constant 0 : index
    %33 = vector.load %arg8[%c224, %c0_30] : memref<288x3072xbf16, #tpu.memory_space<vmem>>, vector<32x3072xbf16>
    tpu.vector_store %arg8[%c224, %c0_30], %32 {strides = array<i32>} : memref<288x3072xbf16, #tpu.memory_space<vmem>>, vector<32x3072xbf16>,
    %c0_31 = arith.constant 0 : index
    %c147 = arith.constant 147 : index
    %34 = vector.load %arg7[%c0_31, %c147] : memref<32x3328xbf16, #tpu.memory_space<vmem>>, vector<32x3072xbf16>
    %c256 = arith.constant 256 : index
    %c0_32 = arith.constant 0 : index
    %35 = vector.load %arg8[%c256, %c0_32] : memref<288x3072xbf16, #tpu.memory_space<vmem>>, vector<32x3072xbf16>
    tpu.vector_store %arg8[%c256, %c0_32], %34 {strides = array<i32>} : memref<288x3072xbf16, #tpu.memory_space<vmem>>, vector<32x3072xbf16>,
    %c0_33 = arith.constant 0 : index
    %c0_34 = arith.constant 0 : index
    %36 = vector.load %arg3[%c0_33, %c0_34] : memref<8x288xbf16, #tpu.memory_space<vmem>>, vector<8x288xbf16>
    %c0_35 = arith.constant 0 : index
    %c0_36 = arith.constant 0 : index
    %37 = vector.load %arg8[%c0_35, %c0_36] : memref<288x3072xbf16, #tpu.memory_space<vmem>>, vector<288x3072xbf16>
    %cst_37 = arith.constant dense<0.000000e+00> : vector<8x3072xf32>
    %38 = tpu.matmul %36, %37, %cst_37 {dimension_numbers = #tpu.dot_dimension_numbers<[1], [0], [0], [1], [0, 0, 1, 1], [], []>} : vector<8x288xbf16>, vector<288x3072xbf16>, vector<8x3072xf32> -> vector<8x3072xf32>
    %c0_38 = arith.constant 0 : index
    %c0_39 = arith.constant 0 : index
    %39 = vector.load %arg4[%c0_38, %c0_39] : memref<8x1xf32, #tpu.memory_space<vmem>>, vector<8x1xf32>
    %40 = vector.broadcast %39 : vector<8x1xf32> to vector<8x3072xf32>
    %41 = arith.addf %38, %40 : vector<8x3072xf32>
    %c0_40 = arith.constant 0 : index
    %c0_41 = arith.constant 0 : index
    %42 = vector.load %arg6[%c0_40, %c0_41] : memref<8x3072xf32, #tpu.memory_space<vmem>>, vector<8x3072xf32>
    tpu.vector_store %arg6[%c0_40, %c0_41], %41 {strides = array<i32>} : memref<8x3072xf32, #tpu.memory_space<vmem>>, vector<8x3072xf32>,
    return
  }
  func.func @transform_0(%arg0: i32) -> (i32, i32) {
    %c0_i32 = arith.constant 0 : i32
    %c0_i32_0 = arith.constant 0 : i32
    return %c0_i32, %arg0 : i32, i32
  }
  func.func @transform_1(%arg0: i32) -> (i32, i32) {
    %c0_i32 = arith.constant 0 : i32
    %c0_i32_0 = arith.constant 0 : i32
    %c0_i32_1 = arith.constant 0 : i32
    return %c0_i32, %c0_i32_0 : i32, i32
  }
  func.func @transform_2(%arg0: i32) -> (i32, i32) {
    %c0_i32 = arith.constant 0 : i32
    %c0_i32_0 = arith.constant 0 : i32
    %c0_i32_1 = arith.constant 0 : i32
    return %c0_i32, %c0_i32_0 : i32, i32
  }
  func.func @transform_3(%arg0: i32) -> (i32, i32) {
    %c0_i32 = arith.constant 0 : i32
    %c0_i32_0 = arith.constant 0 : i32
    %c0_i32_1 = arith.constant 0 : i32
    return %c0_i32, %c0_i32_0 : i32, i32
  }
  func.func @transform_4(%arg0: i32) -> i32 {
    %c0_i32 = arith.constant 0 : i32
    %c0_i32_0 = arith.constant 0 : i32
    return %c0_i32 : i32
  }
  func.func @transform_5(%arg0: i32) -> (i32, i32) {
    %c0_i32 = arith.constant 0 : i32
    %c0_i32_0 = arith.constant 0 : i32
    return %c0_i32, %arg0 : i32, i32
  }
}

</mosaic_0001>

<bundles_post_ra>
// kernel: frame_ffn_forward.1
= control target key start
LH: loop header
LB: loop body
LE: loop exit
PB: predicated region body
PF: predicated region fallthrough
CT: control target
= control target key end

     0   :  { %s17027_s0 = inlined_call_operand.vmem [shape: bf16[80,6144], index: 0, kind: input, shape index: {}]   ;;  %s17028_s1 = inlined_call_operand.vmem [shape: bf16[32,80], index: 1, kind: input, shape index: {}]   ;;  %s17029_s2 = inlined_call_operand.vmem [shape: bf16[8,288], index: 2, kind: input, shape index: {}]   ;;  %s17030_s3 = inlined_call_operand.vmem [shape: f32[8,1], index: 3, kind: input, shape index: {}]   ;;  %s17031_s4 = inlined_call_operand.<no memory space> [shape: f32[1], index: 4, kind: input, shape index: {}]   ;;  %s17032_s5 = inlined_call_operand.vmem [shape: f32[8,6144], index: 5, kind: output, shape index: {}]  }
   0x1   :  { %10 = sst [smem:[#allocation4]] %s17031_s4 }
   0x2   :  { %s11503_s20 = smov 0   ;;  %s11505_s21 = smov 0  }
   0x3   :  { %s11507_s22 = smov 0  }
   0x4 LB: > { %s10192_s4 = sadd.s32 4294967295, %s11459_s22   ;;  %s11520_s23 = sadd.s32 1, %s11459_s22   ;;  %s11459_s22 = sphi %s11507_s22, %s17971_s22   ;;  %s11455_s21 = sphi %s11505_s21, %s17970_s21   ;;  %s11451_s20 = sphi %s11503_s20, %s17969_s20  }
   0x5   : > { %s20_s24 = ssub.s32 %s11459_s22, %s11520_s23  ;;  %s23_s25 = sadd.s32 1, %s11455_s21 }
   0x6   : > { %p21_p0 = scmp.eq.s32.totalorder %s20_s24, 0  ;;  %p30_p1 = scmp.ne.s32.totalorder %s11455_s21, %s11451_s20 }
   0x7   : > { %p31_p2 = scmp.eq.s32.totalorder %s11459_s22, 0  ;;  %p10195_p4 = scmp.ge.s32.totalorder %s11459_s22, 2 }
   0x8   : > { %s11529_s26 = scalar_select %p21_p0, %s11455_s21, %s23_s25  }
   0x9   : > { %p32_p3 = por %p31_p2, %p30_p1  ;;  %178 = sbr.rel (%p10195_p4) target bundleno = 79 (0x4f), region = 32 }
   0xe   : > { %181 = sbr.rel (!%p32_p3) target bundleno = 79 (0x4f), region = 36  ;;  %s183_s27 = sand.u32 (%p32_p3), 1, %s11455_s21  }
   0xf   : > { %s10842_s28 = smul.u32 (%p32_p3), 96, %s11459_s22 }
  0x10   : > { %s10891_s29 = smul.u32 (%p32_p3), 960, %s183_s27 }
  0x11   : > { %s11537_s7 = scalar_lea.vmem (%p32_p3), %s17027_s0, %s10842_s28 }
  0x12   : > { %v201_v0 = vld [vmem:[%s11537_s7] sm:$0xff] (%p32_p3)  ;;  %v203_v1 = vld [vmem:[%s11537_s7 + $0x8] sm:$0xff] (%p32_p3)  ;;  %v205_v2 = vld [vmem:[%s11537_s7 + $0x10] sm:$0xff] (%p32_p3)  ;;  %s11542_s8 = scalar_lea.vmem (%p32_p3), [#allocation5], %s10891_s29 }
  0x13   : > { %202 = vst [vmem:[%s11542_s8] sm:$0xff] %v201_v0  ;;  %204 = vst [vmem:[%s11542_s8 + $0x8] sm:$0xff] %v203_v1  ;;  %v207_v3 = vld [vmem:[%s11537_s7 + $0x18] sm:$0xff]  ;;  %v209_v4 = vld [vmem:[%s11537_s7 + $0x20] sm:$0xff] }
  0x14   : > { %206 = vst [vmem:[%s11542_s8 + $0x10] sm:$0xff] %v205_v2  ;;  %v211_v5 = vld [vmem:[%s11537_s7 + $0x28] sm:$0xff]  ;;  %208 = vst [vmem:[%s11542_s8 + $0x18] sm:$0xff] %v207_v3  ;;  %v213_v6 = vld [vmem:[%s11537_s7 + $0x30] sm:$0xff] }
  0x15   : > { %210 = vst [vmem:[%s11542_s8 + $0x20] sm:$0xff] %v209_v4  ;;  %212 = vst [vmem:[%s11542_s8 + $0x28] sm:$0xff] %v211_v5  ;;  %v215_v7 = vld [vmem:[%s11537_s7 + $0x38] sm:$0xff]  ;;  %v217_v8 = vld [vmem:[%s11537_s7 + $0x40] sm:$0xff] }
  0x16   : > { %214 = vst [vmem:[%s11542_s8 + $0x30] sm:$0xff] %v213_v6  ;;  %216 = vst [vmem:[%s11542_s8 + $0x38] sm:$0xff] %v215_v7  ;;  %v219_v9 = vld [vmem:[%s11537_s7 + $0x48] sm:$0xff]  ;;  %v221_v10 = vld [vmem:[%s11537_s7 + $0x50] sm:$0xff] }
  0x17   : > { %218 = vst [vmem:[%s11542_s8 + $0x40] sm:$0xff] %v217_v8  ;;  %v223_v11 = vld [vmem:[%s11537_s7 + $0x58] sm:$0xff]  ;;  %220 = vst [vmem:[%s11542_s8 + $0x48] sm:$0xff] %v219_v9  ;;  %v225_v12 = vld [vmem:[%s11537_s7 + $0xc0] sm:$0xff] }
  0x18   : > { %222 = vst [vmem:[%s11542_s8 + $0x50] sm:$0xff] %v221_v10  ;;  %224 = vst [vmem:[%s11542_s8 + $0x58] sm:$0xff] %v223_v11  ;;  %v227_v13 = vld [vmem:[%s11537_s7 + $0xc8] sm:$0xff]  ;;  %v229_v14 = vld [vmem:[%s11537_s7 + $0xd0] sm:$0xff] }
  0x19   : > { %226 = vst [vmem:[%s11542_s8 + $0x60] sm:$0xff] %v225_v12  ;;  %228 = vst [vmem:[%s11542_s8 + $0x68] sm:$0xff] %v227_v13  ;;  %v231_v15 = vld [vmem:[%s11537_s7 + $0xd8] sm:$0xff]  ;;  %v233_v16 = vld [vmem:[%s11537_s7 + $0xe0] sm:$0xff] }
  0x1a   : > { %230 = vst [vmem:[%s11542_s8 + $0x70] sm:$0xff] %v229_v14  ;;  %v235_v17 = vld [vmem:[%s11537_s7 + $0xe8] sm:$0xff]  ;;  %232 = vst [vmem:[%s11542_s8 + $0x78] sm:$0xff] %v231_v15  ;;  %v237_v18 = vld [vmem:[%s11537_s7 + $0xf0] sm:$0xff] }
  0x1b   : > { %234 = vst [vmem:[%s11542_s8 + $0x80] sm:$0xff] %v233_v16  ;;  %236 = vst [vmem:[%s11542_s8 + $0x88] sm:$0xff] %v235_v17  ;;  %v239_v19 = vld [vmem:[%s11537_s7 + $0xf8] sm:$0xff]  ;;  %v241_v20 = vld [vmem:[%s11537_s7 + $0x100] sm:$0xff] }
  0x1c   : > { %238 = vst [vmem:[%s11542_s8 + $0x90] sm:$0xff] %v237_v18  ;;  %240 = vst [vmem:[%s11542_s8 + $0x98] sm:$0xff] %v239_v19  ;;  %v243_v21 = vld [vmem:[%s11537_s7 + $0x108] sm:$0xff]  ;;  %v245_v22 = vld [vmem:[%s11537_s7 + $0x110] sm:$0xff] }
  0x1d   : > { %242 = vst [vmem:[%s11542_s8 + $0xa0] sm:$0xff] %v241_v20  ;;  %v247_v23 = vld [vmem:[%s11537_s7 + $0x118] sm:$0xff]  ;;  %244 = vst [vmem:[%s11542_s8 + $0xa8] sm:$0xff] %v243_v21  ;;  %v249_v24 = vld [vmem:[%s11537_s7 + $0x180] sm:$0xff] }
  0x1e   : > { %246 = vst [vmem:[%s11542_s8 + $0xb0] sm:$0xff] %v245_v22  ;;  %248 = vst [vmem:[%s11542_s8 + $0xb8] sm:$0xff] %v247_v23  ;;  %v251_v25 = vld [vmem:[%s11537_s7 + $0x188] sm:$0xff]  ;;  %v253_v26 = vld [vmem:[%s11537_s7 + $0x190] sm:$0xff] }
  0x1f   : > { %250 = vst [vmem:[%s11542_s8 + $0xc0] sm:$0xff] %v249_v24  ;;  %252 = vst [vmem:[%s11542_s8 + $0xc8] sm:$0xff] %v251_v25  ;;  %v255_v27 = vld [vmem:[%s11537_s7 + $0x198] sm:$0xff]  ;;  %v257_v28 = vld [vmem:[%s11537_s7 + $0x1a0] sm:$0xff] }
  0x20   : > { %254 = vst [vmem:[%s11542_s8 + $0xd0] sm:$0xff] %v253_v26  ;;  %v259_v29 = vld [vmem:[%s11537_s7 + $0x1a8] sm:$0xff]  ;;  %256 = vst [vmem:[%s11542_s8 + $0xd8] sm:$0xff] %v255_v27  ;;  %v261_v30 = vld [vmem:[%s11537_s7 + $0x1b0] sm:$0xff] }
  0x21   : > { %258 = vst [vmem:[%s11542_s8 + $0xe0] sm:$0xff] %v257_v28  ;;  %260 = vst [vmem:[%s11542_s8 + $0xe8] sm:$0xff] %v259_v29  ;;  %v263_v31 = vld [vmem:[%s11537_s7 + $0x1b8] sm:$0xff]  ;;  %v265_v32 = vld [vmem:[%s11537_s7 + $0x1c0] sm:$0xff] }
  0x22   : > { %262 = vst [vmem:[%s11542_s8 + $0xf0] sm:$0xff] %v261_v30  ;;  %264 = vst [vmem:[%s11542_s8 + $0xf8] sm:$0xff] %v263_v31  ;;  %v267_v33 = vld [vmem:[%s11537_s7 + $0x1c8] sm:$0xff]  ;;  %v269_v34 = vld [vmem:[%s11537_s7 + $0x1d0] sm:$0xff] }
  0x23   : > { %266 = vst [vmem:[%s11542_s8 + $0x100] sm:$0xff] %v265_v32  ;;  %v271_v35 = vld [vmem:[%s11537_s7 + $0x1d8] sm:$0xff]  ;;  %268 = vst [vmem:[%s11542_s8 + $0x108] sm:$0xff] %v267_v33  ;;  %v273_v36 = vld [vmem:[%s11537_s7 + $0x240] sm:$0xff] }
  0x24   : > { %270 = vst [vmem:[%s11542_s8 + $0x110] sm:$0xff] %v269_v34  ;;  %272 = vst [vmem:[%s11542_s8 + $0x118] sm:$0xff] %v271_v35  ;;  %v275_v37 = vld [vmem:[%s11537_s7 + $0x248] sm:$0xff]  ;;  %v277_v38 = vld [vmem:[%s11537_s7 + $0x250] sm:$0xff] }
  0x25   : > { %274 = vst [vmem:[%s11542_s8 + $0x120] sm:$0xff] %v273_v36  ;;  %276 = vst [vmem:[%s11542_s8 + $0x128] sm:$0xff] %v275_v37  ;;  %v279_v39 = vld [vmem:[%s11537_s7 + $0x258] sm:$0xff]  ;;  %v281_v40 = vld [vmem:[%s11537_s7 + $0x260] sm:$0xff] }
  0x26   : > { %278 = vst [vmem:[%s11542_s8 + $0x130] sm:$0xff] %v277_v38  ;;  %v283_v41 = vld [vmem:[%s11537_s7 + $0x268] sm:$0xff]  ;;  %280 = vst [vmem:[%s11542_s8 + $0x138] sm:$0xff] %v279_v39  ;;  %v285_v42 = vld [vmem:[%s11537_s7 + $0x270] sm:$0xff] }
  0x27   : > { %282 = vst [vmem:[%s11542_s8 + $0x140] sm:$0xff] %v281_v40  ;;  %284 = vst [vmem:[%s11542_s8 + $0x148] sm:$0xff] %v283_v41  ;;  %v287_v43 = vld [vmem:[%s11537_s7 + $0x278] sm:$0xff]  ;;  %v289_v44 = vld [vmem:[%s11537_s7 + $0x280] sm:$0xff] }
  0x28   : > { %286 = vst [vmem:[%s11542_s8 + $0x150] sm:$0xff] %v285_v42  ;;  %288 = vst [vmem:[%s11542_s8 + $0x158] sm:$0xff] %v287_v43  ;;  %v291_v45 = vld [vmem:[%s11537_s7 + $0x288] sm:$0xff]  ;;  %v293_v46 = vld [vmem:[%s11537_s7 + $0x290] sm:$0xff] }
  0x29   : > { %290 = vst [vmem:[%s11542_s8 + $0x160] sm:$0xff] %v289_v44  ;;  %v295_v47 = vld [vmem:[%s11537_s7 + $0x298] sm:$0xff]  ;;  %292 = vst [vmem:[%s11542_s8 + $0x168] sm:$0xff] %v291_v45  ;;  %v297_v48 = vld [vmem:[%s11537_s7 + $0x300] sm:$0xff] }
  0x2a   : > { %294 = vst [vmem:[%s11542_s8 + $0x170] sm:$0xff] %v293_v46  ;;  %296 = vst [vmem:[%s11542_s8 + $0x178] sm:$0xff] %v295_v47  ;;  %v299_v49 = vld [vmem:[%s11537_s7 + $0x308] sm:$0xff]  ;;  %v301_v50 = vld [vmem:[%s11537_s7 + $0x310] sm:$0xff] }
  0x2b   : > { %298 = vst [vmem:[%s11542_s8 + $0x180] sm:$0xff] %v297_v48  ;;  %300 = vst [vmem:[%s11542_s8 + $0x188] sm:$0xff] %v299_v49  ;;  %v303_v51 = vld [vmem:[%s11537_s7 + $0x318] sm:$0xff]  ;;  %v305_v52 = vld [vmem:[%s11537_s7 + $0x320] sm:$0xff] }
  0x2c   : > { %302 = vst [vmem:[%s11542_s8 + $0x190] sm:$0xff] %v301_v50  ;;  %v307_v53 = vld [vmem:[%s11537_s7 + $0x328] sm:$0xff]  ;;  %304 = vst [vmem:[%s11542_s8 + $0x198] sm:$0xff] %v303_v51  ;;  %v309_v54 = vld [vmem:[%s11537_s7 + $0x330] sm:$0xff] }
  0x2d   : > { %306 = vst [vmem:[%s11542_s8 + $0x1a0] sm:$0xff] %v305_v52  ;;  %308 = vst [vmem:[%s11542_s8 + $0x1a8] sm:$0xff] %v307_v53  ;;  %v311_v55 = vld [vmem:[%s11537_s7 + $0x338] sm:$0xff]  ;;  %v313_v56 = vld [vmem:[%s11537_s7 + $0x340] sm:$0xff] }
  0x2e   : > { %310 = vst [vmem:[%s11542_s8 + $0x1b0] sm:$0xff] %v309_v54  ;;  %312 = vst [vmem:[%s11542_s8 + $0x1b8] sm:$0xff] %v311_v55  ;;  %v315_v57 = vld [vmem:[%s11537_s7 + $0x348] sm:$0xff]  ;;  %v317_v58 = vld [vmem:[%s11537_s7 + $0x350] sm:$0xff] }
  0x2f   : > { %314 = vst [vmem:[%s11542_s8 + $0x1c0] sm:$0xff] %v313_v56  ;;  %v319_v59 = vld [vmem:[%s11537_s7 + $0x358] sm:$0xff]  ;;  %316 = vst [vmem:[%s11542_s8 + $0x1c8] sm:$0xff] %v315_v57  ;;  %v321_v60 = vld [vmem:[%s11537_s7 + $0x3c0] sm:$0xff] }
  0x30   : > { %318 = vst [vmem:[%s11542_s8 + $0x1d0] sm:$0xff] %v317_v58  ;;  %320 = vst [vmem:[%s11542_s8 + $0x1d8] sm:$0xff] %v319_v59  ;;  %v323_v61 = vld [vmem:[%s11537_s7 + $0x3c8] sm:$0xff]  ;;  %v325_v62 = vld [vmem:[%s11537_s7 + $0x3d0] sm:$0xff] }
  0x31   : > { %322 = vst [vmem:[%s11542_s8 + $0x1e0] sm:$0xff] %v321_v60  ;;  %324 = vst [vmem:[%s11542_s8 + $0x1e8] sm:$0xff] %v323_v61  ;;  %v327_v63 = vld [vmem:[%s11537_s7 + $0x3d8] sm:$0xff]  ;;  %v329_v0 = vld [vmem:[%s11537_s7 + $0x3e0] sm:$0xff] }
  0x32   : > { %326 = vst [vmem:[%s11542_s8 + $0x1f0] sm:$0xff] %v325_v62  ;;  %v331_v1 = vld [vmem:[%s11537_s7 + $0x3e8] sm:$0xff]  ;;  %328 = vst [vmem:[%s11542_s8 + $0x1f8] sm:$0xff] %v327_v63  ;;  %v333_v2 = vld [vmem:[%s11537_s7 + $0x3f0] sm:$0xff] }
  0x33   : > { %330 = vst [vmem:[%s11542_s8 + $0x200] sm:$0xff] %v329_v0  ;;  %332 = vst [vmem:[%s11542_s8 + $0x208] sm:$0xff] %v331_v1  ;;  %v335_v3 = vld [vmem:[%s11537_s7 + $0x3f8] sm:$0xff]  ;;  %v337_v4 = vld [vmem:[%s11537_s7 + $0x400] sm:$0xff] }
  0x34   : > { %334 = vst [vmem:[%s11542_s8 + $0x210] sm:$0xff] %v333_v2  ;;  %336 = vst [vmem:[%s11542_s8 + $0x218] sm:$0xff] %v335_v3  ;;  %v339_v5 = vld [vmem:[%s11537_s7 + $0x408] sm:$0xff]  ;;  %v341_v6 = vld [vmem:[%s11537_s7 + $0x410] sm:$0xff] }
  0x35   : > { %338 = vst [vmem:[%s11542_s8 + $0x220] sm:$0xff] %v337_v4  ;;  %v343_v7 = vld [vmem:[%s11537_s7 + $0x418] sm:$0xff]  ;;  %340 = vst [vmem:[%s11542_s8 + $0x228] sm:$0xff] %v339_v5  ;;  %v345_v8 = vld [vmem:[%s11537_s7 + $0x480] sm:$0xff] }
  0x36   : > { %342 = vst [vmem:[%s11542_s8 + $0x230] sm:$0xff] %v341_v6  ;;  %344 = vst [vmem:[%s11542_s8 + $0x238] sm:$0xff] %v343_v7  ;;  %v347_v9 = vld [vmem:[%s11537_s7 + $0x488] sm:$0xff]  ;;  %v349_v10 = vld [vmem:[%s11537_s7 + $0x490] sm:$0xff] }
  0x37   : > { %346 = vst [vmem:[%s11542_s8 + $0x240] sm:$0xff] %v345_v8  ;;  %348 = vst [vmem:[%s11542_s8 + $0x248] sm:$0xff] %v347_v9  ;;  %v351_v11 = vld [vmem:[%s11537_s7 + $0x498] sm:$0xff]  ;;  %v353_v12 = vld [vmem:[%s11537_s7 + $0x4a0] sm:$0xff] }
  0x38   : > { %350 = vst [vmem:[%s11542_s8 + $0x250] sm:$0xff] %v349_v10  ;;  %v355_v13 = vld [vmem:[%s11537_s7 + $0x4a8] sm:$0xff]  ;;  %352 = vst [vmem:[%s11542_s8 + $0x258] sm:$0xff] %v351_v11  ;;  %v357_v14 = vld [vmem:[%s11537_s7 + $0x4b0] sm:$0xff] }
  0x39   : > { %354 = vst [vmem:[%s11542_s8 + $0x260] sm:$0xff] %v353_v12  ;;  %356 = vst [vmem:[%s11542_s8 + $0x268] sm:$0xff] %v355_v13  ;;  %v359_v15 = vld [vmem:[%s11537_s7 + $0x4b8] sm:$0xff]  ;;  %v361_v16 = vld [vmem:[%s11537_s7 + $0x4c0] sm:$0xff] }
  0x3a   : > { %358 = vst [vmem:[%s11542_s8 + $0x270] sm:$0xff] %v357_v14  ;;  %360 = vst [vmem:[%s11542_s8 + $0x278] sm:$0xff] %v359_v15  ;;  %v363_v17 = vld [vmem:[%s11537_s7 + $0x4c8] sm:$0xff]  ;;  %v365_v18 = vld [vmem:[%s11537_s7 + $0x4d0] sm:$0xff] }
  0x3b   : > { %362 = vst [vmem:[%s11542_s8 + $0x280] sm:$0xff] %v361_v16  ;;  %v367_v19 = vld [vmem:[%s11537_s7 + $0x4d8] sm:$0xff]  ;;  %364 = vst [vmem:[%s11542_s8 + $0x288] sm:$0xff] %v363_v17  ;;  %v369_v20 = vld [vmem:[%s11537_s7 + $0x540] sm:$0xff] }
  0x3c   : > { %366 = vst [vmem:[%s11542_s8 + $0x290] sm:$0xff] %v365_v18  ;;  %368 = vst [vmem:[%s11542_s8 + $0x298] sm:$0xff] %v367_v19  ;;  %v371_v21 = vld [vmem:[%s11537_s7 + $0x548] sm:$0xff]  ;;  %v373_v22 = vld [vmem:[%s11537_s7 + $0x550] sm:$0xff] }
  0x3d   : > { %370 = vst [vmem:[%s11542_s8 + $0x2a0] sm:$0xff] %v369_v20  ;;  %372 = vst [vmem:[%s11542_s8 + $0x2a8] sm:$0xff] %v371_v21  ;;  %v375_v23 = vld [vmem:[%s11537_s7 + $0x558] sm:$0xff]  ;;  %v377_v24 = vld [vmem:[%s11537_s7 + $0x560] sm:$0xff] }
  0x3e   : > { %374 = vst [vmem:[%s11542_s8 + $0x2b0] sm:$0xff] %v373_v22  ;;  %v379_v25 = vld [vmem:[%s11537_s7 + $0x568] sm:$0xff]  ;;  %376 = vst [vmem:[%s11542_s8 + $0x2b8] sm:$0xff] %v375_v23  ;;  %v381_v26 = vld [vmem:[%s11537_s7 + $0x570] sm:$0xff] }
  0x3f   : > { %378 = vst [vmem:[%s11542_s8 + $0x2c0] sm:$0xff] %v377_v24  ;;  %380 = vst [vmem:[%s11542_s8 + $0x2c8] sm:$0xff] %v379_v25  ;;  %v383_v27 = vld [vmem:[%s11537_s7 + $0x578] sm:$0xff]  ;;  %v385_v28 = vld [vmem:[%s11537_s7 + $0x580] sm:$0xff] }
  0x40   : > { %382 = vst [vmem:[%s11542_s8 + $0x2d0] sm:$0xff] %v381_v26  ;;  %384 = vst [vmem:[%s11542_s8 + $0x2d8] sm:$0xff] %v383_v27  ;;  %v387_v29 = vld [vmem:[%s11537_s7 + $0x588] sm:$0xff]  ;;  %v389_v30 = vld [vmem:[%s11537_s7 + $0x590] sm:$0xff] }
  0x41   : > { %386 = vst [vmem:[%s11542_s8 + $0x2e0] sm:$0xff] %v385_v28  ;;  %v391_v31 = vld [vmem:[%s11537_s7 + $0x598] sm:$0xff]  ;;  %388 = vst [vmem:[%s11542_s8 + $0x2e8] sm:$0xff] %v387_v29  ;;  %v393_v32 = vld [vmem:[%s11537_s7 + $0x600] sm:$0xff] }
  0x42   : > { %390 = vst [vmem:[%s11542_s8 + $0x2f0] sm:$0xff] %v389_v30  ;;  %392 = vst [vmem:[%s11542_s8 + $0x2f8] sm:$0xff] %v391_v31  ;;  %v395_v33 = vld [vmem:[%s11537_s7 + $0x608] sm:$0xff]  ;;  %v397_v34 = vld [vmem:[%s11537_s7 + $0x610] sm:$0xff] }
  0x43   : > { %394 = vst [vmem:[%s11542_s8 + $0x300] sm:$0xff] %v393_v32  ;;  %396 = vst [vmem:[%s11542_s8 + $0x308] sm:$0xff] %v395_v33  ;;  %v399_v35 = vld [vmem:[%s11537_s7 + $0x618] sm:$0xff]  ;;  %v401_v36 = vld [vmem:[%s11537_s7 + $0x620] sm:$0xff] }
  0x44   : > { %398 = vst [vmem:[%s11542_s8 + $0x310] sm:$0xff] %v397_v34  ;;  %v403_v37 = vld [vmem:[%s11537_s7 + $0x628] sm:$0xff]  ;;  %400 = vst [vmem:[%s11542_s8 + $0x318] sm:$0xff] %v399_v35  ;;  %v405_v38 = vld [vmem:[%s11537_s7 + $0x630] sm:$0xff] }
  0x45   : > { %402 = vst [vmem:[%s11542_s8 + $0x320] sm:$0xff] %v401_v36  ;;  %404 = vst [vmem:[%s11542_s8 + $0x328] sm:$0xff] %v403_v37  ;;  %v407_v39 = vld [vmem:[%s11537_s7 + $0x638] sm:$0xff]  ;;  %v409_v40 = vld [vmem:[%s11537_s7 + $0x640] sm:$0xff] }
  0x46   : > { %406 = vst [vmem:[%s11542_s8 + $0x330] sm:$0xff] %v405_v38  ;;  %408 = vst [vmem:[%s11542_s8 + $0x338] sm:$0xff] %v407_v39  ;;  %v411_v41 = vld [vmem:[%s11537_s7 + $0x648] sm:$0xff]  ;;  %v413_v42 = vld [vmem:[%s11537_s7 + $0x650] sm:$0xff] }
  0x47   : > { %410 = vst [vmem:[%s11542_s8 + $0x340] sm:$0xff] %v409_v40  ;;  %v415_v43 = vld [vmem:[%s11537_s7 + $0x658] sm:$0xff]  ;;  %412 = vst [vmem:[%s11542_s8 + $0x348] sm:$0xff] %v411_v41  ;;  %v417_v44 = vld [vmem:[%s11537_s7 + $0x6c0] sm:$0xff] }
  0x48   : > { %414 = vst [vmem:[%s11542_s8 + $0x350] sm:$0xff] %v413_v42  ;;  %416 = vst [vmem:[%s11542_s8 + $0x358] sm:$0xff] %v415_v43  ;;  %v419_v45 = vld [vmem:[%s11537_s7 + $0x6c8] sm:$0xff]  ;;  %v421_v46 = vld [vmem:[%s11537_s7 + $0x6d0] sm:$0xff] }
  0x49   : > { %418 = vst [vmem:[%s11542_s8 + $0x360] sm:$0xff] %v417_v44  ;;  %420 = vst [vmem:[%s11542_s8 + $0x368] sm:$0xff] %v419_v45  ;;  %v423_v47 = vld [vmem:[%s11537_s7 + $0x6d8] sm:$0xff]  ;;  %v425_v48 = vld [vmem:[%s11537_s7 + $0x6e0] sm:$0xff] }
  0x4a   : > { %422 = vst [vmem:[%s11542_s8 + $0x370] sm:$0xff] %v421_v46  ;;  %v427_v49 = vld [vmem:[%s11537_s7 + $0x6e8] sm:$0xff]  ;;  %424 = vst [vmem:[%s11542_s8 + $0x378] sm:$0xff] %v423_v47  ;;  %v429_v50 = vld [vmem:[%s11537_s7 + $0x6f0] sm:$0xff] }
  0x4b   : > { %426 = vst [vmem:[%s11542_s8 + $0x380] sm:$0xff] %v425_v48  ;;  %428 = vst [vmem:[%s11542_s8 + $0x388] sm:$0xff] %v427_v49  ;;  %v431_v51 = vld [vmem:[%s11537_s7 + $0x6f8] sm:$0xff]  ;;  %v433_v52 = vld [vmem:[%s11537_s7 + $0x700] sm:$0xff] }
  0x4c   : > { %430 = vst [vmem:[%s11542_s8 + $0x390] sm:$0xff] %v429_v50  ;;  %432 = vst [vmem:[%s11542_s8 + $0x398] sm:$0xff] %v431_v51  ;;  %v435_v53 = vld [vmem:[%s11537_s7 + $0x708] sm:$0xff]  ;;  %v437_v54 = vld [vmem:[%s11537_s7 + $0x710] sm:$0xff] }
  0x4d   : > { %434 = vst [vmem:[%s11542_s8 + $0x3a0] sm:$0xff] %v433_v52  ;;  %v439_v55 = vld [vmem:[%s11537_s7 + $0x718] sm:$0xff]  ;;  %436 = vst [vmem:[%s11542_s8 + $0x3a8] sm:$0xff] %v435_v53 }
  0x4e   : > { %438 = vst [vmem:[%s11542_s8 + $0x3b0] sm:$0xff] %v437_v54  ;;  %440 = vst [vmem:[%s11542_s8 + $0x3b8] sm:$0xff] %v439_v55 }
  0x4f PF: > { %p10197_p5 = scmp.ge.s32.totalorder %s11459_s22, 1  ;;  %p445_p6 = scmp.lt.s32.totalorder %s11459_s22, 3 }
  0x51   : > { %p446_p7 = pnand %p10197_p5, %p445_p6 }
  0x53   : > { %449 = sbr.rel (%p446_p7) target bundleno = 1510 (0x5e6), region = 59 }
  0x58   : > { %s452_s9 = sand.u32 1, %s11451_s20   ;;  %v17033_v56 = vmov 0   ;;  %v11826_v41 = vld [vmem:[%s17028_s1] sm:$0xff]   ;;  %vm1222_vm0 = vcmask 654336   ;;  %s487_s16 = sld [smem:[#allocation4]]  ;;  %vm3047_vm1 = vcmask 1043456  }
  0x59   : > { %s10892_s10 = smul.u32 960, %s452_s9  ;;  %1261 = vmatprep.mubr.bf16.mxu0 %v17033_v56  ;;  %2491 = vst [vmem:[#allocation2] sm:$0xf] %v17033_v56  ;;  %2492 = vst [vmem:[#allocation2 + $0x68] sm:$0xf] %v17033_v56  ;;  %1314 = vmatprep.mubr.bf16.mxu1 %v17033_v56  ;;  %s11462_s18 = smov 19  }
  0x5a   : > { %2493 = vst [vmem:[#allocation2 + $0xd0] sm:$0xf] %v17033_v56  ;;  %2494 = vst [vmem:[#allocation2 + $0x138] sm:$0xf] %v17033_v56  ;;  %10966 = vset.pattern.permute.xlu0 %v17033_v56  ;;  %s11463_s19 = smov 18   ;;  %s11464_s20 = smov 109  }
  0x5b   : > { %2495 = vst [vmem:[#allocation2 + $0x64] sm:$0xf] %v17033_v56  ;;  %2496 = vst [vmem:[#allocation2 + $0xcc] sm:$0xf] %v17033_v56  ;;  %s11795_s11 = scalar_lea.vmem [#allocation5], %s10892_s10  ;;  %s11465_s24 = smov 1  }
  0x5c   : > { %2497 = vst [vmem:[#allocation2 + $0x134] sm:$0xf] %v17033_v56  ;;  %2498 = vst [vmem:[#allocation2 + $0x19c] sm:$0xf] %v17033_v56  ;;  %v588_v57 = vld [vmem:[%s11795_s11 + $0x300] sm:$0xff]  ;;  %v589_v59 = vld [vmem:[%s11795_s11 + $0x308] sm:$0xff] }
  0x5d   : > { %v600_v58 = vld [vmem:[%s11795_s11 + $0x360] sm:$0xff]  ;;  %v601_v61 = vld [vmem:[%s11795_s11 + $0x368] sm:$0xff]  ;;  %v590_v31 = vld [vmem:[%s11795_s11 + $0x310] sm:$0xff]  ;;  %s11466_s25 = smov 17   ;;  %s11467_s27 = smov 110   ;;  %vm6316_vm2 = vcmask 891904  }
  0x5e   : > { %v10298_v60 = vcombine.high %v588_v57, %v600_v58  ;;  %v10297_v62 = vcombine.low %v588_v57, %v600_v58  ;;  %v564_v63 = vld [vmem:[%s11795_s11 + $0x240] sm:$0xff]  ;;  %v10300_v1 = vcombine.high %v589_v59, %v601_v61  ;;  %v10299_v2 = vcombine.low %v589_v59, %v601_v61  ;;  %v565_v4 = vld [vmem:[%s11795_s11 + $0x248] sm:$0xff]  ;;  %v602_v32 = vld [vmem:[%s11795_s11 + $0x370] sm:$0xff]  ;;  %s1865_s17 = ssub.f32 0.0, %s487_s16  ;;  %s11468_s28 = smov 111  }
  0x5f   : > { %v576_v0 = vld [vmem:[%s11795_s11 + $0x2a0] sm:$0xff]  ;;  %v577_v5 = vld [vmem:[%s11795_s11 + $0x2a8] sm:$0xff]  ;;  %v591_v33 = vld [vmem:[%s11795_s11 + $0x318] sm:$0xff]  ;;  %v10302_v37 = vcombine.high %v590_v31, %v602_v32  ;;  %v10301_v42 = vcombine.low %v590_v31, %v602_v32  ;;  %s11469_s29 = smov 127   ;;  %vm4408_vm3 = vcmask 7168   ;;  %vm3955_vm4 = vcmask 138240  }
  0x60   : > { %v10274_v3 = vcombine.high %v564_v63, %v576_v0  ;;  %v540_v6 = vld [vmem:[%s11795_s11 + $0x180] sm:$0xff]  ;;  %1235 = vmatprep.subr.bf16.mxu0 %v10298_v60  ;;  %v10276_v7 = vcombine.high %v565_v4, %v577_v5  ;;  %v541_v9 = vld [vmem:[%s11795_s11 + $0x188] sm:$0xff]  ;;  %1288 = vmatprep.subr.bf16.mxu1 %v10300_v1  ;;  %v10273_v11 = vcombine.low %v564_v63, %v576_v0  ;;  %v603_v34 = vld [vmem:[%s11795_s11 + $0x378] sm:$0xff]  ;;  %vm9118_vm5 = vcmask 261120  }
  0x61   : > { %v552_v8 = vld [vmem:[%s11795_s11 + $0x1e0] sm:$0xff]  ;;  %v553_v10 = vld [vmem:[%s11795_s11 + $0x1e8] sm:$0xff]  ;;  %1236 = vmatpush1.bf16.msra.mxu0 %v10297_v62  ;;  %1289 = vmatpush1.bf16.msra.mxu1 %v10299_v2  ;;  %v10275_v12 = vcombine.low %v565_v4, %v577_v5  ;;  %v566_v38 = vld [vmem:[%s11795_s11 + $0x250] sm:$0xff]  ;;  %v10304_v40 = vcombine.high %v591_v33, %v603_v34  ;;  %v10303_v48 = vcombine.low %v591_v33, %v603_v34  ;;  %vm3502_vm6 = vcmask 146432  }
  0x62   : > { %1237 = vmatprep.subr.bf16.mxu0 %v10274_v3  ;;  %v10250_v13 = vcombine.high %v540_v6, %v552_v8  ;;  %1290 = vmatprep.subr.bf16.mxu1 %v10276_v7  ;;  %v10252_v14 = vcombine.high %v541_v9, %v553_v10  ;;  %v516_v15 = vld [vmem:[%s11795_s11 + $0xc0] sm:$0xff]  ;;  %v517_v17 = vld [vmem:[%s11795_s11 + $0xc8] sm:$0xff]  ;;  %v10249_v19 = vcombine.low %v540_v6, %v552_v8  ;;  %v578_v39 = vld [vmem:[%s11795_s11 + $0x2b0] sm:$0xff]  ;;  %vm3049_vm7 = vcmask 154624  }
  0x63   : > { %v528_v16 = vld [vmem:[%s11795_s11 + $0x120] sm:$0xff]  ;;  %v529_v18 = vld [vmem:[%s11795_s11 + $0x128] sm:$0xff]  ;;  %v10251_v20 = vcombine.low %v541_v9, %v553_v10  ;;  %v567_v43 = vld [vmem:[%s11795_s11 + $0x258] sm:$0xff]  ;;  %v10278_v45 = vcombine.high %v566_v38, %v578_v39  ;;  %v10277_v50 = vcombine.low %v566_v38, %v578_v39  ;;  %vm5863_vm8 = vcmask 900096  }
  0x64   : > { %v10226_v21 = vcombine.high %v516_v15, %v528_v16  ;;  %v10228_v22 = vcombine.high %v517_v17, %v529_v18  ;;  %v492_v23 = vld [vmem:[%s11795_s11] sm:$0xff]  ;;  %v493_v25 = vld [vmem:[%s11795_s11 + $0x8] sm:$0xff]  ;;  %v10225_v27 = vcombine.low %v516_v15, %v528_v16  ;;  %v10227_v28 = vcombine.low %v517_v17, %v529_v18  ;;  %v579_v44 = vld [vmem:[%s11795_s11 + $0x2b8] sm:$0xff] }
  0x65   : > { %1238 = vmatpush1.bf16.msra.mxu0 %v10273_v11  ;;  %1291 = vmatpush1.bf16.msra.mxu1 %v10275_v12  ;;  %v504_v24 = vld [vmem:[%s11795_s11 + $0x60] sm:$0xff]  ;;  %v505_v26 = vld [vmem:[%s11795_s11 + $0x68] sm:$0xff]  ;;  %v542_v46 = vld [vmem:[%s11795_s11 + $0x190] sm:$0xff]  ;;  %v10280_v49 = vcombine.high %v567_v43, %v579_v44  ;;  %v10279_v57 = vcombine.low %v567_v43, %v579_v44  ;;  %vm5410_vm9 = vcmask 908288   ;;  %vm4957_vm10 = vcmask 1039360  }
  0x66   : > { %1239 = vmatprep.subr.bf16.mxu0 %v10250_v13  ;;  %1292 = vmatprep.subr.bf16.mxu1 %v10252_v14  ;;  %v10202_v29 = vcombine.high %v492_v23, %v504_v24  ;;  %v10204_v30 = vcombine.high %v493_v25, %v505_v26  ;;  %v10201_v35 = vcombine.low %v492_v23, %v504_v24  ;;  %v554_v47 = vld [vmem:[%s11795_s11 + $0x1f0] sm:$0xff]  ;;  %v543_v51 = vld [vmem:[%s11795_s11 + $0x198] sm:$0xff]  ;;  %v11845_v58 = vld [vmem:[%s17028_s1 + $0x8] sm:$0xff]  }
  0x67   : > { %v10203_v36 = vcombine.low %v493_v25, %v505_v26  ;;  %v555_v52 = vld [vmem:[%s11795_s11 + $0x1f8] sm:$0xff]  ;;  %v10254_v53 = vcombine.high %v542_v46, %v554_v47  ;;  %v518_v54 = vld [vmem:[%s11795_s11 + $0xd0] sm:$0xff]  ;;  %v10253_v60 = vcombine.low %v542_v46, %v554_v47  ;;  %v592_v8 = vld [vmem:[%s11795_s11 + $0x320] sm:$0xff] }
  0x68   : > { %v530_v55 = vld [vmem:[%s11795_s11 + $0x130] sm:$0xff]  ;;  %v10256_v59 = vcombine.high %v543_v51, %v555_v52  ;;  %v519_v61 = vld [vmem:[%s11795_s11 + $0xd8] sm:$0xff]  ;;  %v10255_v2 = vcombine.low %v543_v51, %v555_v52  ;;  %v604_v9 = vld [vmem:[%s11795_s11 + $0x380] sm:$0xff] }
  0x69   : > { %1240 = vmatpush1.bf16.msra.mxu0 %v10249_v19  ;;  %1293 = vmatpush1.bf16.msra.mxu1 %v10251_v20  ;;  %v531_v62 = vld [vmem:[%s11795_s11 + $0x138] sm:$0xff]  ;;  %v10230_v63 = vcombine.high %v518_v54, %v530_v55  ;;  %v494_v0 = vld [vmem:[%s11795_s11 + $0x10] sm:$0xff]  ;;  %v10229_v4 = vcombine.low %v518_v54, %v530_v55  ;;  %v10306_v13 = vcombine.high %v592_v8, %v604_v9  ;;  %v568_v14 = vld [vmem:[%s11795_s11 + $0x260] sm:$0xff] }
  0x6a   : > { %1241 = vmatprep.subr.bf16.mxu0 %v10226_v21  ;;  %1294 = vmatprep.subr.bf16.mxu1 %v10228_v22  ;;  %v506_v1 = vld [vmem:[%s11795_s11 + $0x70] sm:$0xff]  ;;  %v10232_v3 = vcombine.high %v519_v61, %v531_v62  ;;  %v495_v5 = vld [vmem:[%s11795_s11 + $0x18] sm:$0xff]  ;;  %v10231_v10 = vcombine.low %v519_v61, %v531_v62  ;;  %v580_v15 = vld [vmem:[%s11795_s11 + $0x2c0] sm:$0xff]  ;;  %v10305_v17 = vcombine.low %v592_v8, %v604_v9 }
  0x6b   : > { %v507_v6 = vld [vmem:[%s11795_s11 + $0x78] sm:$0xff]  ;;  %v10206_v7 = vcombine.high %v494_v0, %v506_v1  ;;  %v10205_v12 = vcombine.low %v494_v0, %v506_v1  ;;  %v10282_v18 = vcombine.high %v568_v14, %v580_v15  ;;  %v544_v19 = vld [vmem:[%s11795_s11 + $0x1a0] sm:$0xff]  ;;  %v10281_v21 = vcombine.low %v568_v14, %v580_v15  ;;  %v593_v32 = vld [vmem:[%s11795_s11 + $0x328] sm:$0xff] }
  0x6c   : > { %v10208_v11 = vcombine.high %v495_v5, %v507_v6  ;;  %v10207_v16 = vcombine.low %v495_v5, %v507_v6  ;;  %v556_v20 = vld [vmem:[%s11795_s11 + $0x200] sm:$0xff]  ;;  %v605_v33 = vld [vmem:[%s11795_s11 + $0x388] sm:$0xff]  ;;  %v594_v38 = vld [vmem:[%s11795_s11 + $0x330] sm:$0xff] }
  0x6d   : > { %1242 = vmatpush1.bf16.msra.mxu0 %v10225_v27  ;;  %1295 = vmatpush1.bf16.msra.mxu1 %v10227_v28  ;;  %v10258_v22 = vcombine.high %v544_v19, %v556_v20  ;;  %v520_v23 = vld [vmem:[%s11795_s11 + $0xe0] sm:$0xff]  ;;  %v10257_v25 = vcombine.low %v544_v19, %v556_v20  ;;  %v10308_v34 = vcombine.high %v593_v32, %v605_v33  ;;  %v557_v46 = vld [vmem:[%s11795_s11 + $0x208] sm:$0xff]  ;;  %v570_v47 = vld [vmem:[%s11795_s11 + $0x270] sm:$0xff] }
  0x6e   : > { %1243 = vmatprep.subr.bf16.mxu0 %v10202_v29  ;;  %1296 = vmatprep.subr.bf16.mxu1 %v10204_v30  ;;  %v532_v24 = vld [vmem:[%s11795_s11 + $0x140] sm:$0xff]  ;;  %v533_v54 = vld [vmem:[%s11795_s11 + $0x148] sm:$0xff]  ;;  %v546_v55 = vld [vmem:[%s11795_s11 + $0x1b0] sm:$0xff] }
  0x6f   : > { %v10234_v26 = vcombine.high %v520_v23, %v532_v24  ;;  %v496_v27 = vld [vmem:[%s11795_s11 + $0x20] sm:$0xff]  ;;  %v10233_v29 = vcombine.low %v520_v23, %v532_v24  ;;  %v509_v0 = vld [vmem:[%s11795_s11 + $0x88] sm:$0xff]  ;;  %v522_v1 = vld [vmem:[%s11795_s11 + $0xf0] sm:$0xff] }
  0x70   : > { %v508_v28 = vld [vmem:[%s11795_s11 + $0x80] sm:$0xff]  ;;  %v510_v8 = vld [vmem:[%s11795_s11 + $0x90] sm:$0xff]  ;;  %v571_v15 = vld [vmem:[%s11795_s11 + $0x278] sm:$0xff] }
  0x71   : > { %1244 = vmatpush1.bf16.msra.mxu0 %v10201_v35  ;;  %1297 = vmatpush1.bf16.msra.mxu1 %v10203_v36  ;;  %v10210_v30 = vcombine.high %v496_v27, %v508_v28  ;;  %v10209_v31 = vcombine.low %v496_v27, %v508_v28  ;;  %v10307_v35 = vcombine.low %v593_v32, %v605_v33  ;;  %v569_v36 = vld [vmem:[%s11795_s11 + $0x268] sm:$0xff]  ;;  %v608_v19 = vld [vmem:[%s11795_s11 + $0x3a0] sm:$0xff]  ;;  %v547_v23 = vld [vmem:[%s11795_s11 + $0x1b8] sm:$0xff] }
  0x72   : > { %1341 = vmatprep.subr.bf16.mxu0 %v10302_v37  ;;  %1394 = vmatprep.subr.bf16.mxu1 %v10304_v40  ;;  %v581_v37 = vld [vmem:[%s11795_s11 + $0x2c8] sm:$0xff]  ;;  %v606_v40 = vld [vmem:[%s11795_s11 + $0x390] sm:$0xff]  ;;  %v559_v24 = vld [vmem:[%s11795_s11 + $0x218] sm:$0xff] }
  0x73   : > { %v10284_v39 = vcombine.high %v569_v36, %v581_v37  ;;  %v10309_v43 = vcombine.low %v594_v38, %v606_v40  ;;  %v10310_v44 = vcombine.high %v594_v38, %v606_v40  ;;  %v584_v27 = vld [vmem:[%s11795_s11 + $0x2e0] sm:$0xff]  ;;  %v10263_v28 = vcombine.low %v547_v23, %v559_v24  ;;  %v535_v32 = vld [vmem:[%s11795_s11 + $0x158] sm:$0xff] }
  0x74   : > { %10321 = vmatmul.mubr.msk.bf16.vlgmr.msra.gmra.mxu0 %vm1222_vm0, %v11826_v41  ;;  %10323 = vmatmul.mubr.msk.bf16.vlgmr.msra.gmra.mxu1 %vm1222_vm0, %v11826_v41  ;;  %v548_v33 = vld [vmem:[%s11795_s11 + $0x1c0] sm:$0xff]  ;;  %v511_v38 = vld [vmem:[%s11795_s11 + $0x98] sm:$0xff] }
  0x75   : > { %1342 = vmatpush1.bf16.msra.mxu0 %v10301_v42  ;;  %1271 = vmatprep.mubr.bf16.mxu0 %v17033_v56  ;;  %v10283_v42 = vcombine.low %v569_v36, %v581_v37  ;;  %v560_v36 = vld [vmem:[%s11795_s11 + $0x220] sm:$0xff]  ;;  %v499_v37 = vld [vmem:[%s11795_s11 + $0x38] sm:$0xff] }
  0x76   : > { %1343 = vmatprep.subr.bf16.mxu0 %v10278_v45  ;;  %1324 = vmatprep.mubr.bf16.mxu1 %v17033_v56  ;;  %v545_v45 = vld [vmem:[%s11795_s11 + $0x1a8] sm:$0xff]  ;;  %v10266_v40 = vcombine.high %v548_v33, %v560_v36 }
  0x77   : > { %1395 = vmatpush1.bf16.msra.mxu1 %v10303_v48  ;;  %v10260_v48 = vcombine.high %v545_v45, %v557_v46 }
  0x78   : > { %1396 = vmatprep.subr.bf16.mxu1 %v10280_v49  ;;  %v582_v49 = vld [vmem:[%s11795_s11 + $0x2d0] sm:$0xff] }
  0x79   : > { %1344 = vmatpush1.bf16.msra.mxu0 %v10277_v50  ;;  %v10259_v50 = vcombine.low %v545_v45, %v557_v46  ;;  %v10285_v51 = vcombine.low %v570_v47, %v582_v49  ;;  %v10286_v52 = vcombine.high %v570_v47, %v582_v49  ;;  %v500_v45 = vld [vmem:[%s11795_s11 + $0x40] sm:$0xff]  ;;  %v609_v49 = vld [vmem:[%s11795_s11 + $0x3a8] sm:$0xff] }
  0x7a   : > { %1345 = vmatprep.subr.bf16.mxu0 %v10254_v53  ;;  %v521_v53 = vld [vmem:[%s11795_s11 + $0xe8] sm:$0xff]  ;;  %v512_v47 = vld [vmem:[%s11795_s11 + $0xa0] sm:$0xff] }
  0x7b   : > { %1397 = vmatpush1.bf16.msra.mxu1 %v10279_v57  ;;  %v10236_v57 = vcombine.high %v521_v53, %v533_v54 }
  0x7c   : > { %10322 = vmatmul.mubr.msk.bf16.gmra.mxu0 %vm1222_vm0, %v11845_v58  ;;  %1398 = vmatprep.subr.bf16.mxu1 %v10256_v59  ;;  %v558_v59 = vld [vmem:[%s11795_s11 + $0x210] sm:$0xff] }
  0x7d   : > { %1346 = vmatpush1.bf16.msra.mxu0 %v10253_v60  ;;  %1367 = vmatprep.mubr.bf16.mxu0 %v17033_v56  ;;  %v10235_v60 = vcombine.low %v521_v53, %v533_v54  ;;  %v10261_v61 = vcombine.low %v546_v55, %v558_v59  ;;  %v10262_v62 = vcombine.high %v546_v55, %v558_v59  ;;  %v573_v54 = vld [vmem:[%s11795_s11 + $0x288] sm:$0xff]  ;;  %v610_v59 = vld [vmem:[%s11795_s11 + $0x3b0] sm:$0xff] }
  0x7e   : > { %1347 = vmatprep.subr.bf16.mxu0 %v10230_v63  ;;  %10324 = vmatmul.mubr.msk.bf16.gmra.mxu1 %vm1222_vm0, %v11845_v58  ;;  %v497_v63 = vld [vmem:[%s11795_s11 + $0x28] sm:$0xff]  ;;  %v10218_v53 = vcombine.high %v500_v45, %v512_v47 }
  0x7f   : > { %1399 = vmatpush1.bf16.msra.mxu1 %v10255_v2  ;;  %1420 = vmatprep.mubr.bf16.mxu1 %v17033_v56  ;;  %v10212_v2 = vcombine.high %v497_v63, %v509_v0  ;;  %v585_v55 = vld [vmem:[%s11795_s11 + $0x2e8] sm:$0xff] }
  0x80   : > { %1400 = vmatprep.subr.bf16.mxu1 %v10232_v3  ;;  %v534_v3 = vld [vmem:[%s11795_s11 + $0x150] sm:$0xff] }
  0x81   : > { %1348 = vmatpush1.bf16.msra.mxu0 %v10229_v4  ;;  %v10211_v4 = vcombine.low %v497_v63, %v509_v0  ;;  %v10237_v5 = vcombine.low %v522_v1, %v534_v3  ;;  %v10238_v6 = vcombine.high %v522_v1, %v534_v3  ;;  %v549_v0 = vld [vmem:[%s11795_s11 + $0x1c8] sm:$0xff]  ;;  %v586_v3 = vld [vmem:[%s11795_s11 + $0x2f0] sm:$0xff] }
  0x82   : > { %1349 = vmatprep.subr.bf16.mxu0 %v10206_v7  ;;  %v498_v7 = vld [vmem:[%s11795_s11 + $0x30] sm:$0xff]  ;;  %v561_v1 = vld [vmem:[%s11795_s11 + $0x228] sm:$0xff] }
  0x83   : > { %1401 = vmatpush1.bf16.msra.mxu1 %v10231_v10  ;;  %v10214_v9 = vcombine.high %v498_v7, %v510_v8  ;;  %v10213_v10 = vcombine.low %v498_v7, %v510_v8  ;;  %v525_v8 = vld [vmem:[%s11795_s11 + $0x108] sm:$0xff] }
  0x84   : > { %1402 = vmatprep.subr.bf16.mxu1 %v10208_v11  ;;  %v595_v11 = vld [vmem:[%s11795_s11 + $0x338] sm:$0xff] }
  0x85   : > { %1350 = vmatpush1.bf16.msra.mxu0 %v10205_v12  ;;  %v607_v12 = vld [vmem:[%s11795_s11 + $0x398] sm:$0xff] }
  0x86   : > { %1447 = vmatprep.subr.bf16.mxu0 %v10306_v13  ;;  %v10312_v13 = vcombine.high %v595_v11, %v607_v12  ;;  %v10311_v14 = vcombine.low %v595_v11, %v607_v12  ;;  %v562_v11 = vld [vmem:[%s11795_s11 + $0x230] sm:$0xff]  ;;  %v10267_v12 = vcombine.low %v549_v0, %v561_v1 }
  0x87   : > { %1403 = vmatpush1.bf16.msra.mxu1 %v10207_v16  ;;  %v583_v16 = vld [vmem:[%s11795_s11 + $0x2d8] sm:$0xff] }
  0x88   : > { %10325 = vmatmul.mubr.msk.bf16.vlgmr.msra.gmra.mxu0 %vm1222_vm0, %v11826_v41  ;;  %1500 = vmatprep.subr.bf16.mxu1 %v10308_v34  ;;  %v10287_v20 = vcombine.low %v571_v15, %v583_v16 }
  0x89   : > { %1377 = vmatprep.mubr.bf16.mxu0 %v17033_v56  ;;  %1448 = vmatpush1.bf16.msra.mxu0 %v10305_v17  ;;  %v596_v17 = vld [vmem:[%s11795_s11 + $0x340] sm:$0xff] }
  0x8a   : > { %1449 = vmatprep.subr.bf16.mxu0 %v10282_v18  ;;  %10327 = vmatmul.mubr.msk.bf16.vlgmr.msra.gmra.mxu1 %vm1222_vm0, %v11826_v41  ;;  %v10288_v18 = vcombine.high %v571_v15, %v583_v16  ;;  %v501_v16 = vld [vmem:[%s11795_s11 + $0x48] sm:$0xff] }
  0x8b   : > { %1430 = vmatprep.mubr.bf16.mxu1 %v17033_v56  ;;  %1501 = vmatpush1.bf16.msra.mxu1 %v10307_v35 }
  0x8c   : > { %1502 = vmatprep.subr.bf16.mxu1 %v10284_v39  ;;  %v10265_v39 = vcombine.low %v548_v33, %v560_v36  ;;  %v587_v33 = vld [vmem:[%s11795_s11 + $0x2f8] sm:$0xff] }
  0x8d   : > { %1450 = vmatpush1.bf16.msra.mxu0 %v10281_v21  ;;  %v10313_v21 = vcombine.low %v596_v17, %v608_v19 }
  0x8e   : > { %1451 = vmatprep.subr.bf16.mxu0 %v10258_v22  ;;  %v10314_v22 = vcombine.high %v596_v17, %v608_v19  ;;  %v513_v17 = vld [vmem:[%s11795_s11 + $0xa8] sm:$0xff] }
  0x8f   : > { %1503 = vmatpush1.bf16.msra.mxu1 %v10283_v42  ;;  %v10216_v42 = vcombine.high %v499_v37, %v511_v38 }
  0x90   : > { %10326 = vmatmul.mubr.msk.bf16.gmra.mxu0 %vm1222_vm0, %v11845_v58  ;;  %1504 = vmatprep.subr.bf16.mxu1 %v10260_v48  ;;  %v597_v48 = vld [vmem:[%s11795_s11 + $0x348] sm:$0xff] }
  0x91   : > { %1452 = vmatpush1.bf16.msra.mxu0 %v10257_v25  ;;  %1473 = vmatprep.mubr.bf16.mxu0 %v17033_v56  ;;  %v572_v25 = vld [vmem:[%s11795_s11 + $0x280] sm:$0xff] }
  0x92   : > { %1453 = vmatprep.subr.bf16.mxu0 %v10234_v26  ;;  %10328 = vmatmul.mubr.msk.bf16.gmra.mxu1 %vm1222_vm0, %v11845_v58  ;;  %v10264_v26 = vcombine.high %v547_v23, %v559_v24  ;;  %v599_v24 = vld [vmem:[%s11795_s11 + $0x358] sm:$0xff] }
  0x93   : > { %1526 = vmatprep.mubr.bf16.mxu1 %v17033_v56  ;;  %1505 = vmatpush1.bf16.msra.mxu1 %v10259_v50  ;;  %v10215_v50 = vcombine.low %v499_v37, %v511_v38  ;;  %v551_v37 = vld [vmem:[%s11795_s11 + $0x1d8] sm:$0xff] }
  0x94   : > { %1506 = vmatprep.subr.bf16.mxu1 %v10236_v57  ;;  %v598_v57 = vld [vmem:[%s11795_s11 + $0x350] sm:$0xff]  ;;  %v563_v38 = vld [vmem:[%s11795_s11 + $0x238] sm:$0xff] }
  0x95   : > { %1454 = vmatpush1.bf16.msra.mxu0 %v10233_v29  ;;  %v10289_v29 = vcombine.low %v572_v25, %v584_v27  ;;  %v10318_v63 = vcombine.high %v598_v57, %v610_v59 }
  0x96   : > { %1455 = vmatprep.subr.bf16.mxu0 %v10210_v30  ;;  %v10290_v30 = vcombine.high %v572_v25, %v584_v27  ;;  %v611_v25 = vld [vmem:[%s11795_s11 + $0x3b8] sm:$0xff]  ;;  %v514_v27 = vld [vmem:[%s11795_s11 + $0xb0] sm:$0xff] }
  0x97   : > { %1507 = vmatpush1.bf16.msra.mxu1 %v10235_v60  ;;  %v10315_v60 = vcombine.low %v597_v48, %v609_v49 }
  0x98   : > { %1508 = vmatprep.subr.bf16.mxu1 %v10212_v2  ;;  %v574_v2 = vld [vmem:[%s11795_s11 + $0x290] sm:$0xff] }
  0x99   : > { %1456 = vmatpush1.bf16.msra.mxu0 %v10209_v31  ;;  %v523_v31 = vld [vmem:[%s11795_s11 + $0xf8] sm:$0xff]  ;;  %v10294_v7 = vcombine.high %v574_v2, %v586_v3 }
  0x9a   : > { %1553 = vmatprep.subr.bf16.mxu0 %v10310_v44  ;;  %v10239_v34 = vcombine.low %v523_v31, %v535_v32  ;;  %v10240_v35 = vcombine.high %v523_v31, %v535_v32  ;;  %v536_v44 = vld [vmem:[%s11795_s11 + $0x160] sm:$0xff]  ;;  %v575_v32 = vld [vmem:[%s11795_s11 + $0x298] sm:$0xff] }
  0x9b   : > { %1509 = vmatpush1.bf16.msra.mxu1 %v10211_v4  ;;  %v10291_v4 = vcombine.low %v573_v54, %v585_v55  ;;  %v10296_v36 = vcombine.high %v575_v32, %v587_v33 }
  0x9c   : > { %10329 = vmatmul.mubr.msk.bf16.vlgmr.msra.gmra.mxu0 %vm1222_vm0, %v11826_v41  ;;  %1606 = vmatprep.subr.bf16.mxu1 %v10312_v13  ;;  %v10293_v13 = vcombine.low %v574_v2, %v586_v3 }
  0x9d   : > { %1483 = vmatprep.mubr.bf16.mxu0 %v17033_v56  ;;  %1554 = vmatpush1.bf16.msra.mxu0 %v10309_v43  ;;  %v524_v43 = vld [vmem:[%s11795_s11 + $0x100] sm:$0xff] }
  0x9e   : > { %1555 = vmatprep.subr.bf16.mxu0 %v10286_v52  ;;  %10331 = vmatmul.mubr.msk.bf16.vlgmr.msra.gmra.mxu1 %vm1222_vm0, %v11826_v41  ;;  %v10242_v46 = vcombine.high %v524_v43, %v536_v44  ;;  %v10316_v52 = vcombine.high %v597_v48, %v609_v49 }
  0x9f   : > { %1536 = vmatprep.mubr.bf16.mxu1 %v17033_v56  ;;  %1607 = vmatpush1.bf16.msra.mxu1 %v10311_v14 }
  0xa0   : > { %1608 = vmatprep.subr.bf16.mxu1 %v10288_v18  ;;  %v526_v18 = vld [vmem:[%s11795_s11 + $0x110] sm:$0xff] }
  0xa1   : > { %1556 = vmatpush1.bf16.msra.mxu0 %v10285_v51  ;;  %v10241_v51 = vcombine.low %v524_v43, %v536_v44  ;;  %v539_v43 = vld [vmem:[%s11795_s11 + $0x178] sm:$0xff]  ;;  %v10271_v44 = vcombine.low %v551_v37, %v563_v38 }
  0xa2   : > { %1557 = vmatprep.subr.bf16.mxu0 %v10262_v62  ;;  %v10292_v62 = vcombine.high %v573_v54, %v585_v55 }
  0xa3   : > { %1609 = vmatpush1.bf16.msra.mxu1 %v10287_v20  ;;  %v538_v20 = vld [vmem:[%s11795_s11 + $0x170] sm:$0xff] }
  0xa4   : > { %10330 = vmatmul.mubr.msk.bf16.gmra.mxu0 %vm1222_vm0, %v11845_v58  ;;  %1610 = vmatprep.subr.bf16.mxu1 %v10264_v26  ;;  %v10246_v23 = vcombine.high %v526_v18, %v538_v20  ;;  %v502_v26 = vld [vmem:[%s11795_s11 + $0x50] sm:$0xff] }
  0xa5   : > { %1579 = vmatprep.mubr.bf16.mxu0 %v17033_v56  ;;  %1558 = vmatpush1.bf16.msra.mxu0 %v10261_v61  ;;  %v10217_v61 = vcombine.low %v500_v45, %v512_v47  ;;  %v10222_v31 = vcombine.high %v502_v26, %v514_v27  ;;  %v515_v47 = vld [vmem:[%s11795_s11 + $0xb8] sm:$0xff] }
  0xa6   : > { %1559 = vmatprep.subr.bf16.mxu0 %v10238_v6  ;;  %10332 = vmatmul.mubr.msk.bf16.gmra.mxu1 %vm1222_vm0, %v11845_v58  ;;  %v10268_v6 = vcombine.high %v549_v0, %v561_v1 }
  0xa7   : > { %1632 = vmatprep.mubr.bf16.mxu1 %v17033_v56  ;;  %1611 = vmatpush1.bf16.msra.mxu1 %v10263_v28  ;;  %v10219_v28 = vcombine.low %v501_v16, %v513_v17 }
  0xa8   : > { %1612 = vmatprep.subr.bf16.mxu1 %v10240_v35  ;;  %v10221_v35 = vcombine.low %v502_v26, %v514_v27 }
  0xa9   : > { %1560 = vmatpush1.bf16.msra.mxu0 %v10237_v5  ;;  %v10317_v5 = vcombine.low %v598_v57, %v610_v59 }
  0xaa   : > { %1561 = vmatprep.subr.bf16.mxu0 %v10214_v9  ;;  %v537_v9 = vld [vmem:[%s11795_s11 + $0x168] sm:$0xff] }
  0xab   : > { %1613 = vmatpush1.bf16.msra.mxu1 %v10239_v34  ;;  %v10244_v14 = vcombine.high %v525_v8, %v537_v9  ;;  %v10243_v19 = vcombine.low %v525_v8, %v537_v9  ;;  %v10319_v34 = vcombine.low %v599_v24, %v611_v25 }
  0xac   : > { %1614 = vmatprep.subr.bf16.mxu1 %v10216_v42  ;;  %v527_v42 = vld [vmem:[%s11795_s11 + $0x118] sm:$0xff] }
  0xad   : > { %1562 = vmatpush1.bf16.msra.mxu0 %v10213_v10  ;;  %v550_v10 = vld [vmem:[%s11795_s11 + $0x1d0] sm:$0xff]  ;;  %v10248_v45 = vcombine.high %v527_v42, %v539_v43  ;;  %v10247_v48 = vcombine.low %v527_v42, %v539_v43 }
  0xae   : > { %1659 = vmatprep.subr.bf16.mxu0 %v10314_v22  ;;  %v10270_v15 = vcombine.high %v550_v10, %v562_v11  ;;  %v10220_v22 = vcombine.high %v501_v16, %v513_v17 }
  0xaf   : > { %1615 = vmatpush1.bf16.msra.mxu1 %v10215_v50 }
  0xb0   : > { %10333 = vmatmul.mubr.msk.bf16.vlgmr.msra.gmra.mxu0 %vm1222_vm0, %v11826_v41  ;;  %1712 = vmatprep.subr.bf16.mxu1 %v10316_v52 }
  0xb1   : > { %1589 = vmatprep.mubr.bf16.mxu0 %v17033_v56  ;;  %1660 = vmatpush1.bf16.msra.mxu0 %v10313_v21  ;;  %v10269_v21 = vcombine.low %v550_v10, %v562_v11 }
  0xb2   : > { %1661 = vmatprep.subr.bf16.mxu0 %v10290_v30  ;;  %10335 = vmatmul.mubr.msk.bf16.vlgmr.msra.gmra.mxu1 %vm1222_vm0, %v11826_v41  ;;  %v10320_v30 = vcombine.high %v599_v24, %v611_v25 }
  0xb3   : > { %1713 = vmatpush1.bf16.msra.mxu1 %v10315_v60  ;;  %1642 = vmatprep.mubr.bf16.mxu1 %v17033_v56 }
  0xb4   : > { %1714 = vmatprep.subr.bf16.mxu1 %v10292_v62 }
  0xb5   : > { %1662 = vmatpush1.bf16.msra.mxu0 %v10289_v29  ;;  %v10245_v29 = vcombine.low %v526_v18, %v538_v20 }
  0xb6   : > { %1663 = vmatprep.subr.bf16.mxu0 %v10266_v40  ;;  %v10272_v40 = vcombine.high %v551_v37, %v563_v38 }
  0xb7   : > { %1715 = vmatpush1.bf16.msra.mxu1 %v10291_v4 }
  0xb8   : > { %10334 = vmatmul.mubr.msk.bf16.gmra.mxu0 %vm1222_vm0, %v11845_v58  ;;  %1716 = vmatprep.subr.bf16.mxu1 %v10268_v6 }
  0xb9   : > { %1685 = vmatprep.mubr.bf16.mxu0 %v17033_v56  ;;  %1664 = vmatpush1.bf16.msra.mxu0 %v10265_v39  ;;  %v10295_v39 = vcombine.low %v575_v32, %v587_v33 }
  0xba   : > { %1665 = vmatprep.subr.bf16.mxu0 %v10242_v46  ;;  %10336 = vmatmul.mubr.msk.bf16.gmra.mxu1 %vm1222_vm0, %v11845_v58  ;;  %v503_v46 = vld [vmem:[%s11795_s11 + $0x58] sm:$0xff] }
  0xbb   : > { %1717 = vmatpush1.bf16.msra.mxu1 %v10267_v12  ;;  %1738 = vmatprep.mubr.bf16.mxu1 %v17033_v56  ;;  %v10224_v49 = vcombine.high %v503_v46, %v515_v47  ;;  %v10223_v50 = vcombine.low %v503_v46, %v515_v47 }
  0xbc   : > { %1718 = vmatprep.subr.bf16.mxu1 %v10244_v14 }
  0xbd   : > { %1666 = vmatpush1.bf16.msra.mxu0 %v10241_v51  ;;  %v11992_v51 = vstv %s1865_s17  ;;  %s16872_s17 = smul.u32 24, %s10192_s4 }
  0xbe   : > { %1667 = vmatprep.subr.bf16.mxu0 %v10218_v53 }
  0xbf   : > { %1719 = vmatpush1.bf16.msra.mxu1 %v10243_v19  ;;  %p481_p8 = scmp.lt.s32.totalorder %s16872_s17, 47 }
  0xc0   : > { %1720 = vmatprep.subr.bf16.mxu1 %v10220_v22 }
  0xc1   : > { %1668 = vmatpush1.bf16.msra.mxu0 %v10217_v61  ;;  %s17973_s17 = smov (!%p481_p8, %s16872_s17), 47 }
  0xc2   : > { %1765 = vmatprep.subr.bf16.mxu0 %v10318_v63  ;;  %s10198_s22 = sshll.u32 %s17973_s17, 3 }
  0xc3   : > { %1721 = vmatpush1.bf16.msra.mxu1 %v10219_v28 }
  0xc4   : > { %10337 = vmatmul.mubr.msk.bf16.vlgmr.msra.gmra.mxu0 %vm1222_vm0, %v11826_v41  ;;  %1818 = vmatprep.subr.bf16.mxu1 %v10320_v30 }
  0xc5   : > { %1766 = vmatpush1.bf16.msra.mxu0 %v10317_v5  ;;  %1695 = vmatprep.mubr.bf16.mxu0 %v17033_v56 }
  0xc6   : > { %1767 = vmatprep.subr.bf16.mxu0 %v10294_v7  ;;  %10339 = vmatmul.mubr.msk.bf16.vlgmr.msra.gmra.mxu1 %vm1222_vm0, %v11826_v41 }
  0xc7   : > { %1819 = vmatpush1.bf16.msra.mxu1 %v10319_v34  ;;  %1748 = vmatprep.mubr.bf16.mxu1 %v17033_v56 }
  0xc8   : > { %1820 = vmatprep.subr.bf16.mxu1 %v10296_v36 }
  0xc9   : > { %1768 = vmatpush1.bf16.msra.mxu0 %v10293_v13 }
  0xca   : > { %1769 = vmatprep.subr.bf16.mxu0 %v10270_v15 }
  0xcb   : > { %1821 = vmatpush1.bf16.msra.mxu1 %v10295_v39 }
  0xcc   : > { %10338 = vmatmul.mubr.msk.bf16.gmra.mxu0 %vm1222_vm0, %v11845_v58  ;;  %1822 = vmatprep.subr.bf16.mxu1 %v10272_v40 }
  0xcd   : > { %1770 = vmatpush1.bf16.msra.mxu0 %v10269_v21  ;;  %1791 = vmatprep.mubr.bf16.mxu0 %v17033_v56 }
  0xce   : > { %1771 = vmatprep.subr.bf16.mxu0 %v10246_v23  ;;  %10340 = vmatmul.mubr.msk.bf16.gmra.mxu1 %vm1222_vm0, %v11845_v58 }
  0xcf   : > { %1823 = vmatpush1.bf16.msra.mxu1 %v10271_v44  ;;  %1844 = vmatprep.mubr.bf16.mxu1 %v17033_v56 }
  0xd0   : > { %1824 = vmatprep.subr.bf16.mxu1 %v10248_v45 }
  0xd1   : > { %1772 = vmatpush1.bf16.msra.mxu0 %v10245_v29 }
  0xd2   : > { %1773 = vmatprep.subr.bf16.mxu0 %v10222_v31 }
  0xd3   : > { %1825 = vmatpush1.bf16.msra.mxu1 %v10247_v48 }
  0xd4   : > { %1826 = vmatprep.subr.bf16.mxu1 %v10224_v49 }
  0xd5   : > { %1774 = vmatpush1.bf16.msra.mxu0 %v10221_v35 }
  0xd7   : > { %1827 = vmatpush1.bf16.msra.mxu1 %v10223_v50 }
  0xd8   : > { %10341 = vmatmul.mubr.msk.bf16.vlgmr.msra.gmra.mxu0 %vm1222_vm0, %v11826_v41 }
  0xd9   : > { %1801 = vmatprep.mubr.bf16.mxu0 %v17033_v56 }
  0xda   : > { %10343 = vmatmul.mubr.msk.bf16.vlgmr.msra.gmra.mxu1 %vm1222_vm0, %v11826_v41 }
  0xdb   : > { %1854 = vmatprep.mubr.bf16.mxu1 %v17033_v56 }
  0xe0   : > { %10342 = vmatmul.mubr.msk.bf16.gmra.mxu0 %vm1222_vm0, %v11845_v58 }
  0xe2   : > { %10344 = vmatmul.mubr.msk.bf16.gmra.mxu1 %vm1222_vm0, %v11845_v58 }
  0xe3   : > { %9195 = vmatprep.mubr.bf16.mxu1 %v17033_v56 }
 0x134   : > { %v11994_v52 = vpop.f32.mrf.mxu0  ;;  %v12000_v54 = vpop.f32.mrf.mxu1 }
 0x135   : > { %v1867_v53 = vmul.f32 %v11992_v51, %v11994_v52  ;;  %v1869_v55 = vmul.f32 %v11992_v51, %v12000_v54 }
 0x136   : > { %v12005_v57 = vpop.f32.mrf.mxu0  ;;  %v12009_v61 = vpop.f32.mrf.mxu1 }
 0x137   : > { %v1963_v59 = vmul.f32 1.442695, %v1867_v53  ;;  %v1868_v60 = vmul.f32 %v11992_v51, %v12005_v57  ;;  %v1967_v62 = vmul.f32 1.442695, %v1869_v55  ;;  %v1870_v41 = vmul.f32 %v11992_v51, %v12009_v61 }
 0x138   : > { %v12013_v63 = vpop.f32.mrf.mxu0  ;;  %v12017_v2 = vpop.f32.mrf.mxu1 }
 0x139   : > { %11044 = vpow2.f32 %v1963_v59  ;;  %v1965_v0 = vmul.f32 1.442695, %v1868_v60  ;;  %v1891_v1 = vmul.f32 %v11992_v51, %v12013_v63  ;;  %v1969_v3 = vmul.f32 1.442695, %v1870_v41 }
 0x13a   : > { %11046 = vpow2.f32 %v1967_v62  ;;  %v1893_v4 = vmul.f32 %v11992_v51, %v12017_v2  ;;  %v12021_v5 = vpop.f32.mrf.mxu0  ;;  %v12025_v8 = vpop.f32.mrf.mxu1 }
 0x13b   : > { %11048 = vpow2.f32 %v1965_v0  ;;  %v2011_v6 = vmul.f32 1.442695, %v1891_v1  ;;  %v1892_v7 = vmul.f32 %v11992_v51, %v12021_v5  ;;  %v1894_v10 = vmul.f32 %v11992_v51, %v12025_v8 }
 0x13c   : > { %11050 = vpow2.f32 %v1969_v3  ;;  %v2015_v9 = vmul.f32 1.442695, %v1893_v4  ;;  %v12029_v11 = vpop.f32.mrf.mxu0 }
 0x13d   : > { %11052 = vpow2.f32 %v2011_v6  ;;  %v2013_v12 = vmul.f32 1.442695, %v1892_v7  ;;  %v1915_v13 = vmul.f32 %v11992_v51, %v12029_v11  ;;  %v2017_v14 = vmul.f32 1.442695, %v1894_v10 }
 0x13e   : > { %11054 = vpow2.f32 %v2015_v9  ;;  %v12036_v15 = vpop.f32.mrf.mxu0  ;;  %v12038_v16 = vpop.f32.mrf.mxu1 }
 0x13f   : > { %11056 = vpow2.f32 %v2013_v12  ;;  %v2059_v17 = vmul.f32 1.442695, %v1915_v13  ;;  %v1916_v18 = vmul.f32 %v11992_v51, %v12036_v15  ;;  %v1917_v58 = vmul.f32 %v11992_v51, %v12038_v16 }
 0x140   : > { %11058 = vpow2.f32 %v2017_v14  ;;  %v12044_v19 = vpop.f32.mrf.mxu0  ;;  %v12046_v20 = vpop.f32.mrf.mxu1 }
 0x141   : > { %11060 = vpow2.f32 %v2059_v17  ;;  %v2061_v21 = vmul.f32 1.442695, %v1916_v18  ;;  %v1939_v22 = vmul.f32 %v11992_v51, %v12044_v19  ;;  %v2063_v23 = vmul.f32 1.442695, %v1917_v58 }
 0x142   : > { %v12050_v24 = vpop.f32.mrf.mxu0  ;;  %v1918_v25 = vmul.f32 %v11992_v51, %v12046_v20  ;;  %v12054_v26 = vpop.f32.mrf.mxu1 }
 0x143   : > { %11062 = vpow2.f32 %v2061_v21  ;;  %v2107_v27 = vmul.f32 1.442695, %v1939_v22  ;;  %v1940_v28 = vmul.f32 %v11992_v51, %v12050_v24  ;;  %v1941_v29 = vmul.f32 %v11992_v51, %v12054_v26 }
 0x144   : > { %11064 = vpow2.f32 %v2063_v23  ;;  %v2065_v30 = vmul.f32 1.442695, %v1918_v25  ;;  %v12068_v59 = vpop.f32.mrf.mxu1 }
 0x145   : > { %11066 = vpow2.f32 %v2107_v27  ;;  %v2109_v31 = vmul.f32 1.442695, %v1940_v28  ;;  %v2111_v32 = vmul.f32 1.442695, %v1941_v29  ;;  %v1942_v18 = vmul.f32 %v11992_v51, %v12068_v59 }
 0x146   : > { %v11045_v33 = vpop.eup %11044  ;;  %11068 = vpow2.f32 %v2065_v30 }
 0x147   : > { %v11047_v34 = vpop.eup %11046  ;;  %v2155_v35 = vadd.f32 1.0, %v11045_v33  ;;  %11070 = vpow2.f32 %v2109_v31 }
 0x148   : > { %v11049_v36 = vpop.eup %11048  ;;  %v2157_v37 = vadd.f32 1.0, %v11047_v34  ;;  %v12060_v38 = vpop.f32.mrf.mxu0  ;;  %11072 = vpow2.f32 %v2111_v32 }
 0x149   : > { %v11051_v39 = vpop.eup %11050  ;;  %11074 = vrcp.f32 %v2155_v35  ;;  %v2156_v40 = vadd.f32 1.0, %v11049_v36  ;;  %v1871_v44 = vmul.f32 %v11992_v51, %v12060_v38  ;;  %v2113_v36 = vmul.f32 1.442695, %v1942_v18 }
 0x14a   : > { %v11053_v42 = vpop.eup %11052  ;;  %11076 = vrcp.f32 %v2157_v37  ;;  %v2158_v43 = vadd.f32 1.0, %v11051_v39  ;;  %v12064_v45 = vpop.f32.mrf.mxu0 }
 0x14b   : > { %v11055_v46 = vpop.eup %11054  ;;  %11078 = vrcp.f32 %v2156_v40  ;;  %v2179_v47 = vadd.f32 1.0, %v11053_v42  ;;  %v1971_v41 = vmul.f32 1.442695, %v1871_v44  ;;  %v1872_v0 = vmul.f32 %v11992_v51, %v12064_v45  ;;  %v12074_v4 = vpop.f32.mrf.mxu1 }
 0x14c   : > { %v11057_v48 = vpop.eup %11056  ;;  %11080 = vrcp.f32 %v2158_v43  ;;  %v2181_v49 = vadd.f32 1.0, %v11055_v46  ;;  %v12066_v50 = vpop.f32.mrf.mxu0  ;;  %v1873_v44 = vmul.f32 %v11992_v51, %v12074_v4 }
 0x14d   : > { %v11059_v53 = vpop.eup %11058  ;;  %11082 = vrcp.f32 %v2179_v47  ;;  %v2180_v55 = vadd.f32 1.0, %v11057_v48  ;;  %v1895_v12 = vmul.f32 %v11992_v51, %v12066_v50  ;;  %v1973_v17 = vmul.f32 1.442695, %v1872_v0  ;;  %v12086_v25 = vpop.f32.mrf.mxu1 }
 0x14e   : > { %v11061_v60 = vpop.eup %11060  ;;  %11084 = vrcp.f32 %v2181_v49  ;;  %v2182_v62 = vadd.f32 1.0, %v11059_v53  ;;  %v12072_v1 = vpop.f32.mrf.mxu0  ;;  %v1874_v49 = vmul.f32 %v11992_v51, %v12086_v25 }
 0x14f   : > { %11086 = vrcp.f32 %v2180_v55  ;;  %v2203_v3 = vadd.f32 1.0, %v11061_v60  ;;  %v1896_v23 = vmul.f32 %v11992_v51, %v12072_v1  ;;  %v2019_v32 = vmul.f32 1.442695, %v1895_v12  ;;  %v12100_v46 = vpop.f32.mrf.mxu1 }
 0x150   : > { %v11063_v6 = vpop.eup %11062  ;;  %11088 = vrcp.f32 %v2182_v62  ;;  %v12076_v7 = vpop.f32.mrf.mxu0  ;;  %v1897_v53 = vmul.f32 %v11992_v51, %v12100_v46 }
 0x151   : > { %v11065_v9 = vpop.eup %11064  ;;  %11090 = vrcp.f32 %v2203_v3  ;;  %v2204_v10 = vadd.f32 1.0, %v11063_v6  ;;  %v1919_v33 = vmul.f32 %v11992_v51, %v12076_v7  ;;  %v2021_v42 = vmul.f32 1.442695, %v1896_v23 }
 0x152   : > { %v11067_v13 = vpop.eup %11066  ;;  %11092 = vpow2.f32 %v1971_v41  ;;  %v2205_v14 = vadd.f32 1.0, %v11065_v9  ;;  %v12082_v58 = vpop.f32.mrf.mxu0 }
 0x153   : > { %v11069_v21 = vpop.eup %11068  ;;  %11094 = vrcp.f32 %v2204_v10  ;;  %v2227_v22 = vadd.f32 1.0, %v11067_v13  ;;  %v1920_v37 = vmul.f32 %v11992_v51, %v12082_v58  ;;  %v2067_v41 = vmul.f32 1.442695, %v1919_v33 }
 0x154   : > { %v11071_v27 = vpop.eup %11070  ;;  %11096 = vrcp.f32 %v2205_v14  ;;  %v2206_v28 = vadd.f32 1.0, %v11069_v21  ;;  %v12088_v29 = vpop.f32.mrf.mxu0  ;;  %v1975_v14 = vmul.f32 1.442695, %v1873_v44 }
 0x155   : > { %v11073_v30 = vpop.eup %11072  ;;  %11098 = vrcp.f32 %v2227_v22  ;;  %v2228_v31 = vadd.f32 1.0, %v11071_v27  ;;  %v1943_v43 = vmul.f32 %v11992_v51, %v12088_v29  ;;  %v2069_v9 = vmul.f32 1.442695, %v1920_v37  ;;  %v12118_v22 = vpop.f32.mrf.mxu1 }
 0x156   : > { %v11075_v34 = vpop.eup %11074  ;;  %11100 = vpow2.f32 %v1973_v17  ;;  %v2229_v35 = vadd.f32 1.0, %v11073_v30  ;;  %v12094_v39 = vpop.f32.mrf.mxu0 }
 0x157   : > { %v11077_v40 = vpop.eup %11076  ;;  %11102 = vrcp.f32 %v2228_v31  ;;  %v1944_v48 = vmul.f32 %v11992_v51, %v12094_v39  ;;  %v2347_v60 = vmul.f32 %v11075_v34, %v11994_v52  ;;  %v2115_v13 = vmul.f32 1.442695, %v1943_v43 }
 0x158   : > { %v11079_v47 = vpop.eup %11078  ;;  %11104 = vrcp.f32 %v2206_v28  ;;  %v2349_v3 = vmul.f32 %v11077_v40, %v12000_v54 }
 0x159   : > { %v11081_v55 = vpop.eup %11080  ;;  %v2348_v62 = vmul.f32 %v11079_v47, %v12005_v57  ;;  %11106 = vpow2.f32 %v2019_v32  ;;  %v2117_v52 = vmul.f32 1.442695, %v1944_v48  ;;  %v1977_v57 = vmul.f32 1.442695, %v1874_v49 }
 0x15a   : > { %v11083_v0 = vpop.eup %11082  ;;  %v2350_v6 = vmul.f32 %v11081_v55, %v12009_v61  ;;  %11108 = vrcp.f32 %v2229_v35  ;;  %v2023_v32 = vmul.f32 1.442695, %v1897_v53 }
 0x15b   : > { %v11085_v10 = vpop.eup %11084  ;;  %v12112_v12 = vpack.c.bf16 %v2348_v62, %v2347_v60  ;;  %11110 = vpow2.f32 %v2021_v42  ;;  %v2371_v61 = vmul.f32 %v11083_v0, %v12013_v63 }
 0x15c   : > { %v11087_v17 = vpop.eup %11086  ;;  %v12114_v18 = vpack.c.bf16 %v2350_v6, %v2349_v3  ;;  %11112 = vpow2.f32 %v2113_v36  ;;  %v12116_v21 = vpop.f32.mrf.mxu0  ;;  %v2373_v30 = vmul.f32 %v11085_v10, %v12017_v2 }
 0x15d   : > { %v11089_v54 = vpop.eup %11088  ;;  %2739 = vst [vmem:[#allocation2 + $0x4] sm:$0xff] %v12112_v12  ;;  %v2372_v23 = vmul.f32 %v11087_v17, %v12021_v5  ;;  %11114 = vpow2.f32 %v2067_v41  ;;  %v1875_v27 = vmul.f32 %v11992_v51, %v12116_v21  ;;  %v1898_v5 = vmul.f32 %v11992_v51, %v12118_v22 }
 0x15e   : > { %v11091_v28 = vpop.eup %11090  ;;  %2740 = vst [vmem:[#allocation2 + $0xc] sm:$0xff] %v12114_v18  ;;  %v2374_v31 = vmul.f32 %v11089_v54, %v12025_v8  ;;  %11116 = vpow2.f32 %v2069_v9  ;;  %v12128_v33 = vpop.f32.mrf.mxu0 }
 0x15f   : > { %v11093_v34 = vpop.eup %11092  ;;  %v12130_v35 = vpack.c.bf16 %v2372_v23, %v2371_v61  ;;  %v2395_v63 = vmul.f32 %v11091_v28, %v12029_v11  ;;  %11118 = vpow2.f32 %v2115_v13  ;;  %v1876_v2 = vmul.f32 %v11992_v51, %v12128_v33  ;;  %v12169_v54 = vpop.f32.mrf.mxu1 }
 0x160   : > { %v11095_v36 = vpop.eup %11094  ;;  %v12135_v37 = vpack.c.bf16 %v2374_v31, %v2373_v30  ;;  %v2159_v40 = vadd.f32 1.0, %v11093_v34  ;;  %11120 = vpow2.f32 %v2117_v52  ;;  %v1979_v43 = vmul.f32 1.442695, %v1875_v27  ;;  %v12141_v11 = vpop.f32.mrf.mxu0 }
 0x161   : > { %v11097_v8 = vpop.eup %11096  ;;  %2751 = vst [vmem:[#allocation2 + $0x6c] sm:$0xff] %v12130_v35  ;;  %v2396_v42 = vmul.f32 %v11095_v36, %v12036_v15  ;;  %11122 = vpow2.f32 %v1975_v14  ;;  %v1899_v47 = vmul.f32 %v11992_v51, %v12141_v11  ;;  %v2025_v55 = vmul.f32 1.442695, %v1898_v5  ;;  %v12181_v5 = vpop.f32.mrf.mxu1 }
 0x162   : > { %v11099_v44 = vpop.eup %11098  ;;  %2752 = vst [vmem:[#allocation2 + $0x74] sm:$0xff] %v12135_v37  ;;  %11124 = vrcp.f32 %v2159_v40  ;;  %v2397_v15 = vmul.f32 %v11097_v8, %v12038_v16  ;;  %v1981_v0 = vmul.f32 1.442695, %v1876_v2  ;;  %v12165_v17 = vpop.f32.mrf.mxu0 }
 0x163   : > { %v11101_v48 = vpop.eup %11100  ;;  %v12146_v49 = vpack.c.bf16 %v2396_v42, %v2395_v63  ;;  %v2419_v53 = vmul.f32 %v11099_v44, %v12044_v19  ;;  %11126 = vpow2.f32 %v1977_v57  ;;  %v2027_v10 = vmul.f32 1.442695, %v1899_v47 }
 0x164   : > { %v11103_v60 = vpop.eup %11102  ;;  %v2160_v62 = vadd.f32 1.0, %v11101_v48  ;;  %v12150_v41 = vld [vmem:[#allocation2] sm:$0xff]  ;;  %11128 = vpow2.f32 %v2023_v32  ;;  %v12174_v23 = vpop.f32.mrf.mxu0  ;;  %v1900_v30 = vmul.f32 %v11992_v51, %v12165_v17  ;;  %v1921_v44 = vmul.f32 %v11992_v51, %v12169_v54 }
 0x165   : > { %v11105_v3 = vpop.eup %11104  ;;  %2763 = vst [vmem:[#allocation2 + $0xd4] sm:$0xff] %v12146_v49  ;;  %v2420_v6 = vmul.f32 %v11103_v60, %v12050_v24  ;;  %v12154_v9 = vld [vmem:[#allocation2 + $0x8] sm:$0xff]  ;;  %2891 = vrot.lane.b32.xlu0 %v12150_v41, %s11462_s18  ;;  %11130 = vpow2.f32 %v1979_v43  ;;  %v12193_v60 = vpop.f32.mrf.mxu1 }
 0x166   : > { %v11107_v19 = vpop.eup %11106  ;;  %11132 = vrcp.f32 %v2160_v62  ;;  %v2398_v16 = vmul.f32 %v11105_v3, %v12046_v20  ;;  %3347 = vrot.lane.b32.xlu1 %v12154_v9, %s11463_s19  ;;  %v12185_v2 = vpop.f32.mrf.mxu0  ;;  %v2029_v43 = vmul.f32 1.442695, %v1900_v30 }
 0x167   : > { %v12161_v13 = vpop.eup %11108  ;;  %v12163_v14 = vpack.c.bf16 %v2420_v6, %v2419_v53  ;;  %v2183_v24 = vadd.f32 1.0, %v11107_v19  ;;  %11134 = vpow2.f32 %v2025_v55  ;;  %v1922_v55 = vmul.f32 %v11992_v51, %v12181_v5  ;;  %v12207_v30 = vpop.f32.mrf.mxu1 }
 0x168   : > { %v11111_v52 = vpop.eup %11110  ;;  %v12167_v57 = vpack.c.bf16 %v2398_v16, %v2397_v15  ;;  %11136 = vpow2.f32 %v1981_v0  ;;  %v1923_v0 = vmul.f32 %v11992_v51, %v12174_v23  ;;  %v12199_v3 = vpop.f32.mrf.mxu0 }
 0x169   : > { %v11113_v20 = vpop.eup %11112  ;;  %2775 = vst [vmem:[#allocation2 + $0x13c] sm:$0xff] %v12163_v14  ;;  %11138 = vrcp.f32 %v2183_v24  ;;  %v2184_v61 = vadd.f32 1.0, %v11111_v52  ;;  %2893 = vrot.lane.b32.xlu0 %v12154_v9, %s11462_s18 }
 0x16a   : > { %v11115_v27 = vpop.eup %11114  ;;  %2764 = vst [vmem:[#allocation2 + $0xdc] sm:$0xff] %v12167_v57  ;;  %v2230_v28 = vadd.f32 1.0, %v11113_v20  ;;  %6159 = vrot.lane.b32.xlu1 %v12112_v12, %s11464_s20  ;;  %11140 = vpow2.f32 %v2027_v10  ;;  %v2071_v10 = vmul.f32 1.442695, %v1921_v44  ;;  %v1946_v44 = vmul.f32 %v11992_v51, %v12207_v30 }
 0x16b   : > { %v11117_v31 = vpop.eup %11116  ;;  %11142 = vrcp.f32 %v2184_v61  ;;  %v2207_v32 = vadd.f32 1.0, %v11115_v27  ;;  %v2073_v27 = vmul.f32 1.442695, %v1922_v55 }
 0x16c   : > { %v11119_v34 = vpop.eup %11118  ;;  %11144 = vrcp.f32 %v2230_v28  ;;  %v2208_v63 = vadd.f32 1.0, %v11117_v31  ;;  %v1924_v28 = vmul.f32 %v11992_v51, %v12185_v2  ;;  %v2075_v31 = vmul.f32 1.442695, %v1923_v0 }
 0x16d   : > { %v11121_v36 = vpop.eup %11120  ;;  %11146 = vrcp.f32 %v2207_v32  ;;  %v2231_v40 = vadd.f32 1.0, %v11119_v34  ;;  %3345 = vrot.lane.b32.xlu0 %v12150_v41, %s11463_s19  ;;  %v1945_v32 = vmul.f32 %v11992_v51, %v12193_v60  ;;  %v12213_v34 = vpop.f32.mrf.mxu0 }
 0x16e   : > { %v11123_v8 = vpop.eup %11122  ;;  %11148 = vrcp.f32 %v2208_v63  ;;  %v2232_v42 = vadd.f32 1.0, %v11121_v36  ;;  %4251 = vrot.lane.b32.xlu1 %v12150_v41, %s11465_s24  ;;  %v1948_v55 = vmul.f32 %v11992_v51, %v12213_v34 }
 0x16f   : > { %v11125_v47 = vpop.eup %11124  ;;  %11150 = vrcp.f32 %v2231_v40  ;;  %v2161_v48 = vadd.f32 1.0, %v11123_v8  ;;  %v1947_v40 = vmul.f32 %v11992_v51, %v12199_v3 }
 0x170   : > { %v11127_v53 = vpop.eup %11126  ;;  %11152 = vrcp.f32 %v2232_v42  ;;  %v2351_v19 = vmul.f32 %v11125_v47, %v12060_v38 }
 0x171   : > { %v11129_v15 = vpop.eup %11128  ;;  %6161 = vrot.lane.b32.xlu0 %v12114_v18, %s11464_s20  ;;  %11154 = vrcp.f32 %v2161_v48  ;;  %v2162_v62 = vadd.f32 1.0, %v11127_v53  ;;  %v2077_v53 = vmul.f32 1.442695, %v1924_v28  ;;  %v2123_v0 = vmul.f32 1.442695, %v1947_v40 }
 0x172   : > { %v11131_v6 = vpop.eup %11130  ;;  %3798 = vrot.lane.b32.xlu1 %v12150_v41, %s11466_s25  ;;  %v2185_v16 = vadd.f32 1.0, %v11129_v15  ;;  %11156 = vpow2.f32 %v2029_v43  ;;  %v2421_v43 = vmul.f32 %v12161_v13, %v12054_v26  ;;  %v2119_v26 = vmul.f32 1.442695, %v1945_v32  ;;  %v12246_v32 = vld [vmem:[#allocation2 + $0x68] sm:$0xff] }
 0x173   : > { %v11133_v24 = vpop.eup %11132  ;;  %11158 = vrcp.f32 %v2162_v62  ;;  %v2163_v52 = vadd.f32 1.0, %v11131_v6 }
 0x174   : > { %v11135_v20 = vpop.eup %11134  ;;  %v2352_v61 = vmul.f32 %v11133_v24, %v12064_v45  ;;  %11160 = vrcp.f32 %v2185_v16 }
 0x175   : > { %v11137_v38 = vpop.eup %11136  ;;  %4253 = vrot.lane.b32.xlu0 %v12154_v9, %s11465_s24  ;;  %11162 = vrcp.f32 %v2163_v52  ;;  %v2186_v41 = vadd.f32 1.0, %v11135_v20  ;;  %v2125_v52 = vmul.f32 1.442695, %v1948_v55 }
 0x176   : > { %v11139_v45 = vpop.eup %11138  ;;  %v10845_v63 = vpack.c.bf16 %v2352_v61, %v2351_v19  ;;  %5706 = vrot.lane.b32.xlu1 %v12112_v12, %s11467_s27  ;;  %v2164_v36 = vadd.f32 1.0, %v11137_v38  ;;  %11164 = vpow2.f32 %v2071_v10 }
 0x177   : > { %v11141_v8 = vpop.eup %11140  ;;  %v2375_v42 = vmul.f32 %v11139_v45, %v12066_v50  ;;  %11166 = vrcp.f32 %v2186_v41 }
 0x178   : > { %v11143_v47 = vpop.eup %11142  ;;  %2741 = vst [vmem:[#allocation2 + $0x14] sm:$0xff] %v10845_v63  ;;  %11168 = vrcp.f32 %v2164_v36  ;;  %v2187_v48 = vadd.f32 1.0, %v11141_v8 }
 0x179   : > { %v11145_v15 = vpop.eup %11144  ;;  %v2376_v62 = vmul.f32 %v11143_v47, %v12072_v1  ;;  %3800 = vrot.lane.b32.xlu0 %v12154_v9, %s11466_s25  ;;  %11170 = vpow2.f32 %v2075_v31  ;;  %v2121_v1 = vmul.f32 1.442695, %v1946_v44 }
 0x17a   : > { %v11147_v50 = vpop.eup %11146  ;;  %v2422_v13 = vmul.f32 %v11145_v15, %v12068_v59  ;;  %5253 = vrot.lane.b32.xlu1 %v12112_v12, %s11468_s28  ;;  %11172 = vrcp.f32 %v2187_v48 }
 0x17b   : > { %v11149_v6 = vpop.eup %11148  ;;  %v10857_v19 = vpack.c.bf16 %v2376_v62, %v2375_v42  ;;  %v2399_v16 = vmul.f32 %v11147_v50, %v12076_v7  ;;  %11174 = vpow2.f32 %v2073_v27 }
 0x17c   : > { %v11151_v10 = vpop.eup %11150  ;;  %v12233_v24 = vpack.c.bf16 %v2422_v13, %v2421_v43  ;;  %v2400_v9 = vmul.f32 %v11149_v6, %v12082_v58  ;;  %11176 = vpow2.f32 %v2077_v53 }
 0x17d   : > { %v11153_v59 = vpop.eup %11152  ;;  %2753 = vst [vmem:[#allocation2 + $0x7c] sm:$0xff] %v10857_v19  ;;  %v2423_v20 = vmul.f32 %v11151_v10, %v12088_v29  ;;  %5708 = vrot.lane.b32.xlu0 %v12114_v18, %s11467_s27  ;;  %11178 = vpow2.f32 %v2119_v26 }
 0x17e   : > { %v11155_v61 = vpop.eup %11154  ;;  %2776 = vst [vmem:[#allocation2 + $0x144] sm:$0xff] %v12233_v24  ;;  %v10869_v7 = vpack.c.bf16 %v2400_v9, %v2399_v16  ;;  %v2424_v27 = vmul.f32 %v11153_v59, %v12094_v39  ;;  %4800 = vrot.lane.b32.xlu1 %v12112_v12, %s11469_s29  ;;  %11180 = vpow2.f32 %v2123_v0 }
 0x17f   : > { %v11157_v58 = vpop.eup %11156  ;;  %v2353_v28 = vmul.f32 %v11155_v61, %v12074_v4  ;;  %11182 = vpow2.f32 %v2121_v1 }
 0x180   : > { %v11159_v29 = vpop.eup %11158  ;;  %2765 = vst [vmem:[#allocation2 + $0xe4] sm:$0xff] %v10869_v7  ;;  %v10881_v38 = vpack.c.bf16 %v2424_v27, %v2423_v20  ;;  %v2188_v41 = vadd.f32 1.0, %v11157_v58  ;;  %11184 = vpow2.f32 %v2125_v52  ;;  %v12282_v58 = vpop.f32.mrf.mxu0 }
 0x181   : > { %v11161_v31 = vpop.eup %11160  ;;  %5255 = vrot.lane.b32.xlu0 %v12114_v18, %s11468_s28  ;;  %v2354_v39 = vmul.f32 %v11159_v29, %v12086_v25 }
 0x182   : > { %v11163_v45 = vpop.eup %11162  ;;  %2777 = vst [vmem:[#allocation2 + $0x14c] sm:$0xff] %v10881_v38  ;;  %2917 = vrot.lane.b32.xlu1 %v12246_v32, %s11462_s18  ;;  %11186 = vrcp.f32 %v2188_v41  ;;  %v2377_v63 = vmul.f32 %v11161_v31, %v12100_v46  ;;  %v1879_v38 = vmul.f32 %v11992_v51, %v12282_v58  ;;  %v12293_v31 = vpop.f32.mrf.mxu0 }
 0x183   : > { %v11165_v4 = vpop.eup %11164  ;;  %v10846_v12 = vpack.c.bf16 %v2354_v39, %v2353_v28  ;;  %v2355_v40 = vmul.f32 %v11163_v45, %v12116_v21  ;;  %v12259_v21 = vld [vmem:[#allocation2 + $0x70] sm:$0xff]  ;;  %v1880_v45 = vmul.f32 %v11992_v51, %v12293_v31 }
 0x184   : > { %v11167_v36 = vpop.eup %11166  ;;  %v2209_v8 = vadd.f32 1.0, %v11165_v4 }
 0x185   : > { %v11169_v42 = vpop.eup %11168  ;;  %4802 = vrot.lane.b32.xlu0 %v12114_v18, %s11469_s29  ;;  %2742 = vst [vmem:[#allocation2 + $0x1c] sm:$0xff] %v10846_v12  ;;  %v2378_v25 = vmul.f32 %v11167_v36, %v12118_v22  ;;  %v12263_v22 = vpop.f32.mrf.mxu1  ;;  %v1989_v36 = vmul.f32 1.442695, %v1880_v45 }
 0x186   : > { %v11171_v43 = vpop.eup %11170  ;;  %3371 = vrot.lane.b32.xlu1 %v12246_v32, %s11463_s19  ;;  %v2356_v44 = vmul.f32 %v11169_v42, %v12128_v33  ;;  %11188 = vrcp.f32 %v2209_v8  ;;  %v1877_v26 = vmul.f32 %v11992_v51, %v12263_v22  ;;  %v12299_v12 = vpop.f32.mrf.mxu0 }
 0x187   : > { %v11173_v47 = vpop.eup %11172  ;;  %v10858_v48 = vpack.c.bf16 %v2378_v25, %v2377_v63  ;;  %v2211_v46 = vadd.f32 1.0, %v11171_v43  ;;  %v12269_v0 = vpop.f32.mrf.mxu1 }
 0x188   : > { %v11175_v53 = vpop.eup %11174  ;;  %v10847_v55 = vpack.c.bf16 %v2356_v44, %v2355_v40  ;;  %v1878_v16 = vmul.f32 %v11992_v51, %v12269_v0  ;;  %v2379_v10 = vmul.f32 %v11173_v47, %v12141_v11  ;;  %v1983_v52 = vmul.f32 1.442695, %v1877_v26 }
 0x189   : > { %v11177_v15 = vpop.eup %11176  ;;  %2919 = vrot.lane.b32.xlu0 %v12259_v21, %s11462_s18  ;;  %2754 = vst [vmem:[#allocation2 + $0x84] sm:$0xff] %v10858_v48  ;;  %11190 = vrcp.f32 %v2211_v46  ;;  %v2210_v18 = vadd.f32 1.0, %v11175_v53  ;;  %v12276_v59 = vpop.f32.mrf.mxu1  ;;  %v1903_v40 = vmul.f32 %v11992_v51, %v12299_v12 }
 0x18a   : > { %v11179_v62 = vpop.eup %11178  ;;  %6185 = vrot.lane.b32.xlu1 %v12130_v35, %s11464_s20  ;;  %2743 = vst [vmem:[#allocation2 + $0x24] sm:$0xff] %v10847_v55  ;;  %v2212_v33 = vadd.f32 1.0, %v11177_v15  ;;  %v1985_v61 = vmul.f32 1.442695, %v1878_v16  ;;  %v1901_v7 = vmul.f32 %v11992_v51, %v12276_v59 }
 0x18b   : > { %v11181_v50 = vpop.eup %11180  ;;  %11192 = vrcp.f32 %v2210_v18  ;;  %v2233_v13 = vadd.f32 1.0, %v11179_v62  ;;  %v12284_v28 = vpop.f32.mrf.mxu1  ;;  %v2035_v42 = vmul.f32 1.442695, %v1903_v40 }
 0x18c   : > { %v11183_v6 = vpop.eup %11182  ;;  %11194 = vrcp.f32 %v2212_v33  ;;  %v2235_v19 = vadd.f32 1.0, %v11181_v50  ;;  %v2031_v29 = vmul.f32 1.442695, %v1901_v7  ;;  %v1902_v41 = vmul.f32 %v11992_v51, %v12284_v28 }
 0x18d   : > { %v11185_v1 = vpop.eup %11184  ;;  %3373 = vrot.lane.b32.xlu0 %v12259_v21, %s11463_s19  ;;  %11196 = vrcp.f32 %v2233_v13  ;;  %v2234_v9 = vadd.f32 1.0, %v11183_v6 }
 0x18e   : > { %4277 = vrot.lane.b32.xlu1 %v12246_v32, %s11465_s24  ;;  %11198 = vrcp.f32 %v2235_v19  ;;  %v2236_v20 = vadd.f32 1.0, %v11185_v1  ;;  %v2033_v4 = vmul.f32 1.442695, %v1902_v41 }
 0x18f   : > { %v11187_v27 = vpop.eup %11186  ;;  %11200 = vrcp.f32 %v2234_v9 }
 0x190   : > { %v2380_v11 = vmul.f32 %v11187_v27, %v12165_v17  ;;  %11202 = vrcp.f32 %v2236_v20  ;;  %v1987_v17 = vmul.f32 1.442695, %v1879_v38  ;;  %v12338_v38 = vpop.f32.mrf.mxu1 }
 0x191   : > { %6187 = vrot.lane.b32.xlu0 %v12135_v37, %s11464_s20  ;;  %11204 = vpow2.f32 %v1983_v52 }
 0x192   : > { %3824 = vrot.lane.b32.xlu1 %v12246_v32, %s11466_s25  ;;  %v10859_v39 = vpack.c.bf16 %v2380_v11, %v2379_v10  ;;  %11206 = vpow2.f32 %v1985_v61  ;;  %v12305_v32 = vpop.f32.mrf.mxu0  ;;  %v12329_v10 = vld [vmem:[#allocation2 + $0xd8] sm:$0xff]  ;;  %v4173_v11 = vld [vmem:[#allocation2 + $0xd0] sm:$0xff] }
 0x193   : > { %11208 = vpow2.f32 %v2031_v29  ;;  %v11189_v63 = vpop.eup %11188  ;;  %v1904_v25 = vmul.f32 %v11992_v51, %v12305_v32 }
 0x194   : > { %2755 = vst [vmem:[#allocation2 + $0x8c] sm:$0xff] %v10859_v39  ;;  %11210 = vpow2.f32 %v1987_v17  ;;  %v2401_v43 = vmul.f32 %v11189_v63, %v12169_v54  ;;  %v12340_v41 = vpop.f32.mrf.mxu0  ;;  %v12347_v17 = vpop.f32.mrf.mxu1 }
 0x195   : > { %4279 = vrot.lane.b32.xlu0 %v12259_v21, %s11465_s24  ;;  %11212 = vpow2.f32 %v2033_v4  ;;  %v2037_v48 = vmul.f32 1.442695, %v1904_v25  ;;  %v1927_v39 = vmul.f32 %v11992_v51, %v12340_v41 }
 0x196   : > { %v11191_v8 = vpop.eup %11190  ;;  %5732 = vrot.lane.b32.xlu1 %v12130_v35, %s11467_s27  ;;  %11214 = vpow2.f32 %v1989_v36  ;;  %v12349_v45 = vpop.f32.mrf.mxu0  ;;  %v1926_v36 = vmul.f32 %v11992_v51, %v12347_v17 }
 0x197   : > { %v2403_v47 = vmul.f32 %v11191_v8, %v12174_v23  ;;  %11216 = vpow2.f32 %v2035_v42  ;;  %v2083_v63 = vmul.f32 1.442695, %v1927_v39  ;;  %v1928_v40 = vmul.f32 %v11992_v51, %v12349_v45  ;;  %v12357_v8 = vpop.f32.mrf.mxu1 }
 0x198   : > { %v11193_v44 = vpop.eup %11192  ;;  %11218 = vpow2.f32 %v2037_v48  ;;  %v12359_v42 = vpop.f32.mrf.mxu0 }
 0x199   : > { %v11195_v46 = vpop.eup %11194  ;;  %3826 = vrot.lane.b32.xlu0 %v12259_v21, %s11466_s25  ;;  %v2402_v53 = vmul.f32 %v11193_v44, %v12181_v5  ;;  %v2085_v44 = vmul.f32 1.442695, %v1928_v40 }
 0x19a   : > { %v11197_v55 = vpop.eup %11196  ;;  %5279 = vrot.lane.b32.xlu1 %v12130_v35, %s11468_s28  ;;  %v2404_v15 = vmul.f32 %v11195_v46, %v12185_v2 }
 0x19b   : > { %v11199_v18 = vpop.eup %11198  ;;  %v10870_v54 = vpack.c.bf16 %v2402_v53, %v2401_v43  ;;  %v2425_v62 = vmul.f32 %v11197_v55, %v12193_v60  ;;  %v2081_v43 = vmul.f32 1.442695, %v1926_v36  ;;  %v1951_v53 = vmul.f32 %v11992_v51, %v12359_v42  ;;  %v12367_v55 = vpop.f32.mrf.mxu1 }
 0x19c   : > { %v11201_v23 = vpop.eup %11200  ;;  %v10871_v33 = vpack.c.bf16 %v2404_v15, %v2403_v47  ;;  %v2427_v26 = vmul.f32 %v11199_v18, %v12199_v3  ;;  %v1949_v47 = vmul.f32 %v11992_v51, %v12357_v8  ;;  %v12369_v15 = vpop.f32.mrf.mxu0 }
 0x19d   : > { %v11203_v50 = vpop.eup %11202  ;;  %5734 = vrot.lane.b32.xlu0 %v12135_v37, %s11467_s27  ;;  %2766 = vst [vmem:[#allocation2 + $0xec] sm:$0xff] %v10870_v54  ;;  %v2426_v5 = vmul.f32 %v11201_v23, %v12207_v30  ;;  %v1950_v23 = vmul.f32 %v11992_v51, %v12367_v55 }
 0x19e   : > { %v11205_v21 = vpop.eup %11204  ;;  %4826 = vrot.lane.b32.xlu1 %v12130_v35, %s11469_s29  ;;  %2767 = vst [vmem:[#allocation2 + $0xf4] sm:$0xff] %v10871_v33  ;;  %v2428_v2 = vmul.f32 %v11203_v50, %v12213_v34  ;;  %v1952_v50 = vmul.f32 %v11992_v51, %v12369_v15 }
 0x19f   : > { %v11207_v13 = vpop.eup %11206  ;;  %v10882_v60 = vpack.c.bf16 %v2426_v5, %v2425_v62  ;;  %v2165_v6 = vadd.f32 1.0, %v11205_v21  ;;  %v2127_v62 = vmul.f32 1.442695, %v1949_v47 }
 0x1a0   : > { %v11209_v19 = vpop.eup %11208  ;;  %v10883_v16 = vpack.c.bf16 %v2428_v2, %v2427_v26  ;;  %v2166_v3 = vadd.f32 1.0, %v11207_v13  ;;  %v2131_v26 = vmul.f32 1.442695, %v1951_v53  ;;  %v2129_v2 = vmul.f32 1.442695, %v1950_v23 }
 0x1a1   : > { %v11211_v1 = vpop.eup %11210  ;;  %5281 = vrot.lane.b32.xlu0 %v12135_v37, %s11468_s28  ;;  %2778 = vst [vmem:[#allocation2 + $0x154] sm:$0xff] %v10882_v60  ;;  %11220 = vrcp.f32 %v2165_v6  ;;  %v2189_v30 = vadd.f32 1.0, %v11209_v19  ;;  %v2133_v6 = vmul.f32 1.442695, %v1952_v50 }
 0x1a2   : > { %v11213_v9 = vpop.eup %11212  ;;  %2945 = vrot.lane.b32.xlu1 %v12329_v10, %s11462_s18  ;;  %2779 = vst [vmem:[#allocation2 + $0x15c] sm:$0xff] %v10883_v16  ;;  %11222 = vrcp.f32 %v2166_v3  ;;  %v2167_v35 = vadd.f32 1.0, %v11211_v1 }
 0x1a3   : > { %v11215_v34 = vpop.eup %11214  ;;  %11224 = vrcp.f32 %v2189_v30  ;;  %v2190_v52 = vadd.f32 1.0, %v11213_v9 }
 0x1a4   : > { %11226 = vrcp.f32 %v2167_v35  ;;  %v2168_v20 = vadd.f32 1.0, %v11215_v34  ;;  %v11217_v61 = vpop.eup %11216 }
 0x1a5   : > { %4828 = vrot.lane.b32.xlu0 %v12135_v37, %s11469_s29  ;;  %11228 = vrcp.f32 %v2190_v52  ;;  %v2191_v7 = vadd.f32 1.0, %v11217_v61  ;;  %v11219_v27 = vpop.eup %11218  ;;  %v1925_v37 = vmul.f32 %v11992_v51, %v12338_v38 }
 0x1a6   : > { %6211 = vrot.lane.b32.xlu1 %v12146_v49, %s11464_s20  ;;  %11230 = vrcp.f32 %v2168_v20  ;;  %v2192_v29 = vadd.f32 1.0, %v11219_v27 }
 0x1a7   : > { %11232 = vrcp.f32 %v2191_v7  ;;  %v2079_v4 = vmul.f32 1.442695, %v1925_v37 }
 0x1a8   : > { %11234 = vrcp.f32 %v2192_v29 }
 0x1a9   : > { %2943 = vrot.lane.b32.xlu0 %v4173_v11, %s11462_s18  ;;  %11236 = vpow2.f32 %v2079_v4  ;;  %v12404_v4 = vld [vmem:[#allocation2 + $0x140] sm:$0xff] }
 0x1aa   : > { %4303 = vrot.lane.b32.xlu1 %v4173_v11, %s11465_s24  ;;  %11238 = vpow2.f32 %v2083_v63 }
 0x1ab   : > { %11240 = vpow2.f32 %v2081_v43 }
 0x1ac   : > { %11242 = vpow2.f32 %v2085_v44 }
 0x1ad   : > { %6213 = vrot.lane.b32.xlu0 %v12167_v57, %s11464_s20  ;;  %11244 = vpow2.f32 %v2127_v62 }
 0x1ae   : > { %v11221_v25 = vpop.eup %11220  ;;  %3850 = vrot.lane.b32.xlu1 %v4173_v11, %s11466_s25  ;;  %11246 = vpow2.f32 %v2131_v26 }
 0x1af   : > { %v11223_v48 = vpop.eup %11222  ;;  %v2357_v46 = vmul.f32 %v11221_v25, %v12263_v22  ;;  %11248 = vpow2.f32 %v2129_v2  ;;  %v12410_v25 = vpop.f32.mrf.mxu1 }
 0x1b0   : > { %v11225_v18 = vpop.eup %11224  ;;  %v2358_v54 = vmul.f32 %v11223_v48, %v12269_v0  ;;  %11250 = vpow2.f32 %v2133_v6 }
 0x1b1   : > { %v11227_v33 = vpop.eup %11226  ;;  %4305 = vrot.lane.b32.xlu0 %v12329_v10, %s11465_s24  ;;  %v2381_v22 = vmul.f32 %v11225_v18, %v12276_v59  ;;  %v12419_v48 = vpop.f32.mrf.mxu1 }
 0x1b2   : > { %v11229_v5 = vpop.eup %11228  ;;  %3397 = vrot.lane.b32.xlu1 %v4173_v11, %s11463_s19  ;;  %v10848_v0 = vpack.c.bf16 %v2358_v54, %v2357_v46  ;;  %v2359_v21 = vmul.f32 %v11227_v33, %v12282_v58  ;;  %v2826_v11 = vld [vmem:[#allocation2 + $0x138] sm:$0xff]  ;;  %v1882_v18 = vmul.f32 %v11992_v51, %v12419_v48 }
 0x1b3   : > { %v11231_v13 = vpop.eup %11230  ;;  %v2382_v60 = vmul.f32 %v11229_v5, %v12284_v28  ;;  %v12425_v23 = vpop.f32.mrf.mxu1 }
 0x1b4   : > { %2744 = vst [vmem:[#allocation2 + $0x2c] sm:$0xff] %v10848_v0  ;;  %v2360_v59 = vmul.f32 %v11231_v13, %v12293_v31  ;;  %v11233_v19 = vpop.eup %11232  ;;  %v1993_v26 = vmul.f32 1.442695, %v1882_v18 }
 0x1b5   : > { %3852 = vrot.lane.b32.xlu0 %v12329_v10, %s11466_s25  ;;  %v10860_v16 = vpack.c.bf16 %v2382_v60, %v2381_v22  ;;  %v2383_v3 = vmul.f32 %v11233_v19, %v12299_v12  ;;  %v11235_v1 = vpop.eup %11234 }
 0x1b6   : > { %5758 = vrot.lane.b32.xlu1 %v12146_v49, %s11467_s27  ;;  %v10849_v58 = vpack.c.bf16 %v2360_v59, %v2359_v21  ;;  %v2384_v28 = vmul.f32 %v11235_v1, %v12305_v32  ;;  %v11237_v30 = vpop.eup %11236  ;;  %v12438_v21 = vpop.f32.mrf.mxu1 }
 0x1b7   : > { %2756 = vst [vmem:[#allocation2 + $0x94] sm:$0xff] %v10860_v16  ;;  %v11239_v9 = vpop.eup %11238  ;;  %v2213_v35 = vadd.f32 1.0, %v11237_v30  ;;  %v1906_v2 = vmul.f32 %v11992_v51, %v12438_v21  ;;  %v5641_v16 = vld [vmem:[#allocation2 + $0x13c] sm:$0xff] }
 0x1b8   : > { %2745 = vst [vmem:[#allocation2 + $0x34] sm:$0xff] %v10849_v58  ;;  %v10861_v31 = vpack.c.bf16 %v2384_v28, %v2383_v3  ;;  %v11241_v34 = vpop.eup %11240  ;;  %v2215_v12 = vadd.f32 1.0, %v11239_v9  ;;  %v12447_v19 = vpop.f32.mrf.mxu1 }
 0x1b9   : > { %3399 = vrot.lane.b32.xlu0 %v12329_v10, %s11463_s19  ;;  %v11243_v52 = vpop.eup %11242  ;;  %11252 = vrcp.f32 %v2213_v35  ;;  %v2214_v32 = vadd.f32 1.0, %v11241_v34  ;;  %v1929_v1 = vmul.f32 %v11992_v51, %v12447_v19 }
 0x1ba   : > { %5305 = vrot.lane.b32.xlu1 %v12146_v49, %s11468_s28  ;;  %2757 = vst [vmem:[#allocation2 + $0x9c] sm:$0xff] %v10861_v31  ;;  %v11245_v10 = vpop.eup %11244  ;;  %11254 = vrcp.f32 %v2215_v12  ;;  %v2216_v20 = vadd.f32 1.0, %v11243_v52  ;;  %v12458_v30 = vpop.f32.mrf.mxu1 }
 0x1bb   : > { %v11247_v61 = vpop.eup %11246  ;;  %11256 = vrcp.f32 %v2214_v32  ;;  %v2237_v7 = vadd.f32 1.0, %v11245_v10  ;;  %v2087_v34 = vmul.f32 1.442695, %v1929_v1  ;;  %v1930_v12 = vmul.f32 %v11992_v51, %v12458_v30 }
 0x1bc   : > { %v11249_v27 = vpop.eup %11248  ;;  %11258 = vrcp.f32 %v2216_v20  ;;  %v2239_v29 = vadd.f32 1.0, %v11247_v61  ;;  %v12470_v20 = vpop.f32.mrf.mxu1 }
 0x1bd   : > { %5760 = vrot.lane.b32.xlu0 %v12167_v57, %s11467_s27  ;;  %v11251_v37 = vpop.eup %11250  ;;  %11260 = vrcp.f32 %v2237_v7  ;;  %v2089_v7 = vmul.f32 1.442695, %v1930_v12 }
 0x1be   : > { %4852 = vrot.lane.b32.xlu1 %v12146_v49, %s11469_s29  ;;  %v2238_v49 = vadd.f32 1.0, %v11249_v27  ;;  %11262 = vrcp.f32 %v2239_v29  ;;  %v2240_v39 = vadd.f32 1.0, %v11251_v37  ;;  %v1953_v27 = vmul.f32 %v11992_v51, %v12470_v20  ;;  %v12481_v37 = vpop.f32.mrf.mxu1 }
 0x1c0   : > { %11264 = vrcp.f32 %v2238_v49 }
 0x1c1   : > { %5307 = vrot.lane.b32.xlu0 %v12167_v57, %s11468_s28  ;;  %11266 = vrcp.f32 %v2240_v39 }
 0x1c2   : > { %2969 = vrot.lane.b32.xlu1 %v2826_v11, %s11462_s18 }
 0x1c5   : > { %4854 = vrot.lane.b32.xlu0 %v12167_v57, %s11469_s29 }
 0x1c6   : > { %6237 = vrot.lane.b32.xlu1 %v12163_v14, %s11464_s20  ;;  %v11253_v63 = vpop.eup %11252  ;;  %v1881_v14 = vmul.f32 %v11992_v51, %v12410_v25 }
 0x1c7   : > { %v11255_v36 = vpop.eup %11254  ;;  %v2405_v40 = vmul.f32 %v11253_v63, %v12338_v38 }
 0x1c8   : > { %v11257_v43 = vpop.eup %11256  ;;  %v2407_v57 = vmul.f32 %v11255_v36, %v12340_v41  ;;  %v1991_v53 = vmul.f32 1.442695, %v1881_v14 }
 0x1c9   : > { %2971 = vrot.lane.b32.xlu0 %v12404_v4, %s11462_s18  ;;  %v11259_v44 = vpop.eup %11258  ;;  %v2406_v47 = vmul.f32 %v11257_v43, %v12347_v17  ;;  %v1954_v43 = vmul.f32 %v11992_v51, %v12481_v37 }
 0x1ca   : > { %4329 = vrot.lane.b32.xlu1 %v2826_v11, %s11465_s24  ;;  %v11261_v46 = vpop.eup %11260  ;;  %v2408_v38 = vmul.f32 %v11259_v44, %v12349_v45  ;;  %11268 = vpow2.f32 %v1991_v53  ;;  %v12430_v45 = vpop.f32.mrf.mxu0 }
 0x1cb   : > { %v11263_v54 = vpop.eup %11262  ;;  %v10872_v62 = vpack.c.bf16 %v2406_v47, %v2405_v40  ;;  %v2429_v41 = vmul.f32 %v11261_v46, %v12357_v8  ;;  %v1905_v8 = vmul.f32 %v11992_v51, %v12425_v23  ;;  %v1883_v0 = vmul.f32 %v11992_v51, %v12430_v45 }
 0x1cc   : > { %v10873_v17 = vpack.c.bf16 %v2408_v38, %v2407_v57  ;;  %v2431_v22 = vmul.f32 %v11263_v54, %v12359_v42  ;;  %11270 = vpow2.f32 %v1993_v26  ;;  %v12443_v13 = vpop.f32.mrf.mxu0  ;;  %v12512_v26 = vpop.f32.mrf.mxu1 }
 0x1cd   : > { %6239 = vrot.lane.b32.xlu0 %v12233_v24, %s11464_s20  ;;  %v11265_v33 = vpop.eup %11264  ;;  %2768 = vst [vmem:[#allocation2 + $0xfc] sm:$0xff] %v10872_v62  ;;  %v2039_v6 = vmul.f32 1.442695, %v1905_v8  ;;  %v1884_v59 = vmul.f32 %v11992_v51, %v12443_v13 }
 0x1ce   : > { %3876 = vrot.lane.b32.xlu1 %v2826_v11, %s11466_s25  ;;  %v11267_v50 = vpop.eup %11266  ;;  %v2430_v5 = vmul.f32 %v11265_v33, %v12367_v55  ;;  %2769 = vst [vmem:[#allocation2 + $0x104] sm:$0xff] %v10873_v17  ;;  %v1995_v55 = vmul.f32 1.442695, %v1883_v0  ;;  %v12451_v3 = vpop.f32.mrf.mxu0  ;;  %v12510_v17 = vld [vmem:[#allocation2 + $0x10] sm:$0xff] }
 0x1cf   : > { %v2432_v42 = vmul.f32 %v11267_v50, %v12369_v15  ;;  %v2041_v15 = vmul.f32 1.442695, %v1906_v2  ;;  %11272 = vpow2.f32 %v2039_v6  ;;  %v1997_v28 = vmul.f32 1.442695, %v1884_v59  ;;  %v12522_v6 = vld [vmem:[#allocation2 + $0x18] sm:$0xff]  ;;  %v12524_v59 = vpop.f32.mrf.mxu1 }
 0x1d0   : > { %v10884_v60 = vpack.c.bf16 %v2430_v5, %v2429_v41  ;;  %v1907_v31 = vmul.f32 %v11992_v51, %v12451_v3  ;;  %11274 = vpow2.f32 %v1995_v55  ;;  %v12462_v35 = vpop.f32.mrf.mxu0  ;;  %v2137_v41 = vmul.f32 1.442695, %v1954_v43 }
 0x1d1   : > { %4331 = vrot.lane.b32.xlu0 %v12404_v4, %s11465_s24  ;;  %v10885_v58 = vpack.c.bf16 %v2432_v42, %v2431_v22  ;;  %11276 = vpow2.f32 %v2041_v15  ;;  %v1908_v10 = vmul.f32 %v11992_v51, %v12462_v35 }
 0x1d2   : > { %3423 = vrot.lane.b32.xlu1 %v2826_v11, %s11463_s19  ;;  %2780 = vst [vmem:[#allocation2 + $0x164] sm:$0xff] %v10884_v60  ;;  %v2043_v32 = vmul.f32 1.442695, %v1907_v31  ;;  %11278 = vpow2.f32 %v1997_v28  ;;  %v12474_v61 = vpop.f32.mrf.mxu0 }
 0x1d3   : > { %2781 = vst [vmem:[#allocation2 + $0x16c] sm:$0xff] %v10885_v58  ;;  %v2045_v11 = vmul.f32 1.442695, %v1908_v10  ;;  %v1931_v29 = vmul.f32 %v11992_v51, %v12474_v61 }
 0x1d4   : > { %11280 = vpow2.f32 %v2043_v32  ;;  %v12485_v39 = vpop.f32.mrf.mxu0 }
 0x1d5   : > { %3878 = vrot.lane.b32.xlu0 %v12404_v4, %s11466_s25  ;;  %11282 = vpow2.f32 %v2087_v34  ;;  %v2091_v36 = vmul.f32 1.442695, %v1931_v29  ;;  %v1932_v40 = vmul.f32 %v11992_v51, %v12485_v39 }
 0x1d6   : > { %5784 = vrot.lane.b32.xlu1 %v5641_v16, %s11467_s27  ;;  %11284 = vpow2.f32 %v2045_v11  ;;  %v12495_v57 = vpop.f32.mrf.mxu0  ;;  %v12540_v11 = vpop.f32.mrf.mxu1 }
 0x1d7   : > { %v12460_v9 = vpop.permute.xlu0 %2891  ;;  %11286 = vpow2.f32 %v2089_v7  ;;  %v11269_v14 = vpop.eup %11268  ;;  %v2093_v44 = vmul.f32 1.442695, %v1932_v40  ;;  %v1955_v47 = vmul.f32 %v11992_v51, %v12495_v57 }
 0x1d8   : > { %v12466_v52 = vpop.permute.xlu1 %3347  ;;  %11288 = vpow2.f32 %v2091_v36  ;;  %v2169_v38 = vadd.f32 1.0, %v11269_v14  ;;  %v12502_v53 = vpop.f32.mrf.mxu0 }
 0x1d9   : > { %3425 = vrot.lane.b32.xlu0 %v12404_v4, %s11463_s19  ;;  %v2135_v4 = vmul.f32 1.442695, %v1953_v27  ;;  %v11271_v18 = vpop.eup %11270  ;;  %v2139_v62 = vmul.f32 1.442695, %v1955_v47  ;;  %v1956_v33 = vmul.f32 %v11992_v51, %v12502_v53  ;;  %v1885_v27 = vmul.f32 %v11992_v51, %v12512_v26 }
 0x1da   : > { %5331 = vrot.lane.b32.xlu1 %v5641_v16, %s11468_s28  ;;  %v2170_v22 = vadd.f32 1.0, %v11271_v18  ;;  %v12552_v18 = vld [vmem:[#allocation2 + $0x80] sm:$0xff] }
 0x1db   : > { %v12483_v49 = vpop.permute.xlu0 %2893  ;;  %11290 = vpow2.f32 %v2135_v4  ;;  %v2141_v50 = vmul.f32 1.442695, %v1956_v33 }
 0x1dc   : > { %v12487_v63 = vpop.permute.xlu1 %6159  ;;  %11292 = vpow2.f32 %v2093_v44  ;;  %v11273_v5 = vpop.eup %11272  ;;  %v1886_v44 = vmul.f32 %v11992_v51, %v12524_v59 }
 0x1dd   : > { %5786 = vrot.lane.b32.xlu0 %v12233_v24, %s11467_s27  ;;  %11294 = vrcp.f32 %v2169_v38  ;;  %v11275_v0 = vpop.eup %11274  ;;  %v2193_v2 = vadd.f32 1.0, %v11273_v5  ;;  %v12558_v5 = vpop.f32.mrf.mxu1 }
 0x1de   : > { %4878 = vrot.lane.b32.xlu1 %v5641_v16, %s11469_s29  ;;  %11296 = vpow2.f32 %v2139_v62  ;;  %v11277_v60 = vpop.eup %11276  ;;  %v2171_v55 = vadd.f32 1.0, %v11275_v0  ;;  %v12526_v16 = vpop.f32.mrf.mxu0 }
 0x1df   : > { %v12500_v46 = vpop.permute.xlu0 %3345  ;;  %11298 = vrcp.f32 %v2170_v22  ;;  %v11279_v58 = vpop.eup %11278  ;;  %v2194_v15 = vadd.f32 1.0, %v11277_v60  ;;  %v1999_v22 = vmul.f32 1.442695, %v1885_v27  ;;  %v1887_v60 = vmul.f32 %v11992_v51, %v12526_v16 }
 0x1e0   : > { %v12504_v54 = vpop.permute.xlu1 %4251  ;;  %11300 = vpow2.f32 %v2137_v41  ;;  %v2172_v31 = vadd.f32 1.0, %v11279_v58  ;;  %v12573_v27 = vpop.f32.mrf.mxu1 }
 0x1e1   : > { %5333 = vrot.lane.b32.xlu0 %v12233_v24, %s11468_s28  ;;  %11302 = vpow2.f32 %v2141_v50  ;;  %v11281_v1 = vpop.eup %11280  ;;  %v1909_v50 = vmul.f32 %v11992_v51, %v12540_v11 }
 0x1e2   : > { %2895 = vrot.lane.b32.xlu1 %v12510_v17, %s11462_s18  ;;  %11304 = vrcp.f32 %v2193_v2  ;;  %v11283_v34 = vpop.eup %11282  ;;  %v2195_v32 = vadd.f32 1.0, %v11281_v1 }
 0x1e3   : > { %v12516_v8 = vpop.permute.xlu0 %6161  ;;  %11306 = vrcp.f32 %v2171_v55  ;;  %v11285_v10 = vpop.eup %11284  ;;  %v2217_v7 = vadd.f32 1.0, %v11283_v34 }
 0x1e4   : > { %17404 = vst [vmem:[#allocation6_spill] sm:$0xff] %v12516_v8  ;;  %v12518_v42 = vpop.permute.xlu1 %3798  ;;  %11308 = vrcp.f32 %v2194_v15  ;;  %v11287_v29 = vpop.eup %11286  ;;  %v2196_v4 = vadd.f32 1.0, %v11285_v10 }
 0x1e5   : > { %4880 = vrot.lane.b32.xlu0 %v12233_v24, %s11469_s29  ;;  %v12532_v24 = vpop.f32.mrf.mxu0  ;;  %11310 = vrcp.f32 %v2172_v31  ;;  %v11289_v40 = vpop.eup %11288  ;;  %v2218_v14 = vadd.f32 1.0, %v11287_v29  ;;  %v2001_v31 = vmul.f32 1.442695, %v1886_v44 }
 0x1e6   : > { %2897 = vrot.lane.b32.xlu1 %v12522_v6, %s11462_s18  ;;  %11312 = vrcp.f32 %v2195_v32  ;;  %v2219_v62 = vadd.f32 1.0, %v11289_v40  ;;  %v1888_v40 = vmul.f32 %v11992_v51, %v12532_v24 }
 0x1e7   : > { %v12530_v28 = vpop.permute.xlu0 %4253  ;;  %v12544_v36 = vpop.f32.mrf.mxu0  ;;  %11314 = vrcp.f32 %v2217_v7  ;;  %v1910_v7 = vmul.f32 %v11992_v51, %v12558_v5 }
 0x1e8   : > { %v12534_v12 = vpop.permute.xlu1 %5706  ;;  %v11291_v47 = vpop.eup %11290  ;;  %11316 = vrcp.f32 %v2196_v4 }
 0x1e9   : > { %17405 = vst [vmem:[#allocation7_spill] sm:$0xff] %v12534_v12  ;;  %3349 = vrot.lane.b32.xlu0 %v12510_v17, %s11463_s19  ;;  %v11293_v41 = vpop.eup %11292  ;;  %11318 = vrcp.f32 %v2218_v14  ;;  %v2241_v33 = vadd.f32 1.0, %v11291_v47  ;;  %v12564_v55 = vpop.f32.mrf.mxu0  ;;  %v2003_v47 = vmul.f32 1.442695, %v1887_v60 }
 0x1ea   : > { %3351 = vrot.lane.b32.xlu1 %v12522_v6, %s11463_s19  ;;  %v11295_v0 = vpop.eup %11294  ;;  %11320 = vrcp.f32 %v2219_v62  ;;  %v2220_v2 = vadd.f32 1.0, %v11293_v41  ;;  %v1911_v62 = vmul.f32 %v11992_v51, %v12544_v36 }
 0x1eb   : > { %v12546_v43 = vpop.permute.xlu0 %3800  ;;  %v11297_v58 = vpop.eup %11296  ;;  %v2361_v1 = vmul.f32 %v11295_v0, %v12410_v25  ;;  %11322 = vrcp.f32 %v2241_v33  ;;  %v2047_v25 = vmul.f32 1.442695, %v1909_v50  ;;  %v1912_v50 = vmul.f32 %v11992_v51, %v12564_v55 }
 0x1ec   : > { %v12550_v38 = vpop.permute.xlu1 %5253  ;;  %v11299_v34 = vpop.eup %11298  ;;  %11324 = vrcp.f32 %v2220_v2  ;;  %v2243_v10 = vadd.f32 1.0, %v11297_v58 }
 0x1ed   : > { %17406 = vst [vmem:[#allocation8_spill] sm:$0xff] %v12550_v38  ;;  %2923 = vrot.lane.b32.xlu0 %v12552_v18, %s11462_s18  ;;  %v11301_v29 = vpop.eup %11300  ;;  %v2362_v4 = vmul.f32 %v11299_v34, %v12419_v48  ;;  %11326 = vpow2.f32 %v1999_v22  ;;  %v12584_v41 = vpop.f32.mrf.mxu0  ;;  %v2049_v34 = vmul.f32 1.442695, %v1910_v7 }
 0x1ee   : > { %4255 = vrot.lane.b32.xlu1 %v12510_v17, %s11465_s24  ;;  %v11303_v14 = vpop.eup %11302  ;;  %11328 = vrcp.f32 %v2243_v10  ;;  %v2242_v44 = vadd.f32 1.0, %v11301_v29  ;;  %v1933_v10 = vmul.f32 %v11992_v51, %v12573_v27  ;;  %v12597_v29 = vpop.f32.mrf.mxu1 }
 0x1ef   : > { %v12566_v15 = vpop.permute.xlu0 %5708  ;;  %v11305_v33 = vpop.eup %11304  ;;  %v10850_v48 = vpack.c.bf16 %v2362_v4, %v2361_v1  ;;  %v2244_v22 = vadd.f32 1.0, %v11303_v14  ;;  %11330 = vpow2.f32 %v2001_v31  ;;  %v12599_v4 = vld [vmem:[#allocation2 + $0x14] sm:$0xff]  ;;  %v2005_v14 = vmul.f32 1.442695, %v1888_v40 }
 0x1f0   : > { %17407 = vst [vmem:[#allocation9_spill] sm:$0xff] %v12566_v15  ;;  %v12569_v32 = vpop.permute.xlu1 %4800  ;;  %v11307_v2 = vpop.eup %11306  ;;  %v2385_v60 = vmul.f32 %v11305_v33, %v12425_v23  ;;  %11332 = vrcp.f32 %v2242_v44  ;;  %v1935_v23 = vmul.f32 %v11992_v51, %v12584_v41  ;;  %v2051_v33 = vmul.f32 1.442695, %v1911_v62 }
 0x1f1   : > { %17408 = vst [vmem:[#allocation10_spill] sm:$0xff] %v12569_v32  ;;  %3377 = vrot.lane.b32.xlu0 %v12552_v18, %s11463_s19  ;;  %v11309_v1 = vpop.eup %11308  ;;  %2746 = vst [vmem:[#allocation2 + $0x3c] sm:$0xff] %v10850_v48  ;;  %v2363_v31 = vmul.f32 %v11307_v2, %v12430_v45  ;;  %11334 = vrcp.f32 %v2244_v22  ;;  %v1934_v56 = vmul.f32 %v11992_v51, %v12597_v29  ;;  %v12611_v32 = vpop.f32.mrf.mxu0  ;;  %v2053_v22 = vmul.f32 1.442695, %v1912_v50 }
 0x1f2   : > { %3802 = vrot.lane.b32.xlu1 %v12510_v17, %s11466_s25  ;;  %v12592_v17 = vld [vmem:[#allocation2 + $0x78] sm:$0xff]  ;;  %v11311_v7 = vpop.eup %11310  ;;  %v2386_v44 = vmul.f32 %v11309_v1, %v12438_v21  ;;  %11336 = vpow2.f32 %v2047_v25  ;;  %v1936_v2 = vmul.f32 %v11992_v51, %v12611_v32  ;;  %v2095_v62 = vmul.f32 1.442695, %v1933_v10  ;;  %v12621_v1 = vpop.f32.mrf.mxu1 }
 0x1f3   : > { %v12586_v0 = vpop.permute.xlu0 %5255  ;;  %v11313_v48 = vpop.eup %11312  ;;  %v2364_v40 = vmul.f32 %v11311_v7, %v12443_v13  ;;  %11338 = vpow2.f32 %v2003_v47  ;;  %v2099_v50 = vmul.f32 1.442695, %v1935_v23 }
 0x1f4   : > { %17409 = vst [vmem:[#allocation11_spill] sm:$0xff] %v12586_v0  ;;  %v12590_v58 = vpop.permute.xlu1 %2917  ;;  %v11315_v38 = vpop.eup %11314  ;;  %v10862_v21 = vpack.c.bf16 %v2386_v44, %v2385_v60  ;;  %v2387_v25 = vmul.f32 %v11313_v48, %v12451_v3  ;;  %11340 = vpow2.f32 %v2049_v34  ;;  %v2097_v60 = vmul.f32 1.442695, %v1934_v56 }
 0x1f5   : > { %4281 = vrot.lane.b32.xlu0 %v12592_v17, %s11465_s24  ;;  %v11317_v12 = vpop.eup %11316  ;;  %v10851_v13 = vpack.c.bf16 %v2364_v40, %v2363_v31  ;;  %v2409_v47 = vmul.f32 %v11315_v38, %v12447_v19  ;;  %11342 = vpow2.f32 %v2005_v14  ;;  %v2101_v31 = vmul.f32 1.442695, %v1936_v2  ;;  %v12634_v14 = vld [vmem:[#allocation2 + $0x7c] sm:$0xff] }
 0x1f6   : > { %5710 = vrot.lane.b32.xlu1 %v12599_v4, %s11467_s27  ;;  %v11319_v7 = vpop.eup %11318  ;;  %2758 = vst [vmem:[#allocation2 + $0xa4] sm:$0xff] %v10862_v21  ;;  %v2388_v3 = vmul.f32 %v11317_v12, %v12462_v35  ;;  %11344 = vpow2.f32 %v2051_v33  ;;  %v12637_v35 = vpop.f32.mrf.mxu1 }
 0x1f7   : > { %v12613_v45 = vpop.permute.xlu0 %4802  ;;  %v11321_v34 = vpop.eup %11320  ;;  %2747 = vst [vmem:[#allocation2 + $0x44] sm:$0xff] %v10851_v13  ;;  %v2410_v44 = vmul.f32 %v11319_v7, %v12458_v30  ;;  %11346 = vpow2.f32 %v2053_v22  ;;  %v1957_v30 = vmul.f32 %v11992_v51, %v12621_v1 }
 0x1f8   : > { %17410 = vst [vmem:[#allocation12_spill] sm:$0xff] %v12613_v45  ;;  %v12618_v0 = vpop.permute.xlu1 %3371  ;;  %v11323_v19 = vpop.eup %11322  ;;  %v10863_v23 = vpack.c.bf16 %v2388_v3, %v2387_v25  ;;  %v2411_v48 = vmul.f32 %v11321_v34, %v12474_v61  ;;  %11348 = vpow2.f32 %v2095_v62 }
 0x1f9   : > { %3828 = vrot.lane.b32.xlu0 %v12592_v17, %s11466_s25  ;;  %v11325_v56 = vpop.eup %11324  ;;  %v10874_v12 = vpack.c.bf16 %v2410_v44, %v2409_v47  ;;  %11350 = vpow2.f32 %v2099_v50  ;;  %v2433_v13 = vmul.f32 %v11323_v19, %v12470_v20  ;;  %v12651_v47 = vpop.f32.mrf.mxu1  ;;  %v2143_v3 = vmul.f32 1.442695, %v1957_v30 }
 0x1fa   : > { %5257 = vrot.lane.b32.xlu1 %v12599_v4, %s11468_s28  ;;  %v11327_v33 = vpop.eup %11326  ;;  %2759 = vst [vmem:[#allocation2 + $0xac] sm:$0xff] %v10863_v23  ;;  %v2412_v40 = vmul.f32 %v11325_v56, %v12485_v39  ;;  %11352 = vpow2.f32 %v2097_v60  ;;  %v12656_v60 = vpop.f32.mrf.mxu0 }
 0x1fb   : > { %v12629_v10 = vpop.permute.xlu0 %2919  ;;  %v11329_v61 = vpop.eup %11328  ;;  %2770 = vst [vmem:[#allocation2 + $0x10c] sm:$0xff] %v10874_v12  ;;  %v2173_v2 = vadd.f32 1.0, %v11327_v33  ;;  %11354 = vpow2.f32 %v2101_v31  ;;  %v1959_v44 = vmul.f32 %v11992_v51, %v12656_v60 }
 0x1fc   : > { %v12632_v38 = vpop.permute.xlu1 %6185  ;;  %v11331_v21 = vpop.eup %11330  ;;  %v10875_v62 = vpack.c.bf16 %v2412_v40, %v2411_v48  ;;  %v2435_v39 = vmul.f32 %v11329_v61, %v12495_v57  ;;  %v12672_v61 = vld [vmem:[#allocation2 + $0x1c] sm:$0xff] }
 0x1fd   : > { %5736 = vrot.lane.b32.xlu0 %v12634_v14, %s11467_s27  ;;  %v11333_v50 = vpop.eup %11332  ;;  %11356 = vrcp.f32 %v2173_v2  ;;  %v2174_v7 = vadd.f32 1.0, %v11331_v21  ;;  %v12668_v30 = vpop.f32.mrf.mxu1  ;;  %v2147_v2 = vmul.f32 1.442695, %v1959_v44 }
 0x1fe   : > { %4804 = vrot.lane.b32.xlu1 %v12599_v4, %s11469_s29  ;;  %v11335_v34 = vpop.eup %11334  ;;  %2771 = vst [vmem:[#allocation2 + $0x114] sm:$0xff] %v10875_v62  ;;  %v2434_v20 = vmul.f32 %v11333_v50, %v12481_v37  ;;  %v12678_v50 = vpop.f32.mrf.mxu0 }
 0x1ff   : > { %v12646_v22 = vpop.permute.xlu0 %3373  ;;  %v11337_v31 = vpop.eup %11336  ;;  %v2436_v57 = vmul.f32 %v11335_v34, %v12502_v53  ;;  %11358 = vrcp.f32 %v2174_v7 }
 0x200   : > { %v12648_v25 = vpop.permute.xlu1 %4277  ;;  %v11339_v23 = vpop.eup %11338  ;;  %v10886_v56 = vpack.c.bf16 %v2434_v20, %v2433_v13  ;;  %v2197_v12 = vadd.f32 1.0, %v11337_v31  ;;  %11360 = vpow2.f32 %v2143_v3  ;;  %v1958_v3 = vmul.f32 %v11992_v51, %v12637_v35 }
 0x201   : > { %5283 = vrot.lane.b32.xlu0 %v12634_v14, %s11468_s28  ;;  %v10887_v37 = vpack.c.bf16 %v2436_v57, %v2435_v39  ;;  %v2175_v33 = vadd.f32 1.0, %v11339_v23  ;;  %v12684_v34 = vpop.f32.mrf.mxu1 }
 0x202   : > { %6163 = vrot.lane.b32.xlu1 %v12599_v4, %s11464_s20  ;;  %v11341_v4 = vpop.eup %11340  ;;  %2782 = vst [vmem:[#allocation2 + $0x174] sm:$0xff] %v10886_v56  ;;  %11362 = vrcp.f32 %v2197_v12  ;;  %v1960_v56 = vmul.f32 %v11992_v51, %v12678_v50 }
 0x203   : > { %v12663_v19 = vpop.permute.xlu0 %6187  ;;  %v11343_v40 = vpop.eup %11342  ;;  %v2198_v53 = vadd.f32 1.0, %v11341_v4  ;;  %2783 = vst [vmem:[#allocation2 + $0x17c] sm:$0xff] %v10887_v37  ;;  %11364 = vrcp.f32 %v2175_v33 }
 0x204   : > { %v12666_v48 = vpop.permute.xlu1 %3824  ;;  %v11345_v21 = vpop.eup %11344  ;;  %v2176_v13 = vadd.f32 1.0, %v11343_v40 }
 0x205   : > { %4830 = vrot.lane.b32.xlu0 %v12634_v14, %s11469_s29  ;;  %v11347_v39 = vpop.eup %11346  ;;  %11366 = vrcp.f32 %v2198_v53  ;;  %v2199_v44 = vadd.f32 1.0, %v11345_v21  ;;  %v1889_v53 = vmul.f32 %v11992_v51, %v12651_v47  ;;  %v12698_v21 = vpop.f32.mrf.mxu1 }
 0x206   : > { %6165 = vrot.lane.b32.xlu1 %v12672_v61, %s11464_s20  ;;  %v11349_v20 = vpop.eup %11348  ;;  %11368 = vrcp.f32 %v2176_v13  ;;  %v2200_v31 = vadd.f32 1.0, %v11347_v39  ;;  %v12700_v13 = vld [vmem:[#allocation2 + $0x84] sm:$0xff] }
 0x207   : > { %v12676_v62 = vpop.permute.xlu0 %4279  ;;  %v11351_v57 = vpop.eup %11350  ;;  %v2221_v23 = vadd.f32 1.0, %v11349_v20  ;;  %11370 = vpow2.f32 %v2147_v2  ;;  %v1890_v20 = vmul.f32 %v11992_v51, %v12668_v30 }
 0x208   : > { %v12680_v7 = vpop.permute.xlu1 %5732  ;;  %v11353_v12 = vpop.eup %11352  ;;  %11372 = vrcp.f32 %v2199_v44  ;;  %v2223_v37 = vadd.f32 1.0, %v11351_v57 }
 0x209   : > { %17411 = vst [vmem:[#allocation13_spill] sm:$0xff] %v12680_v7  ;;  %6189 = vrot.lane.b32.xlu0 %v12634_v14, %s11464_s20  ;;  %v11355_v33 = vpop.eup %11354  ;;  %11374 = vrcp.f32 %v2200_v31  ;;  %v2145_v14 = vmul.f32 1.442695, %v1958_v3  ;;  %v2222_v2 = vadd.f32 1.0, %v11353_v12  ;;  %v2149_v3 = vmul.f32 1.442695, %v1960_v56 }
 0x20a   : > { %4257 = vrot.lane.b32.xlu1 %v12522_v6, %s11465_s24  ;;  %11376 = vrcp.f32 %v2221_v23  ;;  %v2224_v39 = vadd.f32 1.0, %v11355_v33  ;;  %v11357_v44 = vpop.eup %11356  ;;  %v1913_v31 = vmul.f32 %v11992_v51, %v12684_v34  ;;  %v1914_v23 = vmul.f32 %v11992_v51, %v12698_v21 }
 0x20b   : > { %v12692_v4 = vpop.permute.xlu0 %3826  ;;  %11378 = vrcp.f32 %v2223_v37  ;;  %v2365_v45 = vmul.f32 %v11357_v44, %v12512_v26  ;;  %v2009_v56 = vmul.f32 1.442695, %v1890_v20 }
 0x20c   : > { %v12694_v40 = vpop.permute.xlu1 %5279  ;;  %11380 = vrcp.f32 %v2222_v2  ;;  %v11359_v12 = vpop.eup %11358  ;;  %v2055_v26 = vmul.f32 1.442695, %v1913_v31 }
 0x20d   : > { %17412 = vst [vmem:[#allocation14_spill] sm:$0xff] %v12694_v40  ;;  %6191 = vrot.lane.b32.xlu0 %v12700_v13, %s11464_s20  ;;  %11382 = vrcp.f32 %v2224_v39  ;;  %v2007_v40 = vmul.f32 1.442695, %v1889_v53  ;;  %v11361_v37 = vpop.eup %11360  ;;  %v12724_v39 = vpop.f32.mrf.mxu1 }
 0x20e   : > { %3804 = vrot.lane.b32.xlu1 %v12522_v6, %s11466_s25  ;;  %v2366_v6 = vmul.f32 %v11359_v12, %v12524_v59  ;;  %11384 = vpow2.f32 %v2145_v14 }
 0x20f   : > { %v12710_v57 = vpop.permute.xlu0 %5734  ;;  %11386 = vpow2.f32 %v2149_v3  ;;  %v11363_v2 = vpop.eup %11362 }
 0x210   : > { %17413 = vst [vmem:[#allocation15_spill] sm:$0xff] %v12710_v57  ;;  %v12715_v33 = vpop.permute.xlu1 %4826  ;;  %v10852_v7 = vpack.c.bf16 %v2366_v6, %v2365_v45  ;;  %v11365_v53 = vpop.eup %11364  ;;  %v2389_v59 = vmul.f32 %v11363_v2, %v12540_v11  ;;  %11388 = vpow2.f32 %v2007_v40 }
 0x211   : > { %17414 = vst [vmem:[#allocation16_spill] sm:$0xff] %v12715_v33  ;;  %4283 = vrot.lane.b32.xlu0 %v12552_v18, %s11465_s24  ;;  %v2057_v33 = vmul.f32 1.442695, %v1914_v23  ;;  %v2367_v20 = vmul.f32 %v11365_v53, %v12526_v16  ;;  %11390 = vpow2.f32 %v2009_v56  ;;  %v12738_v40 = vpop.f32.mrf.mxu1  ;;  %v2245_v56 = vadd.f32 1.0, %v11361_v37 }
 0x212   : > { %5712 = vrot.lane.b32.xlu1 %v12672_v61, %s11467_s27  ;;  %v11367_v14 = vpop.eup %11366  ;;  %2748 = vst [vmem:[#allocation2 + $0x4c] sm:$0xff] %v10852_v7  ;;  %11392 = vpow2.f32 %v2055_v26 }
 0x213   : > { %v12722_v44 = vpop.permute.xlu0 %5281  ;;  %v11369_v3 = vpop.eup %11368  ;;  %v2390_v45 = vmul.f32 %v11367_v14, %v12558_v5  ;;  %11394 = vpow2.f32 %v2057_v33  ;;  %v1937_v14 = vmul.f32 %v11992_v51, %v12724_v39 }
 0x214   : > { %17415 = vst [vmem:[#allocation17_spill] sm:$0xff] %v12722_v44  ;;  %v12726_v15 = vpop.permute.xlu1 %2945  ;;  %v11371_v31 = vpop.eup %11370  ;;  %v2368_v11 = vmul.f32 %v11369_v3, %v12532_v24  ;;  %11396 = vrcp.f32 %v2245_v56 }
 0x215   : > { %3830 = vrot.lane.b32.xlu0 %v12552_v18, %s11466_s25  ;;  %v11373_v18 = vpop.eup %11372  ;;  %v10864_v16 = vpack.c.bf16 %v2390_v45, %v2389_v59  ;;  %v2247_v33 = vadd.f32 1.0, %v11371_v31  ;;  %v12755_v37 = vpop.f32.mrf.mxu1  ;;  %v2103_v31 = vmul.f32 1.442695, %v1937_v14 }
 0x216   : > { %5259 = vrot.lane.b32.xlu1 %v12672_v61, %s11468_s28  ;;  %v11375_v12 = vpop.eup %11374  ;;  %v10853_v6 = vpack.c.bf16 %v2368_v11, %v2367_v20  ;;  %v2391_v5 = vmul.f32 %v11373_v18, %v12544_v36  ;;  %v1938_v36 = vmul.f32 %v11992_v51, %v12738_v40 }
 0x217   : > { %v12735_v23 = vpop.permute.xlu0 %4828  ;;  %v11377_v26 = vpop.eup %11376  ;;  %2760 = vst [vmem:[#allocation2 + $0xb4] sm:$0xff] %v10864_v16  ;;  %v2392_v24 = vmul.f32 %v11375_v12, %v12564_v55  ;;  %11398 = vrcp.f32 %v2247_v33 }
 0x218   : > { %17416 = vst [vmem:[#allocation18_spill] sm:$0xff] %v12735_v23  ;;  %v12740_v7 = vpop.permute.xlu1 %6211  ;;  %v11379_v2 = vpop.eup %11378  ;;  %2749 = vst [vmem:[#allocation2 + $0x54] sm:$0xff] %v10853_v6  ;;  %v2413_v59 = vmul.f32 %v11377_v26, %v12573_v27  ;;  %v2105_v16 = vmul.f32 1.442695, %v1938_v36  ;;  %11400 = vpow2.f32 %v2103_v31  ;;  %v12774_v26 = vld [vmem:[#allocation2 + $0xe0] sm:$0xff]  ;;  %v12786_v31 = vld [vmem:[#allocation2 + $0x150] sm:$0xff] }
 0x219   : > { %5738 = vrot.lane.b32.xlu0 %v12700_v13, %s11467_s27  ;;  %v11381_v20 = vpop.eup %11380  ;;  %v10865_v3 = vpack.c.bf16 %v2392_v24, %v2391_v5  ;;  %v2415_v55 = vmul.f32 %v11379_v2, %v12584_v41  ;;  %v1961_v41 = vmul.f32 %v11992_v51, %v12755_v37 }
 0x21a   : > { %4806 = vrot.lane.b32.xlu1 %v12672_v61, %s11469_s29  ;;  %v11383_v45 = vpop.eup %11382  ;;  %v2414_v27 = vmul.f32 %v11381_v20, %v12597_v29  ;;  %v12770_v29 = vpop.f32.mrf.mxu1  ;;  %11402 = vpow2.f32 %v2105_v16 }
 0x21b   : > { %v12748_v53 = vpop.permute.xlu0 %2943  ;;  %v11385_v11 = vpop.eup %11384  ;;  %2761 = vst [vmem:[#allocation2 + $0xbc] sm:$0xff] %v10865_v3  ;;  %v2416_v18 = vmul.f32 %v11383_v45, %v12611_v32  ;;  %v2151_v33 = vmul.f32 1.442695, %v1961_v41  ;;  %v1962_v36 = vmul.f32 %v11992_v51, %v12770_v29 }
 0x21c   : > { %v12757_v61 = vpop.permute.xlu1 %4303  ;;  %v11387_v12 = vpop.eup %11386  ;;  %v2246_v5 = vadd.f32 1.0, %v11385_v11 }
 0x21d   : > { %5285 = vrot.lane.b32.xlu0 %v12700_v13, %s11468_s28  ;;  %v10876_v13 = vpack.c.bf16 %v2414_v27, %v2413_v59  ;;  %v10877_v24 = vpack.c.bf16 %v2416_v18, %v2415_v55  ;;  %v2248_v2 = vadd.f32 1.0, %v11387_v12  ;;  %v11389_v32 = vpop.eup %11388  ;;  %v2153_v18 = vmul.f32 1.442695, %v1962_v36  ;;  %v12798_v12 = vld [vmem:[#allocation2 + $0x148] sm:$0xff] }
 0x21e   : > { %2921 = vrot.lane.b32.xlu1 %v12592_v17, %s11462_s18  ;;  %11404 = vrcp.f32 %v2246_v5  ;;  %v11391_v14 = vpop.eup %11390  ;;  %v2177_v59 = vadd.f32 1.0, %v11389_v32 }
 0x21f   : > { %v12768_v6 = vpop.permute.xlu0 %6213  ;;  %2772 = vst [vmem:[#allocation2 + $0x11c] sm:$0xff] %v10876_v13  ;;  %2773 = vst [vmem:[#allocation2 + $0x124] sm:$0xff] %v10877_v24  ;;  %11406 = vrcp.f32 %v2248_v2  ;;  %v11393_v20 = vpop.eup %11392  ;;  %v2178_v55 = vadd.f32 1.0, %v11391_v14 }
 0x220   : > { %v12772_v56 = vpop.permute.xlu1 %3850  ;;  %11408 = vpow2.f32 %v2151_v33  ;;  %v11395_v45 = vpop.eup %11394  ;;  %v2201_v11 = vadd.f32 1.0, %v11393_v20 }
 0x221   : > { %2947 = vrot.lane.b32.xlu0 %v12774_v26, %s11462_s18  ;;  %11410 = vrcp.f32 %v2177_v59  ;;  %v2202_v51 = vadd.f32 1.0, %v11395_v45  ;;  %v11397_v13 = vpop.eup %11396 }
 0x222   : > { %3375 = vrot.lane.b32.xlu1 %v12592_v17, %s11463_s19  ;;  %v12788_v17 = vld [vmem:[#allocation2 + $0xe8] sm:$0xff]  ;;  %11412 = vrcp.f32 %v2178_v55  ;;  %v2437_v14 = vmul.f32 %v11397_v13, %v12621_v1 }
 0x223   : > { %v12782_v3 = vpop.permute.xlu0 %4305  ;;  %11414 = vrcp.f32 %v2201_v11 }
 0x224   : > { %v12784_v27 = vpop.permute.xlu1 %3397  ;;  %11416 = vrcp.f32 %v2202_v51  ;;  %v11399_v5 = vpop.eup %11398 }
 0x225   : > { %2975 = vrot.lane.b32.xlu0 %v12786_v31, %s11462_s18  ;;  %11418 = vpow2.f32 %v2153_v18  ;;  %v11401_v2 = vpop.eup %11400  ;;  %v2439_v20 = vmul.f32 %v11399_v5, %v12656_v60 }
 0x226   : > { %2949 = vrot.lane.b32.xlu1 %v12788_v17, %s11462_s18  ;;  %v2225_v59 = vadd.f32 1.0, %v11401_v2 }
 0x227   : > { %v12794_v16 = vpop.permute.xlu0 %3852  ;;  %v11403_v33 = vpop.eup %11402 }
 0x228   : > { %v12796_v41 = vpop.permute.xlu1 %5758  ;;  %v2226_v55 = vadd.f32 1.0, %v11403_v33  ;;  %11420 = vrcp.f32 %v2225_v59 }
 0x229   : > { %4333 = vrot.lane.b32.xlu0 %v12798_v12, %s11465_s24 }
 0x22a   : > { %4307 = vrot.lane.b32.xlu1 %v12774_v26, %s11465_s24  ;;  %11422 = vrcp.f32 %v2226_v55 }
 0x22b   : > { %v12804_v24 = vpop.permute.xlu0 %3399  ;;  %v11405_v36 = vpop.eup %11404 }
 0x22c   : > { %v12806_v32 = vpop.permute.xlu1 %5305  ;;  %v11407_v45 = vpop.eup %11406  ;;  %v2438_v18 = vmul.f32 %v11405_v36, %v12637_v35 }
 0x22d   : > { %17417 = vst [vmem:[#allocation19_spill] sm:$0xff] %v12806_v32  ;;  %3880 = vrot.lane.b32.xlu0 %v12798_v12, %s11466_s25  ;;  %v11409_v51 = vpop.eup %11408  ;;  %v2440_v32 = vmul.f32 %v11407_v45, %v12678_v50  ;;  %v5643_v45 = vld [vmem:[#allocation2 + $0x14c] sm:$0xff] }
 0x22e   : > { %3854 = vrot.lane.b32.xlu1 %v12774_v26, %s11466_s25  ;;  %v11411_v1 = vpop.eup %11410  ;;  %v10888_v13 = vpack.c.bf16 %v2438_v18, %v2437_v14  ;;  %v2249_v2 = vadd.f32 1.0, %v11409_v51  ;;  %v5630_v51 = vld [vmem:[#allocation2 + $0xe4] sm:$0xff] }
 0x22f   : > { %v12814_v11 = vpop.permute.xlu0 %5760  ;;  %v11413_v60 = vpop.eup %11412  ;;  %v10889_v5 = vpack.c.bf16 %v2440_v32, %v2439_v20  ;;  %v2369_v35 = vmul.f32 %v11411_v1, %v12651_v47 }
 0x230   : > { %v12817_v23 = vpop.permute.xlu1 %4852  ;;  %v11415_v33 = vpop.eup %11414  ;;  %2784 = vst [vmem:[#allocation2 + $0x184] sm:$0xff] %v10888_v13  ;;  %v2370_v50 = vmul.f32 %v11413_v60, %v12668_v30  ;;  %11424 = vrcp.f32 %v2249_v2 }
 0x231   : > { %17418 = vst [vmem:[#allocation20_spill] sm:$0xff] %v12817_v23  ;;  %3427 = vrot.lane.b32.xlu0 %v12798_v12, %s11463_s19  ;;  %v11417_v36 = vpop.eup %11416  ;;  %2785 = vst [vmem:[#allocation2 + $0x18c] sm:$0xff] %v10889_v5  ;;  %v2393_v14 = vmul.f32 %v11415_v33, %v12684_v34  ;;  %v12841_v34 = vld [vmem:[%s17029_s2] sm:$0xff] }
 0x232   : > { %3401 = vrot.lane.b32.xlu1 %v12774_v26, %s11463_s19  ;;  %v11419_v18 = vpop.eup %11418  ;;  %v10854_v26 = vpack.c.bf16 %v2370_v50, %v2369_v35  ;;  %v2394_v47 = vmul.f32 %v11417_v36, %v12698_v21  ;;  %17421 = vst [vmem:[#allocation23_spill] sm:$0xff] %v12841_v34  ;;  %v17053_v21 = vrot.slane %v12516_v8, 4  ;;  %v12849_v60 = vcombine.high %v12841_v34, %v12841_v34 }
 0x233   : > { %v12825_v59 = vpop.permute.xlu0 %5307  ;;  %v2250_v32 = vadd.f32 1.0, %v11419_v18  ;;  %v6263_v36 = vrot.slane %v12487_v63, 4 }
 0x234   : > { %17419 = vst [vmem:[#allocation21_spill] sm:$0xff] %v12825_v59  ;;  %v12828_v55 = vpop.permute.xlu1 %2969  ;;  %2750 = vst [vmem:[#allocation2 + $0x5c] sm:$0xff] %v10854_v26  ;;  %v10866_v30 = vpack.c.bf16 %v2394_v47, %v2393_v14  ;;  %v6276_v14 = vrot.slane %v12632_v38, 4  ;;  %9154 = vmatprep.mubr.bf16.mxu0 %v12849_v60  ;;  %v6289_v47 = vrot.slane %v12740_v7, 4  ;;  %v4355_v59 = vrot.slane %v12504_v54, 4 }
 0x235   : > { %5788 = vrot.lane.b32.xlu0 %v5643_v45, %s11467_s27  ;;  %11426 = vrcp.f32 %v2250_v32  ;;  %v11421_v5 = vpop.eup %11420 }
 0x236   : > { %5762 = vrot.lane.b32.xlu1 %v5630_v51, %s11467_s27  ;;  %2762 = vst [vmem:[#allocation2 + $0xc4] sm:$0xff] %v10866_v30  ;;  %v2417_v18 = vmul.f32 %v11421_v5, %v12724_v39  ;;  %v4368_v30 = vrot.slane %v12648_v25, 4  ;;  %v6315_v39 = vsel %vm3047_vm1, %v6263_v36, %v17053_v21  ;;  %v17422_v5 = vrot.slane %v12663_v19, 4 }
 0x237   : > { %v12834_v20 = vpop.permute.xlu0 %4854  ;;  %v11423_v50 = vpop.eup %11422  ;;  %v4381_v36 = vrot.slane %v12757_v61, 4  ;;  %v17425_v21 = vrot.slane %v12782_v3, 4 }
 0x238   : > { %17420 = vst [vmem:[#allocation22_spill] sm:$0xff] %v12834_v20  ;;  %v6238_v1 = vpop.permute.xlu1 %6237  ;;  %v2418_v32 = vmul.f32 %v11423_v50, %v12738_v40  ;;  %v6340_v26 = vsel %vm3047_vm1, %v6276_v14, %v17422_v5  ;;  %v17423_v40 = vrot.slane %v12768_v6, 4 }
 0x239   : > { %5335 = vrot.lane.b32.xlu0 %v5643_v45, %s11468_s28  ;;  %v6302_v34 = vrot.slane %v6238_v1, 4 }
 0x23a   : > { %5309 = vrot.lane.b32.xlu1 %v5630_v51, %s11468_s28  ;;  %v6364_v50 = vsel %vm3047_vm1, %v6289_v47, %v17423_v40  ;;  %v10878_v35 = vpack.c.bf16 %v2418_v32, %v2417_v18  ;;  %v6317_v47 = vsel %vm6316_vm2, %v12487_v63, %v6315_v39  ;;  %v6341_v18 = vsel %vm6316_vm2, %v12632_v38, %v6340_v26 }
 0x23b   : > { %v12845_v2 = vpop.permute.xlu0 %2971  ;;  %v17424_v32 = vrot.slane %v12676_v62, 4  ;;  %v4456_v63 = vsel %vm3047_vm1, %v4381_v36, %v17425_v21  ;;  %v10781_v8 = vcombine.high %v6317_v47, %v6341_v18  ;;  %v17068_v36 = vrot.slane %v12794_v16, 4 }
 0x23c   : > { %v12852_v33 = vpop.permute.xlu1 %4329  ;;  %2774 = vst [vmem:[#allocation2 + $0x12c] sm:$0xff] %v10878_v35 }
 0x23d   : > { %4882 = vrot.lane.b32.xlu0 %v5643_v45, %s11469_s29  ;;  %v11425_v44 = vpop.eup %11424  ;;  %v4432_v5 = vsel %vm3047_vm1, %v4368_v30, %v17424_v32 }
 0x23e   : > { %4856 = vrot.lane.b32.xlu1 %v5630_v51, %s11469_s29  ;;  %v2441_v35 = vmul.f32 %v11425_v44, %v12755_v37  ;;  %v4433_v21 = vsel %vm4408_vm3, %v12648_v25, %v4432_v5  ;;  %v3928_v37 = vrot.slane %v12772_v56, 4  ;;  %v4457_v25 = vsel %vm4408_vm3, %v12757_v61, %v4456_v63 }
 0x23f   : > { %v12865_v13 = vpop.permute.xlu0 %6239 }
 0x240   : > { %v17054_v23 = vrot.slane %v12865_v13, 4  ;;  %v12874_v20 = vpop.permute.xlu1 %3876  ;;  %v4003_v63 = vsel %vm3047_vm1, %v3928_v37, %v17068_v36 }
 0x241   : > { %6241 = vrot.lane.b32.xlu0 %v5643_v45, %s11464_s20  ;;  %v4394_v45 = vrot.slane %v12852_v33, 4 }
 0x242   : > { %6215 = vrot.lane.b32.xlu1 %v5630_v51, %s11464_s20  ;;  %v6388_v14 = vsel %vm3047_vm1, %v6302_v34, %v17054_v23  ;;  %v6365_v51 = vsel %vm6316_vm2, %v12740_v7, %v6364_v50  ;;  %v11427_v32 = vpop.eup %11426  ;;  %v11430_v23 = vld [vmem:[#allocation2 + $0x154] sm:$0xff]  ;;  %v17426_v7 = vrot.slane %v12530_v28, 4  ;;  %v17067_v50 = vrot.slane %v12692_v4, 4 }
 0x243   : > { %v12895_v40 = vpop.permute.xlu0 %4331  ;;  %v6389_v34 = vsel %vm6316_vm2, %v6238_v1, %v6388_v14  ;;  %v11431_v14 = vld [vmem:[#allocation2 + $0xec] sm:$0xff] }
 0x244   : > { %v17071_v38 = vrot.slane %v12895_v40, 4  ;;  %v12904_v26 = vpop.permute.xlu1 %3423  ;;  %v10804_v39 = vcombine.low %v6365_v51, %v6389_v34  ;;  %v10805_v30 = vcombine.high %v6365_v51, %v6389_v34  ;;  %v4407_v1 = vsel %vm3047_vm1, %v4355_v59, %v17426_v7 }
 0x245   : > { %6243 = vrot.lane.b32.xlu0 %v11430_v23, %s11464_s20  ;;  %v2442_v23 = vmul.f32 %v11427_v32, %v12770_v29  ;;  %v3941_v59 = vrot.slane %v12874_v20, 4  ;;  %v17066_v7 = vrot.slane %v12546_v43, 4  ;;  %v4409_v61 = vsel %vm4408_vm3, %v12504_v54, %v4407_v1  ;;  %v12948_v54 = vld [vmem:[%s17029_s2 + $0x8] ss:$0 sps:$4 sm:$0xff]  }
 0x246   : > { %6217 = vrot.lane.b32.xlu1 %v11431_v14, %s11464_s20  ;;  %9175 = vmatprep.subr.bf16.mxu1 %v10805_v30  ;;  %v4480_v44 = vsel %vm3047_vm1, %v4394_v45, %v17071_v38  ;;  %v10780_v14 = vcombine.low %v6317_v47, %v6341_v18  ;;  %v10540_v37 = vcombine.low %v4409_v61, %v4433_v21 }
 0x247   : > { %v12922_v51 = vpop.permute.xlu0 %3878  ;;  %9176 = vmatpush1.bf16.msra.mxu1 %v10804_v39  ;;  %v4481_v5 = vsel %vm4408_vm3, %v12852_v33, %v4480_v44  ;;  %v10890_v32 = vpack.c.bf16 %v2442_v23, %v2441_v35  ;;  %v3915_v33 = vrot.slane %v12666_v48, 4  ;;  %v3902_v35 = vrot.slane %v12518_v42, 4 }
 0x248   : > { %v17069_v34 = vrot.slane %v12922_v51, 4  ;;  %v12929_v30 = vpop.permute.xlu1 %5784  ;;  %9177 = vmatprep.subr.bf16.mxu1 %v10781_v8  ;;  %v10564_v45 = vcombine.low %v4457_v25, %v4481_v5  ;;  %v10565_v29 = vcombine.high %v4457_v25, %v4481_v5  ;;  %v10541_v8 = vcombine.high %v4409_v61, %v4433_v21 }
 0x249   : > { %4335 = vrot.lane.b32.xlu0 %v12786_v31, %s11465_s24  ;;  %2786 = vst [vmem:[#allocation2 + $0x194] sm:$0xff] %v10890_v32  ;;  %v3979_v23 = vsel %vm3047_vm1, %v3915_v33, %v17067_v50  ;;  %v3488_v25 = vrot.slane %v12904_v26, 4  ;;  %v3475_v32 = vrot.slane %v12784_v27, 4  ;;  %v2805_v50 = vld [vmem:[#allocation2 + $0x90] sm:$0xff] }
 0x24a   : > { %4309 = vrot.lane.b32.xlu1 %v12788_v17, %s11465_s24  ;;  %9122 = vmatprep.subr.bf16.mxu0 %v10565_v29  ;;  %v4027_v47 = vsel %vm3047_vm1, %v3941_v59, %v17069_v34  ;;  %v4004_v59 = vsel %vm3955_vm4, %v12772_v56, %v4003_v63  ;;  %v3980_v56 = vsel %vm3955_vm4, %v12666_v48, %v3979_v23  ;;  %v17058_v29 = vrot.slane %v12646_v22, 4 }
 0x24b   : > { %v12950_v18 = vpop.permute.xlu0 %3425  ;;  %9123 = vmatpush1.bf16.msra.mxu0 %v10564_v45  ;;  %9178 = vmatpush1.bf16.msra.mxu1 %v10780_v14  ;;  %v4028_v39 = vsel %vm3955_vm4, %v12874_v20, %v4027_v47  ;;  %v17063_v20 = vrot.slane %v12804_v24, 4  ;;  %v3954_v45 = vsel %vm3047_vm1, %v3902_v35, %v17066_v7  ;;  %v3462_v63 = vrot.slane %v12618_v0, 4 }
 0x24c   : > { %v17062_v1 = vrot.slane %v12950_v18, 4  ;;  %v12956_v44 = vpop.permute.xlu1 %5331  ;;  %9124 = vmatprep.subr.bf16.mxu0 %v10541_v8  ;;  %v10517_v5 = vcombine.high %v4004_v59, %v4028_v39  ;;  %v10516_v33 = vcombine.low %v4004_v59, %v4028_v39  ;;  %v3956_v48 = vsel %vm3955_vm4, %v12518_v42, %v3954_v45  ;;  %v5644_v59 = vld [vmem:[#allocation2 + $0x154] sm:$0xff] }
 0x24d   : > { %3882 = vrot.lane.b32.xlu0 %v12786_v31, %s11466_s25  ;;  %v3449_v8 = vrot.slane %v12500_v46, 4  ;;  %v10493_v47 = vcombine.high %v3956_v48, %v3980_v56  ;;  %v3550_v35 = vsel %vm3047_vm1, %v3475_v32, %v17063_v20  ;;  %v17055_v42 = vrot.slane %v12466_v52, 4  ;;  %v2792_v20 = vld [vmem:[#allocation2 + $0x28] sm:$0xff] }
 0x24e   : > { %3856 = vrot.lane.b32.xlu1 %v12788_v17, %s11466_s25  ;;  %10828 = vmatmul.mubr.msk.bf16.vlgmr.msra.gmra.mxu1 %vm9118_vm5, %v12948_v54  ;;  %v3574_v61 = vsel %vm3047_vm1, %v3488_v25, %v17062_v1  ;;  %v17056_v39 = vrot.slane %v12845_v2, 4  ;;  %v10492_v25 = vcombine.low %v3956_v48, %v3980_v56  ;;  %v3551_v45 = vsel %vm3502_vm6, %v12784_v27, %v3550_v35 }
 0x24f   : > { %v12974_v21 = vpop.permute.xlu0 %5786  ;;  %9125 = vmatpush1.bf16.msra.mxu0 %v10540_v37  ;;  %9236 = vmatprep.mubr.bf16.mxu1 %v12849_v60  ;;  %v3021_v32 = vrot.slane %v12748_v53, 4  ;;  %v17059_v48 = vrot.slane %v12629_v10, 4  ;;  %v17057_v27 = vrot.slane %v12726_v15, 4 }
 0x250   : > { %v12981_v14 = vpop.permute.xlu1 %4878  ;;  %9126 = vmatprep.subr.bf16.mxu0 %v10517_v5  ;;  %v5631_v5 = vld [vmem:[#allocation2 + $0xec] sm:$0xff] }
 0x251   : > { %3429 = vrot.lane.b32.xlu0 %v12786_v31, %s11463_s19  ;;  %v3575_v31 = vsel %vm3502_vm6, %v12904_v26, %v3574_v61  ;;  %v3501_v26 = vsel %vm3047_vm1, %v3449_v8, %v17055_v42  ;;  %v3034_v61 = vrot.slane %v12828_v55, 4 }
 0x252   : > { %3403 = vrot.lane.b32.xlu1 %v12788_v17, %s11463_s19  ;;  %v3526_v17 = vsel %vm3047_vm1, %v3462_v63, %v17058_v29  ;;  %v3503_v35 = vsel %vm3502_vm6, %v12500_v46, %v3501_v26  ;;  %v10468_v42 = vcombine.low %v3551_v45, %v3575_v31 }
 0x253   : > { %v12997_v23 = vpop.permute.xlu0 %5333  ;;  %9127 = vmatpush1.bf16.msra.mxu0 %v10516_v33  ;;  %v10469_v33 = vcombine.high %v3551_v45, %v3575_v31  ;;  %v3527_v56 = vsel %vm3502_vm6, %v12618_v0, %v3526_v17  ;;  %v3121_v8 = vsel %vm3047_vm1, %v3034_v61, %v17056_v39  ;;  %v17061_v0 = vrot.slane %v12483_v49, 4 }
 0x254   : > { %17427 = vst [vmem:[#allocation24_spill] sm:$0xff] %v12997_v23  ;;  %v13003_v37 = vpop.permute.xlu1 %2895  ;;  %9128 = vmatprep.subr.bf16.mxu0 %v10493_v47  ;;  %v3008_v17 = vrot.slane %v12590_v58, 4  ;;  %v3122_v46 = vsel %vm3049_vm7, %v12828_v55, %v3121_v8  ;;  %v2995_v31 = vrot.slane %v12460_v9, 4  ;;  %v17060_v45 = vrot.slane %v12974_v21, 4 }
 0x255   : > { %5790 = vrot.lane.b32.xlu0 %v5644_v59, %s11467_s27  ;;  %v5849_v55 = vrot.slane %v12929_v30, 4 }
 0x256   : > { %5764 = vrot.lane.b32.xlu1 %v5631_v5, %s11467_s27 }
 0x257   : > { %v13017_v47 = vpop.permute.xlu0 %4880  ;;  %9129 = vmatpush1.bf16.msra.mxu0 %v10492_v25  ;;  %v3097_v25 = vsel %vm3047_vm1, %v3021_v32, %v17057_v27  ;;  %v3073_v32 = vsel %vm3047_vm1, %v3008_v17, %v17059_v48  ;;  %v17064_v27 = vrot.slane %v12814_v11, 4  ;;  %v13065_v17 = vld [vmem:[#allocation2 + $0x20] sm:$0xff] }
 0x258   : > { %17428 = vst [vmem:[#allocation25_spill] sm:$0xff] %v13017_v47  ;;  %v13023_v63 = vpop.permute.xlu1 %2897  ;;  %9130 = vmatprep.subr.bf16.mxu0 %v10469_v33  ;;  %v10445_v33 = vcombine.high %v3503_v35, %v3527_v56  ;;  %v3098_v39 = vsel %vm3049_vm7, %v12748_v53, %v3097_v25  ;;  %v3074_v53 = vsel %vm3049_vm7, %v12590_v58, %v3073_v32 }
 0x259   : > { %17429 = vst [vmem:[#allocation26_spill] sm:$0xff] %v13023_v63  ;;  %5337 = vrot.lane.b32.xlu0 %v5644_v59, %s11468_s28  ;;  %v10421_v8 = vcombine.high %v3098_v39, %v3122_v46  ;;  %v10420_v25 = vcombine.low %v3098_v39, %v3122_v46 }
 0x25a   : > { %5311 = vrot.lane.b32.xlu1 %v5631_v5, %s11468_s28 }
 0x25b   : > { %9131 = vmatpush1.bf16.msra.mxu0 %v10468_v42  ;;  %v13037_v61 = vpop.permute.xlu0 %3349  ;;  %v10444_v42 = vcombine.low %v3503_v35, %v3527_v56  ;;  %v17065_v56 = vrot.slane %v12710_v57, 4 }
 0x25c   : > { %v13043_v26 = vpop.permute.xlu1 %3351  ;;  %9132 = vmatprep.subr.bf16.mxu0 %v10445_v33  ;;  %v3048_v33 = vsel %vm3047_vm1, %v2995_v31, %v17061_v0  ;;  %v17432_v31 = vld [vmem:[#allocation9_spill] sm:$0xff] }
 0x25d   : > { %17430 = vst [vmem:[#allocation27_spill] sm:$0xff] %v13043_v26  ;;  %4884 = vrot.lane.b32.xlu0 %v5644_v59, %s11469_s29  ;;  %v5836_v59 = vrot.slane %v12796_v41, 4  ;;  %v3050_v58 = vsel %vm3049_vm7, %v12460_v9, %v3048_v33  ;;  %v17070_v32 = vrot.slane %v17432_v31, 4  ;;  %v17434_v9 = vld [vmem:[#allocation7_spill] sm:$0xff] }
 0x25e   : > { %4858 = vrot.lane.b32.xlu1 %v5631_v5, %s11469_s29  ;;  %v5935_v5 = vsel %vm3047_vm1, %v5849_v55, %v17060_v45  ;;  %v5810_v33 = vrot.slane %v17434_v9, 4  ;;  %v17072_v45 = vrot.slane %v12997_v23, 4  ;;  %v10396_v1 = vcombine.low %v3050_v58, %v3074_v53 }
 0x25f   : > { %9133 = vmatpush1.bf16.msra.mxu0 %v10444_v42  ;;  %v13057_v29 = vpop.permute.xlu0 %2923  ;;  %v17433_v42 = vld [vmem:[#allocation13_spill] sm:$0xff]  ;;  %v5911_v55 = vsel %vm3047_vm1, %v5836_v59, %v17064_v27  ;;  %v5936_v46 = vsel %vm5863_vm8, %v12929_v30, %v5935_v5 }
 0x260   : > { %17431 = vst [vmem:[#allocation28_spill] sm:$0xff] %v13057_v29  ;;  %v13063_v35 = vpop.permute.xlu1 %4255  ;;  %9134 = vmatprep.subr.bf16.mxu0 %v10421_v8  ;;  %v5823_v48 = vrot.slane %v17433_v42, 4  ;;  %v10397_v8 = vcombine.high %v3050_v58, %v3074_v53  ;;  %v5912_v59 = vsel %vm5863_vm8, %v12796_v41, %v5911_v55  ;;  %v17435_v30 = vld [vmem:[#allocation21_spill] sm:$0xff]  ;;  %v17437_v41 = vld [vmem:[#allocation19_spill] sm:$0xff] }
 0x261   : > { %2899 = vrot.lane.b32.xlu0 %v13065_v17, %s11462_s18  ;;  %v17073_v5 = vrot.slane %v17435_v30, 4  ;;  %v10757_v27 = vcombine.high %v5912_v59, %v5936_v46  ;;  %v17436_v58 = vld [vmem:[#allocation17_spill] sm:$0xff]  ;;  %v5383_v55 = vrot.slane %v17437_v41, 4  ;;  %v10756_v34 = vcombine.low %v5912_v59, %v5936_v46  ;;  %v17440_v59 = vld [vmem:[#allocation8_spill] sm:$0xff] }
 0x262   : > { %2973 = vrot.lane.b32.xlu1 %v12798_v12, %s11462_s18  ;;  %v5887_v12 = vsel %vm3047_vm1, %v5823_v48, %v17065_v56  ;;  %v17074_v56 = vrot.slane %v17436_v58, 4  ;;  %v17447_v58 = vrot.slane %v13017_v47, 4  ;;  %v13174_v47 = vld [vmem:[#allocation2 + $0x24] sm:$0xff] }
 0x263   : > { %9135 = vmatpush1.bf16.msra.mxu0 %v10420_v25  ;;  %v13081_v39 = vpop.permute.xlu0 %3377  ;;  %v5396_v25 = vrot.slane %v12956_v44, 4  ;;  %v5888_v53 = vsel %vm5863_vm8, %v17433_v42, %v5887_v12  ;;  %v17438_v42 = vld [vmem:[#allocation11_spill] sm:$0xff]  ;;  %v17439_v12 = vld [vmem:[#allocation14_spill] sm:$0xff] }
 0x264   : > { %v13087_v0 = vpop.permute.xlu1 %3802  ;;  %9136 = vmatprep.subr.bf16.mxu0 %v10397_v8  ;;  %v5862_v8 = vsel %vm3047_vm1, %v5810_v33, %v17070_v32  ;;  %v5370_v32 = vrot.slane %v17439_v12, 4  ;;  %17454 = vst [vmem:[#allocation14_spill] sm:$0xff] %v13174_v47 }
 0x265   : > { %3353 = vrot.lane.b32.xlu0 %v13065_v17, %s11463_s19  ;;  %v5482_v36 = vsel %vm3047_vm1, %v5396_v25, %v17072_v45 }
 0x266   : > { %2901 = vrot.lane.b32.xlu1 %v2792_v20, %s11462_s18  ;;  %v5483_v46 = vsel %vm5410_vm9, %v12956_v44, %v5482_v36  ;;  %v4943_v36 = vrot.slane %v12981_v14, 4 }
 0x267   : > { %9137 = vmatpush1.bf16.msra.mxu0 %v10396_v1  ;;  %v13102_v48 = vpop.permute.xlu0 %4281  ;;  %v5864_v1 = vsel %vm5863_vm8, %v17434_v9, %v5862_v8  ;;  %v5357_v9 = vrot.slane %v17440_v59, 4 }
 0x268   : > { %v13108_v7 = vpop.permute.xlu1 %5710  ;;  %9138 = vmatprep.subr.bf16.mxu0 %v10757_v27  ;;  %v10733_v38 = vcombine.high %v5864_v1, %v5888_v53  ;;  %v5458_v27 = vsel %vm3047_vm1, %v5383_v55, %v17073_v5  ;;  %v10732_v33 = vcombine.low %v5864_v1, %v5888_v53  ;;  %v17442_v55 = vld [vmem:[#allocation22_spill] sm:$0xff]  ;;  %v17445_v1 = vld [vmem:[#allocation20_spill] sm:$0xff]  ;;  %v4164_v5 = vld [vmem:[#allocation2 + $0x88] sm:$0xff]  ;;  %v5029_v23 = vsel %vm3047_vm1, %v4943_v36, %v17447_v58 }
 0x269   : > { %2927 = vrot.lane.b32.xlu0 %v2805_v50, %s11462_s18  ;;  %v17444_v53 = vld [vmem:[#allocation18_spill] sm:$0xff] }
 0x26a   : > { %3355 = vrot.lane.b32.xlu1 %v2792_v20, %s11463_s19  ;;  %v5434_v20 = vsel %vm3047_vm1, %v5370_v32, %v17074_v56  ;;  %v17453_v36 = vrot.slane %v17444_v53, 4 }
 0x26b   : > { %9139 = vmatpush2.bf16.msra.mxu0 %v10756_v34  ;;  %v13122_v25 = vpop.permute.xlu0 %3828  ;;  %v5459_v34 = vsel %vm5410_vm9, %v17437_v41, %v5458_v27  ;;  %v4930_v27 = vrot.slane %v17445_v1, 4  ;;  %v17450_v41 = vrot.slane %v17442_v55, 4 }
 0x26c   : > { %v13128_v45 = vpop.permute.xlu1 %5257  ;;  %9140 = vmatprep.subr.bf16.mxu0 %v10733_v38  ;;  %v10709_v44 = vcombine.high %v5459_v34, %v5483_v46  ;;  %v17443_v38 = vrot.slane %v17438_v42, 4  ;;  %v10708_v30 = vcombine.low %v5459_v34, %v5483_v46  ;;  %v5030_v46 = vsel %vm4957_vm10, %v12981_v14, %v5029_v23 }
 0x26d   : > { %17441 = vst [vmem:[#allocation13_spill] sm:$0xff] %v13128_v45  ;;  %3381 = vrot.lane.b32.xlu0 %v2805_v50, %s11463_s19  ;;  %v5435_v50 = vsel %vm5410_vm9, %v17439_v12, %v5434_v20  ;;  %v17448_v12 = vld [vmem:[#allocation12_spill] sm:$0xff] }
 0x26e   : > { %4259 = vrot.lane.b32.xlu1 %v13065_v17, %s11465_s24  ;;  %v5409_v8 = vsel %vm3047_vm1, %v5357_v9, %v17443_v38  ;;  %v17449_v20 = vld [vmem:[#allocation16_spill] sm:$0xff]  ;;  %v17455_v23 = vrot.slane %v17448_v12, 4 }
 0x26f   : > { %9141 = vmatpush2.bf16.msra.mxu0 %v10732_v33  ;;  %v13143_v32 = vpop.permute.xlu0 %5736  ;;  %v5411_v33 = vsel %vm5410_vm9, %v17440_v59, %v5409_v8  ;;  %v4917_v38 = vrot.slane %v17449_v20, 4  ;;  %v17452_v59 = vld [vmem:[#allocation10_spill] sm:$0xff] }
 0x270   : > { %v13149_v56 = vpop.permute.xlu1 %4804  ;;  %9142 = vmatprep.subr.bf16.mxu0 %v10709_v44  ;;  %v10685_v44 = vcombine.high %v5411_v33, %v5435_v50  ;;  %v4904_v8 = vrot.slane %v17452_v59, 4  ;;  %v10684_v9 = vcombine.low %v5411_v33, %v5435_v50 }
 0x271   : > { %17446 = vst [vmem:[#allocation7_spill] sm:$0xff] %v13149_v56  ;;  %4285 = vrot.lane.b32.xlu0 %v4164_v5, %s11465_s24  ;;  %v5005_v56 = vsel %vm3047_vm1, %v4930_v27, %v17450_v41 }
 0x272   : > { %3806 = vrot.lane.b32.xlu1 %v13065_v17, %s11466_s25  ;;  %v4981_v17 = vsel %vm3047_vm1, %v4917_v38, %v17453_v36  ;;  %v4956_v41 = vsel %vm3047_vm1, %v4904_v8, %v17455_v23  ;;  %v13190_v38 = vld [vmem:[#allocation2 + $0x8c] sm:$0xff] }
 0x273   : > { %9143 = vmatpush2.bf16.msra.mxu0 %v10708_v30  ;;  %v13164_v58 = vpop.permute.xlu0 %5283  ;;  %v5006_v30 = vsel %vm4957_vm10, %v17445_v1, %v5005_v56  ;;  %v4982_v50 = vsel %vm4957_vm10, %v17449_v20, %v4981_v17  ;;  %17458 = vst [vmem:[#allocation16_spill] sm:$0xff] %v13190_v38  ;;  %v4958_v1 = vsel %vm4957_vm10, %v17452_v59, %v4956_v41  ;;  %v10971_v59 = vld [vmem:[#allocation2 + $0xd8] ss:$104 sps:$4 sm:$0xff]   ;;  %v2817_v41 = vld [vmem:[#allocation2 + $0xf0] sm:$0xff] }
 0x274   : > { %17451 = vst [vmem:[#allocation19_spill] sm:$0xff] %v13164_v58  ;;  %v13169_v34 = vpop.permute.xlu1 %6163  ;;  %9144 = vmatprep.subr.bf16.mxu0 %v10685_v44  ;;  %v10661_v14 = vcombine.high %v5006_v30, %v5030_v46  ;;  %v10660_v56 = vcombine.low %v5006_v30, %v5030_v46  ;;  %v10636_v36 = vcombine.low %v4958_v1, %v4982_v50  ;;  %v17477_v58 = vrot.slane %v12782_v3, 4 }
 0x275   : > { %3832 = vrot.lane.b32.xlu0 %v4164_v5, %s11466_s25  ;;  %v17083_v46 = vrot.slane %v13169_v34, 4 }
 0x276   : > { %5714 = vrot.lane.b32.xlu1 %v13174_v47, %s11467_s27 }
 0x277   : > { %9145 = vmatpush2.bf16.msra.mxu0 %v10684_v9  ;;  %v13184_v27 = vpop.permute.xlu0 %4830  ;;  %v10637_v9 = vcombine.high %v4958_v1, %v4982_v50  ;;  %v10974_v1 = vld [vmem:[#allocation2 + $0x8] ss:$104 sps:$4 sm:$0xff]  }
 0x278   : > { %17456 = vst [vmem:[#allocation8_spill] sm:$0xff] %v13184_v27  ;;  %v13188_v33 = vpop.permute.xlu1 %6165  ;;  %9146 = vmatprep.subr.bf16.mxu0 %v10661_v14  ;;  %v2793_v27 = vld [vmem:[#allocation2 + $0x30] sm:$0xff] }
 0x279   : > { %17457 = vst [vmem:[#allocation20_spill] sm:$0xff] %v13188_v33  ;;  %5740 = vrot.lane.b32.xlu0 %v13190_v38, %s11467_s27  ;;  %v17082_v20 = vrot.slane %v13188_v33, 4 }
 0x27a   : > { %5261 = vrot.lane.b32.xlu1 %v13174_v47, %s11468_s28 }
 0x27b   : > { %9147 = vmatpush2.bf16.msra.mxu0 %v10660_v56  ;;  %v13198_v44 = vpop.permute.xlu0 %6189  ;;  %v6320_v50 = vsel %vm3047_vm1, %v17083_v46, %v17082_v20  ;;  %v10969_v56 = vld [vmem:[#allocation2 + $0xd4] ss:$104 sps:$4 sm:$0xff]  }
 0x27c   : > { %v13201_v8 = vpop.permute.xlu1 %4257  ;;  %9148 = vmatprep.subr.bf16.mxu0 %v10637_v9  ;;  %v17087_v30 = vrot.slane %v13198_v44, 4 }
 0x27d   : > { %5287 = vrot.lane.b32.xlu0 %v13190_v38, %s11468_s28  ;;  %v17476_v38 = vrot.slane %v12895_v40, 4 }
 0x27e   : > { %2925 = vrot.lane.b32.xlu1 %v4164_v5, %s11462_s18 }
 0x27f   : > { %9149 = vmatpush2.bf16.msra.mxu0 %v10636_v36  ;;  %v13207_v17 = vpop.permute.xlu0 %6191 }
 0x280   : > { %17459 = vst [vmem:[#allocation10_spill] sm:$0xff] %v13207_v17  ;;  %v13210_v14 = vpop.permute.xlu1 %3804  ;;  %v17086_v23 = vrot.slane %v13207_v17, 4  ;;  %9150 = vmatprep.subr.bf16.mxu0 %v10971_v59  ;;  %v13229_v59 = vsel %vm6316_vm2, %v13169_v34, %v6320_v50  ;;  %v17464_v50 = vld [vmem:[#allocation23_spill] sm:$0xff]  ;;  %v4190_v17 = vld [vmem:[#allocation2 + $0x158] sm:$0xff] }
 0x281   : > { %2951 = vrot.lane.b32.xlu0 %v2817_v41, %s11462_s18  ;;  %17460 = vst [vmem:[#allocation29_spill] sm:$0xff] %v13229_v59 }
 0x282   : > { %3379 = vrot.lane.b32.xlu1 %v4164_v5, %s11463_s19  ;;  %v6344_v9 = vsel %vm3047_vm1, %v17087_v30, %v17086_v23  ;;  %v2831_v5 = vld [vmem:[#allocation2 + $0x160] sm:$0xff]  ;;  %v13241_v30 = vld [vmem:[#allocation2 + $0xf8] sm:$0xff] }
 0x283   : > { %9151 = vmatpush2.bf16.msra.mxu0 %v10969_v56  ;;  %v13225_v36 = vpop.permute.xlu0 %4283  ;;  %v13233_v20 = vsel %vm6316_vm2, %v13198_v44, %v6344_v9  ;;  %v10972_v23 = vld [vmem:[#allocation2 + $0x4] ss:$104 sps:$4 sm:$0xff]   ;;  %17463 = vst [vmem:[#allocation32_spill] sm:$0xff] %v13241_v30  ;;  %v13248_v9 = vcombine.low %v17464_v50, %v17464_v50  ;;  %v17468_v56 = vmov 0  }
 0x284   : > { %17461 = vst [vmem:[#allocation30_spill] sm:$0xff] %v13233_v20  ;;  %v13235_v46 = vpop.permute.xlu1 %5712  ;;  %9152 = vmatprep.subr.bf16.mxu0 %v10974_v1 }
 0x285   : > { %17462 = vst [vmem:[#allocation31_spill] sm:$0xff] %v13235_v46  ;;  %2979 = vrot.lane.b32.xlu0 %v2831_v5, %s11462_s18  ;;  %17465 = vst [vmem:[#allocation23_spill] sm:$0xff] %v13248_v9 }
 0x286   : > { %2953 = vrot.lane.b32.xlu1 %v13241_v30, %s11462_s18  ;;  %v13274_v30 = vld [vmem:[#allocation2 + $0x15c] sm:$0xff] }
 0x287   : > { %9153 = vmatpush2.bf16.msra.mxu0 %v10972_v23  ;;  %v13250_v1 = vpop.permute.xlu0 %3830  ;;  %17471 = vst [vmem:[#allocation37_spill] sm:$0xff] %v13274_v30 }
 0x288   : > { %v13252_v33 = vpop.permute.xlu1 %5259 }
 0x289   : > { %17466 = vst [vmem:[#allocation33_spill] sm:$0xff] %v13252_v33  ;;  %4337 = vrot.lane.b32.xlu0 %v4190_v17, %s11465_s24 }
 0x28a   : > { %4311 = vrot.lane.b32.xlu1 %v2817_v41, %s11465_s24  ;;  %9155 = vmatmul.mubr.bf16.vlgmr.msra.gmra.mxu0 %v13248_v9 }
 0x28b   : > { %v13257_v5 = vpop.permute.xlu0 %5738  ;;  %9277 = vmatprep.mubr.bf16.mxu0 %v17468_v56  ;;  %v13276_v56 = vld [vmem:[#allocation2 + $0xf4] sm:$0xff] }
 0x28c   : > { %17467 = vst [vmem:[#allocation34_spill] sm:$0xff] %v13257_v5  ;;  %v13260_v20 = vpop.permute.xlu1 %4806  ;;  %17472 = vst [vmem:[#allocation38_spill] sm:$0xff] %v13276_v56 }
 0x28d   : > { %17469 = vst [vmem:[#allocation35_spill] sm:$0xff] %v13260_v20  ;;  %3884 = vrot.lane.b32.xlu0 %v4190_v17, %s11466_s25 }
 0x28e   : > { %3858 = vrot.lane.b32.xlu1 %v2817_v41, %s11466_s25 }
 0x28f   : > { %v13264_v23 = vpop.permute.xlu0 %5285 }
 0x290   : > { %17470 = vst [vmem:[#allocation36_spill] sm:$0xff] %v13264_v23  ;;  %v13266_v50 = vpop.permute.xlu1 %2921 }
 0x291   : > { %3431 = vrot.lane.b32.xlu0 %v4190_v17, %s11463_s19 }
 0x292   : > { %3405 = vrot.lane.b32.xlu1 %v2817_v41, %s11463_s19  ;;  %v17115_v41 = vrot.slane %v13102_v48, 4 }
 0x293   : > { %v13270_v59 = vpop.permute.xlu0 %2947 }
 0x294   : > { %v13272_v9 = vpop.permute.xlu1 %3375 }
 0x295   : > { %5792 = vrot.lane.b32.xlu0 %v13274_v30, %s11467_s27 }
 0x296   : > { %5766 = vrot.lane.b32.xlu1 %v13276_v56, %s11467_s27 }
 0x297   : > { %v13282_v20 = vpop.permute.xlu0 %2975 }
 0x298   : > { %17473 = vst [vmem:[#allocation39_spill] sm:$0xff] %v13282_v20  ;;  %v13284_v12 = vpop.permute.xlu1 %2949 }
 0x299   : > { %17474 = vst [vmem:[#allocation40_spill] sm:$0xff] %v13284_v12  ;;  %5339 = vrot.lane.b32.xlu0 %v13274_v30, %s11468_s28  ;;  %v17475_v30 = vrot.slane %v12676_v62, 4 }
 0x29a   : > { %5313 = vrot.lane.b32.xlu1 %v13276_v56, %s11468_s28 }
 0x29b   : > { %v13292_v53 = vpop.permute.xlu0 %4333  ;;  %v4434_v23 = vsel %vm3047_vm1, %v17475_v30, %v17115_v41  ;;  %v17478_v30 = vrot.slane %v13063_v35, 4 }
 0x29c   : > { %v13294_v47 = vpop.permute.xlu1 %4307  ;;  %v17117_v55 = vrot.slane %v13292_v53, 4  ;;  %v4435_v45 = vsel %vm4408_vm3, %v12676_v62, %v4434_v23 }
 0x29d   : > { %v17119_v33 = vrot.slane %v13294_v47, 4  ;;  %2903 = vrot.lane.b32.xlu0 %v2793_v27, %s11462_s18 }
 0x29e   : > { %2977 = vrot.lane.b32.xlu1 %v4190_v17, %s11462_s18  ;;  %v4482_v56 = vsel %vm3047_vm1, %v17476_v38, %v17117_v55  ;;  %v17479_v17 = vrot.slane %v12530_v28, 4 }
 0x29f   : > { %v13310_v42 = vpop.permute.xlu0 %3880  ;;  %v4458_v46 = vsel %vm3047_vm1, %v17477_v58, %v17119_v33  ;;  %v4483_v57 = vsel %vm4408_vm3, %v12895_v40, %v4482_v56  ;;  %v17124_v58 = vrot.slane %v13122_v25, 4  ;;  %v2794_v56 = vld [vmem:[#allocation2 + $0x38] sm:$0xff] }
 0x2a0   : > { %v4410_v41 = vsel %vm3047_vm1, %v17479_v17, %v17478_v30  ;;  %v13324_v31 = vpop.permute.xlu1 %3854  ;;  %v17121_v38 = vrot.slane %v13310_v42, 4  ;;  %v4459_v55 = vsel %vm4408_vm3, %v12782_v3, %v4458_v46  ;;  %v17480_v3 = vrot.slane %v12922_v51, 4 }
 0x2a1   : > { %v17122_v40 = vrot.slane %v13324_v31, 4  ;;  %3357 = vrot.lane.b32.xlu0 %v2793_v27, %s11463_s19  ;;  %v10566_v33 = vcombine.low %v4459_v55, %v4483_v57  ;;  %v10567_v5 = vcombine.high %v4459_v55, %v4483_v57  ;;  %v4411_v30 = vsel %vm4408_vm3, %v12530_v28, %v4410_v41  ;;  %v2807_v28 = vld [vmem:[#allocation2 + $0xa0] sm:$0xff] }
 0x2a2   : > { %2905 = vrot.lane.b32.xlu1 %v2794_v56, %s11462_s18  ;;  %v4029_v62 = vsel %vm3047_vm1, %v17480_v3, %v17121_v38  ;;  %v17123_v46 = vrot.slane %v13087_v0, 4  ;;  %v10543_v17 = vcombine.high %v4411_v30, %v4435_v45  ;;  %v17481_v57 = vrot.slane %v12794_v16, 4 }
 0x2a3   : > { %9204 = vmatprep.subr.bf16.mxu1 %v10567_v5  ;;  %v13343_v23 = vpop.permute.xlu0 %3427  ;;  %v4030_v3 = vsel %vm3955_vm4, %v12922_v51, %v4029_v62  ;;  %v17483_v51 = vrot.slane %v12546_v43, 4 }
 0x2a4   : > { %v4005_v55 = vsel %vm3047_vm1, %v17481_v57, %v17122_v40  ;;  %v13350_v27 = vpop.permute.xlu1 %3401  ;;  %9205 = vmatpush1.bf16.msra.mxu1 %v10566_v33  ;;  %v17127_v38 = vrot.slane %v13343_v23, 4  ;;  %v17482_v57 = vrot.slane %v12692_v4, 4  ;;  %v10542_v40 = vcombine.low %v4411_v30, %v4435_v45 }
 0x2a5   : > { %v4006_v41 = vsel %vm3955_vm4, %v12794_v16, %v4005_v55  ;;  %v17126_v5 = vrot.slane %v13350_v27, 4  ;;  %9206 = vmatprep.subr.bf16.mxu1 %v10543_v17  ;;  %2931 = vrot.lane.b32.xlu0 %v2807_v28, %s11462_s18  ;;  %v3957_v62 = vsel %vm3047_vm1, %v17483_v51, %v17123_v46  ;;  %v13374_v28 = vld [vmem:[#allocation2 + $0x100] sm:$0xff]  ;;  %v17486_v30 = vrot.slane %v12804_v24, 4 }
 0x2a6   : > { %v3981_v33 = vsel %vm3047_vm1, %v17482_v57, %v17124_v58  ;;  %3359 = vrot.lane.b32.xlu1 %v2794_v56, %s11463_s19  ;;  %v10519_v55 = vcombine.high %v4006_v41, %v4030_v3  ;;  %17484 = vst [vmem:[#allocation41_spill] sm:$0xff] %v13374_v28  ;;  %v13379_v56 = vld [vmem:[#allocation2 + $0x98] sm:$0xff] }
 0x2a7   : > { %v13365_v16 = vpop.permute.xlu0 %5788  ;;  %v3982_v57 = vsel %vm3955_vm4, %v12692_v4, %v3981_v33  ;;  %17485 = vst [vmem:[#allocation42_spill] sm:$0xff] %v13379_v56  ;;  %v3552_v51 = vsel %vm3047_vm1, %v17486_v30, %v17126_v5  ;;  %v10518_v33 = vcombine.low %v4006_v41, %v4030_v3  ;;  %v2833_v30 = vld [vmem:[#allocation2 + $0x170] sm:$0xff]  ;;  %v2820_v3 = vld [vmem:[#allocation2 + $0x108] sm:$0xff] }
 0x2a8   : > { %v13372_v17 = vpop.permute.xlu1 %5762  ;;  %9207 = vmatpush1.bf16.msra.mxu1 %v10542_v40  ;;  %v17487_v40 = vrot.slane %v12950_v18, 4  ;;  %v3553_v5 = vsel %vm3502_vm6, %v12804_v24, %v3552_v51  ;;  %v17491_v24 = vrot.slane %v13037_v61, 4 }
 0x2a9   : > { %9208 = vmatprep.subr.bf16.mxu1 %v10519_v55  ;;  %2955 = vrot.lane.b32.xlu0 %v13374_v28, %s11462_s18  ;;  %v3958_v55 = vsel %vm3955_vm4, %v12546_v43, %v3957_v62  ;;  %v17488_v43 = vrot.slane %v13272_v9, 4  ;;  %v17489_v62 = vrot.slane %v12646_v22, 4 }
 0x2aa   : > { %v3576_v4 = vsel %vm3047_vm1, %v17487_v40, %v17127_v38  ;;  %2929 = vrot.lane.b32.xlu1 %v13379_v56, %s11462_s18  ;;  %v10495_v45 = vcombine.high %v3958_v55, %v3982_v57  ;;  %v10494_v38 = vcombine.low %v3958_v55, %v3982_v57  ;;  %v13424_v57 = vld [vmem:[#allocation2 + $0x168] sm:$0xff] }
 0x2ab   : > { %v13398_v58 = vpop.permute.xlu0 %5335  ;;  %v3577_v41 = vsel %vm3502_vm6, %v12950_v18, %v3576_v4  ;;  %v3528_v40 = vsel %vm3047_vm1, %v17489_v62, %v17488_v43  ;;  %v17492_v18 = vrot.slane %v12466_v52, 4  ;;  %v2795_v4 = vld [vmem:[#allocation2 + $0x40] sm:$0xff]  ;;  %17493 = vst [vmem:[#allocation44_spill] sm:$0xff] %v13424_v57 }
 0x2ac   : > { %v13400_v28 = vpop.permute.xlu1 %5309  ;;  %9209 = vmatpush1.bf16.msra.mxu1 %v10518_v33  ;;  %v10471_v46 = vcombine.high %v3553_v5, %v3577_v41  ;;  %v10470_v55 = vcombine.low %v3553_v5, %v3577_v41  ;;  %v17495_v5 = vrot.slane %v12663_v19, 4 }
 0x2ad   : > { %9210 = vmatprep.subr.bf16.mxu1 %v10495_v45  ;;  %2983 = vrot.lane.b32.xlu0 %v2833_v30, %s11462_s18  ;;  %v3504_v45 = vsel %vm3047_vm1, %v17492_v18, %v17491_v24  ;;  %v3529_v30 = vsel %vm3502_vm6, %v12646_v22, %v3528_v40  ;;  %v2796_v22 = vld [vmem:[#allocation2 + $0x48] sm:$0xff] }
 0x2ae   : > { %2957 = vrot.lane.b32.xlu1 %v2820_v3, %s11462_s18  ;;  %v3505_v3 = vsel %vm3502_vm6, %v12466_v52, %v3504_v45  ;;  %v17496_v52 = vrot.slane %v12865_v13, 4 }
 0x2af   : > { %v13413_v33 = vpop.permute.xlu0 %4882  ;;  %v10447_v62 = vcombine.high %v3505_v3, %v3529_v30  ;;  %v10446_v40 = vcombine.low %v3505_v3, %v3529_v30 }
 0x2b0   : > { %17490 = vst [vmem:[#allocation43_spill] sm:$0xff] %v13413_v33  ;;  %v13420_v51 = vpop.permute.xlu1 %4856  ;;  %9211 = vmatpush1.bf16.msra.mxu1 %v10494_v38 }
 0x2b1   : > { %9212 = vmatprep.subr.bf16.mxu1 %v10471_v46  ;;  %2907 = vrot.lane.b32.xlu0 %v2795_v4, %s11462_s18  ;;  %v17494_v46 = vrot.slane %v13198_v44, 4 }
 0x2b2   : > { %2981 = vrot.lane.b32.xlu1 %v13424_v57, %s11462_s18  ;;  %v17500_v57 = vld [vmem:[#allocation6_spill] sm:$0xff] }
 0x2b3   : > { %v6242_v43 = vpop.permute.xlu0 %6241  ;;  %v6342_v41 = vsel %vm3047_vm1, %v17495_v5, %v17494_v46  ;;  %v17501_v46 = vrot.slane %v17500_v57, 4 }
 0x2b4   : > { %v6216_v24 = vpop.permute.xlu1 %6215  ;;  %9213 = vmatpush1.bf16.msra.mxu1 %v10470_v55  ;;  %v6304_v38 = vrot.slane %v6242_v43, 4 }
 0x2b5   : > { %v6291_v18 = vrot.slane %v6216_v24, 4  ;;  %9214 = vmatprep.subr.bf16.mxu1 %v10447_v62  ;;  %3361 = vrot.lane.b32.xlu0 %v2795_v4, %s11463_s19  ;;  %v17498_v62 = vrot.slane %v12768_v6, 4  ;;  %v17499_v4 = vrot.slane %v13169_v34, 4 }
 0x2b6   : > { %2909 = vrot.lane.b32.xlu1 %v2796_v22, %s11462_s18  ;;  %v6390_v45 = vsel %vm3047_vm1, %v17496_v52, %v6304_v38  ;;  %v2809_v52 = vld [vmem:[#allocation2 + $0xb0] sm:$0xff] }
 0x2b7   : > { %v13441_v55 = vpop.permute.xlu0 %6243  ;;  %v6366_v56 = vsel %vm3047_vm1, %v17498_v62, %v6291_v18  ;;  %v6391_v44 = vsel %vm6316_vm2, %v12865_v13, %v6390_v45  ;;  %v6318_v30 = vsel %vm3047_vm1, %v17501_v46, %v17499_v4  ;;  %v6343_v62 = vsel %vm6316_vm2, %v12663_v19, %v6342_v41 }
 0x2b8   : > { %17497 = vst [vmem:[#allocation45_spill] sm:$0xff] %v13441_v55  ;;  %v13453_v3 = vpop.permute.xlu1 %6217  ;;  %9215 = vmatpush1.bf16.msra.mxu1 %v10446_v40  ;;  %v17132_v5 = vrot.slane %v13441_v55, 4  ;;  %v6367_v33 = vsel %vm6316_vm2, %v12768_v6, %v6366_v56  ;;  %v17134_v13 = vrot.slane %v13225_v36, 4  ;;  %v6319_v40 = vsel %vm6316_vm2, %v17500_v57, %v6318_v30 }
 0x2b9   : > { %17502 = vst [vmem:[#allocation6_spill] sm:$0xff] %v13453_v3  ;;  %v17133_v34 = vrot.slane %v13453_v3, 4  ;;  %2935 = vrot.lane.b32.xlu0 %v2809_v52, %s11462_s18  ;;  %v10806_v45 = vcombine.low %v6367_v33, %v6391_v44  ;;  %v10807_v4 = vcombine.high %v6367_v33, %v6391_v44  ;;  %v17135_v56 = vrot.slane %v13201_v8, 4  ;;  %v2821_v44 = vld [vmem:[#allocation2 + $0x110] sm:$0xff]  ;;  %v2808_v52 = vld [vmem:[#allocation2 + $0xa8] sm:$0xff] }
 0x2ba   : > { %3363 = vrot.lane.b32.xlu1 %v2796_v22, %s11463_s19  ;;  %v6392_v6 = vsel %vm3047_vm1, %v6304_v38, %v17132_v5  ;;  %v10783_v41 = vcombine.high %v6319_v40, %v6343_v62 }
 0x2bb   : > { %9257 = vmatprep.subr.bf16.mxu0 %v10807_v4  ;;  %v13470_v19 = vpop.permute.xlu0 %4335  ;;  %v6368_v46 = vsel %vm3047_vm1, %v6291_v18, %v17133_v34  ;;  %v13476_v33 = vsel %vm6316_vm2, %v6242_v43, %v6392_v6  ;;  %v17503_v43 = vrot.slane %v13102_v48, 4  ;;  %v17504_v6 = vrot.slane %v13292_v53, 4  ;;  %v2835_v34 = vld [vmem:[#allocation2 + $0x180] sm:$0xff] }
 0x2bc   : > { %v13478_v22 = vpop.permute.xlu1 %4309  ;;  %9258 = vmatpush1.bf16.msra.mxu0 %v10806_v45  ;;  %v17147_v57 = vrot.slane %v13470_v19, 4  ;;  %v13482_v38 = vsel %vm6316_vm2, %v6216_v24, %v6368_v46  ;;  %v10782_v24 = vcombine.low %v6319_v40, %v6343_v62  ;;  %v17506_v62 = vrot.slane %v13063_v35, 4  ;;  %v2822_v45 = vld [vmem:[#allocation2 + $0x118] sm:$0xff]  ;;  %v2799_v4 = vld [vmem:[#allocation2 + $0x60] sm:$0xf] }
 0x2bd   : > { %v17138_v30 = vrot.slane %v13478_v22, 4  ;;  %9259 = vmatprep.subr.bf16.mxu0 %v10783_v41  ;;  %2959 = vrot.lane.b32.xlu0 %v2821_v44, %s11462_s18  ;;  %v4436_v18 = vsel %vm3047_vm1, %v17503_v43, %v17134_v13  ;;  %v17505_v44 = vrot.slane %v13294_v47, 4 }
 0x2be   : > { %2933 = vrot.lane.b32.xlu1 %v2808_v52, %s11462_s18  ;;  %v4484_v41 = vsel %vm3047_vm1, %v17504_v6, %v17147_v57  ;;  %v4412_v40 = vsel %vm3047_vm1, %v17506_v62, %v17135_v56 }
 0x2bf   : > { %v13501_v46 = vpop.permute.xlu0 %3882  ;;  %v4460_v43 = vsel %vm3047_vm1, %v17505_v44, %v17138_v30  ;;  %v4485_v5 = vsel %vm4408_vm3, %v13292_v53, %v4484_v41  ;;  %v4437_v44 = vsel %vm4408_vm3, %v13102_v48, %v4436_v18  ;;  %v17140_v53 = vrot.slane %v13250_v1, 4 }
 0x2c0   : > { %v13515_v52 = vpop.permute.xlu1 %3856  ;;  %9260 = vmatpush1.bf16.msra.mxu0 %v10782_v24  ;;  %v17136_v6 = vrot.slane %v13501_v46, 4  ;;  %v4461_v13 = vsel %vm4408_vm3, %v13294_v47, %v4460_v43  ;;  %v4413_v24 = vsel %vm4408_vm3, %v13063_v35, %v4412_v40  ;;  %v17507_v47 = vrot.slane %v13310_v42, 4  ;;  %v2797_v43 = vld [vmem:[#allocation2 + $0x50] sm:$0xff] }
 0x2c1   : > { %v17137_v41 = vrot.slane %v13515_v52, 4  ;;  %2987 = vrot.lane.b32.xlu0 %v2835_v34, %s11462_s18  ;;  %v10568_v62 = vcombine.low %v4461_v13, %v4485_v5  ;;  %v10569_v56 = vcombine.high %v4461_v13, %v4485_v5  ;;  %v17139_v18 = vrot.slane %v13210_v14, 4 }
 0x2c2   : > { %2961 = vrot.lane.b32.xlu1 %v2822_v45, %s11462_s18  ;;  %v4031_v48 = vsel %vm3047_vm1, %v17507_v47, %v17136_v6  ;;  %v10545_v5 = vcombine.high %v4413_v24, %v4437_v44  ;;  %v17508_v13 = vrot.slane %v13324_v31, 4  ;;  %v2834_v6 = vld [vmem:[#allocation2 + $0x178] sm:$0xff] }
 0x2c3   : > { %9286 = vmatprep.subr.bf16.mxu0 %v10569_v56  ;;  %10829 = vmatmul.mubr.msk.bf16.vlgmr.msra.gmra.mxu0 %vm9118_vm5, %v12948_v54  ;;  %v13536_v34 = vpop.permute.xlu0 %3429  ;;  %v4032_v56 = vsel %vm3955_vm4, %v13310_v42, %v4031_v48 }
 0x2c4   : > { %v4007_v35 = vsel %vm3047_vm1, %v17508_v13, %v17137_v41  ;;  %v13543_v45 = vpop.permute.xlu1 %3403  ;;  %9287 = vmatpush1.bf16.msra.mxu0 %v10568_v62  ;;  %9318 = vmatprep.mubr.bf16.mxu0 %v12849_v60  ;;  %v17142_v47 = vrot.slane %v13536_v34, 4  ;;  %v17509_v62 = vrot.slane %v13122_v25, 4 }
 0x2c5   : > { %v4008_v40 = vsel %vm3955_vm4, %v13324_v31, %v4007_v35  ;;  %v17141_v54 = vrot.slane %v13543_v45, 4  ;;  %9288 = vmatprep.subr.bf16.mxu0 %v10545_v5  ;;  %2911 = vrot.lane.b32.xlu0 %v2797_v43, %s11462_s18  ;;  %v10544_v31 = vcombine.low %v4413_v24, %v4437_v44  ;;  %v17510_v35 = vrot.slane %v13087_v0, 4  ;;  %v2798_v44 = vld [vmem:[#allocation2 + $0x58] sm:$0xff] }
 0x2c6   : > { %v3983_v13 = vsel %vm3047_vm1, %v17509_v62, %v17140_v53  ;;  %2985 = vrot.lane.b32.xlu1 %v2834_v6, %s11462_s18  ;;  %v10521_v48 = vcombine.high %v4008_v40, %v4032_v56  ;;  %v17511_v6 = vrot.slane %v13350_v27, 4  ;;  %v17512_v62 = vrot.slane %v13343_v23, 4 }
 0x2c7   : > { %v13559_v42 = vpop.permute.xlu0 %5790  ;;  %v3959_v5 = vsel %vm3047_vm1, %v17510_v35, %v17139_v18  ;;  %v3984_v30 = vsel %vm3955_vm4, %v13122_v25, %v3983_v13  ;;  %v10520_v35 = vcombine.low %v4008_v40, %v4032_v56  ;;  %v17143_v13 = vrot.slane %v13043_v26, 4 }
 0x2c8   : > { %v13566_v41 = vpop.permute.xlu1 %5764  ;;  %9289 = vmatpush1.bf16.msra.mxu0 %v10544_v31  ;;  %v3554_v24 = vsel %vm3047_vm1, %v17511_v6, %v17141_v54  ;;  %v3578_v31 = vsel %vm3047_vm1, %v17512_v62, %v17142_v47  ;;  %v3960_v25 = vsel %vm3955_vm4, %v13087_v0, %v3959_v5  ;;  %v17144_v53 = vrot.slane %v13023_v63, 4 }
 0x2c9   : > { %9290 = vmatprep.subr.bf16.mxu0 %v10521_v48  ;;  %2915 = vrot.lane.b32.xlu0 %v2799_v4, %s11462_s18  ;;  %v2997_v4 = vrot.slane %v13003_v37, 4  ;;  %v17146_v48 = vrot.slane %v13081_v39, 4  ;;  %v10497_v6 = vcombine.high %v3960_v25, %v3984_v30  ;;  %v3555_v40 = vsel %vm3502_vm6, %v13350_v27, %v3554_v24 }
 0x2ca   : > { %2913 = vrot.lane.b32.xlu1 %v2798_v44, %s11462_s18  ;;  %v3579_v0 = vsel %vm3502_vm6, %v13343_v23, %v3578_v31  ;;  %v17513_v56 = vrot.slane %v13272_v9, 4  ;;  %v10496_v62 = vcombine.low %v3960_v25, %v3984_v30  ;;  %v17514_v27 = vrot.slane %v13037_v61, 4 }
 0x2cb   : > { %v13587_v18 = vpop.permute.xlu0 %5337  ;;  %v10473_v31 = vcombine.high %v3555_v40, %v3579_v0  ;;  %v17515_v47 = vrot.slane %v12483_v49, 4  ;;  %v3053_v30 = vsel %vm3047_vm1, %v2997_v4, %v17144_v53  ;;  %v10472_v53 = vcombine.low %v3555_v40, %v3579_v0 }
 0x2cc   : > { %v13590_v54 = vpop.permute.xlu1 %5311  ;;  %9291 = vmatpush1.bf16.msra.mxu0 %v10520_v35  ;;  %v3530_v5 = vsel %vm3047_vm1, %v17513_v56, %v17146_v48  ;;  %v3010_v35 = vrot.slane %v13266_v50, 4  ;;  %v3506_v23 = vsel %vm3047_vm1, %v17514_v27, %v17143_v13  ;;  %v3253_v56 = vld [vmem:[#allocation2 + $0x60] sm:$0xf]  ;;  %v17145_v27 = vrot.slane %v13057_v29, 4 }
 0x2cd   : > { %9292 = vmatprep.subr.bf16.mxu0 %v10497_v6  ;;  %3365 = vrot.lane.b32.xlu0 %v2797_v43, %s11463_s19  ;;  %v3051_v6 = vsel %vm3047_vm1, %v17515_v47, %v2997_v4  ;;  %v3531_v43 = vsel %vm3502_vm6, %v13272_v9, %v3530_v5  ;;  %v17148_v13 = vrot.slane %v13284_v12, 4  ;;  %v2810_v47 = vld [vmem:[#allocation2 + $0xb8] sm:$0xff]  ;;  %v3507_v4 = vsel %vm3502_vm6, %v13037_v61, %v3506_v23  ;;  %v2811_v23 = vld [vmem:[#allocation2 + $0xc0] sm:$0xff] }
 0x2ce   : > { %3367 = vrot.lane.b32.xlu1 %v2798_v44, %s11463_s19  ;;  %v3023_v44 = vrot.slane %v13270_v59, 4  ;;  %v13630_v9 = vsel %vm3049_vm7, %v12483_v49, %v3051_v6  ;;  %v10449_v61 = vcombine.high %v3507_v4, %v3531_v43  ;;  %v5851_v0 = vrot.slane %v13365_v16, 4  ;;  %v17552_v12 = vld [vmem:[#allocation33_spill] sm:$0xff] }
 0x2cf   : > { %v13609_v24 = vpop.permute.xlu0 %4884  ;;  %v17516_v6 = vrot.slane %v12726_v15, 4  ;;  %v5838_v48 = vrot.slane %v13372_v17, 4  ;;  %v10448_v5 = vcombine.low %v3507_v4, %v3531_v43  ;;  %v5398_v29 = vrot.slane %v13398_v58, 4 }
 0x2d0   : > { %v13620_v25 = vpop.permute.xlu1 %4858  ;;  %9293 = vmatpush1.bf16.msra.mxu0 %v10496_v62  ;;  %v13635_v62 = vsel %vm3049_vm7, %v13003_v37, %v3053_v30  ;;  %v17517_v37 = vrot.slane %v12629_v10, 4  ;;  %v3101_v57 = vsel %vm3047_vm1, %v3023_v44, %v17148_v13  ;;  %v17168_v26 = vrot.slane %v17552_v12, 4 }
 0x2d1   : > { %9294 = vmatprep.subr.bf16.mxu0 %v10473_v31  ;;  %3369 = vrot.lane.b32.xlu0 %v3253_v56, %s11463_s19  ;;  %v3077_v31 = vsel %vm3047_vm1, %v3010_v35, %v17145_v27  ;;  %v17149_v27 = vrot.slane %v13282_v20, 4  ;;  %v3102_v4 = vsel %vm3049_vm7, %v13270_v59, %v3101_v57  ;;  %v17521_v59 = vrot.slane %v12814_v11, 4 }
 0x2d2   : > { %2937 = vrot.lane.b32.xlu1 %v2810_v47, %s11462_s18  ;;  %v3099_v47 = vsel %vm3047_vm1, %v17516_v6, %v3023_v44  ;;  %v3075_v30 = vsel %vm3047_vm1, %v17517_v37, %v3010_v35  ;;  %v13658_v6 = vsel %vm3049_vm7, %v13266_v50, %v3077_v31  ;;  %v17152_v35 = vrot.slane %v13566_v41, 4 }
 0x2d3   : > { %v13640_v56 = vpop.permute.xlu0 %2899  ;;  %v3076_v43 = vsel %vm3049_vm7, %v12629_v10, %v3075_v30  ;;  %v5913_v57 = vsel %vm3047_vm1, %v17521_v59, %v5838_v48  ;;  %v17526_v59 = vrot.slane %v13108_v7, 4  ;;  %v10401_v55 = vcombine.high %v13635_v62, %v13658_v6 }
 0x2d4   : > { %9295 = vmatpush1.bf16.msra.mxu0 %v10472_v53  ;;  %v2974_v49 = vpop.permute.xlu1 %2973  ;;  %v2812_v53 = vld [vmem:[#allocation2 + $0xc8] sm:$0xf]  ;;  %v5914_v63 = vsel %vm5863_vm8, %v12814_v11, %v5913_v57  ;;  %v10398_v57 = vcombine.low %v13630_v9, %v3076_v43 }
 0x2d5   : > { %v3036_v40 = vrot.slane %v2974_v49, 4  ;;  %9296 = vmatprep.subr.bf16.mxu0 %v10449_v61  ;;  %2939 = vrot.lane.b32.xlu0 %v2811_v23, %s11462_s18  ;;  %v3100_v61 = vsel %vm3049_vm7, %v12726_v15, %v3099_v47  ;;  %v17518_v23 = vrot.slane %v12845_v2, 4  ;;  %v17520_v15 = vrot.slane %v12974_v21, 4 }
 0x2d6   : > { %2941 = vrot.lane.b32.xlu1 %v2812_v53, %s11462_s18 }
 0x2d7   : > { %v3125_v44 = vsel %vm3047_vm1, %v3036_v40, %v17149_v27  ;;  %v13666_v13 = vpop.permute.xlu0 %3353  ;;  %v3123_v50 = vsel %vm3047_vm1, %v17518_v23, %v3036_v40  ;;  %v2823_v27 = vld [vmem:[#allocation2 + $0x120] sm:$0xff]  ;;  %v5937_v47 = vsel %vm3047_vm1, %v17520_v15, %v5851_v0  ;;  %v2824_v23 = vld [vmem:[#allocation2 + $0x128] sm:$0xff] }
 0x2d8   : > { %v3126_v31 = vsel %vm3049_vm7, %v2974_v49, %v3125_v44  ;;  %9297 = vmatpush1.bf16.msra.mxu0 %v10448_v5  ;;  %v13678_v53 = vpop.permute.xlu1 %2901  ;;  %v3124_v37 = vsel %vm3049_vm7, %v12845_v2, %v3123_v50  ;;  %v17522_v5 = vld [vmem:[#allocation34_spill] sm:$0xff]  ;;  %v5915_v2 = vsel %vm3047_vm1, %v5838_v48, %v17152_v35  ;;  %v17523_v50 = vrot.slane %v13559_v42, 4  ;;  %v17527_v49 = vld [vmem:[#allocation9_spill] sm:$0xff]  ;;  %v17530_v48 = vld [vmem:[#allocation15_spill] sm:$0xff] }
 0x2d9   : > { %17519 = vst [vmem:[#allocation46_spill] sm:$0xff] %v13678_v53  ;;  %v10424_v40 = vcombine.low %v3102_v4, %v3126_v31  ;;  %2963 = vrot.lane.b32.xlu0 %v2823_v27, %s11462_s18  ;;  %v10422_v10 = vcombine.low %v3100_v61, %v3124_v37  ;;  %v10423_v30 = vcombine.high %v3100_v61, %v3124_v37  ;;  %v17524_v27 = vld [vmem:[#allocation13_spill] sm:$0xff]  ;;  %v17531_v35 = vrot.slane %v17530_v48, 4 }
 0x2da   : > { %2965 = vrot.lane.b32.xlu1 %v2824_v23, %s11462_s18  ;;  %v10425_v44 = vcombine.high %v3102_v4, %v3126_v31  ;;  %v5939_v15 = vsel %vm3047_vm1, %v5851_v0, %v17523_v50  ;;  %v10399_v61 = vcombine.high %v13630_v9, %v3076_v43  ;;  %v17528_v23 = vrot.slane %v17527_v49, 4  ;;  %v17532_v0 = vld [vmem:[#allocation31_spill] sm:$0xff] }
 0x2db   : > { %9216 = vmatprep.subr.bf16.mxu1 %v10423_v30  ;;  %v13698_v37 = vpop.permute.xlu0 %2927  ;;  %v17529_v31 = vrot.slane %v13143_v32, 4  ;;  %v17161_v50 = vrot.slane %v17532_v0, 4  ;;  %v17544_v0 = vld [vmem:[#allocation24_spill] sm:$0xff] }
 0x2dc   : > { %17525 = vst [vmem:[#allocation13_spill] sm:$0xff] %v13698_v37  ;;  %v5865_v4 = vsel %vm3047_vm1, %v17528_v23, %v17526_v59  ;;  %9298 = vmatprep.subr.bf16.mxu0 %v10425_v44  ;;  %9217 = vmatpush1.bf16.msra.mxu1 %v10422_v10  ;;  %v13712_v30 = vpop.permute.xlu1 %3355  ;;  %v5938_v59 = vsel %vm5863_vm8, %v12974_v21, %v5937_v47  ;;  %v5385_v23 = vrot.slane %v13400_v28, 4  ;;  %v2836_v21 = vld [vmem:[#allocation2 + $0x188] sm:$0xff]  ;;  %v17534_v47 = vrot.slane %v17522_v5, 4 }
 0x2dd   : > { %v5889_v3 = vsel %vm3047_vm1, %v17531_v35, %v17529_v31  ;;  %17533 = vst [vmem:[#allocation9_spill] sm:$0xff] %v13712_v30  ;;  %9299 = vmatpush1.bf16.msra.mxu0 %v10424_v40  ;;  %9218 = vmatprep.subr.bf16.mxu1 %v10399_v61  ;;  %v2825_v35 = vld [vmem:[#allocation2 + $0x130] sm:$0xf]  ;;  %v5916_v10 = vsel %vm5863_vm8, %v13372_v17, %v5915_v2  ;;  %v17535_v40 = vmov %v17529_v31  ;;  %v17536_v17 = vld [vmem:[#allocation19_spill] sm:$0xff]  ;;  %v17545_v5 = vrot.slane %v17544_v0, 4 }
 0x2de   : > { %v5940_v44 = vsel %vm5863_vm8, %v13365_v16, %v5939_v15  ;;  %9300 = vmatprep.subr.bf16.mxu0 %v10401_v55  ;;  %2967 = vrot.lane.b32.xlu0 %v2825_v35, %s11462_s18  ;;  %v5891_v61 = vsel %vm3047_vm1, %v17535_v40, %v17534_v47  ;;  %v5372_v2 = vrot.slane %v17536_v17, 4  ;;  %v10400_v16 = vcombine.low %v13635_v62, %v13658_v6 }
 0x2df   : > { %2989 = vrot.lane.b32.xlu1 %v2836_v21, %s11462_s18  ;;  %v13739_v15 = vpop.permute.xlu0 %3381  ;;  %v10759_v9 = vcombine.high %v5914_v63, %v5938_v59  ;;  %v5866_v55 = vsel %vm5863_vm8, %v17527_v49, %v5865_v4  ;;  %v10761_v35 = vcombine.high %v5916_v10, %v5940_v44  ;;  %v5890_v47 = vsel %vm5863_vm8, %v17530_v48, %v5889_v3  ;;  %v17540_v21 = vld [vmem:[#allocation11_spill] sm:$0xff]  ;;  %v2837_v49 = vld [vmem:[#allocation2 + $0x190] sm:$0xff] }
 0x2e0   : > { %17537 = vst [vmem:[#allocation15_spill] sm:$0xff] %v13739_v15  ;;  %9219 = vmatpush1.bf16.msra.mxu1 %v10398_v57  ;;  %v13743_v43 = vpop.permute.xlu1 %4259  ;;  %v17538_v40 = vrot.slane %v13108_v7, 4  ;;  %v17539_v6 = vrot.slane %v17524_v27, 4  ;;  %v17541_v11 = vrot.slane %v17540_v21, 4  ;;  %v5892_v4 = vsel %vm5863_vm8, %v13143_v32, %v5891_v61  ;;  %v17542_v57 = vld [vmem:[#allocation21_spill] sm:$0xff] }
 0x2e1   : > { %9301 = vmatpush1.bf16.msra.mxu0 %v10400_v16  ;;  %9220 = vmatprep.subr.bf16.mxu1 %v10759_v9  ;;  %v17543_v3 = vrot.slane %v17542_v57, 4  ;;  %v10758_v20 = vcombine.low %v5914_v63, %v5938_v59  ;;  %v17547_v16 = vrot.slane %v13590_v54, 4  ;;  %v17548_v32 = vrot.slane %v13587_v18, 4  ;;  %v17550_v59 = vld [vmem:[#allocation17_spill] sm:$0xff] }
 0x2e2   : > { %v5867_v62 = vsel %vm3047_vm1, %v17538_v40, %v17161_v50  ;;  %v5412_v31 = vsel %vm3047_vm1, %v17541_v11, %v17539_v6  ;;  %v5484_v40 = vsel %vm3047_vm1, %v17545_v5, %v5398_v29  ;;  %v17546_v50 = vld [vmem:[#allocation36_spill] sm:$0xff]  ;;  %9302 = vmatprep.subr.bf16.mxu0 %v10761_v35  ;;  %2991 = vrot.lane.b32.xlu0 %v2837_v49, %s11462_s18  ;;  %v2838_v11 = vld [vmem:[#allocation2 + $0x198] sm:$0xf]  ;;  %v17551_v35 = vrot.slane %v17550_v59, 4 }
 0x2e3   : > { %v5460_v48 = vsel %vm3047_vm1, %v17543_v3, %v5385_v23  ;;  %v5462_v9 = vsel %vm3047_vm1, %v5385_v23, %v17547_v16  ;;  %v5486_v61 = vsel %vm3047_vm1, %v5398_v29, %v17548_v32  ;;  %v10760_v6 = vcombine.low %v5916_v10, %v5940_v44  ;;  %2993 = vrot.lane.b32.xlu1 %v2838_v11, %s11462_s18  ;;  %v13774_v3 = vpop.permute.xlu0 %4285  ;;  %v17553_v11 = vld [vmem:[#allocation43_spill] sm:$0xff] }
 0x2e4   : > { %17549 = vst [vmem:[#allocation19_spill] sm:$0xff] %v13774_v3  ;;  %v10735_v5 = vcombine.high %v5866_v55, %v5890_v47  ;;  %v5868_v63 = vsel %vm5863_vm8, %v13108_v7, %v5867_v62  ;;  %v5436_v49 = vsel %vm3047_vm1, %v17551_v35, %v5372_v2  ;;  %9221 = vmatpush2.bf16.msra.mxu1 %v10758_v20  ;;  %v13782_v23 = vpop.permute.xlu1 %3806  ;;  %v4932_v44 = vrot.slane %v13420_v51, 4  ;;  %v4712_v62 = vld [vmem:[#allocation2 + $0x84] sm:$0xff]  ;;  %v17562_v35 = vld [vmem:[#allocation37_spill] sm:$0xff] }
 0x2e5   : > { %v10737_v16 = vcombine.high %v5868_v63, %v5892_v4  ;;  %v5461_v29 = vsel %vm5410_vm9, %v17542_v57, %v5460_v48  ;;  %v5485_v10 = vsel %vm5410_vm9, %v17544_v0, %v5484_v40  ;;  %v4945_v7 = vrot.slane %v17553_v11, 4  ;;  %9303 = vmatpush2.bf16.msra.mxu0 %v10760_v6 }
 0x2e6   : > { %9222 = vmatprep.subr.bf16.mxu1 %v10735_v5  ;;  %v5463_v32 = vsel %vm5410_vm9, %v13400_v28, %v5462_v9  ;;  %v5487_v20 = vsel %vm5410_vm9, %v13398_v58, %v5486_v61  ;;  %v10734_v48 = vcombine.low %v5866_v55, %v5890_v47  ;;  %4832 = vrot.lane.b32.xlu0 %v4712_v62, %s11469_s29  ;;  %v17554_v0 = vrot.slane %v17546_v50, 4  ;;  %v17555_v5 = vld [vmem:[#allocation38_spill] sm:$0xff] }
 0x2e7   : > { %9304 = vmatprep.subr.bf16.mxu0 %v10737_v16  ;;  %v10736_v6 = vcombine.low %v5868_v63, %v5892_v4  ;;  %4860 = vrot.lane.b32.xlu1 %v17555_v5, %s11469_s29  ;;  %v13802_v28 = vpop.permute.xlu0 %3832  ;;  %v10711_v9 = vcombine.high %v5461_v29, %v5485_v10  ;;  %v10713_v61 = vcombine.high %v5463_v32, %v5487_v20  ;;  %v17557_v63 = vld [vmem:[#allocation8_spill] sm:$0xff]  ;;  %v17566_v16 = vld [vmem:[#allocation14_spill] sm:$0xff] }
 0x2e8   : > { %v5438_v40 = vsel %vm3047_vm1, %v5372_v2, %v17554_v0  ;;  %9223 = vmatpush2.bf16.msra.mxu1 %v10734_v48  ;;  %v13804_v58 = vpop.permute.xlu1 %5714  ;;  %v5413_v55 = vsel %vm5410_vm9, %v17540_v21, %v5412_v31  ;;  %v5437_v47 = vsel %vm5410_vm9, %v17550_v59, %v5436_v49  ;;  %v17556_v2 = vrot.slane %v17524_v27, 4  ;;  %v17558_v48 = vld [vmem:[#allocation22_spill] sm:$0xff]  ;;  %v17560_v21 = vld [vmem:[#allocation25_spill] sm:$0xff] }
 0x2e9   : > { %9305 = vmatpush2.bf16.msra.mxu0 %v10736_v6  ;;  %9224 = vmatprep.subr.bf16.mxu1 %v10711_v9  ;;  %v5439_v62 = vsel %vm5410_vm9, %v17536_v17, %v5438_v40  ;;  %v17559_v0 = vrot.slane %v17558_v48, 4  ;;  %v17561_v57 = vrot.slane %v17560_v21, 4  ;;  %v10710_v49 = vcombine.low %v5461_v29, %v5485_v10  ;;  %v17565_v40 = vld [vmem:[#allocation7_spill] sm:$0xff] }
 0x2ea   : > { %v5414_v4 = vsel %vm3047_vm1, %v17556_v2, %v17168_v26  ;;  %9306 = vmatprep.subr.bf16.mxu0 %v10713_v61  ;;  %4886 = vrot.lane.b32.xlu0 %v17562_v35, %s11469_s29  ;;  %v17563_v2 = vrot.slane %v13620_v25, 4  ;;  %v17564_v9 = vrot.slane %v13609_v24, 4  ;;  %v17173_v26 = vrot.slane %v17565_v40, 4 }
 0x2eb   : > { %v5007_v31 = vsel %vm3047_vm1, %v17559_v0, %v4932_v44  ;;  %v5031_v59 = vsel %vm3047_vm1, %v17561_v57, %v4945_v7  ;;  %v10712_v0 = vcombine.low %v5463_v32, %v5487_v20  ;;  %4808 = vrot.lane.b32.xlu1 %v17566_v16, %s11469_s29  ;;  %v13835_v57 = vpop.permute.xlu0 %5740  ;;  %v10687_v29 = vcombine.high %v5413_v55, %v5437_v47  ;;  %v17568_v16 = vld [vmem:[#allocation18_spill] sm:$0xff] }
 0x2ec   : > { %v5009_v6 = vsel %vm3047_vm1, %v4932_v44, %v17563_v2  ;;  %v5033_v17 = vsel %vm3047_vm1, %v4945_v7, %v17564_v9  ;;  %v5415_v10 = vsel %vm5410_vm9, %v17524_v27, %v5414_v4  ;;  %9225 = vmatpush2.bf16.msra.mxu1 %v10710_v49  ;;  %v13839_v61 = vpop.permute.xlu1 %5261  ;;  %v5008_v2 = vsel %vm4957_vm10, %v17558_v48, %v5007_v31  ;;  %v17570_v31 = vld [vmem:[#allocation16_spill] sm:$0xff] }
 0x2ed   : > { %v10689_v44 = vcombine.high %v5415_v10, %v5439_v62  ;;  %v5032_v7 = vsel %vm4957_vm10, %v17560_v21, %v5031_v59  ;;  %v17169_v32 = vrot.slane %v13678_v53, 4  ;;  %9307 = vmatpush2.bf16.msra.mxu0 %v10712_v0  ;;  %9226 = vmatprep.subr.bf16.mxu1 %v10687_v29  ;;  %v5010_v20 = vsel %vm4957_vm10, %v13420_v51, %v5009_v6  ;;  %v17571_v6 = vld [vmem:[#allocation12_spill] sm:$0xff] }
 0x2ee   : > { %v5034_v27 = vsel %vm4957_vm10, %v17553_v11, %v5033_v17  ;;  %v17567_v4 = vrot.slane %v17557_v63, 4  ;;  %v17569_v49 = vrot.slane %v17568_v16, 4  ;;  %v10686_v48 = vcombine.low %v5413_v55, %v5437_v47  ;;  %4834 = vrot.lane.b32.xlu0 %v17570_v31, %s11469_s29 }
 0x2ef   : > { %9308 = vmatprep.subr.bf16.mxu0 %v10689_v44  ;;  %v17174_v21 = vrot.slane %v13640_v56, 4  ;;  %v10688_v59 = vcombine.low %v5415_v10, %v5439_v62  ;;  %6219 = vrot.lane.b32.xlu1 %v17555_v5, %s11464_s20  ;;  %v13860_v51 = vpop.permute.xlu0 %5287  ;;  %v10663_v11 = vcombine.high %v5008_v2, %v5032_v7  ;;  %v17572_v17 = vrot.slane %v17571_v6, 4 }
 0x2f0   : > { %v4983_v9 = vsel %vm3047_vm1, %v17569_v49, %v17567_v4  ;;  %9227 = vmatpush2.bf16.msra.mxu1 %v10686_v48  ;;  %v13867_v55 = vpop.permute.xlu1 %2925  ;;  %v10665_v47 = vcombine.high %v5010_v20, %v5034_v27  ;;  %v17172_v62 = vrot.slane %v13712_v30, 4  ;;  %v17170_v5 = vrot.slane %v13698_v37, 4  ;;  %v17591_v30 = vld [vmem:[#allocation30_spill] sm:$0xff] }
 0x2f1   : > { %v4959_v0 = vsel %vm3047_vm1, %v17572_v17, %v17173_v26  ;;  %v4984_v29 = vsel %vm4957_vm10, %v17568_v16, %v4983_v9  ;;  %9309 = vmatpush2.bf16.msra.mxu0 %v10688_v59  ;;  %v3057_v10 = vsel %vm3047_vm1, %v17174_v21, %v17169_v32  ;;  %v17175_v44 = vrot.slane %v13867_v55, 4  ;;  %9228 = vmatprep.subr.bf16.mxu1 %v10663_v11  ;;  %v6059_v16 = vld [vmem:[#allocation2 + $0x24] sm:$0xff] }
 0x2f2   : > { %v10662_v4 = vcombine.low %v5008_v2, %v5032_v7  ;;  %9310 = vmatprep.subr.bf16.mxu0 %v10665_v47  ;;  %6245 = vrot.lane.b32.xlu0 %v17562_v35, %s11464_s20  ;;  %v4960_v49 = vsel %vm4957_vm10, %v17571_v6, %v4959_v0  ;;  %v17176_v9 = vrot.slane %v13666_v13, 4  ;;  %v10664_v31 = vcombine.low %v5010_v20, %v5034_v27  ;;  %v6072_v0 = vld [vmem:[#allocation2 + $0x8c] sm:$0xff]  ;;  %v13937_v20 = vld [vmem:[#allocation2 + $0x164] sm:$0xff] }
 0x2f3   : > { %v3081_v48 = vsel %vm3047_vm1, %v17175_v44, %v17170_v5  ;;  %6167 = vrot.lane.b32.xlu1 %v6059_v16, %s11464_s20  ;;  %v13890_v2 = vpop.permute.xlu0 %2951  ;;  %v10639_v7 = vcombine.high %v4960_v49, %v4984_v29  ;;  %v13894_v35 = vsel %vm3049_vm7, %v13640_v56, %v3057_v10  ;;  %v17171_v6 = vrot.slane %v13739_v15, 4  ;;  %v13912_v10 = vld [vmem:[#allocation2 + $0xfc] sm:$0xff]  ;;  %v17577_v5 = vld [vmem:[#allocation32_spill] sm:$0xff] }
 0x2f4   : > { %17573 = vst [vmem:[#allocation11_spill] sm:$0xff] %v13894_v35  ;;  %v13898_v59 = vsel %vm3049_vm7, %v13867_v55, %v3081_v48  ;;  %9229 = vmatpush2.bf16.msra.mxu1 %v10662_v4  ;;  %v13900_v11 = vpop.permute.xlu1 %3379  ;;  %v3510_v27 = vsel %vm3047_vm1, %v17176_v9, %v17172_v62  ;;  %v10638_v47 = vcombine.low %v4960_v49, %v4984_v29  ;;  %v10978_v32 = vld [vmem:[#allocation2 + $0xdc] ss:$104 sps:$4 sm:$0xff]   ;;  %v10981_v62 = vld [vmem:[#allocation2 + $0xc] ss:$104 sps:$4 sm:$0xff]   ;;  %v17589_v35 = vmov 0  }
 0x2f5   : > { %17574 = vst [vmem:[#allocation21_spill] sm:$0xff] %v13898_v59  ;;  %9311 = vmatpush2.bf16.msra.mxu0 %v10664_v31  ;;  %v17177_v17 = vrot.slane %v13900_v11, 4  ;;  %9230 = vmatprep.subr.bf16.mxu1 %v10639_v7  ;;  %v10980_v31 = vld [vmem:[#allocation2 + $0xe0] ss:$104 sps:$4 sm:$0xff]   ;;  %v13927_v29 = vsel %vm3502_vm6, %v13666_v13, %v3510_v27  ;;  %v13955_v27 = vld [vmem:[#allocation2 + $0x2c] sm:$0xff]  ;;  %v17582_v37 = vcombine.high %v13482_v38, %v13476_v33 }
 0x2f6   : > { %6193 = vrot.lane.b32.xlu0 %v6072_v0, %s11464_s20  ;;  %17575 = vst [vmem:[#allocation24_spill] sm:$0xff] %v13927_v29  ;;  %v13951_v0 = vld [vmem:[#allocation2 + $0x160] sm:$0xff] }
 0x2f7   : > { %v3534_v16 = vsel %vm3047_vm1, %v17177_v17, %v17171_v6  ;;  %6221 = vrot.lane.b32.xlu1 %v13912_v10, %s11464_s20  ;;  %v13923_v48 = vpop.permute.xlu0 %2979 }
 0x2f8   : > { %v13931_v49 = vsel %vm3502_vm6, %v13900_v11, %v3534_v16  ;;  %9231 = vmatpush2.bf16.msra.mxu1 %v10638_v47  ;;  %v13933_v7 = vpop.permute.xlu1 %2953  ;;  %v10983_v47 = vld [vmem:[#allocation2 + $0x10] ss:$104 sps:$4 sm:$0xff]  }
 0x2f9   : > { %17576 = vst [vmem:[#allocation36_spill] sm:$0xff] %v13931_v49  ;;  %9232 = vmatprep.subr.bf16.mxu1 %v10980_v31  ;;  %v17597_v49 = vld [vmem:[#allocation41_spill] sm:$0xff] }
 0x2fa   : > { %6247 = vrot.lane.b32.xlu0 %v13937_v20, %s11464_s20 }
 0x2fb   : > { %4313 = vrot.lane.b32.xlu1 %v17577_v5, %s11465_s24  ;;  %v13945_v16 = vpop.permute.xlu0 %4337  ;;  %v17578_v5 = vrot.slane %v13470_v19, 4 }
 0x2fc   : > { %9233 = vmatpush2.bf16.msra.mxu1 %v10978_v32  ;;  %v13947_v4 = vpop.permute.xlu1 %4311  ;;  %v17178_v31 = vrot.slane %v13945_v16, 4 }
 0x2fd   : > { %v17183_v6 = vrot.slane %v13947_v4, 4  ;;  %9234 = vmatprep.subr.bf16.mxu1 %v10983_v47  ;;  %v17580_v47 = vrot.slane %v13478_v22, 4 }
 0x2fe   : > { %4339 = vrot.lane.b32.xlu0 %v13951_v0, %s11465_s24  ;;  %v4486_v32 = vsel %vm3047_vm1, %v17578_v5, %v17178_v31 }
 0x2ff   : > { %6169 = vrot.lane.b32.xlu1 %v13955_v27, %s11464_s20  ;;  %v13964_v26 = vpop.permute.xlu0 %3884  ;;  %v4462_v21 = vsel %vm3047_vm1, %v17580_v47, %v17183_v6  ;;  %v4487_v44 = vsel %vm4408_vm3, %v13470_v19, %v4486_v32  ;;  %v13983_v47 = vld [vmem:[#allocation2 + $0x94] sm:$0xff] }
 0x300   : > { %17579 = vst [vmem:[#allocation17_spill] sm:$0xff] %v13964_v26  ;;  %9235 = vmatpush2.bf16.msra.mxu1 %v10981_v62  ;;  %v13973_v9 = vpop.permute.xlu1 %3858  ;;  %v17186_v17 = vrot.slane %v13964_v26, 4  ;;  %v4463_v5 = vsel %vm4408_vm3, %v13478_v22, %v4462_v21  ;;  %v13987_v62 = vld [vmem:[#allocation2 + $0x28] sm:$0xff]  ;;  %v17583_v22 = vrot.slane %v13501_v46, 4 }
 0x301   : > { %17581 = vst [vmem:[#allocation33_spill] sm:$0xff] %v13973_v9  ;;  %v17191_v53 = vrot.slane %v13973_v9, 4  ;;  %9339 = vmatprep.subr.bf16.mxu1 %v17582_v37  ;;  %v10570_v6 = vcombine.low %v4463_v5, %v4487_v44  ;;  %v10571_v19 = vcombine.high %v4463_v5, %v4487_v44  ;;  %v17584_v37 = vld [vmem:[#allocation23_spill] sm:$0xff]  ;;  %v17586_v44 = vrot.slane %v13515_v52, 4 }
 0x302   : > { %6195 = vrot.lane.b32.xlu0 %v13983_v47, %s11464_s20  ;;  %v4033_v21 = vsel %vm3047_vm1, %v17583_v22, %v17186_v17  ;;  %v17587_v22 = vcombine.low %v13482_v38, %v13476_v33  ;;  %v17593_v33 = vrot.slane %v13774_v3, 4  ;;  %v17594_v38 = vrot.slane %v13225_v36, 4 }
 0x303   : > { %4261 = vrot.lane.b32.xlu1 %v13987_v62, %s11465_s24  ;;  %9237 = vmatmul.mubr.bf16.vlgmr.msra.gmra.mxu1 %v17584_v37  ;;  %v13998_v31 = vpop.permute.xlu0 %3431  ;;  %v4009_v5 = vsel %vm3047_vm1, %v17586_v44, %v17191_v53  ;;  %v14007_v59 = vsel %vm3955_vm4, %v13501_v46, %v4033_v21  ;;  %v17590_v53 = vld [vmem:[#allocation29_spill] sm:$0xff]  ;;  %v14024_v21 = vld [vmem:[#allocation2 + $0x90] sm:$0xff]  ;;  %v17602_v9 = vrot.slane %v13543_v45, 4 }
 0x304   : > { %17585 = vst [vmem:[#allocation43_spill] sm:$0xff] %v13998_v31  ;;  %9340 = vmatpush1.bf16.msra.mxu1 %v17587_v22  ;;  %v14012_v17 = vpop.permute.xlu1 %3405  ;;  %9359 = vmatprep.mubr.bf16.mxu1 %v17589_v35  ;;  %v14018_v15 = vsel %vm3955_vm4, %v13515_v52, %v4009_v5  ;;  %v17592_v46 = vcombine.high %v17590_v53, %v17591_v30  ;;  %v17595_v5 = vrot.slane %v13998_v31, 4 }
 0x305   : > { %17588 = vst [vmem:[#allocation38_spill] sm:$0xff] %v14012_v17  ;;  %v4438_v22 = vsel %vm3047_vm1, %v17594_v38, %v17593_v33  ;;  %v10523_v52 = vcombine.high %v14018_v15, %v14007_v59  ;;  %v17599_v33 = vrot.slane %v13743_v43, 4  ;;  %v17600_v38 = vrot.slane %v13201_v8, 4 }
 0x306   : > { %9341 = vmatprep.subr.bf16.mxu1 %v17592_v46  ;;  %4287 = vrot.lane.b32.xlu0 %v14024_v21, %s11465_s24  ;;  %v17596_v46 = vrot.slane %v13536_v34, 4  ;;  %v17601_v26 = vrot.slane %v14012_v17, 4 }
 0x307   : > { %4315 = vrot.lane.b32.xlu1 %v17597_v49, %s11465_s24  ;;  %v14044_v29 = vpop.permute.xlu0 %5792  ;;  %v4414_v32 = vsel %vm3047_vm1, %v17600_v38, %v17599_v33  ;;  %v17212_v49 = vrot.slane %v13802_v28, 4  ;;  %v4439_v38 = vsel %vm4408_vm3, %v13225_v36, %v4438_v22  ;;  %v14095_v22 = vld [vmem:[%s17029_s2 + $0x8] ss:$0 sps:$4 sm:$0xff]  }
 0x308   : > { %v3580_v44 = vsel %vm3047_vm1, %v17596_v46, %v17595_v5  ;;  %17598 = vst [vmem:[#allocation8_spill] sm:$0xff] %v14044_v29  ;;  %v3556_v31 = vsel %vm3047_vm1, %v17602_v9, %v17601_v26  ;;  %v17603_v46 = vcombine.low %v17590_v53, %v17591_v30  ;;  %v14064_v3 = vpop.permute.xlu1 %5766  ;;  %v17206_v33 = vrot.slane %v14044_v29, 4  ;;  %v17605_v30 = vld [vmem:[#allocation44_spill] sm:$0xff] }
 0x309   : > { %v14058_v5 = vsel %vm3502_vm6, %v13536_v34, %v3580_v44  ;;  %17604 = vst [vmem:[#allocation22_spill] sm:$0xff] %v14064_v3  ;;  %v14071_v26 = vsel %vm3502_vm6, %v13543_v45, %v3556_v31  ;;  %v17211_v34 = vrot.slane %v14064_v3, 4  ;;  %v14080_v44 = vld [vmem:[#allocation2 + $0xf8] sm:$0xff]  ;;  %v4415_v36 = vsel %vm4408_vm3, %v13201_v8, %v4414_v32 }
 0x30a   : > { %9342 = vmatpush1.bf16.msra.mxu1 %v17603_v46  ;;  %4341 = vrot.lane.b32.xlu0 %v17605_v30, %s11465_s24  ;;  %v17606_v45 = vrot.slane %v13559_v42, 4  ;;  %v10547_v32 = vcombine.high %v4415_v36, %v4439_v38  ;;  %v17608_v46 = vrot.slane %v13566_v41, 4 }
 0x30b   : > { %9368 = vmatprep.subr.bf16.mxu1 %v10571_v19  ;;  %3860 = vrot.lane.b32.xlu1 %v14080_v44, %s11466_s25  ;;  %v14099_v8 = vpop.permute.xlu0 %5339  ;;  %v17610_v19 = vrot.slane %v13250_v1, 4 }
 0x30c   : > { %v5941_v31 = vsel %vm3047_vm1, %v17606_v45, %v17206_v33  ;;  %17607 = vst [vmem:[#allocation25_spill] sm:$0xff] %v14099_v8  ;;  %v5917_v45 = vsel %vm3047_vm1, %v17608_v46, %v17211_v34  ;;  %v14110_v9 = vpop.permute.xlu1 %5313  ;;  %v17213_v53 = vrot.slane %v14099_v8, 4  ;;  %v10546_v34 = vcombine.low %v4415_v36, %v4439_v38 }
 0x30d   : > { %10830 = vmatmul.mubr.msk.bf16.vlgmr.msra.gmra.mxu1 %vm9118_vm5, %v14095_v22  ;;  %v14108_v33 = vsel %vm5863_vm8, %v13559_v42, %v5941_v31  ;;  %17609 = vst [vmem:[#allocation37_spill] sm:$0xff] %v14110_v9  ;;  %v3985_v29 = vsel %vm3047_vm1, %v17610_v19, %v17212_v49  ;;  %v14120_v3 = vsel %vm5863_vm8, %v13566_v41, %v5917_v45  ;;  %v17220_v31 = vrot.slane %v14110_v9, 4  ;;  %v14131_v19 = vld [vmem:[#allocation2 + $0x30] sm:$0xff] }
 0x30e   : > { %9369 = vmatpush1.bf16.msra.mxu1 %v10570_v6  ;;  %9400 = vmatprep.mubr.bf16.mxu1 %v12849_v60  ;;  %v17611_v41 = vrot.slane %v13587_v18, 4  ;;  %v17612_v38 = vrot.slane %v13782_v23, 4  ;;  %v17613_v36 = vrot.slane %v13210_v14, 4  ;;  %v17614_v46 = vrot.slane %v13590_v54, 4 }
 0x30f   : > { %9370 = vmatprep.subr.bf16.mxu1 %v10547_v32  ;;  %3886 = vrot.lane.b32.xlu0 %v13951_v0, %s11466_s25  ;;  %v3025_v32 = vrot.slane %v13890_v2, 4  ;;  %v14141_v49 = vpop.permute.xlu0 %2903  ;;  %v3986_v17 = vsel %vm3955_vm4, %v13250_v1, %v3985_v29 }
 0x310   : > { %v5488_v45 = vsel %vm3047_vm1, %v17611_v41, %v17213_v53  ;;  %4263 = vrot.lane.b32.xlu1 %v14131_v19, %s11465_s24  ;;  %v3961_v6 = vsel %vm3047_vm1, %v17613_v36, %v17612_v38  ;;  %v5464_v42 = vsel %vm3047_vm1, %v17614_v46, %v17220_v31  ;;  %v17227_v53 = vrot.slane %v13923_v48, 4  ;;  %v2978_v8 = vpop.permute.xlu1 %2977 }
 0x311   : > { %v14155_v41 = vsel %vm5410_vm9, %v13587_v18, %v5488_v45  ;;  %v14162_v38 = vsel %vm5410_vm9, %v13590_v54, %v5464_v42  ;;  %v17615_v36 = vrot.slane %v13933_v7, 4  ;;  %v3038_v46 = vrot.slane %v2978_v8, 4  ;;  %v17616_v45 = vld [vmem:[#allocation42_spill] sm:$0xff] }
 0x312   : > { %9371 = vmatpush1.bf16.msra.mxu1 %v10546_v34  ;;  %v10714_v18 = vcombine.low %v14162_v38, %v14155_v41  ;;  %v10715_v34 = vcombine.high %v14162_v38, %v14155_v41  ;;  %v3962_v1 = vsel %vm3955_vm4, %v13210_v14, %v3961_v6  ;;  %v17617_v14 = vcombine.low %v14018_v15, %v14007_v59  ;;  %v11433_v59 = vld [vmem:[#allocation2 + $0x100] sm:$0xff] }
 0x313   : > { %v3105_v9 = vsel %vm3047_vm1, %v3025_v32, %v17615_v36  ;;  %9372 = vmatprep.subr.bf16.mxu1 %v10523_v52  ;;  %4289 = vrot.lane.b32.xlu0 %v17616_v45, %s11465_s24  ;;  %v3129_v54 = vsel %vm3047_vm1, %v3038_v46, %v17227_v53  ;;  %v14180_v29 = vpop.permute.xlu0 %3357  ;;  %v10499_v52 = vcombine.high %v3962_v1, %v3986_v17  ;;  %v17620_v31 = vrot.slane %v13081_v39, 4 }
 0x314   : > { %3808 = vrot.lane.b32.xlu1 %v13987_v62, %s11466_s25  ;;  %v14184_v42 = vsel %vm3049_vm7, %v13890_v2, %v3105_v9  ;;  %v14187_v36 = vsel %vm3049_vm7, %v2978_v8, %v3129_v54  ;;  %v14192_v6 = vpop.permute.xlu1 %2905  ;;  %v17619_v62 = vrot.slane %v13900_v11, 4  ;;  %v10498_v9 = vcombine.low %v3962_v1, %v3986_v17 }
 0x315   : > { %17618 = vst [vmem:[#allocation7_spill] sm:$0xff] %v14192_v6  ;;  %v17622_v54 = vrot.slane %v13666_v13, 4  ;;  %v17625_v1 = vcombine.high %v14071_v26, %v14058_v5 }
 0x316   : > { %9373 = vmatpush1.bf16.msra.mxu1 %v17617_v14  ;;  %v3532_v2 = vsel %vm3047_vm1, %v17620_v31, %v17619_v62  ;;  %v17626_v62 = vld [vmem:[#allocation39_spill] sm:$0xff] }
 0x317   : > { %9374 = vmatprep.subr.bf16.mxu1 %v10499_v52  ;;  %3834 = vrot.lane.b32.xlu0 %v14024_v21, %s11466_s25  ;;  %v14206_v8 = vpop.permute.xlu0 %2931  ;;  %v17623_v52 = vld [vmem:[#allocation27_spill] sm:$0xff]  ;;  %v3533_v17 = vsel %vm3502_vm6, %v13081_v39, %v3532_v2  ;;  %v17221_v21 = vrot.slane %v14192_v6, 4 }
 0x318   : > { %3862 = vrot.lane.b32.xlu1 %v11433_v59, %s11466_s25  ;;  %17621 = vst [vmem:[#allocation14_spill] sm:$0xff] %v14206_v8  ;;  %v17624_v11 = vrot.slane %v17623_v52, 4  ;;  %v14213_v31 = vpop.permute.xlu1 %3359  ;;  %v17627_v59 = vrot.slane %v17626_v62, 4 }
 0x31a   : > { %v3508_v14 = vsel %vm3047_vm1, %v17624_v11, %v17622_v54  ;;  %9375 = vmatpush1.bf16.msra.mxu1 %v10498_v9  ;;  %v3127_v13 = vsel %vm3047_vm1, %v17627_v59, %v3038_v46  ;;  %v17223_v54 = vrot.slane %v14141_v49, 4  ;;  %v17628_v11 = vld [vmem:[#allocation40_spill] sm:$0xff]  ;;  %v17630_v46 = vcombine.low %v14071_v26, %v14058_v5 }
 0x31b   : > { %9376 = vmatprep.subr.bf16.mxu1 %v17625_v1  ;;  %3888 = vrot.lane.b32.xlu0 %v17605_v30, %s11466_s25  ;;  %v3509_v9 = vsel %vm3502_vm6, %v17623_v52, %v3508_v14  ;;  %v14231_v39 = vpop.permute.xlu0 %2955  ;;  %v17629_v1 = vrot.slane %v17628_v11, 4  ;;  %v3128_v52 = vsel %vm3049_vm7, %v17626_v62, %v3127_v13  ;;  %v17222_v14 = vrot.slane %v14206_v8, 4  ;;  %v17632_v5 = vld [vmem:[#allocation28_spill] sm:$0xff] }
 0x31c   : > { %3407 = vrot.lane.b32.xlu1 %v14080_v44, %s11463_s19  ;;  %v10451_v2 = vcombine.high %v3509_v9, %v3533_v17  ;;  %v14239_v30 = vpop.permute.xlu1 %2929  ;;  %v3061_v44 = vsel %vm3047_vm1, %v17223_v54, %v17221_v21  ;;  %v17633_v26 = vrot.slane %v17632_v5, 4 }
 0x31d   : > { %v3103_v45 = vsel %vm3047_vm1, %v17629_v1, %v3025_v32  ;;  %v17224_v59 = vrot.slane %v14239_v30, 4  ;;  %v17631_v32 = vrot.slane %v13867_v55, 4 }
 0x31e   : > { %9377 = vmatpush1.bf16.msra.mxu1 %v17630_v46  ;;  %v10450_v46 = vcombine.low %v3509_v9, %v3533_v17  ;;  %v3104_v62 = vsel %vm3049_vm7, %v17628_v11, %v3103_v45  ;;  %v17635_v17 = vrot.slane %v13640_v56, 4  ;;  %v17636_v9 = vld [vmem:[#allocation26_spill] sm:$0xff]  ;;  %v14275_v45 = vsel %vm3049_vm7, %v14141_v49, %v3061_v44  ;;  %v3713_v44 = vld [vmem:[#allocation2 + $0x98] sm:$0xff] }
 0x31f   : > { %9378 = vmatprep.subr.bf16.mxu1 %v10451_v2  ;;  %v3079_v1 = vsel %vm3047_vm1, %v17633_v26, %v17631_v32  ;;  %3433 = vrot.lane.b32.xlu0 %v13951_v0, %s11463_s19  ;;  %v3085_v13 = vsel %vm3047_vm1, %v17224_v59, %v17222_v14  ;;  %v14266_v55 = vpop.permute.xlu0 %2983  ;;  %v10427_v2 = vcombine.high %v3104_v62, %v3128_v52  ;;  %v17637_v32 = vrot.slane %v17636_v9, 4  ;;  %v3286_v14 = vld [vmem:[#allocation2 + $0x168] sm:$0xff] }
 0x320   : > { %3810 = vrot.lane.b32.xlu1 %v14131_v19, %s11466_s25  ;;  %17634 = vst [vmem:[#allocation18_spill] sm:$0xff] %v14266_v55  ;;  %17638 = vst [vmem:[#allocation16_spill] sm:$0xff] %v14275_v45  ;;  %v14279_v11 = vsel %vm3049_vm7, %v14239_v30, %v3085_v13  ;;  %v14281_v26 = vpop.permute.xlu1 %2957  ;;  %v3080_v19 = vsel %vm3049_vm7, %v17632_v5, %v3079_v1  ;;  %v17229_v56 = vrot.slane %v13835_v57, 4  ;;  %v3273_v13 = vld [vmem:[#allocation2 + $0x100] sm:$0xff]  ;;  %v17230_v5 = vrot.slane %v13804_v58, 4 }
 0x321   : > { %v3055_v0 = vsel %vm3047_vm1, %v17637_v32, %v17635_v17  ;;  %17639 = vst [vmem:[#allocation12_spill] sm:$0xff] %v14279_v11  ;;  %17640 = vst [vmem:[#allocation32_spill] sm:$0xff] %v14281_v26  ;;  %v17225_v17 = vrot.slane %v14281_v26, 4  ;;  %v10426_v32 = vcombine.low %v3104_v62, %v3128_v52  ;;  %v17226_v1 = vrot.slane %v14231_v39, 4 }
 0x322   : > { %9379 = vmatpush1.bf16.msra.mxu1 %v10450_v46  ;;  %v3056_v46 = vsel %vm3049_vm7, %v17636_v9, %v3055_v0  ;;  %v17228_v62 = vrot.slane %v14266_v55, 4 }
 0x323   : > { %9380 = vmatprep.subr.bf16.mxu1 %v10427_v2  ;;  %3836 = vrot.lane.b32.xlu0 %v3713_v44, %s11466_s25  ;;  %v14297_v21 = vpop.permute.xlu0 %2907  ;;  %v10403_v2 = vcombine.high %v3056_v46, %v3080_v19  ;;  %v3109_v9 = vsel %vm3047_vm1, %v17226_v1, %v17225_v17  ;;  %v10402_v59 = vcombine.low %v3056_v46, %v3080_v19  ;;  %v17231_v46 = vrot.slane %v13860_v51, 4 }
 0x324   : > { %3409 = vrot.lane.b32.xlu1 %v3273_v13, %s11463_s19  ;;  %17641 = vst [vmem:[#allocation23_spill] sm:$0xff] %v14297_v21  ;;  %v14299_v52 = vpop.permute.xlu1 %2981  ;;  %v17642_v13 = vld [vmem:[#allocation34_spill] sm:$0xff] }
 0x325   : > { %v17239_v0 = vrot.slane %v14299_v52, 4  ;;  %v17643_v54 = vrot.slane %v17642_v13, 4 }
 0x326   : > { %9381 = vmatpush1.bf16.msra.mxu1 %v10426_v32 }
 0x327   : > { %9382 = vmatprep.subr.bf16.mxu1 %v10403_v2  ;;  %v5893_v32 = vsel %vm3047_vm1, %v17643_v54, %v17229_v56  ;;  %3435 = vrot.lane.b32.xlu0 %v3286_v14, %s11463_s19  ;;  %v3133_v15 = vsel %vm3047_vm1, %v17239_v0, %v17228_v62  ;;  %v14320_v17 = vpop.permute.xlu0 %3361  ;;  %v17645_v2 = vld [vmem:[#allocation31_spill] sm:$0xff]  ;;  %v14329_v54 = vsel %vm3049_vm7, %v14231_v39, %v3109_v9  ;;  %v17234_v9 = vrot.slane %v13839_v61, 4 }
 0x328   : > { %3383 = vrot.lane.b32.xlu1 %v3713_v44, %s11463_s19  ;;  %17644 = vst [vmem:[#allocation29_spill] sm:$0xff] %v14320_v17  ;;  %v17646_v1 = vrot.slane %v17645_v2, 4  ;;  %17647 = vst [vmem:[#allocation30_spill] sm:$0xff] %v14329_v54  ;;  %v14333_v14 = vsel %vm3049_vm7, %v14299_v52, %v3133_v15  ;;  %v14335_v19 = vpop.permute.xlu1 %2909  ;;  %v5894_v44 = vsel %vm5863_vm8, %v17642_v13, %v5893_v32 }
 0x329   : > { %17648 = vst [vmem:[#allocation41_spill] sm:$0xff] %v14333_v14  ;;  %17649 = vst [vmem:[#allocation44_spill] sm:$0xff] %v14335_v19  ;;  %v17232_v56 = vrot.slane %v14335_v19, 4  ;;  %v17704_v14 = vrot.slane %v13743_v43, 4 }
 0x32a   : > { %v5869_v53 = vsel %vm3047_vm1, %v17646_v1, %v17230_v5  ;;  %9383 = vmatpush1.bf16.msra.mxu1 %v10402_v59  ;;  %v17650_v1 = vcombine.high %v14120_v3, %v14108_v33  ;;  %v17233_v5 = vrot.slane %v14297_v21, 4 }
 0x32b   : > { %5768 = vrot.lane.b32.xlu0 %v13912_v10, %s11467_s27  ;;  %v5870_v15 = vsel %vm5863_vm8, %v17645_v2, %v5869_v53  ;;  %v14354_v13 = vpop.permute.xlu0 %2935  ;;  %v17654_v53 = vrot.slane %v17546_v50, 4 }
 0x32c   : > { %9384 = vmatprep.subr.bf16.mxu1 %v17650_v1  ;;  %5794 = vrot.lane.b32.xlu1 %v13937_v20, %s11467_s27  ;;  %17651 = vst [vmem:[#allocation42_spill] sm:$0xff] %v14354_v13  ;;  %v10739_v32 = vcombine.high %v5870_v15, %v5894_v44  ;;  %v17652_v1 = vcombine.low %v14120_v3, %v14108_v33  ;;  %v14359_v62 = vpop.permute.xlu1 %3363  ;;  %v17656_v33 = vrot.slane %v17552_v12, 4 }
 0x32d   : > { %17653 = vst [vmem:[#allocation27_spill] sm:$0xff] %v14359_v62  ;;  %v5440_v2 = vsel %vm3047_vm1, %v17654_v53, %v17231_v46  ;;  %v10738_v59 = vcombine.low %v5870_v15, %v5894_v44  ;;  %v17235_v15 = vrot.slane %v14354_v13, 4  ;;  %v3065_v53 = vsel %vm3047_vm1, %v17233_v5, %v17232_v56 }
 0x32e   : > { %9385 = vmatpush2.bf16.msra.mxu1 %v17652_v1  ;;  %v5441_v44 = vsel %vm5410_vm9, %v17546_v50, %v5440_v2  ;;  %v14397_v50 = vld [vmem:[#allocation2 + $0x16c] sm:$0xff]  ;;  %v14412_v5 = vsel %vm3049_vm7, %v14297_v21, %v3065_v53 }
 0x32f   : > { %9386 = vmatprep.subr.bf16.mxu1 %v10739_v32  ;;  %5716 = vrot.lane.b32.xlu0 %v13955_v27, %s11467_s27  ;;  %v14372_v3 = vpop.permute.xlu0 %2959  ;;  %v5416_v32 = vsel %vm3047_vm1, %v17656_v33, %v17234_v9  ;;  %17659 = vst [vmem:[#allocation26_spill] sm:$0xff] %v14412_v5 }
 0x330   : > { %5742 = vrot.lane.b32.xlu1 %v13983_v47, %s11467_s27  ;;  %17655 = vst [vmem:[#allocation39_spill] sm:$0xff] %v14372_v3  ;;  %v14379_v1 = vpop.permute.xlu1 %2933  ;;  %v5417_v2 = vsel %vm5410_vm9, %v17552_v12, %v5416_v32  ;;  %v14448_v32 = vld [vmem:[#allocation2 + $0x9c] sm:$0xff] }
 0x331   : > { %17657 = vst [vmem:[#allocation40_spill] sm:$0xff] %v14379_v1  ;;  %v17236_v46 = vrot.slane %v14379_v1, 4  ;;  %v10691_v56 = vcombine.high %v5417_v2, %v5441_v44 }
 0x332   : > { %9387 = vmatpush2.bf16.msra.mxu1 %v10738_v59  ;;  %v14393_v59 = vld [vmem:[#allocation2 + $0x104] sm:$0xff] }
 0x333   : > { %9388 = vmatprep.subr.bf16.mxu1 %v10715_v34  ;;  %5770 = vrot.lane.b32.xlu0 %v14393_v59, %s11467_s27  ;;  %v3089_v33 = vsel %vm3047_vm1, %v17236_v46, %v17235_v15  ;;  %v14408_v34 = vpop.permute.xlu0 %2987  ;;  %v10690_v46 = vcombine.low %v5417_v2, %v5441_v44  ;;  %v14444_v2 = vld [vmem:[#allocation2 + $0x34] sm:$0xff] }
 0x334   : > { %5796 = vrot.lane.b32.xlu1 %v14397_v50, %s11467_s27  ;;  %17658 = vst [vmem:[#allocation28_spill] sm:$0xff] %v14408_v34  ;;  %v14416_v9 = vsel %vm3049_vm7, %v14379_v1, %v3089_v33  ;;  %v14421_v12 = vpop.permute.xlu1 %2961  ;;  %v17238_v33 = vrot.slane %v14372_v3, 4  ;;  %v14700_v1 = vld [vmem:[#allocation2 + $0x38] sm:$0xff] }
 0x335   : > { %17660 = vst [vmem:[#allocation34_spill] sm:$0xff] %v14416_v9  ;;  %17661 = vst [vmem:[#allocation31_spill] sm:$0xff] %v14421_v12  ;;  %v17237_v15 = vrot.slane %v14421_v12, 4  ;;  %v17685_v12 = vrot.slane %v17565_v40, 4 }
 0x336   : > { %9389 = vmatpush2.bf16.msra.mxu1 %v10714_v18  ;;  %v17242_v18 = vrot.slane %v14408_v34, 4 }
 0x337   : > { %9390 = vmatprep.subr.bf16.mxu1 %v10691_v56  ;;  %5315 = vrot.lane.b32.xlu0 %v13912_v10, %s11468_s28  ;;  %v14433_v41 = vpop.permute.xlu0 %2911  ;;  %v3113_v56 = vsel %vm3047_vm1, %v17238_v33, %v17237_v15 }
 0x338   : > { %5341 = vrot.lane.b32.xlu1 %v13937_v20, %s11468_s28  ;;  %17662 = vst [vmem:[#allocation47_spill] sm:$0xff] %v14433_v41  ;;  %v14435_v38 = vpop.permute.xlu1 %2985  ;;  %v14461_v15 = vsel %vm3049_vm7, %v14372_v3, %v3113_v56 }
 0x339   : > { %17663 = vst [vmem:[#allocation48_spill] sm:$0xff] %v14435_v38  ;;  %v17243_v44 = vrot.slane %v14435_v38, 4  ;;  %17665 = vst [vmem:[#allocation50_spill] sm:$0xff] %v14461_v15 }
 0x33a   : > { %9391 = vmatpush2.bf16.msra.mxu1 %v10690_v46 }
 0x33b   : > { %5718 = vrot.lane.b32.xlu0 %v14444_v2, %s11467_s27  ;;  %v3137_v46 = vsel %vm3047_vm1, %v17243_v44, %v17242_v18  ;;  %v14457_v53 = vpop.permute.xlu0 %2915  ;;  %v17254_v18 = vrot.slane %v14433_v41, 4 }
 0x33c   : > { %5744 = vrot.lane.b32.xlu1 %v14448_v32, %s11467_s27  ;;  %17664 = vst [vmem:[#allocation49_spill] sm:$0xff] %v14457_v53  ;;  %v14465_v33 = vsel %vm3049_vm7, %v14435_v38, %v3137_v46  ;;  %v14467_v0 = vpop.permute.xlu1 %2913 }
 0x33d   : > { %17666 = vst [vmem:[#allocation51_spill] sm:$0xff] %v14465_v33  ;;  %17667 = vst [vmem:[#allocation52_spill] sm:$0xff] %v14467_v0  ;;  %v17253_v19 = vrot.slane %v14467_v0, 4 }
 0x33f   : > { %5263 = vrot.lane.b32.xlu0 %v13955_v27, %s11468_s28  ;;  %v14477_v56 = vpop.permute.xlu0 %3365 }
 0x340   : > { %5289 = vrot.lane.b32.xlu1 %v13983_v47, %s11468_s28  ;;  %17668 = vst [vmem:[#allocation53_spill] sm:$0xff] %v14477_v56  ;;  %v14479_v44 = vpop.permute.xlu1 %3367 }
 0x341   : > { %17669 = vst [vmem:[#allocation54_spill] sm:$0xff] %v14479_v44 }
 0x343   : > { %5317 = vrot.lane.b32.xlu0 %v14393_v59, %s11468_s28  ;;  %v14485_v46 = vpop.permute.xlu0 %3369 }
 0x344   : > { %5343 = vrot.lane.b32.xlu1 %v14397_v50, %s11468_s28  ;;  %17670 = vst [vmem:[#allocation55_spill] sm:$0xff] %v14485_v46  ;;  %v14488_v53 = vpop.permute.xlu1 %2937  ;;  %v3069_v46 = vsel %vm3047_vm1, %v17254_v18, %v17253_v19 }
 0x345   : > { %17671 = vst [vmem:[#allocation56_spill] sm:$0xff] %v14488_v53  ;;  %v17258_v13 = vrot.slane %v14488_v53, 4  ;;  %v14519_v0 = vsel %vm3049_vm7, %v14433_v41, %v3069_v46 }
 0x346   : > { %17675 = vst [vmem:[#allocation60_spill] sm:$0xff] %v14519_v0 }
 0x347   : > { %4862 = vrot.lane.b32.xlu0 %v13912_v10, %s11469_s29  ;;  %v14495_v44 = vpop.permute.xlu0 %2939 }
 0x348   : > { %4888 = vrot.lane.b32.xlu1 %v13937_v20, %s11469_s29  ;;  %17672 = vst [vmem:[#allocation57_spill] sm:$0xff] %v14495_v44  ;;  %v17257_v9 = vrot.slane %v14495_v44, 4  ;;  %v14499_v5 = vpop.permute.xlu1 %2941 }
 0x349   : > { %17673 = vst [vmem:[#allocation58_spill] sm:$0xff] %v14499_v5 }
 0x34a   : > { %v3093_v20 = vsel %vm3047_vm1, %v17258_v13, %v17257_v9 }
 0x34b   : > { %5265 = vrot.lane.b32.xlu0 %v14444_v2, %s11468_s28  ;;  %v14515_v10 = vpop.permute.xlu0 %2963  ;;  %v14523_v19 = vsel %vm3049_vm7, %v14488_v53, %v3093_v20 }
 0x34c   : > { %5291 = vrot.lane.b32.xlu1 %v14448_v32, %s11468_s28  ;;  %17674 = vst [vmem:[#allocation59_spill] sm:$0xff] %v14515_v10  ;;  %17676 = vst [vmem:[#allocation61_spill] sm:$0xff] %v14523_v19  ;;  %v14525_v18 = vpop.permute.xlu1 %2965  ;;  %v17266_v20 = vrot.slane %v14515_v10, 4 }
 0x34d   : > { %17677 = vst [vmem:[#allocation62_spill] sm:$0xff] %v14525_v18  ;;  %v17265_v13 = vrot.slane %v14525_v18, 4 }
 0x34f   : > { %4810 = vrot.lane.b32.xlu0 %v13955_v27, %s11469_s29  ;;  %v17681_v27 = vld [vmem:[#allocation35_spill] sm:$0xff] }
 0x350   : > { %4836 = vrot.lane.b32.xlu1 %v13983_v47, %s11469_s29  ;;  %v14535_v46 = vpop.permute.xlu0 %2967  ;;  %v4907_v9 = vrot.slane %v17681_v27, 4  ;;  %v3117_v47 = vsel %vm3047_vm1, %v17266_v20, %v17265_v13 }
 0x351   : > { %17678 = vst [vmem:[#allocation63_spill] sm:$0xff] %v14535_v46  ;;  %v14539_v5 = vpop.permute.xlu1 %2989  ;;  %v14568_v13 = vsel %vm3049_vm7, %v14515_v10, %v3117_v47 }
 0x352   : > { %17679 = vst [vmem:[#allocation64_spill] sm:$0xff] %v14539_v5  ;;  %v17276_v19 = vrot.slane %v14539_v5, 4  ;;  %17683 = vst [vmem:[#allocation66_spill] sm:$0xff] %v14568_v13  ;;  %v17688_v13 = vrot.slane %v13620_v25, 4 }
 0x353   : > { %4864 = vrot.lane.b32.xlu0 %v14393_v59, %s11469_s29 }
 0x354   : > { %4890 = vrot.lane.b32.xlu1 %v14397_v50, %s11469_s29  ;;  %v14545_v44 = vpop.permute.xlu0 %2991 }
 0x355   : > { %17680 = vst [vmem:[#allocation65_spill] sm:$0xff] %v14545_v44  ;;  %v17275_v0 = vrot.slane %v14545_v44, 4  ;;  %v14555_v46 = vpop.permute.xlu1 %2993  ;;  %v4961_v44 = vsel %vm3047_vm1, %v17685_v12, %v4907_v9 }
 0x356   : > { %17682 = vst [vmem:[#allocation35_spill] sm:$0xff] %v14555_v46  ;;  %v4962_v12 = vsel %vm4957_vm10, %v17565_v40, %v4961_v44  ;;  %v17689_v40 = vrot.slane %v13609_v24, 4 }
 0x357   : > { %4812 = vrot.lane.b32.xlu0 %v14444_v2, %s11469_s29  ;;  %v3141_v18 = vsel %vm3047_vm1, %v17276_v19, %v17275_v0 }
 0x358   : > { %4838 = vrot.lane.b32.xlu1 %v14448_v32, %s11469_s29  ;;  %v4833_v20 = vpop.permute.xlu0 %4832  ;;  %v14572_v46 = vsel %vm3049_vm7, %v14539_v5, %v3141_v18  ;;  %v17686_v18 = vrot.slane %v17557_v63, 4  ;;  %v17690_v5 = vld [vmem:[#allocation6_spill] sm:$0xff] }
 0x359   : > { %17684 = vst [vmem:[#allocation67_spill] sm:$0xff] %v14572_v46  ;;  %v4920_v41 = vrot.slane %v4833_v20, 4  ;;  %v14574_v53 = vpop.permute.xlu1 %4860 }
 0x35b   : > { %6223 = vrot.lane.b32.xlu0 %v14393_v59, %s11464_s20  ;;  %v4985_v19 = vsel %vm3047_vm1, %v17686_v18, %v4920_v41 }
 0x35c   : > { %6249 = vrot.lane.b32.xlu1 %v14397_v50, %s11464_s20  ;;  %v14591_v10 = vpop.permute.xlu0 %4886  ;;  %v4986_v33 = vsel %vm4957_vm10, %v17557_v63, %v4985_v19  ;;  %v17687_v50 = vrot.slane %v14574_v53, 4  ;;  %v10986_v63 = vld [vmem:[#allocation2 + $0xe8] ss:$104 sps:$4 sm:$0xff]  }
 0x35d   : > { %v17284_v0 = vrot.slane %v14591_v10, 4  ;;  %v14598_v47 = vpop.permute.xlu1 %4808  ;;  %v10640_v59 = vcombine.low %v4962_v12, %v4986_v33  ;;  %v10641_v46 = vcombine.high %v4962_v12, %v4986_v33 }
 0x35e   : > { %v5011_v18 = vsel %vm3047_vm1, %v17688_v13, %v17687_v50  ;;  %v17285_v15 = vrot.slane %v14598_v47, 4 }
 0x35f   : > { %6171 = vrot.lane.b32.xlu0 %v14444_v2, %s11464_s20  ;;  %9312 = vmatprep.subr.bf16.mxu0 %v10641_v46  ;;  %v5035_v19 = vsel %vm3047_vm1, %v17689_v40, %v17284_v0  ;;  %v5012_v13 = vsel %vm4957_vm10, %v13620_v25, %v5011_v18  ;;  %v14624_v46 = vld [vmem:[#allocation2 + $0x10c] sm:$0xff]  ;;  %v10989_v25 = vld [vmem:[#allocation2 + $0x18] ss:$104 sps:$4 sm:$0xff]  }
 0x360   : > { %6197 = vrot.lane.b32.xlu1 %v14448_v32, %s11464_s20  ;;  %9313 = vmatpush2.bf16.msra.mxu0 %v10640_v59  ;;  %v14615_v33 = vpop.permute.xlu0 %4834  ;;  %v5036_v44 = vsel %vm4957_vm10, %v13609_v24, %v5035_v19  ;;  %v4963_v59 = vsel %vm3047_vm1, %v4907_v9, %v17285_v15  ;;  %v10984_v0 = vld [vmem:[#allocation2 + $0xe4] ss:$104 sps:$4 sm:$0xff]   ;;  %v14632_v24 = vld [vmem:[#allocation2 + $0x174] sm:$0xff] }
 0x361   : > { %v17289_v2 = vrot.slane %v14615_v33, 4  ;;  %v14622_v32 = vpop.permute.xlu1 %6219  ;;  %9314 = vmatprep.subr.bf16.mxu0 %v10986_v63  ;;  %v10666_v12 = vcombine.low %v5012_v13, %v5036_v44  ;;  %v10667_v50 = vcombine.high %v5012_v13, %v5036_v44  ;;  %v4964_v9 = vsel %vm4957_vm10, %v17681_v27, %v4963_v59  ;;  %v10992_v27 = vld [vmem:[#allocation2 + $0xf0] ss:$104 sps:$4 sm:$0xff]  }
 0x362   : > { %v6293_v40 = vrot.slane %v14622_v32, 4  ;;  %v17692_v59 = vld [vmem:[#allocation45_spill] sm:$0xff] }
 0x363   : > { %6225 = vrot.lane.b32.xlu0 %v14624_v46, %s11464_s20  ;;  %9392 = vmatprep.subr.bf16.mxu1 %v10667_v50  ;;  %v4987_v18 = vsel %vm3047_vm1, %v4920_v41, %v17289_v2  ;;  %v14647_v50 = vld [vmem:[#allocation2 + $0x108] sm:$0xff]  ;;  %v17691_v41 = vrot.slane %v17690_v5, 4  ;;  %v10987_v2 = vld [vmem:[#allocation2 + $0x14] ss:$104 sps:$4 sm:$0xff]  }
 0x364   : > { %6251 = vrot.lane.b32.xlu1 %v14632_v24, %s11464_s20  ;;  %9315 = vmatpush2.bf16.msra.mxu0 %v10984_v0  ;;  %v14639_v63 = vpop.permute.xlu0 %6245  ;;  %v4988_v19 = vsel %vm4957_vm10, %v4833_v20, %v4987_v18  ;;  %v14655_v20 = vld [vmem:[#allocation2 + $0x170] sm:$0xff] }
 0x365   : > { %9393 = vmatpush2.bf16.msra.mxu1 %v10666_v12  ;;  %v6306_v13 = vrot.slane %v14639_v63, 4  ;;  %v14645_v44 = vpop.permute.xlu1 %6167  ;;  %9316 = vmatprep.subr.bf16.mxu0 %v10989_v25  ;;  %v10642_v15 = vcombine.low %v4964_v9, %v4988_v19  ;;  %v10643_v34 = vcombine.high %v4964_v9, %v4988_v19  ;;  %v6370_v0 = vsel %vm3047_vm1, %v17691_v41, %v6293_v40 }
 0x366   : > { %v17693_v25 = vrot.slane %v17692_v59, 4  ;;  %v6371_v19 = vsel %vm6316_vm2, %v17690_v5, %v6370_v0  ;;  %v10990_v0 = vld [vmem:[#allocation2 + $0xec] ss:$104 sps:$4 sm:$0xff]  }
 0x367   : > { %4317 = vrot.lane.b32.xlu0 %v14647_v50, %s11465_s24  ;;  %9394 = vmatprep.subr.bf16.mxu1 %v10643_v34  ;;  %v14671_v34 = vld [vmem:[#allocation2 + $0x3c] sm:$0xff] }
 0x368   : > { %4343 = vrot.lane.b32.xlu1 %v14655_v20, %s11465_s24  ;;  %v6394_v18 = vsel %vm3047_vm1, %v17693_v25, %v6306_v13  ;;  %9317 = vmatpush2.bf16.msra.mxu0 %v10987_v2  ;;  %v14662_v9 = vpop.permute.xlu0 %6193  ;;  %v17694_v2 = vrot.slane %v14645_v44, 4  ;;  %v17695_v25 = vld [vmem:[#allocation20_spill] sm:$0xff] }
 0x369   : > { %9395 = vmatpush2.bf16.msra.mxu1 %v10642_v15  ;;  %v6395_v41 = vsel %vm6316_vm2, %v17692_v59, %v6394_v18  ;;  %v17298_v12 = vrot.slane %v14662_v9, 4  ;;  %v14669_v56 = vpop.permute.xlu1 %6221  ;;  %v17696_v21 = vrot.slane %v17695_v25, 4  ;;  %v14681_v59 = vld [vmem:[#allocation2 + $0xa4] sm:$0xff] }
 0x36a   : > { %9396 = vmatprep.subr.bf16.mxu1 %v10992_v27  ;;  %v10810_v62 = vcombine.low %v6371_v19, %v6395_v41  ;;  %v10811_v6 = vcombine.high %v6371_v19, %v6395_v41  ;;  %v10995_v27 = vld [vmem:[#allocation2 + $0x20] ss:$104 sps:$4 sm:$0xff]   ;;  %v17699_v11 = vrot.slane %v14669_v56, 4 }
 0x36b   : > { %v6322_v15 = vsel %vm3047_vm1, %v17696_v21, %v17694_v2  ;;  %6173 = vrot.lane.b32.xlu0 %v14671_v34, %s11464_s20  ;;  %v17697_v18 = vld [vmem:[#allocation10_spill] sm:$0xff]  ;;  %9319 = vmatmul.mubr.bf16.vlgmr.msra.gmra.mxu0 %v17584_v37 }
 0x36c   : > { %6199 = vrot.lane.b32.xlu1 %v14681_v59, %s11464_s20  ;;  %9421 = vmatprep.subr.bf16.mxu0 %v10811_v6  ;;  %v17698_v19 = vrot.slane %v17697_v18, 4  ;;  %v14691_v21 = vpop.permute.xlu0 %6247  ;;  %v6323_v2 = vsel %vm6316_vm2, %v17695_v25, %v6322_v15  ;;  %v10993_v25 = vld [vmem:[#allocation2 + $0x1c] ss:$104 sps:$4 sm:$0xff]  }
 0x36d   : > { %9397 = vmatpush2.bf16.msra.mxu1 %v10990_v0  ;;  %v17303_v6 = vrot.slane %v14691_v21, 4  ;;  %9422 = vmatpush1.bf16.msra.mxu0 %v10810_v62  ;;  %v14698_v8 = vpop.permute.xlu1 %4313  ;;  %v6372_v0 = vsel %vm3047_vm1, %v6293_v40, %v17699_v11  ;;  %v14708_v15 = vld [vmem:[#allocation2 + $0xa0] sm:$0xff] }
 0x36e   : > { %v6346_v41 = vsel %vm3047_vm1, %v17698_v19, %v17298_v12  ;;  %9398 = vmatprep.subr.bf16.mxu1 %v10995_v27  ;;  %v17304_v45 = vrot.slane %v14698_v8, 4  ;;  %9441 = vmatprep.mubr.bf16.mxu0 %v17589_v35  ;;  %v6373_v11 = vsel %vm6316_vm2, %v14622_v32, %v6372_v0  ;;  %v17708_v38 = vrot.slane %v14698_v8, 4 }
 0x36f   : > { %v6347_v5 = vsel %vm6316_vm2, %v17697_v18, %v6346_v41  ;;  %4265 = vrot.lane.b32.xlu0 %v14700_v1, %s11465_s24  ;;  %v6396_v62 = vsel %vm3047_vm1, %v6306_v13, %v17303_v6  ;;  %v14725_v41 = vld [vmem:[#allocation2 + $0x110] sm:$0xff]  ;;  %v17700_v13 = vrot.slane %v13947_v4, 4 }
 0x370   : > { %v10786_v19 = vcombine.low %v6323_v2, %v6347_v5  ;;  %v10787_v12 = vcombine.high %v6323_v2, %v6347_v5  ;;  %4291 = vrot.lane.b32.xlu1 %v14708_v15, %s11465_s24  ;;  %v14716_v5 = vpop.permute.xlu0 %4339  ;;  %v6397_v40 = vsel %vm6316_vm2, %v14639_v63, %v6396_v62  ;;  %v14735_v63 = vld [vmem:[#allocation2 + $0x178] sm:$0xff] }
 0x371   : > { %9399 = vmatpush2.bf16.msra.mxu1 %v10993_v25  ;;  %v4399_v27 = vrot.slane %v14716_v5, 4  ;;  %v14723_v18 = vpop.permute.xlu1 %6169  ;;  %v10813_v2 = vcombine.high %v6373_v11, %v6397_v40  ;;  %v4464_v25 = vsel %vm3047_vm1, %v17700_v13, %v17304_v45  ;;  %v17702_v45 = vrot.slane %v14645_v44, 4 }
 0x372   : > { %9423 = vmatprep.subr.bf16.mxu0 %v10787_v12  ;;  %v10812_v12 = vcombine.low %v6373_v11, %v6397_v40  ;;  %v17307_v32 = vrot.slane %v14723_v18, 4  ;;  %v4465_v11 = vsel %vm4408_vm3, %v13947_v4, %v4464_v25 }
 0x373   : > { %9424 = vmatpush1.bf16.msra.mxu0 %v10786_v19  ;;  %4319 = vrot.lane.b32.xlu0 %v14725_v41, %s11465_s24  ;;  %v17701_v19 = vrot.slane %v13945_v16, 4 }
 0x374   : > { %4345 = vrot.lane.b32.xlu1 %v14735_v63, %s11465_s24  ;;  %9503 = vmatprep.subr.bf16.mxu1 %v10813_v2  ;;  %v14742_v62 = vpop.permute.xlu0 %6195  ;;  %v6324_v26 = vsel %vm3047_vm1, %v17702_v45, %v17307_v32 }
 0x375   : > { %v4488_v0 = vsel %vm3047_vm1, %v17701_v19, %v4399_v27  ;;  %9401 = vmatmul.mubr.bf16.vlgmr.msra.gmra.mxu1 %v17584_v37  ;;  %v17311_v13 = vrot.slane %v14742_v62, 4  ;;  %v14752_v2 = vpop.permute.xlu1 %4261  ;;  %v6325_v25 = vsel %vm6316_vm2, %v14645_v44, %v6324_v26  ;;  %v14788_v26 = vld [vmem:[#allocation2 + $0xa8] sm:$0xff] }
 0x376   : > { %v4489_v40 = vsel %vm4408_vm3, %v13945_v16, %v4488_v0  ;;  %10831 = vmatmul.mubr.msk.bf16.vlgmr.msra.gmra.mxu0 %vm9118_vm5, %v14095_v22  ;;  %9504 = vmatpush1.bf16.msra.mxu1 %v10812_v12  ;;  %v4360_v4 = vrot.slane %v14752_v2, 4  ;;  %v17703_v16 = vrot.slane %v14662_v9, 4  ;;  %v17705_v44 = vld [vmem:[#allocation19_spill] sm:$0xff] }
 0x377   : > { %v10572_v6 = vcombine.low %v4465_v11, %v4489_v40  ;;  %v10573_v19 = vcombine.high %v4465_v11, %v4489_v40  ;;  %9523 = vmatprep.mubr.bf16.mxu1 %v17589_v35  ;;  %3864 = vrot.lane.b32.xlu0 %v14647_v50, %s11466_s25 }
 0x378   : > { %9482 = vmatprep.mubr.bf16.mxu0 %v12849_v60  ;;  %3890 = vrot.lane.b32.xlu1 %v14655_v20, %s11466_s25  ;;  %v6348_v12 = vsel %vm3047_vm1, %v17703_v16, %v17311_v13  ;;  %v14771_v45 = vpop.permute.xlu0 %4287  ;;  %v4416_v16 = vsel %vm3047_vm1, %v17704_v14, %v4360_v4 }
 0x379   : > { %9450 = vmatprep.subr.bf16.mxu0 %v10573_v19  ;;  %v6349_v0 = vsel %vm6316_vm2, %v14662_v9, %v6348_v12  ;;  %v4373_v11 = vrot.slane %v14771_v45, 4  ;;  %v14778_v40 = vpop.permute.xlu1 %4315  ;;  %v14780_v19 = vld [vmem:[#allocation2 + $0x40] sm:$0xff]  ;;  %v17706_v9 = vrot.slane %v17705_v44, 4  ;;  %v4417_v14 = vsel %vm4408_vm3, %v13743_v43, %v4416_v16 }
 0x37a   : > { %9451 = vmatpush1.bf16.msra.mxu0 %v10572_v6  ;;  %v10788_v32 = vcombine.low %v6325_v25, %v6349_v0  ;;  %v10789_v3 = vcombine.high %v6325_v25, %v6349_v0 }
 0x37b   : > { %4267 = vrot.lane.b32.xlu0 %v14780_v19, %s11465_s24  ;;  %v4440_v12 = vsel %vm3047_vm1, %v17706_v9, %v4373_v11 }
 0x37c   : > { %4293 = vrot.lane.b32.xlu1 %v14788_v26, %s11465_s24  ;;  %9505 = vmatprep.subr.bf16.mxu1 %v10789_v3  ;;  %v14795_v25 = vpop.permute.xlu0 %4341  ;;  %v4441_v0 = vsel %vm4408_vm3, %v17705_v44, %v4440_v12  ;;  %v17707_v3 = vrot.slane %v14778_v40, 4 }
 0x37d   : > { %9506 = vmatpush1.bf16.msra.mxu1 %v10788_v32  ;;  %v17317_v13 = vrot.slane %v14795_v25, 4  ;;  %v14802_v6 = vpop.permute.xlu1 %3860  ;;  %v10548_v54 = vcombine.low %v4417_v14, %v4441_v0  ;;  %v10549_v55 = vcombine.high %v4417_v14, %v4441_v0  ;;  %v17709_v0 = vld [vmem:[#allocation33_spill] sm:$0xff] }
 0x37e   : > { %v4466_v9 = vsel %vm3047_vm1, %v17708_v38, %v17707_v3  ;;  %v3933_v32 = vrot.slane %v14802_v6, 4  ;;  %v17710_v3 = vrot.slane %v17709_v0, 4 }
 0x37f   : > { %3812 = vrot.lane.b32.xlu0 %v14700_v1, %s11466_s25  ;;  %9452 = vmatprep.subr.bf16.mxu0 %v10549_v55  ;;  %v4490_v43 = vsel %vm3047_vm1, %v4399_v27, %v17317_v13  ;;  %v4467_v44 = vsel %vm4408_vm3, %v14698_v8, %v4466_v9 }
 0x380   : > { %3838 = vrot.lane.b32.xlu1 %v14708_v15, %s11466_s25  ;;  %9453 = vmatpush1.bf16.msra.mxu0 %v10548_v54  ;;  %v4491_v38 = vsel %vm4408_vm3, %v14716_v5, %v4490_v43  ;;  %v4011_v27 = vsel %vm3047_vm1, %v17710_v3, %v3933_v32 }
 0x381   : > { %v3887_v16 = vpop.permute.xlu0 %3886  ;;  %10832 = vmatmul.mubr.msk.bf16.vlgmr.msra.gmra.mxu1 %vm9118_vm5, %v14095_v22  ;;  %v10574_v14 = vcombine.low %v4467_v44, %v4491_v38  ;;  %v10575_v55 = vcombine.high %v4467_v44, %v4491_v38  ;;  %v17711_v22 = vld [vmem:[#allocation17_spill] sm:$0xff]  ;;  %v4012_v43 = vsel %vm3955_vm4, %v17709_v0, %v4011_v27 }
 0x382   : > { %v3946_v1 = vrot.slane %v3887_v16, 4  ;;  %v14823_v12 = vpop.permute.xlu1 %4263  ;;  %9564 = vmatprep.mubr.bf16.mxu1 %v12849_v60  ;;  %v17712_v8 = vrot.slane %v17711_v22, 4 }
 0x383   : > { %3866 = vrot.lane.b32.xlu0 %v14725_v41, %s11466_s25  ;;  %9532 = vmatprep.subr.bf16.mxu1 %v10575_v55  ;;  %v17713_v55 = vrot.slane %v14823_v12, 4 }
 0x384   : > { %3892 = vrot.lane.b32.xlu1 %v14735_v63, %s11466_s25  ;;  %v4035_v5 = vsel %vm3047_vm1, %v17712_v8, %v3946_v1  ;;  %9533 = vmatpush1.bf16.msra.mxu1 %v10574_v14 }
 0x385   : > { %v14837_v9 = vpop.permute.xlu0 %4289  ;;  %v4036_v44 = vsel %vm3955_vm4, %v17711_v22, %v4035_v5  ;;  %v4418_v17 = vsel %vm3047_vm1, %v4360_v4, %v17713_v55 }
 0x386   : > { %v17327_v38 = vrot.slane %v14837_v9, 4  ;;  %v14844_v3 = vpop.permute.xlu1 %3808  ;;  %v10524_v13 = vcombine.low %v4012_v43, %v4036_v44  ;;  %v10525_v54 = vcombine.high %v4012_v43, %v4036_v44  ;;  %v4419_v27 = vsel %vm4408_vm3, %v14752_v2, %v4418_v17 }
 0x387   : > { %v3907_v8 = vrot.slane %v14844_v3, 4  ;;  %3411 = vrot.lane.b32.xlu0 %v14647_v50, %s11463_s19  ;;  %v17715_v17 = vrot.slane %v13802_v28, 4 }
 0x388   : > { %3437 = vrot.lane.b32.xlu1 %v14655_v20, %s11463_s19  ;;  %9454 = vmatprep.subr.bf16.mxu0 %v10525_v54  ;;  %v4442_v14 = vsel %vm3047_vm1, %v4373_v11, %v17327_v38  ;;  %v17714_v20 = vrot.slane %v13782_v23, 4 }
 0x389   : > { %v3835_v0 = vpop.permute.xlu0 %3834  ;;  %9455 = vmatpush1.bf16.msra.mxu0 %v10524_v13  ;;  %v4443_v4 = vsel %vm4408_vm3, %v14771_v45, %v4442_v14 }
 0x38a   : > { %v3920_v22 = vrot.slane %v3835_v0, 4  ;;  %v14861_v5 = vpop.permute.xlu1 %3862  ;;  %v10550_v50 = vcombine.low %v4419_v27, %v4443_v4  ;;  %v10551_v43 = vcombine.high %v4419_v27, %v4443_v4  ;;  %v3963_v54 = vsel %vm3047_vm1, %v17714_v20, %v3907_v8 }
 0x38b   : > { %v17326_v44 = vrot.slane %v14861_v5, 4  ;;  %3814 = vrot.lane.b32.xlu0 %v14780_v19, %s11466_s25  ;;  %v3964_v45 = vsel %vm3955_vm4, %v13782_v23, %v3963_v54 }
 0x38c   : > { %3840 = vrot.lane.b32.xlu1 %v14788_v26, %s11466_s25  ;;  %9534 = vmatprep.subr.bf16.mxu1 %v10551_v43  ;;  %v3987_v13 = vsel %vm3047_vm1, %v17715_v17, %v3920_v22 }
 0x38d   : > { %v14874_v2 = vpop.permute.xlu0 %3888  ;;  %9535 = vmatpush1.bf16.msra.mxu1 %v10550_v50  ;;  %v3988_v11 = vsel %vm3955_vm4, %v13802_v28, %v3987_v13  ;;  %v4013_v4 = vsel %vm3047_vm1, %v3933_v32, %v17326_v44  ;;  %v17716_v13 = vld [vmem:[#allocation38_spill] sm:$0xff]  ;;  %v17739_v44 = vld [vmem:[#allocation21_spill] sm:$0xff] }
 0x38e   : > { %v17325_v55 = vrot.slane %v14874_v2, 4  ;;  %v3408_v19 = vpop.permute.xlu1 %3407  ;;  %v10500_v14 = vcombine.low %v3964_v45, %v3988_v11  ;;  %v10501_v27 = vcombine.high %v3964_v45, %v3988_v11  ;;  %v4014_v50 = vsel %vm3955_vm4, %v14802_v6, %v4013_v4  ;;  %v17718_v6 = vld [vmem:[#allocation43_spill] sm:$0xff] }
 0x38f   : > { %v3480_v43 = vrot.slane %v3408_v19, 4  ;;  %3385 = vrot.lane.b32.xlu0 %v14708_v15, %s11463_s19  ;;  %v17717_v45 = vrot.slane %v17716_v13, 4 }
 0x390   : > { %3413 = vrot.lane.b32.xlu1 %v14725_v41, %s11463_s19  ;;  %9456 = vmatprep.subr.bf16.mxu0 %v10501_v27  ;;  %v4037_v23 = vsel %vm3047_vm1, %v3946_v1, %v17325_v55 }
 0x391   : > { %v3434_v28 = vpop.permute.xlu0 %3433  ;;  %9457 = vmatpush1.bf16.msra.mxu0 %v10500_v14  ;;  %v4038_v20 = vsel %vm3955_vm4, %v3887_v16, %v4037_v23  ;;  %v3558_v41 = vsel %vm3047_vm1, %v17717_v45, %v3480_v43  ;;  %v17719_v16 = vrot.slane %v17718_v6, 4 }
 0x392   : > { %v3493_v32 = vrot.slane %v3434_v28, 4  ;;  %v14894_v54 = vpop.permute.xlu1 %3810  ;;  %v10526_v17 = vcombine.low %v4014_v50, %v4038_v20  ;;  %v10527_v15 = vcombine.high %v4014_v50, %v4038_v20  ;;  %v3559_v27 = vsel %vm3502_vm6, %v17716_v13, %v3558_v41 }
 0x393   : > { %v17319_v11 = vrot.slane %v14894_v54, 4  ;;  %3439 = vrot.lane.b32.xlu0 %v14735_v63, %s11463_s19 }
 0x394   : > { %3387 = vrot.lane.b32.xlu1 %v14788_v26, %s11463_s19  ;;  %9536 = vmatprep.subr.bf16.mxu1 %v10527_v15  ;;  %v3582_v1 = vsel %vm3047_vm1, %v17719_v16, %v3493_v32 }
 0x395   : > { %v14907_v14 = vpop.permute.xlu0 %3836  ;;  %9537 = vmatpush1.bf16.msra.mxu1 %v10526_v17  ;;  %v3583_v4 = vsel %vm3502_vm6, %v17718_v6, %v3582_v1  ;;  %v3965_v20 = vsel %vm3047_vm1, %v3907_v8, %v17319_v11  ;;  %v17321_v17 = vrot.slane %v14180_v29, 4  ;;  %v17720_v1 = vld [vmem:[#allocation24_spill] sm:$0xff] }
 0x396   : > { %v17324_v23 = vrot.slane %v14907_v14, 4  ;;  %v14914_v63 = vpop.permute.xlu1 %3409  ;;  %v10476_v50 = vcombine.low %v3559_v27, %v3583_v4  ;;  %v10477_v26 = vcombine.high %v3559_v27, %v3583_v4  ;;  %v3966_v8 = vsel %vm3955_vm4, %v14844_v3, %v3965_v20  ;;  %v17721_v27 = vld [vmem:[#allocation36_spill] sm:$0xff] }
 0x397   : > { %v17322_v15 = vrot.slane %v14914_v63, 4  ;;  %5772 = vrot.lane.b32.xlu0 %v14624_v46, %s11467_s27  ;;  %v17722_v4 = vcombine.high %v17720_v1, %v17721_v27 }
 0x398   : > { %5798 = vrot.lane.b32.xlu1 %v14632_v24, %s11467_s27  ;;  %9458 = vmatprep.subr.bf16.mxu0 %v10477_v26  ;;  %v3989_v13 = vsel %vm3047_vm1, %v3920_v22, %v17324_v23 }
 0x399   : > { %v14928_v45 = vpop.permute.xlu0 %3435  ;;  %9459 = vmatpush1.bf16.msra.mxu0 %v10476_v50  ;;  %v3990_v41 = vsel %vm3955_vm4, %v3835_v0, %v3989_v13  ;;  %v3560_v22 = vsel %vm3047_vm1, %v3480_v43, %v17322_v15  ;;  %v17723_v0 = vld [vmem:[#allocation9_spill] sm:$0xff]  ;;  %v17725_v43 = vrot.slane %v14299_v52, 4 }
 0x39a   : > { %v17320_v6 = vrot.slane %v14928_v45, 4  ;;  %v14934_v16 = vpop.permute.xlu1 %3383  ;;  %9460 = vmatprep.subr.bf16.mxu0 %v17722_v4  ;;  %v10502_v26 = vcombine.low %v3966_v8, %v3990_v41  ;;  %v10503_v11 = vcombine.high %v3966_v8, %v3990_v41  ;;  %v17724_v20 = vrot.slane %v17723_v0, 4 }
 0x39b   : > { %v17323_v50 = vrot.slane %v14934_v16, 4  ;;  %5720 = vrot.lane.b32.xlu0 %v14671_v34, %s11467_s27  ;;  %v17726_v8 = vrot.slane %v13923_v48, 4 }
 0x39c   : > { %5746 = vrot.lane.b32.xlu1 %v14681_v59, %s11467_s27  ;;  %9538 = vmatprep.subr.bf16.mxu1 %v10503_v11  ;;  %v3584_v3 = vsel %vm3047_vm1, %v3493_v32, %v17320_v6  ;;  %v3512_v13 = vsel %vm3047_vm1, %v17724_v20, %v17321_v17  ;;  %v17727_v11 = vcombine.low %v17720_v1, %v17721_v27  ;;  %v17728_v20 = vld [vmem:[#allocation15_spill] sm:$0xff]  ;;  %v14978_v1 = vld [vmem:[#allocation2 + $0x114] sm:$0xff] }
 0x39d   : > { %v3131_v41 = vsel %vm3047_vm1, %v17726_v8, %v17725_v43  ;;  %v14960_v4 = vpop.permute.xlu0 %5768  ;;  %9539 = vmatpush1.bf16.msra.mxu1 %v10502_v26  ;;  %v3561_v32 = vsel %vm3502_vm6, %v3408_v19, %v3560_v22  ;;  %v3585_v6 = vsel %vm3502_vm6, %v3434_v28, %v3584_v3  ;;  %v17729_v17 = vrot.slane %v17728_v20, 4 }
 0x39e   : > { %9461 = vmatpush1.bf16.msra.mxu0 %v17727_v11  ;;  %v5841_v15 = vrot.slane %v14960_v4, 4  ;;  %v14973_v43 = vpop.permute.xlu1 %5794  ;;  %v17730_v8 = vcombine.high %v14184_v42, %v14187_v36  ;;  %v10478_v27 = vcombine.low %v3561_v32, %v3585_v6  ;;  %v10479_v19 = vcombine.high %v3561_v32, %v3585_v6  ;;  %v17731_v11 = vld [vmem:[#allocation22_spill] sm:$0xff] }
 0x39f   : > { %v3536_v52 = vsel %vm3047_vm1, %v17729_v17, %v17323_v50  ;;  %v5854_v26 = vrot.slane %v14973_v43, 4  ;;  %5774 = vrot.lane.b32.xlu0 %v14978_v1, %s11467_s27  ;;  %v14985_v17 = vld [vmem:[#allocation2 + $0x17c] sm:$0xff]  ;;  %v3513_v22 = vsel %vm3502_vm6, %v17723_v0, %v3512_v13  ;;  %v17732_v6 = vrot.slane %v17731_v11, 4 }
 0x3a0   : > { %9462 = vmatprep.subr.bf16.mxu0 %v17730_v8  ;;  %v3537_v28 = vsel %vm3502_vm6, %v17728_v20, %v3536_v52  ;;  %5800 = vrot.lane.b32.xlu1 %v14985_v17, %s11467_s27  ;;  %v17733_v20 = vrot.slane %v14231_v39, 4  ;;  %v17734_v52 = vrot.slane %v13933_v7, 4  ;;  %v17735_v0 = vcombine.low %v14184_v42, %v14187_v36 }
 0x3a1   : > { %9540 = vmatprep.subr.bf16.mxu1 %v10479_v19  ;;  %v10455_v3 = vcombine.high %v3513_v22, %v3537_v28  ;;  %v5919_v32 = vsel %vm3047_vm1, %v17732_v6, %v5841_v15  ;;  %v14999_v50 = vpop.permute.xlu0 %5716  ;;  %v17736_v19 = vld [vmem:[#allocation8_spill] sm:$0xff]  ;;  %v3132_v39 = vsel %vm3049_vm7, %v13923_v48, %v3131_v41  ;;  %v17741_v36 = vrot.slane %v14239_v30, 4 }
 0x3a2   : > { %v3107_v8 = vsel %vm3047_vm1, %v17734_v52, %v17733_v20  ;;  %9463 = vmatpush1.bf16.msra.mxu0 %v17735_v0  ;;  %9541 = vmatpush1.bf16.msra.mxu1 %v10478_v27  ;;  %v5920_v13 = vsel %vm5863_vm8, %v17731_v11, %v5919_v32  ;;  %v17737_v23 = vrot.slane %v17736_v19, 4  ;;  %v5815_v55 = vrot.slane %v14999_v50, 4  ;;  %v15012_v20 = vpop.permute.xlu1 %5742  ;;  %v17738_v52 = vld [vmem:[#allocation11_spill] sm:$0xff]  ;;  %v17742_v27 = vld [vmem:[#allocation13_spill] sm:$0xff] }
 0x3a3   : > { %v17740_v38 = vcombine.high %v17738_v52, %v17739_v44  ;;  %9542 = vmatprep.subr.bf16.mxu1 %v10455_v3  ;;  %v17743_v11 = vrot.slane %v17742_v27, 4  ;;  %v5828_v48 = vrot.slane %v15012_v20, 4  ;;  %v10454_v41 = vcombine.low %v3513_v22, %v3537_v28  ;;  %5319 = vrot.lane.b32.xlu0 %v14624_v46, %s11468_s28  ;;  %v17746_v28 = vld [vmem:[#allocation46_spill] sm:$0xff] }
 0x3a4   : > { %v5943_v6 = vsel %vm3047_vm1, %v17737_v23, %v5854_v26  ;;  %v3108_v32 = vsel %vm3049_vm7, %v13933_v7, %v3107_v8  ;;  %5345 = vrot.lane.b32.xlu1 %v14632_v24, %s11468_s28  ;;  %v17744_v30 = vrot.slane %v13804_v58, 4  ;;  %v17747_v22 = vrot.slane %v17746_v28, 4 }
 0x3a5   : > { %9464 = vmatprep.subr.bf16.mxu0 %v17740_v38  ;;  %v5944_v42 = vsel %vm5863_vm8, %v17736_v19, %v5943_v6  ;;  %v3083_v23 = vsel %vm3047_vm1, %v17743_v11, %v17741_v36  ;;  %v10431_v3 = vcombine.high %v3108_v32, %v3132_v39  ;;  %v17745_v19 = vrot.slane %v14141_v49, 4  ;;  %v15041_v36 = vpop.permute.xlu0 %5770 }
 0x3a6   : > { %v10765_v38 = vcombine.high %v5920_v13, %v5944_v42  ;;  %v5871_v0 = vsel %vm3047_vm1, %v17744_v30, %v5815_v55  ;;  %v17748_v7 = vcombine.low %v17738_v52, %v17739_v44  ;;  %9543 = vmatpush1.bf16.msra.mxu1 %v10454_v41  ;;  %v17749_v11 = vrot.slane %v13835_v57, 4  ;;  %v15058_v44 = vld [vmem:[#allocation2 + $0x44] sm:$0xff] }
 0x3a7   : > { %v3059_v6 = vsel %vm3047_vm1, %v17747_v22, %v17745_v19  ;;  %v5872_v8 = vsel %vm5863_vm8, %v13804_v58, %v5871_v0  ;;  %v3084_v30 = vsel %vm3049_vm7, %v17742_v27, %v3083_v23  ;;  %v17343_v19 = vrot.slane %v15041_v36, 4  ;;  %v15056_v22 = vpop.permute.xlu1 %5796  ;;  %9544 = vmatprep.subr.bf16.mxu1 %v10431_v3  ;;  %5722 = vrot.lane.b32.xlu0 %v15058_v44, %s11467_s27 }
 0x3a8   : > { %9465 = vmatpush1.bf16.msra.mxu0 %v17748_v7  ;;  %v5895_v49 = vsel %vm3047_vm1, %v17749_v11, %v5828_v48  ;;  %v17342_v52 = vrot.slane %v15056_v22, 4  ;;  %v10764_v41 = vcombine.low %v5920_v13, %v5944_v42  ;;  %v10430_v0 = vcombine.low %v3108_v32, %v3132_v39  ;;  %v15065_v7 = vld [vmem:[#allocation2 + $0xac] sm:$0xff] }
 0x3a9   : > { %9466 = vmatprep.subr.bf16.mxu0 %v10765_v38  ;;  %v5896_v58 = vsel %vm5863_vm8, %v13835_v57, %v5895_v49  ;;  %v3060_v27 = vsel %vm3049_vm7, %v17746_v28, %v3059_v6  ;;  %5748 = vrot.lane.b32.xlu1 %v15065_v7, %s11467_s27  ;;  %v5921_v57 = vsel %vm3047_vm1, %v5841_v15, %v17343_v19  ;;  %v15074_v3 = vpop.permute.xlu0 %5315 }
 0x3aa   : > { %v10741_v23 = vcombine.high %v5872_v8, %v5896_v58  ;;  %v10407_v38 = vcombine.high %v3060_v27, %v3084_v30  ;;  %9545 = vmatpush1.bf16.msra.mxu1 %v10430_v0  ;;  %v5922_v13 = vsel %vm5863_vm8, %v14960_v4, %v5921_v57  ;;  %v5945_v39 = vsel %vm3047_vm1, %v5854_v26, %v17342_v52  ;;  %v17750_v26 = vld [vmem:[#allocation37_spill] sm:$0xff]  ;;  %v15414_v52 = vld [vmem:[#allocation2 + $0x50] sm:$0xff] }
 0x3ab   : > { %v5388_v42 = vrot.slane %v15074_v3, 4  ;;  %v15082_v32 = vpop.permute.xlu1 %5341  ;;  %v5946_v15 = vsel %vm5863_vm8, %v14973_v43, %v5945_v39  ;;  %v10740_v6 = vcombine.low %v5872_v8, %v5896_v58  ;;  %v10406_v11 = vcombine.low %v3060_v27, %v3084_v30  ;;  %5267 = vrot.lane.b32.xlu0 %v14671_v34, %s11468_s28  ;;  %v17752_v8 = vld [vmem:[#allocation25_spill] sm:$0xff]  ;;  %v15101_v27 = vpop.f32.mrf.mxu1 }
 0x3ac   : > { %9467 = vmatpush2.bf16.msra.mxu0 %v10764_v41  ;;  %9546 = vmatprep.subr.bf16.mxu1 %v10407_v38  ;;  %v5401_v28 = vrot.slane %v15082_v32, 4  ;;  %v10767_v4 = vcombine.high %v5922_v13, %v5946_v15  ;;  %v17751_v49 = vrot.slane %v17750_v26, 4  ;;  %v17753_v30 = vrot.slane %v17752_v8, 4  ;;  %17754 = vst [vmem:[#allocation6_spill] sm:$0xff] %v15101_v27 }
 0x3ad   : > { %9468 = vmatprep.subr.bf16.mxu0 %v10741_v23  ;;  %5293 = vrot.lane.b32.xlu1 %v14681_v59, %s11468_s28  ;;  %v15094_v0 = vpop.permute.xlu0 %5718 }
 0x3ae   : > { %v5466_v41 = vsel %vm3047_vm1, %v17751_v49, %v5388_v42  ;;  %9547 = vmatpush1.bf16.msra.mxu1 %v10406_v11  ;;  %v5490_v58 = vsel %vm3047_vm1, %v17753_v30, %v5401_v28  ;;  %v17341_v23 = vrot.slane %v15094_v0, 4  ;;  %v15111_v49 = vpop.f32.mrf.mxu1 }
 0x3af   : > { %v5467_v43 = vsel %vm5410_vm9, %v17750_v26, %v5466_v41  ;;  %v15104_v38 = vpop.permute.xlu1 %5744  ;;  %9548 = vmatprep.subr.bf16.mxu1 %v10767_v4  ;;  %v5491_v57 = vsel %vm5410_vm9, %v17752_v8, %v5490_v58  ;;  %5321 = vrot.lane.b32.xlu0 %v14978_v1, %s11468_s28  ;;  %17755 = vst [vmem:[#allocation45_spill] sm:$0xff] %v15111_v49 }
 0x3b0   : > { %9469 = vmatpush2.bf16.msra.mxu0 %v10740_v6  ;;  %v17338_v39 = vrot.slane %v15104_v38, 4  ;;  %v10766_v6 = vcombine.low %v5922_v13, %v5946_v15  ;;  %v10716_v11 = vcombine.low %v5467_v43, %v5491_v57  ;;  %v10717_v26 = vcombine.high %v5467_v43, %v5491_v57  ;;  %v9201_v43 = vpop.f32.mrf.mxu1 }
 0x3b1   : > { %5347 = vrot.lane.b32.xlu1 %v14985_v17, %s11468_s28  ;;  %v5873_v4 = vsel %vm3047_vm1, %v5815_v55, %v17341_v23  ;;  %v5264_v41 = vpop.permute.xlu0 %5263  ;;  %v15409_v23 = vpop.f32.mrf.mxu0 }
 0x3b2   : > { %9470 = vmatprep.subr.bf16.mxu0 %v10717_v26  ;;  %9549 = vmatpush2.bf16.msra.mxu1 %v10766_v6  ;;  %v5874_v13 = vsel %vm5863_vm8, %v14999_v50, %v5873_v4  ;;  %v5897_v15 = vsel %vm3047_vm1, %v5828_v48, %v17338_v39  ;;  %v5362_v8 = vrot.slane %v5264_v41, 4  ;;  %v9202_v50 = vpop.f32.mrf.mxu1  ;;  %v17756_v26 = vrot.slane %v13839_v61, 4  ;;  %17770 = vst [vmem:[#allocation20_spill] sm:$0xff] %v15409_v23 }
 0x3b3   : > { %v5290_v30 = vpop.permute.xlu1 %5289  ;;  %v5898_v58 = vsel %vm5863_vm8, %v15012_v20, %v5897_v15  ;;  %4866 = vrot.lane.b32.xlu0 %v14624_v46, %s11469_s29  ;;  %v17757_v4 = vrot.slane %v13860_v51, 4 }
 0x3b4   : > { %9471 = vmatpush2.bf16.msra.mxu0 %v10716_v11  ;;  %v5375_v55 = vrot.slane %v5290_v30, 4  ;;  %v10742_v57 = vcombine.low %v5874_v13, %v5898_v58  ;;  %v10743_v6 = vcombine.high %v5874_v13, %v5898_v58  ;;  %v5418_v48 = vsel %vm3047_vm1, %v17756_v26, %v5362_v8 }
 0x3b5   : > { %4892 = vrot.lane.b32.xlu1 %v14632_v24, %s11469_s29  ;;  %v15136_v11 = vpop.permute.xlu0 %5317  ;;  %v5419_v20 = vsel %vm5410_vm9, %v13839_v61, %v5418_v48 }
 0x3b6   : > { %9550 = vmatprep.subr.bf16.mxu1 %v10743_v6  ;;  %v5442_v46 = vsel %vm3047_vm1, %v17757_v4, %v5375_v55  ;;  %v17337_v13 = vrot.slane %v15136_v11, 4 }
 0x3b7   : > { %9551 = vmatpush2.bf16.msra.mxu1 %v10742_v57  ;;  %v15144_v15 = vpop.permute.xlu1 %5343  ;;  %v5443_v24 = vsel %vm5410_vm9, %v13860_v51, %v5442_v46  ;;  %5269 = vrot.lane.b32.xlu0 %v15058_v44, %s11468_s28 }
 0x3b8   : > { %v17336_v43 = vrot.slane %v15144_v15, 4  ;;  %v10692_v58 = vcombine.low %v5419_v20, %v5443_v24  ;;  %v10693_v6 = vcombine.high %v5419_v20, %v5443_v24  ;;  %v5468_v61 = vsel %vm3047_vm1, %v5388_v42, %v17337_v13 }
 0x3b9   : > { %5295 = vrot.lane.b32.xlu1 %v15065_v7, %s11468_s28  ;;  %v4863_v57 = vpop.permute.xlu0 %4862  ;;  %v5469_v50 = vsel %vm5410_vm9, %v15074_v3, %v5468_v61  ;;  %v17758_v3 = vrot.slane %v14574_v53, 4 }
 0x3ba   : > { %9472 = vmatprep.subr.bf16.mxu0 %v10693_v6  ;;  %v5492_v51 = vsel %vm3047_vm1, %v5401_v28, %v17336_v43  ;;  %v4935_v26 = vrot.slane %v4863_v57, 4 }
 0x3bb   : > { %9473 = vmatpush2.bf16.msra.mxu0 %v10692_v58  ;;  %v4889_v48 = vpop.permute.xlu1 %4888  ;;  %v5493_v20 = vsel %vm5410_vm9, %v15082_v32, %v5492_v51  ;;  %4814 = vrot.lane.b32.xlu0 %v14671_v34, %s11469_s29  ;;  %v17759_v32 = vrot.slane %v14591_v10, 4 }
 0x3bc   : > { %v4948_v4 = vrot.slane %v4889_v48, 4  ;;  %v10718_v42 = vcombine.low %v5469_v50, %v5493_v20  ;;  %v10719_v46 = vcombine.high %v5469_v50, %v5493_v20  ;;  %v5013_v24 = vsel %vm3047_vm1, %v17758_v3, %v4935_v26 }
 0x3bd   : > { %4840 = vrot.lane.b32.xlu1 %v14681_v59, %s11469_s29  ;;  %v15170_v28 = vpop.permute.xlu0 %5265  ;;  %v5014_v58 = vsel %vm4957_vm10, %v14574_v53, %v5013_v24 }
 0x3be   : > { %9552 = vmatprep.subr.bf16.mxu1 %v10719_v46  ;;  %v5037_v6 = vsel %vm3047_vm1, %v17759_v32, %v4948_v4  ;;  %v17333_v34 = vrot.slane %v15170_v28, 4 }
 0x3bf   : > { %9553 = vmatpush2.bf16.msra.mxu1 %v10718_v42  ;;  %v15178_v61 = vpop.permute.xlu1 %5291  ;;  %v5038_v59 = vsel %vm4957_vm10, %v14591_v10, %v5037_v6  ;;  %4868 = vrot.lane.b32.xlu0 %v14978_v1, %s11469_s29 }
 0x3c0   : > { %v17332_v50 = vrot.slane %v15178_v61, 4  ;;  %v10668_v51 = vcombine.low %v5014_v58, %v5038_v59  ;;  %v10669_v20 = vcombine.high %v5014_v58, %v5038_v59  ;;  %v5420_v53 = vsel %vm3047_vm1, %v5362_v8, %v17333_v34  ;;  %v11005_v34 = vld [vmem:[#allocation2 + $0x2c] ss:$104 sps:$4 sm:$0xff]  }
 0x3c1   : > { %4894 = vrot.lane.b32.xlu1 %v14985_v17, %s11469_s29  ;;  %v4811_v42 = vpop.permute.xlu0 %4810  ;;  %v5421_v46 = vsel %vm5410_vm9, %v5264_v41, %v5420_v53  ;;  %v17760_v41 = vrot.slane %v14598_v47, 4 }
 0x3c2   : > { %9474 = vmatprep.subr.bf16.mxu0 %v10669_v20  ;;  %v5444_v10 = vsel %vm3047_vm1, %v5375_v55, %v17332_v50  ;;  %v4909_v3 = vrot.slane %v4811_v42, 4 }
 0x3c3   : > { %9475 = vmatpush2.bf16.msra.mxu0 %v10668_v51  ;;  %v4837_v24 = vpop.permute.xlu1 %4836  ;;  %v5445_v58 = vsel %vm5410_vm9, %v5290_v30, %v5444_v10  ;;  %4816 = vrot.lane.b32.xlu0 %v15058_v44, %s11469_s29  ;;  %v17761_v30 = vrot.slane %v14615_v33, 4 }
 0x3c4   : > { %v4922_v32 = vrot.slane %v4837_v24, 4  ;;  %v10694_v6 = vcombine.low %v5421_v46, %v5445_v58  ;;  %v10695_v59 = vcombine.high %v5421_v46, %v5445_v58  ;;  %v4965_v8 = vsel %vm3047_vm1, %v17760_v41, %v4909_v3 }
 0x3c5   : > { %4842 = vrot.lane.b32.xlu1 %v15065_v7, %s11469_s29  ;;  %v15202_v55 = vpop.permute.xlu0 %4864  ;;  %v4966_v51 = vsel %vm4957_vm10, %v14598_v47, %v4965_v8  ;;  %v10998_v8 = vld [vmem:[#allocation2 + $0xf8] ss:$104 sps:$4 sm:$0xff]  }
 0x3c6   : > { %9554 = vmatprep.subr.bf16.mxu1 %v10695_v59  ;;  %v4989_v20 = vsel %vm3047_vm1, %v17761_v30, %v4922_v32  ;;  %v17331_v53 = vrot.slane %v15202_v55, 4 }
 0x3c7   : > { %9555 = vmatpush2.bf16.msra.mxu1 %v10694_v6  ;;  %v15210_v46 = vpop.permute.xlu1 %4890  ;;  %v4990_v10 = vsel %vm4957_vm10, %v14615_v33, %v4989_v20  ;;  %6227 = vrot.lane.b32.xlu0 %v14978_v1, %s11464_s20 }
 0x3c8   : > { %v17330_v58 = vrot.slane %v15210_v46, 4  ;;  %v10644_v59 = vcombine.low %v4966_v51, %v4990_v10  ;;  %v10645_v41 = vcombine.high %v4966_v51, %v4990_v10  ;;  %v5015_v47 = vsel %vm3047_vm1, %v4935_v26, %v17331_v53 }
 0x3c9   : > { %6253 = vrot.lane.b32.xlu1 %v14985_v17, %s11464_s20  ;;  %v15222_v6 = vpop.permute.xlu0 %4812  ;;  %v5016_v33 = vsel %vm4957_vm10, %v4863_v57, %v5015_v47  ;;  %v10996_v57 = vld [vmem:[#allocation2 + $0xf4] ss:$104 sps:$4 sm:$0xff]  }
 0x3ca   : > { %9476 = vmatprep.subr.bf16.mxu0 %v10645_v41  ;;  %v5039_v30 = vsel %vm3047_vm1, %v4948_v4, %v17330_v58  ;;  %v17329_v1 = vrot.slane %v15222_v6, 4 }
 0x3cb   : > { %9477 = vmatpush2.bf16.msra.mxu0 %v10644_v59  ;;  %v15229_v51 = vpop.permute.xlu1 %4838  ;;  %v5040_v17 = vsel %vm4957_vm10, %v4889_v48, %v5039_v30  ;;  %6175 = vrot.lane.b32.xlu0 %v15058_v44, %s11464_s20  ;;  %v11001_v48 = vld [vmem:[#allocation2 + $0x28] ss:$104 sps:$4 sm:$0xff]  }
 0x3cc   : > { %v17328_v20 = vrot.slane %v15229_v51, 4  ;;  %9478 = vmatprep.subr.bf16.mxu0 %v10998_v8  ;;  %v10670_v26 = vcombine.low %v5016_v33, %v5040_v17  ;;  %v10671_v10 = vcombine.high %v5016_v33, %v5040_v17  ;;  %v4967_v4 = vsel %vm3047_vm1, %v4909_v3, %v17329_v1  ;;  %v10999_v17 = vld [vmem:[#allocation2 + $0x24] ss:$104 sps:$4 sm:$0xff]  }
 0x3cd   : > { %6201 = vrot.lane.b32.xlu1 %v15065_v7, %s11464_s20  ;;  %v15240_v59 = vpop.permute.xlu0 %6223  ;;  %v4968_v41 = vsel %vm4957_vm10, %v4811_v42, %v4967_v4  ;;  %v15249_v7 = vld [vmem:[#allocation2 + $0x11c] sm:$0xff]  ;;  %v15255_v42 = vld [vmem:[#allocation2 + $0x184] sm:$0xff] }
 0x3ce   : > { %9556 = vmatprep.subr.bf16.mxu1 %v10671_v10  ;;  %v4991_v44 = vsel %vm3047_vm1, %v4922_v32, %v17328_v20  ;;  %v6295_v47 = vrot.slane %v15240_v59, 4  ;;  %v15272_v20 = vld [vmem:[#allocation2 + $0x118] sm:$0xff] }
 0x3cf   : > { %9479 = vmatpush2.bf16.msra.mxu0 %v10996_v57  ;;  %9557 = vmatpush2.bf16.msra.mxu1 %v10670_v26  ;;  %v15247_v8 = vpop.permute.xlu1 %6249  ;;  %v4992_v3 = vsel %vm4957_vm10, %v4837_v24, %v4991_v44  ;;  %v17762_v26 = vrot.slane %v14669_v56, 4  ;;  %v11004_v57 = vld [vmem:[#allocation2 + $0x100] ss:$104 sps:$4 sm:$0xff]   ;;  %v11002_v1 = vld [vmem:[#allocation2 + $0xfc] ss:$104 sps:$4 sm:$0xff]  }
 0x3d0   : > { %v6308_v33 = vrot.slane %v15247_v8, 4  ;;  %9480 = vmatprep.subr.bf16.mxu0 %v11001_v48  ;;  %6229 = vrot.lane.b32.xlu0 %v15249_v7, %s11464_s20  ;;  %v10646_v30 = vcombine.low %v4968_v41, %v4992_v3  ;;  %v10647_v32 = vcombine.high %v4968_v41, %v4992_v3  ;;  %v17763_v48 = vrot.slane %v14691_v21, 4 }
 0x3d1   : > { %6255 = vrot.lane.b32.xlu1 %v15255_v42, %s11464_s20  ;;  %v6374_v10 = vsel %vm3047_vm1, %v17762_v26, %v6295_v47  ;;  %v15262_v24 = vpop.permute.xlu0 %6171 }
 0x3d2   : > { %9558 = vmatprep.subr.bf16.mxu1 %v10647_v32  ;;  %v6375_v4 = vsel %vm6316_vm2, %v14669_v56, %v6374_v10  ;;  %v6398_v44 = vsel %vm3047_vm1, %v17763_v48, %v6308_v33  ;;  %v6269_v41 = vrot.slane %v15262_v24, 4  ;;  %v15279_v56 = vld [vmem:[#allocation2 + $0x180] sm:$0xff] }
 0x3d3   : > { %9481 = vmatpush2.bf16.msra.mxu0 %v10999_v17  ;;  %9559 = vmatpush2.bf16.msra.mxu1 %v10646_v30  ;;  %v15270_v3 = vpop.permute.xlu1 %6197  ;;  %v6399_v32 = vsel %vm6316_vm2, %v14691_v21, %v6398_v44  ;;  %v17764_v30 = vrot.slane %v14723_v18, 4 }
 0x3d4   : > { %v6282_v26 = vrot.slane %v15270_v3, 4  ;;  %9560 = vmatprep.subr.bf16.mxu1 %v11004_v57  ;;  %4321 = vrot.lane.b32.xlu0 %v15272_v20, %s11465_s24  ;;  %v10814_v10 = vcombine.low %v6375_v4, %v6399_v32  ;;  %v10815_v48 = vcombine.high %v6375_v4, %v6399_v32  ;;  %v11007_v57 = vld [vmem:[#allocation2 + $0x30] ss:$104 sps:$4 sm:$0xff]   ;;  %v17765_v4 = vrot.slane %v14742_v62, 4 }
 0x3d5   : > { %4347 = vrot.lane.b32.xlu1 %v15279_v56, %s11465_s24  ;;  %v6326_v21 = vsel %vm3047_vm1, %v17764_v30, %v6269_v41  ;;  %v15288_v17 = vpop.permute.xlu0 %6225 }
 0x3d6   : > { %9585 = vmatprep.subr.bf16.mxu0 %v10815_v48  ;;  %9483 = vmatmul.mubr.bf16.vlgmr.msra.gmra.mxu0 %v17584_v37  ;;  %v6327_v44 = vsel %vm6316_vm2, %v14723_v18, %v6326_v21  ;;  %v6350_v32 = vsel %vm3047_vm1, %v17765_v4, %v6282_v26  ;;  %v17335_v58 = vrot.slane %v15288_v17, 4  ;;  %v15301_v48 = vld [vmem:[#allocation2 + $0x4c] sm:$0xff]  ;;  %v15308_v18 = vld [vmem:[#allocation2 + $0xb4] sm:$0xff] }
 0x3d7   : > { %9561 = vmatpush2.bf16.msra.mxu1 %v11002_v1  ;;  %9586 = vmatpush1.bf16.msra.mxu0 %v10814_v10  ;;  %v15299_v30 = vpop.permute.xlu1 %6251  ;;  %v6351_v53 = vsel %vm6316_vm2, %v14742_v62, %v6350_v32  ;;  %v15326_v32 = vld [vmem:[#allocation2 + $0x48] sm:$0xff] }
 0x3d8   : > { %v17334_v50 = vrot.slane %v15299_v30, 4  ;;  %9562 = vmatprep.subr.bf16.mxu1 %v11007_v57  ;;  %6177 = vrot.lane.b32.xlu0 %v15301_v48, %s11464_s20  ;;  %v10790_v21 = vcombine.low %v6327_v44, %v6351_v53  ;;  %v10791_v4 = vcombine.high %v6327_v44, %v6351_v53  ;;  %v6376_v1 = vsel %vm3047_vm1, %v6295_v47, %v17335_v58 }
 0x3d9   : > { %6203 = vrot.lane.b32.xlu1 %v15308_v18, %s11464_s20  ;;  %9605 = vmatprep.mubr.bf16.mxu0 %v17589_v35  ;;  %v15316_v62 = vpop.permute.xlu0 %4317  ;;  %v6377_v10 = vsel %vm6316_vm2, %v15240_v59, %v6376_v1  ;;  %v15333_v59 = vld [vmem:[#allocation2 + $0xb0] sm:$0xff] }
 0x3da   : > { %9587 = vmatprep.subr.bf16.mxu0 %v10791_v4  ;;  %v6400_v53 = vsel %vm3047_vm1, %v6308_v33, %v17334_v50  ;;  %v4388_v57 = vrot.slane %v15316_v62, 4 }
 0x3db   : > { %9563 = vmatpush2.bf16.msra.mxu1 %v11005_v34  ;;  %9588 = vmatpush1.bf16.msra.mxu0 %v10790_v21  ;;  %v15324_v44 = vpop.permute.xlu1 %4343  ;;  %v6401_v47 = vsel %vm6316_vm2, %v15247_v8, %v6400_v53  ;;  %v17766_v34 = vrot.slane %v14778_v40, 4 }
 0x3dc   : > { %v4401_v4 = vrot.slane %v15324_v44, 4  ;;  %4269 = vrot.lane.b32.xlu0 %v15326_v32, %s11465_s24  ;;  %v10816_v1 = vcombine.low %v6377_v10, %v6401_v47  ;;  %v10817_v33 = vcombine.high %v6377_v10, %v6401_v47  ;;  %v17767_v10 = vrot.slane %v14795_v25, 4 }
 0x3dd   : > { %4295 = vrot.lane.b32.xlu1 %v15333_v59, %s11465_s24  ;;  %v4468_v21 = vsel %vm3047_vm1, %v17766_v34, %v4388_v57  ;;  %v15342_v8 = vpop.permute.xlu0 %6173  ;;  %v15355_v34 = vld [vmem:[#allocation2 + $0x120] sm:$0xff] }
 0x3de   : > { %9667 = vmatprep.subr.bf16.mxu1 %v10817_v33  ;;  %9565 = vmatmul.mubr.bf16.vlgmr.msra.gmra.mxu1 %v17584_v37  ;;  %v4469_v53 = vsel %vm4408_vm3, %v14778_v40, %v4468_v21  ;;  %v4492_v47 = vsel %vm3047_vm1, %v17767_v10, %v4401_v4  ;;  %v17340_v50 = vrot.slane %v15342_v8, 4  ;;  %v15362_v40 = vld [vmem:[%s17029_s2 + $0x8] ss:$0 sps:$4 sm:$0xff]  }
 0x3df   : > { %9668 = vmatpush1.bf16.msra.mxu1 %v10816_v1  ;;  %v15353_v58 = vpop.permute.xlu1 %6199  ;;  %v4493_v33 = vsel %vm4408_vm3, %v14795_v25, %v4492_v47  ;;  %10833 = vmatmul.mubr.msk.bf16.vlgmr.msra.gmra.mxu0 %vm9118_vm5, %v15362_v40  ;;  %v15369_v1 = vld [vmem:[#allocation2 + $0x188] sm:$0xff] }
 0x3e0   : > { %v17339_v21 = vrot.slane %v15353_v58, 4  ;;  %4323 = vrot.lane.b32.xlu0 %v15355_v34, %s11465_s24  ;;  %v10576_v10 = vcombine.low %v4469_v53, %v4493_v33  ;;  %v10577_v43 = vcombine.high %v4469_v53, %v4493_v33  ;;  %9687 = vmatprep.mubr.bf16.mxu1 %v17589_v35  ;;  %v6328_v25 = vsel %vm3047_vm1, %v6269_v41, %v17340_v50 }
 0x3e1   : > { %4349 = vrot.lane.b32.xlu1 %v15369_v1, %s11465_s24  ;;  %9646 = vmatprep.mubr.bf16.mxu0 %v12849_v60  ;;  %v15380_v47 = vpop.permute.xlu0 %4265  ;;  %v6329_v13 = vsel %vm6316_vm2, %v15262_v24, %v6328_v25 }
 0x3e2   : > { %9614 = vmatprep.subr.bf16.mxu0 %v10577_v43  ;;  %v6352_v53 = vsel %vm3047_vm1, %v6282_v26, %v17339_v21  ;;  %v4362_v33 = vrot.slane %v15380_v47, 4  ;;  %v17768_v26 = vrot.slane %v14823_v12, 4 }
 0x3e3   : > { %9615 = vmatpush1.bf16.msra.mxu0 %v10576_v10  ;;  %v15390_v39 = vpop.permute.xlu1 %4291  ;;  %v6353_v41 = vsel %vm6316_vm2, %v15270_v3, %v6352_v53  ;;  %v17769_v53 = vrot.slane %v14837_v9, 4 }
 0x3e4   : > { %v4375_v43 = vrot.slane %v15390_v39, 4  ;;  %3868 = vrot.lane.b32.xlu0 %v15272_v20, %s11466_s25  ;;  %v10792_v24 = vcombine.low %v6329_v13, %v6353_v41  ;;  %v10793_v25 = vcombine.high %v6329_v13, %v6353_v41  ;;  %v4420_v21 = vsel %vm3047_vm1, %v17768_v26, %v4362_v33 }
 0x3e5   : > { %3894 = vrot.lane.b32.xlu1 %v15279_v56, %s11466_s25  ;;  %v15402_v10 = vpop.permute.xlu0 %4319  ;;  %v4421_v3 = vsel %vm4408_vm3, %v14823_v12, %v4420_v21  ;;  %v15421_v12 = vld [vmem:[#allocation2 + $0xb8] sm:$0xff] }
 0x3e6   : > { %9669 = vmatprep.subr.bf16.mxu1 %v10793_v25  ;;  %v4444_v50 = vsel %vm3047_vm1, %v17769_v53, %v4375_v43  ;;  %v17345_v13 = vrot.slane %v15402_v10, 4 }
 0x3e7   : > { %9670 = vmatpush1.bf16.msra.mxu1 %v10792_v24  ;;  %v15412_v41 = vpop.permute.xlu1 %4345  ;;  %v4445_v25 = vsel %vm4408_vm3, %v14837_v9, %v4444_v50 }
 0x3e8   : > { %v17344_v26 = vrot.slane %v15412_v41, 4  ;;  %4271 = vrot.lane.b32.xlu0 %v15414_v52, %s11465_s24  ;;  %v10552_v21 = vcombine.low %v4421_v3, %v4445_v25  ;;  %v10553_v53 = vcombine.high %v4421_v3, %v4445_v25  ;;  %v4470_v24 = vsel %vm3047_vm1, %v4388_v57, %v17345_v13  ;;  %v15441_v25 = vpop.f32.mrf.mxu0 }
 0x3e9   : > { %4297 = vrot.lane.b32.xlu1 %v15421_v12, %s11465_s24  ;;  %v15430_v9 = vpop.permute.xlu0 %3864  ;;  %v4471_v50 = vsel %vm4408_vm3, %v15316_v62, %v4470_v24  ;;  %17771 = vst [vmem:[#allocation10_spill] sm:$0xff] %v15441_v25  ;;  %v17805_v25 = vld [vmem:[#allocation12_spill] sm:$0xff] }
 0x3ea   : > { %9616 = vmatprep.subr.bf16.mxu0 %v10553_v53  ;;  %v4494_v3 = vsel %vm3047_vm1, %v4401_v4, %v17344_v26  ;;  %10834 = vmatmul.mubr.msk.bf16.vlgmr.msra.gmra.mxu1 %vm9118_vm5, %v15362_v40  ;;  %v17346_v19 = vrot.slane %v15430_v9, 4  ;;  %v9160_v26 = vpop.f32.mrf.mxu0 }
 0x3eb   : > { %9617 = vmatpush1.bf16.msra.mxu0 %v10552_v21  ;;  %v15444_v57 = vpop.permute.xlu1 %3890  ;;  %v4495_v53 = vsel %vm4408_vm3, %v15324_v44, %v4494_v3  ;;  %9728 = vmatprep.mubr.bf16.mxu1 %v12849_v60  ;;  %v17772_v21 = vrot.slane %v14861_v5, 4 }
 0x3ec   : > { %v17349_v62 = vrot.slane %v15444_v57, 4  ;;  %3816 = vrot.lane.b32.xlu0 %v15326_v32, %s11466_s25  ;;  %v10578_v4 = vcombine.low %v4471_v50, %v4495_v53  ;;  %v10579_v24 = vcombine.high %v4471_v50, %v4495_v53  ;;  %v17773_v32 = vrot.slane %v14874_v2, 4  ;;  %v9161_v50 = vpop.f32.mrf.mxu0 }
 0x3ed   : > { %3842 = vrot.lane.b32.xlu1 %v15333_v59, %s11466_s25  ;;  %v4015_v13 = vsel %vm3047_vm1, %v17772_v21, %v17346_v19  ;;  %v15459_v44 = vpop.permute.xlu0 %4267  ;;  %v15473_v21 = vpop.f32.mrf.mxu1 }
 0x3ee   : > { %9696 = vmatprep.subr.bf16.mxu1 %v10579_v24  ;;  %v4016_v3 = vsel %vm3955_vm4, %v14861_v5, %v4015_v13  ;;  %v4039_v26 = vsel %vm3047_vm1, %v17773_v32, %v17349_v62  ;;  %v17347_v53 = vrot.slane %v15459_v44, 4  ;;  %17774 = vst [vmem:[#allocation19_spill] sm:$0xff] %v15473_v21  ;;  %v15478_v27 = vpop.f32.mrf.mxu0 }
 0x3ef   : > { %9697 = vmatpush1.bf16.msra.mxu1 %v10578_v4  ;;  %v15469_v49 = vpop.permute.xlu1 %4293  ;;  %v4040_v24 = vsel %vm3955_vm4, %v14874_v2, %v4039_v26  ;;  %17775 = vst [vmem:[#allocation33_spill] sm:$0xff] %v15478_v27 }
 0x3f0   : > { %v17348_v19 = vrot.slane %v15469_v49, 4  ;;  %3870 = vrot.lane.b32.xlu0 %v15355_v34, %s11466_s25  ;;  %v10528_v5 = vcombine.low %v4016_v3, %v4040_v24  ;;  %v10529_v13 = vcombine.high %v4016_v3, %v4040_v24  ;;  %v4422_v4 = vsel %vm3047_vm1, %v4362_v33, %v17347_v53  ;;  %v15492_v3 = vpop.f32.mrf.mxu1 }
 0x3f1   : > { %3896 = vrot.lane.b32.xlu1 %v15369_v1, %s11466_s25  ;;  %v15485_v2 = vpop.permute.xlu0 %3812  ;;  %v4423_v32 = vsel %vm4408_vm3, %v15380_v47, %v4422_v4  ;;  %17776 = vst [vmem:[#allocation17_spill] sm:$0xff] %v15492_v3 }
 0x3f2   : > { %9618 = vmatprep.subr.bf16.mxu0 %v10529_v13  ;;  %v4446_v26 = vsel %vm3047_vm1, %v4375_v43, %v17348_v19  ;;  %v3909_v50 = vrot.slane %v15485_v2, 4  ;;  %v15499_v13 = vpop.f32.mrf.mxu0  ;;  %v9242_v43 = vpop.f32.mrf.mxu1 }
 0x3f3   : > { %9619 = vmatpush1.bf16.msra.mxu0 %v10528_v5  ;;  %v15495_v24 = vpop.permute.xlu1 %3838  ;;  %v4447_v33 = vsel %vm4408_vm3, %v15390_v39, %v4446_v26  ;;  %17777 = vst [vmem:[#allocation38_spill] sm:$0xff] %v15499_v13  ;;  %v17778_v5 = vrot.slane %v14894_v54, 4  ;;  %v17779_v13 = vrot.slane %v14907_v14, 4 }
 0x3f4   : > { %v3922_v53 = vrot.slane %v15495_v24, 4  ;;  %3415 = vrot.lane.b32.xlu0 %v15272_v20, %s11463_s19  ;;  %v10554_v47 = vcombine.low %v4423_v32, %v4447_v33  ;;  %v10555_v4 = vcombine.high %v4423_v32, %v4447_v33  ;;  %v9283_v62 = vpop.f32.mrf.mxu0  ;;  %v9243_v32 = vpop.f32.mrf.mxu1 }
 0x3f5   : > { %3441 = vrot.lane.b32.xlu1 %v15279_v56, %s11463_s19  ;;  %v3967_v19 = vsel %vm3047_vm1, %v17778_v5, %v3909_v50  ;;  %v15509_v39 = vpop.permute.xlu0 %3866 }
 0x3f6   : > { %9698 = vmatprep.subr.bf16.mxu1 %v10555_v4  ;;  %v3968_v26 = vsel %vm3955_vm4, %v14894_v54, %v3967_v19  ;;  %v3991_v20 = vsel %vm3047_vm1, %v17779_v13, %v3922_v53  ;;  %v17350_v33 = vrot.slane %v15509_v39, 4  ;;  %v9284_v62 = vpop.f32.mrf.mxu0  ;;  %v15524_v5 = vpop.f32.mrf.mxu1  ;;  %v17781_v13 = vrot.slane %v15430_v9, 4 }
 0x3f7   : > { %9699 = vmatpush1.bf16.msra.mxu1 %v10554_v47  ;;  %v15517_v56 = vpop.permute.xlu1 %3892  ;;  %v3992_v43 = vsel %vm3955_vm4, %v14907_v14, %v3991_v20  ;;  %17780 = vst [vmem:[#allocation43_spill] sm:$0xff] %v15524_v5 }
 0x3f8   : > { %v17351_v4 = vrot.slane %v15517_v56, 4  ;;  %3818 = vrot.lane.b32.xlu0 %v15414_v52, %s11466_s25  ;;  %v10504_v54 = vcombine.low %v3968_v26, %v3992_v43  ;;  %v10505_v19 = vcombine.high %v3968_v26, %v3992_v43  ;;  %v4017_v47 = vsel %vm3047_vm1, %v17781_v13, %v17350_v33  ;;  %v15542_v32 = vpop.f32.mrf.mxu1 }
 0x3f9   : > { %3844 = vrot.lane.b32.xlu1 %v15421_v12, %s11466_s25  ;;  %v15533_v14 = vpop.permute.xlu0 %3411  ;;  %v4018_v20 = vsel %vm3955_vm4, %v15430_v9, %v4017_v47  ;;  %v17782_v52 = vrot.slane %v15444_v57, 4  ;;  %17783 = vst [vmem:[#allocation24_spill] sm:$0xff] %v15542_v32 }
 0x3fa   : > { %9620 = vmatprep.subr.bf16.mxu0 %v10505_v19  ;;  %v3482_v43 = vrot.slane %v15533_v14, 4  ;;  %v9365_v33 = vpop.f32.mrf.mxu1 }
 0x3fb   : > { %v4041_v26 = vsel %vm3047_vm1, %v17782_v52, %v17351_v4  ;;  %9621 = vmatpush1.bf16.msra.mxu0 %v10504_v54  ;;  %v3438_v62 = vpop.permute.xlu1 %3437  ;;  %v17784_v52 = vrot.slane %v14914_v63, 4  ;;  %v3456_v33 = vrot.slane %v14213_v31, 4 }
 0x3fc   : > { %v4042_v19 = vsel %vm3955_vm4, %v15444_v57, %v4041_v26  ;;  %v3495_v13 = vrot.slane %v3438_v62, 4  ;;  %3389 = vrot.lane.b32.xlu0 %v15333_v59, %s11463_s19  ;;  %v17785_v26 = vrot.slane %v14928_v45, 4  ;;  %v9366_v32 = vpop.f32.mrf.mxu1 }
 0x3fd   : > { %v10530_v9 = vcombine.low %v4018_v20, %v4042_v19  ;;  %v10531_v47 = vcombine.high %v4018_v20, %v4042_v19  ;;  %3417 = vrot.lane.b32.xlu1 %v15355_v34, %s11463_s19  ;;  %v3562_v4 = vsel %vm3047_vm1, %v17784_v52, %v3482_v43  ;;  %v15554_v54 = vpop.permute.xlu0 %3814 }
 0x3fe   : > { %v3563_v57 = vsel %vm3502_vm6, %v14914_v63, %v3562_v4  ;;  %v3586_v59 = vsel %vm3047_vm1, %v17785_v26, %v3495_v13  ;;  %v17353_v20 = vrot.slane %v15554_v54, 4 }
 0x3ff   : > { %9700 = vmatprep.subr.bf16.mxu1 %v10531_v47  ;;  %v15563_v34 = vpop.permute.xlu1 %3840  ;;  %v3587_v19 = vsel %vm3502_vm6, %v14928_v45, %v3586_v59 }
 0x400   : > { %9701 = vmatpush1.bf16.msra.mxu1 %v10530_v9  ;;  %v17352_v47 = vrot.slane %v15563_v34, 4  ;;  %3443 = vrot.lane.b32.xlu0 %v15369_v1, %s11463_s19  ;;  %v10480_v63 = vcombine.low %v3563_v57, %v3587_v19  ;;  %v10481_v4 = vcombine.high %v3563_v57, %v3587_v19  ;;  %v3969_v32 = vsel %vm3047_vm1, %v3909_v50, %v17353_v20 }
 0x401   : > { %3391 = vrot.lane.b32.xlu1 %v15421_v12, %s11463_s19  ;;  %v3386_v9 = vpop.permute.xlu0 %3385  ;;  %v3970_v52 = vsel %vm3955_vm4, %v15485_v2, %v3969_v32  ;;  %v17786_v57 = vrot.slane %v14180_v29, 4 }
 0x402   : > { %9622 = vmatprep.subr.bf16.mxu0 %v10481_v4  ;;  %v3993_v45 = vsel %vm3047_vm1, %v3922_v53, %v17352_v47  ;;  %v3469_v26 = vrot.slane %v3386_v9, 4  ;;  %v17787_v4 = vld [vmem:[#allocation29_spill] sm:$0xff] }
 0x403   : > { %9623 = vmatpush1.bf16.msra.mxu0 %v10480_v63  ;;  %v15580_v1 = vpop.permute.xlu1 %3413  ;;  %v3994_v12 = vsel %vm3955_vm4, %v15495_v24, %v3993_v45  ;;  %v3514_v50 = vsel %vm3047_vm1, %v17786_v57, %v3456_v33  ;;  %v17355_v53 = vrot.slane %v17787_v4, 4  ;;  %v17788_v63 = vrot.slane %v14934_v16, 4 }
 0x404   : > { %v17356_v59 = vrot.slane %v15580_v1, 4  ;;  %5776 = vrot.lane.b32.xlu0 %v15249_v7, %s11467_s27  ;;  %v10506_v2 = vcombine.low %v3970_v52, %v3994_v12  ;;  %v10507_v19 = vcombine.high %v3970_v52, %v3994_v12  ;;  %v3515_v45 = vsel %vm3502_vm6, %v14180_v29, %v3514_v50 }
 0x405   : > { %5802 = vrot.lane.b32.xlu1 %v15255_v42, %s11467_s27  ;;  %v3538_v24 = vsel %vm3047_vm1, %v17788_v63, %v3469_v26  ;;  %v15596_v32 = vpop.permute.xlu0 %3439 }
 0x406   : > { %9702 = vmatprep.subr.bf16.mxu1 %v10507_v19  ;;  %v3539_v57 = vsel %vm3502_vm6, %v14934_v16, %v3538_v24  ;;  %v17354_v52 = vrot.slane %v15596_v32, 4  ;;  %v3564_v63 = vsel %vm3047_vm1, %v3482_v43, %v17356_v59  ;;  %v3516_v16 = vsel %vm3047_vm1, %v3456_v33, %v17355_v53  ;;  %v17790_v24 = vld [vmem:[#allocation48_spill] sm:$0xff]  ;;  %v17795_v59 = vld [vmem:[#allocation41_spill] sm:$0xff] }
 0x407   : > { %9703 = vmatpush1.bf16.msra.mxu1 %v10506_v2  ;;  %v15603_v12 = vpop.permute.xlu1 %3387  ;;  %v10456_v47 = vcombine.low %v3515_v45, %v3539_v57  ;;  %v10457_v20 = vcombine.high %v3515_v45, %v3539_v57  ;;  %v3565_v43 = vsel %vm3502_vm6, %v15533_v14, %v3564_v63  ;;  %v17791_v45 = vrot.slane %v17790_v24, 4  ;;  %v17792_v57 = vld [vmem:[#allocation18_spill] sm:$0xff]  ;;  %v15644_v24 = vld [vmem:[#allocation2 + $0x18c] sm:$0xff] }
 0x408   : > { %17789 = vst [vmem:[#allocation36_spill] sm:$0xff] %v15603_v12  ;;  %v17357_v19 = vrot.slane %v15603_v12, 4  ;;  %5724 = vrot.lane.b32.xlu0 %v15301_v48, %s11467_s27  ;;  %v3588_v29 = vsel %vm3047_vm1, %v3495_v13, %v17354_v52  ;;  %v17793_v13 = vrot.slane %v17792_v57, 4  ;;  %v15638_v14 = vld [vmem:[#allocation2 + $0x124] sm:$0xff] }
 0x409   : > { %5750 = vrot.lane.b32.xlu1 %v15308_v18, %s11467_s27  ;;  %9624 = vmatprep.subr.bf16.mxu0 %v10457_v20  ;;  %v15619_v50 = vpop.permute.xlu0 %5772  ;;  %v3589_v2 = vsel %vm3502_vm6, %v3438_v62, %v3588_v29 }
 0x40a   : > { %9625 = vmatpush1.bf16.msra.mxu0 %v10456_v47  ;;  %v3540_v20 = vsel %vm3047_vm1, %v3469_v26, %v17357_v19  ;;  %v3135_v52 = vsel %vm3047_vm1, %v17793_v13, %v17791_v45  ;;  %v5843_v33 = vrot.slane %v15619_v50, 4  ;;  %v17794_v47 = vld [vmem:[#allocation30_spill] sm:$0xff]  ;;  %v10482_v62 = vcombine.low %v3565_v43, %v3589_v2 }
 0x40b   : > { %v15633_v53 = vpop.permute.xlu1 %5798  ;;  %v17796_v5 = vcombine.high %v17794_v47, %v17795_v59  ;;  %v10483_v63 = vcombine.high %v3565_v43, %v3589_v2  ;;  %v3541_v26 = vsel %vm3502_vm6, %v3386_v9, %v3540_v20  ;;  %v3517_v45 = vsel %vm3502_vm6, %v14213_v31, %v3516_v16  ;;  %v17798_v9 = vld [vmem:[#allocation39_spill] sm:$0xff]  ;;  %v17800_v20 = vld [vmem:[#allocation32_spill] sm:$0xff] }
 0x40c   : > { %v5856_v29 = vrot.slane %v15633_v53, 4  ;;  %5778 = vrot.lane.b32.xlu0 %v15638_v14, %s11467_s27  ;;  %v17797_v13 = vrot.slane %v15041_v36, 4  ;;  %v17799_v2 = vrot.slane %v17798_v9, 4  ;;  %v17801_v19 = vrot.slane %v17800_v20, 4 }
 0x40d   : > { %9626 = vmatprep.subr.bf16.mxu0 %v17796_v5  ;;  %5804 = vrot.lane.b32.xlu1 %v15644_v24, %s11467_s27  ;;  %v10459_v5 = vcombine.high %v3517_v45, %v3541_v26  ;;  %v15658_v3 = vpop.permute.xlu0 %5720  ;;  %v17802_v31 = vcombine.low %v17794_v47, %v17795_v59  ;;  %v3136_v9 = vsel %vm3049_vm7, %v17792_v57, %v3135_v52 }
 0x40e   : > { %9704 = vmatprep.subr.bf16.mxu1 %v10483_v63  ;;  %v5923_v43 = vsel %vm3047_vm1, %v17797_v13, %v5843_v33  ;;  %v3111_v27 = vsel %vm3047_vm1, %v17801_v19, %v17799_v2  ;;  %v17803_v63 = vrot.slane %v15056_v22, 4  ;;  %v17360_v21 = vrot.slane %v15658_v3, 4  ;;  %v17804_v2 = vld [vmem:[#allocation16_spill] sm:$0xff] }
 0x40f   : > { %9627 = vmatpush1.bf16.msra.mxu0 %v17802_v31  ;;  %9705 = vmatpush1.bf16.msra.mxu1 %v10482_v62  ;;  %v5924_v16 = vsel %vm5863_vm8, %v15041_v36, %v5923_v43  ;;  %v15671_v19 = vpop.permute.xlu1 %5746  ;;  %v17806_v23 = vcombine.high %v17804_v2, %v17805_v25  ;;  %v17807_v36 = vld [vmem:[#allocation40_spill] sm:$0xff]  ;;  %v17809_v62 = vld [vmem:[#allocation14_spill] sm:$0xff]  ;;  %v10458_v57 = vcombine.low %v3517_v45, %v3541_v26  ;;  %v17814_v26 = vld [vmem:[#allocation7_spill] sm:$0xff] }
 0x410   : > { %v5947_v13 = vsel %vm3047_vm1, %v17803_v63, %v5856_v29  ;;  %9706 = vmatprep.subr.bf16.mxu1 %v10459_v5  ;;  %v17808_v47 = vrot.slane %v17807_v36, 4  ;;  %v17810_v43 = vrot.slane %v17809_v62, 4  ;;  %5323 = vrot.lane.b32.xlu0 %v15249_v7, %s11468_s28  ;;  %v3112_v63 = vsel %vm3049_vm7, %v17800_v20, %v3111_v27  ;;  %v17812_v36 = vld [vmem:[#allocation23_spill] sm:$0xff] }
 0x411   : > { %9628 = vmatprep.subr.bf16.mxu0 %v17806_v23  ;;  %v5948_v59 = vsel %vm5863_vm8, %v15056_v22, %v5947_v13  ;;  %5349 = vrot.lane.b32.xlu1 %v15255_v42, %s11468_s28  ;;  %v10435_v22 = vcombine.high %v3112_v63, %v3136_v9  ;;  %v17811_v5 = vrot.slane %v15094_v0, 4  ;;  %v17815_v45 = vrot.slane %v17814_v26, 4  ;;  %v15700_v52 = vpop.permute.xlu0 %5774 }
 0x412   : > { %v3087_v31 = vsel %vm3047_vm1, %v17810_v43, %v17808_v47  ;;  %v10769_v23 = vcombine.high %v5924_v16, %v5948_v59  ;;  %v17813_v47 = vrot.slane %v17812_v36, 4  ;;  %v17816_v27 = vcombine.low %v17804_v2, %v17805_v25  ;;  %v15717_v25 = vld [vmem:[#allocation2 + $0x54] sm:$0xff] }
 0x413   : > { %v5875_v13 = vsel %vm3047_vm1, %v17811_v5, %v17360_v21  ;;  %9707 = vmatpush1.bf16.msra.mxu1 %v10458_v57  ;;  %v17817_v12 = vrot.slane %v15671_v19, 4  ;;  %v17818_v5 = vrot.slane %v15104_v38, 4  ;;  %v3088_v21 = vsel %vm3049_vm7, %v17809_v62, %v3087_v31 }
 0x414   : > { %v3063_v43 = vsel %vm3047_vm1, %v17815_v45, %v17813_v47  ;;  %9629 = vmatpush1.bf16.msra.mxu0 %v17816_v27  ;;  %v5876_v20 = vsel %vm5863_vm8, %v15094_v0, %v5875_v13  ;;  %v17374_v47 = vrot.slane %v15700_v52, 4  ;;  %v15715_v45 = vpop.permute.xlu1 %5800  ;;  %9708 = vmatprep.subr.bf16.mxu1 %v10435_v22  ;;  %v10768_v57 = vcombine.low %v5924_v16, %v5948_v59 }
 0x415   : > { %v5899_v36 = vsel %vm3047_vm1, %v17818_v5, %v17817_v12  ;;  %9630 = vmatprep.subr.bf16.mxu0 %v10769_v23  ;;  %v17371_v2 = vrot.slane %v15715_v45, 4  ;;  %v10434_v13 = vcombine.low %v3112_v63, %v3136_v9  ;;  %5726 = vrot.lane.b32.xlu0 %v15717_v25, %s11467_s27  ;;  %v15724_v12 = vld [vmem:[#allocation2 + $0xbc] sm:$0xff]  ;;  %v3064_v62 = vsel %vm3049_vm7, %v17814_v26, %v3063_v43  ;;  %v15733_v22 = vpop.permute.xlu0 %5319 }
 0x416   : > { %v5900_v0 = vsel %vm5863_vm8, %v15104_v38, %v5899_v36  ;;  %5752 = vrot.lane.b32.xlu1 %v15724_v12, %s11467_s27  ;;  %v10411_v23 = vcombine.high %v3064_v62, %v3088_v21  ;;  %v5925_v38 = vsel %vm3047_vm1, %v5843_v33, %v17374_v47  ;;  %v5390_v59 = vrot.slane %v15733_v22, 4  ;;  %v4185_v47 = vld [vmem:[#allocation2 + $0x130] sm:$0xf] }
 0x417   : > { %v10745_v31 = vcombine.high %v5876_v20, %v5900_v0  ;;  %9709 = vmatpush1.bf16.msra.mxu1 %v10434_v13  ;;  %v5926_v16 = vsel %vm5863_vm8, %v15619_v50, %v5925_v38  ;;  %v5949_v9 = vsel %vm3047_vm1, %v5856_v29, %v17371_v2  ;;  %v10744_v43 = vcombine.low %v5876_v20, %v5900_v0 }
 0x418   : > { %9631 = vmatpush2.bf16.msra.mxu0 %v10768_v57  ;;  %v15741_v63 = vpop.permute.xlu1 %5345  ;;  %9710 = vmatprep.subr.bf16.mxu1 %v10411_v23  ;;  %v5950_v33 = vsel %vm5863_vm8, %v15633_v53, %v5949_v9  ;;  %v10410_v27 = vcombine.low %v3064_v62, %v3088_v21  ;;  %v17819_v29 = vrot.slane %v15136_v11, 4  ;;  %v17820_v21 = vrot.slane %v15144_v15, 4 }
 0x419   : > { %9632 = vmatprep.subr.bf16.mxu0 %v10745_v31  ;;  %v5403_v26 = vrot.slane %v15741_v63, 4  ;;  %5271 = vrot.lane.b32.xlu0 %v15301_v48, %s11468_s28  ;;  %v10771_v50 = vcombine.high %v5926_v16, %v5950_v33  ;;  %v15753_v36 = vpop.permute.xlu0 %5722  ;;  %v10770_v31 = vcombine.low %v5926_v16, %v5950_v33  ;;  %v17821_v38 = vrot.slane %v15658_v3, 4 }
 0x41a   : > { %5297 = vrot.lane.b32.xlu1 %v15308_v18, %s11468_s28  ;;  %v5470_v5 = vsel %vm3047_vm1, %v17819_v29, %v5390_v59  ;;  %v17370_v0 = vrot.slane %v15753_v36, 4  ;;  %v17822_v16 = vrot.slane %v15671_v19, 4 }
 0x41b   : > { %9711 = vmatpush1.bf16.msra.mxu1 %v10410_v27  ;;  %v5471_v53 = vsel %vm5410_vm9, %v15136_v11, %v5470_v5  ;;  %v5494_v20 = vsel %vm3047_vm1, %v17820_v21, %v5403_v26 }
 0x41c   : > { %9633 = vmatpush2.bf16.msra.mxu0 %v10744_v43  ;;  %v15761_v57 = vpop.permute.xlu1 %5748  ;;  %9712 = vmatprep.subr.bf16.mxu1 %v10771_v50  ;;  %v5495_v13 = vsel %vm5410_vm9, %v15144_v15, %v5494_v20  ;;  %v5877_v9 = vsel %vm3047_vm1, %v17821_v38, %v17370_v0 }
 0x41d   : > { %v17369_v62 = vrot.slane %v15761_v57, 4  ;;  %5325 = vrot.lane.b32.xlu0 %v15638_v14, %s11468_s28  ;;  %v10720_v23 = vcombine.low %v5471_v53, %v5495_v13  ;;  %v10721_v11 = vcombine.high %v5471_v53, %v5495_v13  ;;  %v5268_v43 = vpop.permute.xlu0 %5267  ;;  %v5878_v15 = vsel %vm5863_vm8, %v15658_v3, %v5877_v9 }
 0x41e   : > { %5351 = vrot.lane.b32.xlu1 %v15644_v24, %s11468_s28  ;;  %v5364_v27 = vrot.slane %v5268_v43, 4  ;;  %v17823_v3 = vrot.slane %v15170_v28, 4 }
 0x41f   : > { %9634 = vmatprep.subr.bf16.mxu0 %v10721_v11  ;;  %9713 = vmatpush2.bf16.msra.mxu1 %v10770_v31  ;;  %v5901_v33 = vsel %vm3047_vm1, %v17822_v16, %v17369_v62 }
 0x420   : > { %9635 = vmatpush2.bf16.msra.mxu0 %v10720_v23  ;;  %v5294_v50 = vpop.permute.xlu1 %5293  ;;  %v5902_v29 = vsel %vm5863_vm8, %v15671_v19, %v5901_v33  ;;  %v5422_v20 = vsel %vm3047_vm1, %v17823_v3, %v5364_v27  ;;  %v17824_v19 = vrot.slane %v15178_v61, 4 }
 0x421   : > { %v5377_v5 = vrot.slane %v5294_v50, 4  ;;  %4870 = vrot.lane.b32.xlu0 %v15249_v7, %s11469_s29  ;;  %v10746_v53 = vcombine.low %v5878_v15, %v5902_v29  ;;  %v10747_v21 = vcombine.high %v5878_v15, %v5902_v29  ;;  %v15791_v13 = vpop.permute.xlu0 %5321  ;;  %v5423_v31 = vsel %vm5410_vm9, %v15170_v28, %v5422_v20 }
 0x422   : > { %4896 = vrot.lane.b32.xlu1 %v15255_v42, %s11469_s29  ;;  %v17368_v7 = vrot.slane %v15791_v13, 4 }
 0x423   : > { %9714 = vmatprep.subr.bf16.mxu1 %v10747_v21  ;;  %v5446_v23 = vsel %vm3047_vm1, %v17824_v19, %v5377_v5  ;;  %v17826_v19 = vrot.slane %v15210_v46, 4 }
 0x424   : > { %9715 = vmatpush2.bf16.msra.mxu1 %v10746_v53  ;;  %v15799_v11 = vpop.permute.xlu1 %5347  ;;  %v5447_v42 = vsel %vm5410_vm9, %v15178_v61, %v5446_v23  ;;  %v5472_v28 = vsel %vm3047_vm1, %v5390_v59, %v17368_v7 }
 0x425   : > { %v17367_v38 = vrot.slane %v15799_v11, 4  ;;  %5273 = vrot.lane.b32.xlu0 %v15717_v25, %s11468_s28  ;;  %v10696_v9 = vcombine.low %v5423_v31, %v5447_v42  ;;  %v10697_v15 = vcombine.high %v5423_v31, %v5447_v42  ;;  %v4867_v16 = vpop.permute.xlu0 %4866  ;;  %v5473_v33 = vsel %vm5410_vm9, %v15733_v22, %v5472_v28 }
 0x426   : > { %5299 = vrot.lane.b32.xlu1 %v15724_v12, %s11468_s28  ;;  %v4937_v29 = vrot.slane %v4867_v16, 4  ;;  %v17825_v22 = vrot.slane %v15202_v55, 4 }
 0x427   : > { %9636 = vmatprep.subr.bf16.mxu0 %v10697_v15  ;;  %v5496_v61 = vsel %vm3047_vm1, %v5403_v26, %v17367_v38 }
 0x428   : > { %9637 = vmatpush2.bf16.msra.mxu0 %v10696_v9  ;;  %v15816_v53 = vpop.permute.xlu1 %4892  ;;  %v5497_v21 = vsel %vm5410_vm9, %v15741_v63, %v5496_v61  ;;  %v5017_v26 = vsel %vm3047_vm1, %v17825_v22, %v4937_v29 }
 0x429   : > { %v4950_v3 = vrot.slane %v15816_v53, 4  ;;  %4818 = vrot.lane.b32.xlu0 %v15301_v48, %s11469_s29  ;;  %v10722_v59 = vcombine.low %v5473_v33, %v5497_v21  ;;  %v10723_v20 = vcombine.high %v5473_v33, %v5497_v21  ;;  %v15828_v31 = vpop.permute.xlu0 %5269  ;;  %v5018_v63 = vsel %vm4957_vm10, %v15202_v55, %v5017_v26 }
 0x42a   : > { %4844 = vrot.lane.b32.xlu1 %v15308_v18, %s11469_s29  ;;  %v17366_v48 = vrot.slane %v15828_v31, 4 }
 0x42b   : > { %9716 = vmatprep.subr.bf16.mxu1 %v10723_v20  ;;  %v5041_v23 = vsel %vm3047_vm1, %v17826_v19, %v4950_v3  ;;  %v15852_v21 = vpop.f32.mrf.mxu0 }
 0x42c   : > { %9717 = vmatpush2.bf16.msra.mxu1 %v10722_v59  ;;  %v15836_v42 = vpop.permute.xlu1 %5295  ;;  %v5042_v18 = vsel %vm4957_vm10, %v15210_v46, %v5041_v23  ;;  %v5424_v55 = vsel %vm3047_vm1, %v5364_v27, %v17366_v48  ;;  %17827 = vst [vmem:[#allocation9_spill] sm:$0xff] %v15852_v21  ;;  %v17871_v21 = vrot.slane %v15700_v52, 4 }
 0x42d   : > { %v17365_v9 = vrot.slane %v15836_v42, 4  ;;  %4872 = vrot.lane.b32.xlu0 %v15638_v14, %s11469_s29  ;;  %v10672_v15 = vcombine.low %v5018_v63, %v5042_v18  ;;  %v10673_v28 = vcombine.high %v5018_v63, %v5042_v18  ;;  %v4815_v33 = vpop.permute.xlu0 %4814  ;;  %v5425_v61 = vsel %vm5410_vm9, %v5268_v43, %v5424_v55 }
 0x42e   : > { %4898 = vrot.lane.b32.xlu1 %v15644_v24, %s11469_s29  ;;  %v4911_v59 = vrot.slane %v4815_v33, 4  ;;  %v17828_v43 = vrot.slane %v15222_v6, 4 }
 0x42f   : > { %9638 = vmatprep.subr.bf16.mxu0 %v10673_v28  ;;  %v5448_v46 = vsel %vm3047_vm1, %v5377_v5, %v17365_v9 }
 0x430   : > { %9639 = vmatpush2.bf16.msra.mxu0 %v10672_v15  ;;  %v4841_v20 = vpop.permute.xlu1 %4840  ;;  %v5449_v22 = vsel %vm5410_vm9, %v5294_v50, %v5448_v46  ;;  %v4969_v5 = vsel %vm3047_vm1, %v17828_v43, %v4911_v59  ;;  %v17829_v50 = vrot.slane %v15229_v51, 4  ;;  %v15869_v15 = vpop.f32.mrf.mxu0 }
 0x431   : > { %v4924_v26 = vrot.slane %v4841_v20, 4  ;;  %4820 = vrot.lane.b32.xlu0 %v15717_v25, %s11469_s29  ;;  %v10698_v27 = vcombine.low %v5425_v61, %v5449_v22  ;;  %v10699_v63 = vcombine.high %v5425_v61, %v5449_v22  ;;  %v15862_v19 = vpop.permute.xlu0 %4868  ;;  %v4970_v23 = vsel %vm4957_vm10, %v15222_v6, %v4969_v5  ;;  %17830 = vst [vmem:[#allocation15_spill] sm:$0xff] %v15869_v15  ;;  %v11010_v5 = vld [vmem:[#allocation2 + $0x108] ss:$104 sps:$4 sm:$0xff]  }
 0x432   : > { %4846 = vrot.lane.b32.xlu1 %v15724_v12, %s11469_s29  ;;  %v17364_v28 = vrot.slane %v15862_v19, 4 }
 0x433   : > { %9718 = vmatprep.subr.bf16.mxu1 %v10699_v63  ;;  %v4993_v18 = vsel %vm3047_vm1, %v17829_v50, %v4924_v26  ;;  %v9324_v63 = vpop.f32.mrf.mxu0 }
 0x434   : > { %9719 = vmatpush2.bf16.msra.mxu1 %v10698_v27  ;;  %v15872_v55 = vpop.permute.xlu1 %4894  ;;  %v4994_v61 = vsel %vm4957_vm10, %v15229_v51, %v4993_v18  ;;  %v5019_v27 = vsel %vm3047_vm1, %v4937_v29, %v17364_v28 }
 0x435   : > { %v17363_v46 = vrot.slane %v15872_v55, 4  ;;  %6231 = vrot.lane.b32.xlu0 %v15638_v14, %s11464_s20  ;;  %v10648_v6 = vcombine.low %v4970_v23, %v4994_v61  ;;  %v10649_v22 = vcombine.high %v4970_v23, %v4994_v61  ;;  %v15884_v43 = vpop.permute.xlu0 %4816  ;;  %v5020_v51 = vsel %vm4957_vm10, %v4867_v16, %v5019_v27  ;;  %v9325_v50 = vpop.f32.mrf.mxu0  ;;  %v11013_v27 = vld [vmem:[#allocation2 + $0x38] ss:$104 sps:$4 sm:$0xff]  }
 0x436   : > { %6257 = vrot.lane.b32.xlu1 %v15644_v24, %s11464_s20  ;;  %v17362_v23 = vrot.slane %v15884_v43, 4 }
 0x437   : > { %9640 = vmatprep.subr.bf16.mxu0 %v10649_v22  ;;  %v5043_v14 = vsel %vm3047_vm1, %v4950_v3, %v17363_v46  ;;  %v11008_v22 = vld [vmem:[#allocation2 + $0x104] ss:$104 sps:$4 sm:$0xff]   ;;  %v15905_v63 = vpop.f32.mrf.mxu0 }
 0x438   : > { %9641 = vmatpush2.bf16.msra.mxu0 %v10648_v6  ;;  %v15891_v18 = vpop.permute.xlu1 %4842  ;;  %v5044_v24 = vsel %vm4957_vm10, %v15816_v53, %v5043_v14  ;;  %v4971_v3 = vsel %vm3047_vm1, %v4911_v59, %v17362_v23  ;;  %v15903_v6 = vpop.f32.mrf.mxu1  ;;  %17832 = vst [vmem:[#allocation8_spill] sm:$0xff] %v15905_v63  ;;  %v15916_v59 = vld [vmem:[#allocation2 + $0x12c] sm:$0xff] }
 0x439   : > { %v17361_v29 = vrot.slane %v15891_v18, 4  ;;  %9642 = vmatprep.subr.bf16.mxu0 %v11010_v5  ;;  %6179 = vrot.lane.b32.xlu0 %v15717_v25, %s11464_s20  ;;  %v10674_v16 = vcombine.low %v5020_v51, %v5044_v24  ;;  %v10675_v61 = vcombine.high %v5020_v51, %v5044_v24  ;;  %17831 = vst [vmem:[#allocation22_spill] sm:$0xff] %v15903_v6  ;;  %v15907_v53 = vpop.permute.xlu0 %6227 }
 0x43a   : > { %6205 = vrot.lane.b32.xlu1 %v15724_v12, %s11464_s20  ;;  %v4972_v25 = vsel %vm4957_vm10, %v4815_v33, %v4971_v3  ;;  %v6297_v12 = vrot.slane %v15907_v53, 4  ;;  %v15919_v50 = vpop.f32.mrf.mxu1  ;;  %v15924_v33 = vld [vmem:[#allocation2 + $0x194] sm:$0xff] }
 0x43b   : > { %9720 = vmatprep.subr.bf16.mxu1 %v10675_v61  ;;  %v4995_v5 = vsel %vm3047_vm1, %v4924_v26, %v17361_v29  ;;  %17833 = vst [vmem:[#allocation11_spill] sm:$0xff] %v15919_v50  ;;  %v11016_v29 = vld [vmem:[#allocation2 + $0x110] ss:$104 sps:$4 sm:$0xff]   ;;  %v17869_v50 = vld [vmem:[#allocation31_spill] sm:$0xff] }
 0x43c   : > { %9643 = vmatpush2.bf16.msra.mxu0 %v11008_v22  ;;  %9721 = vmatpush2.bf16.msra.mxu1 %v10674_v16  ;;  %v15914_v51 = vpop.permute.xlu1 %6253  ;;  %v4996_v14 = vsel %vm4957_vm10, %v4841_v20, %v4995_v5  ;;  %v15926_v22 = vpop.f32.mrf.mxu0  ;;  %v11011_v16 = vld [vmem:[#allocation2 + $0x34] ss:$104 sps:$4 sm:$0xff]   ;;  %v17835_v20 = vrot.slane %v15288_v17, 4  ;;  %v17870_v6 = vrot.slane %v17869_v50, 4 }
 0x43d   : > { %v6310_v24 = vrot.slane %v15914_v51, 4  ;;  %9644 = vmatprep.subr.bf16.mxu0 %v11013_v27  ;;  %6233 = vrot.lane.b32.xlu0 %v15916_v59, %s11464_s20  ;;  %v10650_v26 = vcombine.low %v4972_v25, %v4996_v14  ;;  %v10651_v61 = vcombine.high %v4972_v25, %v4996_v14  ;;  %17834 = vst [vmem:[#allocation21_spill] sm:$0xff] %v15926_v22  ;;  %v9406_v27 = vpop.f32.mrf.mxu1  ;;  %v15935_v5 = vpop.permute.xlu0 %6175  ;;  %v17836_v14 = vrot.slane %v15299_v30, 4 }
 0x43e   : > { %6259 = vrot.lane.b32.xlu1 %v15924_v33, %s11464_s20  ;;  %v6378_v3 = vsel %vm3047_vm1, %v17835_v20, %v6297_v12  ;;  %v9447_v46 = vpop.f32.mrf.mxu0  ;;  %v6271_v28 = vrot.slane %v15935_v5, 4  ;;  %v15945_v20 = vld [vmem:[#allocation2 + $0x128] sm:$0xff] }
 0x43f   : > { %9722 = vmatprep.subr.bf16.mxu1 %v10651_v61  ;;  %v6379_v25 = vsel %vm6316_vm2, %v15288_v17, %v6378_v3  ;;  %v6402_v23 = vsel %vm3047_vm1, %v17836_v14, %v6310_v24  ;;  %v9407_v27 = vpop.f32.mrf.mxu1  ;;  %v15952_v17 = vld [vmem:[#allocation2 + $0x190] sm:$0xff]  ;;  %v11019_v14 = vld [vmem:[#allocation2 + $0x40] ss:$104 sps:$4 sm:$0xff]  }
 0x440   : > { %9645 = vmatpush2.bf16.msra.mxu0 %v11011_v16  ;;  %9723 = vmatpush2.bf16.msra.mxu1 %v10650_v26  ;;  %v15943_v9 = vpop.permute.xlu1 %6201  ;;  %v6403_v61 = vsel %vm6316_vm2, %v15299_v30, %v6402_v23  ;;  %v9448_v16 = vpop.f32.mrf.mxu0  ;;  %v11014_v26 = vld [vmem:[#allocation2 + $0x10c] ss:$104 sps:$4 sm:$0xff]   ;;  %v17837_v30 = vrot.slane %v15342_v8, 4 }
 0x441   : > { %v17376_v48 = vrot.slane %v15943_v9, 4  ;;  %9724 = vmatprep.subr.bf16.mxu1 %v11016_v29  ;;  %4325 = vrot.lane.b32.xlu0 %v15945_v20, %s11465_s24  ;;  %v10818_v46 = vcombine.low %v6379_v25, %v6403_v61  ;;  %v10819_v3 = vcombine.high %v6379_v25, %v6403_v61  ;;  %v17838_v61 = vrot.slane %v15353_v58, 4  ;;  %v15971_v16 = vpop.f32.mrf.mxu1 }
 0x442   : > { %4351 = vrot.lane.b32.xlu1 %v15952_v17, %s11465_s24  ;;  %v6330_v23 = vsel %vm3047_vm1, %v17837_v30, %v6271_v28  ;;  %v15961_v29 = vpop.permute.xlu0 %6229  ;;  %17839 = vst [vmem:[#allocation13_spill] sm:$0xff] %v15971_v16  ;;  %v15976_v30 = vld [vmem:[#allocation2 + $0x5c] sm:$0xff] }
 0x443   : > { %9749 = vmatprep.subr.bf16.mxu0 %v10819_v3  ;;  %9647 = vmatmul.mubr.bf16.vlgmr.msra.gmra.mxu0 %v17584_v37  ;;  %v6331_v25 = vsel %vm6316_vm2, %v15342_v8, %v6330_v23  ;;  %v6354_v27 = vsel %vm3047_vm1, %v17838_v61, %v17376_v48  ;;  %v17372_v38 = vrot.slane %v15961_v29, 4  ;;  %v15983_v23 = vld [vmem:[#allocation2 + $0xc4] sm:$0xff]  ;;  %v15985_v0 = vpop.f32.mrf.mxu1 }
 0x444   : > { %9725 = vmatpush2.bf16.msra.mxu1 %v11014_v26  ;;  %9750 = vmatpush1.bf16.msra.mxu0 %v10818_v46  ;;  %v15974_v3 = vpop.permute.xlu1 %6255  ;;  %v6355_v7 = vsel %vm6316_vm2, %v15353_v58, %v6354_v27  ;;  %17840 = vst [vmem:[#allocation46_spill] sm:$0xff] %v15985_v0  ;;  %v11017_v46 = vld [vmem:[#allocation2 + $0x3c] ss:$104 sps:$4 sm:$0xff]  }
 0x445   : > { %v17373_v8 = vrot.slane %v15974_v3, 4  ;;  %9726 = vmatprep.subr.bf16.mxu1 %v11019_v14  ;;  %6181 = vrot.lane.b32.xlu0 %v15976_v30, %s11464_s20  ;;  %v10794_v61 = vcombine.low %v6331_v25, %v6355_v7  ;;  %v10795_v62 = vcombine.high %v6331_v25, %v6355_v7  ;;  %v6380_v58 = vsel %vm3047_vm1, %v6297_v12, %v17372_v38  ;;  %v9529_v25 = vpop.f32.mrf.mxu1  ;;  %v16005_v12 = vld [vmem:[#allocation2 + $0x58] sm:$0xff] }
 0x446   : > { %6207 = vrot.lane.b32.xlu1 %v15983_v23, %s11464_s20  ;;  %9769 = vmatprep.mubr.bf16.mxu0 %v17589_v35  ;;  %v15995_v26 = vpop.permute.xlu0 %4321  ;;  %v6381_v7 = vsel %vm6316_vm2, %v15907_v53, %v6380_v58  ;;  %v16012_v53 = vld [vmem:[#allocation2 + $0xc0] sm:$0xff] }
 0x447   : > { %9751 = vmatprep.subr.bf16.mxu0 %v10795_v62  ;;  %v6404_v14 = vsel %vm3047_vm1, %v6310_v24, %v17373_v8  ;;  %v17375_v27 = vrot.slane %v15995_v26, 4  ;;  %v9530_v25 = vpop.f32.mrf.mxu1 }
 0x448   : > { %9727 = vmatpush2.bf16.msra.mxu1 %v11017_v46  ;;  %9752 = vmatpush1.bf16.msra.mxu0 %v10794_v61  ;;  %v16003_v2 = vpop.permute.xlu1 %4347  ;;  %v6405_v62 = vsel %vm6316_vm2, %v15914_v51, %v6404_v14  ;;  %v17841_v61 = vrot.slane %v15402_v10, 4  ;;  %v17842_v51 = vrot.slane %v15412_v41, 4 }
 0x449   : > { %v4403_v38 = vrot.slane %v16003_v2, 4  ;;  %4273 = vrot.lane.b32.xlu0 %v16005_v12, %s11465_s24  ;;  %v10820_v24 = vcombine.low %v6381_v7, %v6405_v62  ;;  %v10821_v58 = vcombine.high %v6381_v7, %v6405_v62 }
 0x44a   : > { %4299 = vrot.lane.b32.xlu1 %v16012_v53, %s11465_s24  ;;  %v4472_v46 = vsel %vm3047_vm1, %v17841_v61, %v17375_v27  ;;  %v16024_v8 = vpop.permute.xlu0 %6177 }
 0x44b   : > { %v4496_v14 = vsel %vm3047_vm1, %v17842_v51, %v4403_v38  ;;  %9831 = vmatprep.subr.bf16.mxu1 %v10821_v58  ;;  %9729 = vmatmul.mubr.bf16.vlgmr.msra.gmra.mxu1 %v17584_v37  ;;  %v4473_v7 = vsel %vm4408_vm3, %v15402_v10, %v4472_v46  ;;  %v17378_v62 = vrot.slane %v16024_v8, 4  ;;  %v4198_v51 = vld [vmem:[#allocation2 + $0x198] sm:$0xf] }
 0x44c   : > { %9832 = vmatpush1.bf16.msra.mxu1 %v10820_v24  ;;  %v16030_v25 = vpop.permute.xlu1 %6203  ;;  %v4497_v61 = vsel %vm4408_vm3, %v15412_v41, %v4496_v14  ;;  %10835 = vmatmul.mubr.msk.bf16.vlgmr.msra.gmra.mxu0 %vm9118_vm5, %v15362_v40  ;;  %v17843_v40 = vrot.slane %v15943_v9, 4 }
 0x44d   : > { %v17377_v58 = vrot.slane %v16030_v25, 4  ;;  %4327 = vrot.lane.b32.xlu0 %v4185_v47, %s11465_s24  ;;  %v10580_v27 = vcombine.low %v4473_v7, %v4497_v61  ;;  %v10581_v48 = vcombine.high %v4473_v7, %v4497_v61  ;;  %9851 = vmatprep.mubr.bf16.mxu1 %v17589_v35  ;;  %v6332_v10 = vsel %vm3047_vm1, %v6271_v28, %v17378_v62 }
 0x44e   : > { %4353 = vrot.lane.b32.xlu1 %v4198_v51, %s11465_s24  ;;  %9810 = vmatprep.mubr.bf16.mxu0 %v12849_v60  ;;  %v16051_v47 = vpop.permute.xlu0 %4269  ;;  %v6333_v24 = vsel %vm6316_vm2, %v15935_v5, %v6332_v10  ;;  %v17844_v51 = vrot.slane %v15459_v44, 4  ;;  %v17845_v5 = vrot.slane %v15469_v49, 4 }
 0x44f   : > { %v6356_v41 = vsel %vm3047_vm1, %v17843_v40, %v17377_v58  ;;  %9778 = vmatprep.subr.bf16.mxu0 %v10581_v48  ;;  %v4364_v46 = vrot.slane %v16051_v47, 4 }
 0x450   : > { %9779 = vmatpush1.bf16.msra.mxu0 %v10580_v27  ;;  %v16056_v28 = vpop.permute.xlu1 %4295  ;;  %v6357_v14 = vsel %vm6316_vm2, %v15943_v9, %v6356_v41 }
 0x451   : > { %v4377_v7 = vrot.slane %v16056_v28, 4  ;;  %3872 = vrot.lane.b32.xlu0 %v15945_v20, %s11466_s25  ;;  %v10796_v61 = vcombine.low %v6333_v24, %v6357_v14  ;;  %v10797_v48 = vcombine.high %v6333_v24, %v6357_v14  ;;  %v4424_v40 = vsel %vm3047_vm1, %v17844_v51, %v4364_v46  ;;  %v4159_v14 = vld [vmem:[#allocation2 + $0x60] sm:$0xf] }
 0x452   : > { %3898 = vrot.lane.b32.xlu1 %v15952_v17, %s11466_s25  ;;  %v16071_v9 = vpop.permute.xlu0 %4323  ;;  %v4425_v10 = vsel %vm4408_vm3, %v15459_v44, %v4424_v40  ;;  %v17846_v44 = vrot.slane %v15995_v26, 4 }
 0x453   : > { %v4448_v27 = vsel %vm3047_vm1, %v17845_v5, %v4377_v7  ;;  %9833 = vmatprep.subr.bf16.mxu1 %v10797_v48  ;;  %v17380_v41 = vrot.slane %v16071_v9, 4  ;;  %v4172_v5 = vld [vmem:[#allocation2 + $0xc8] sm:$0xf] }
 0x454   : > { %9834 = vmatpush1.bf16.msra.mxu1 %v10796_v61  ;;  %v16076_v24 = vpop.permute.xlu1 %4349  ;;  %v4449_v51 = vsel %vm4408_vm3, %v15469_v49, %v4448_v27 }
 0x455   : > { %v17379_v58 = vrot.slane %v16076_v24, 4  ;;  %4275 = vrot.lane.b32.xlu0 %v4159_v14, %s11465_s24  ;;  %v10556_v48 = vcombine.low %v4425_v10, %v4449_v51  ;;  %v10557_v62 = vcombine.high %v4425_v10, %v4449_v51  ;;  %v4474_v40 = vsel %vm3047_vm1, %v17846_v44, %v17380_v41  ;;  %v16098_v10 = vld [vmem:[%s17029_s2 + $0x8] ss:$0 sps:$4 sm:$0xff]  }
 0x456   : > { %4301 = vrot.lane.b32.xlu1 %v4172_v5, %s11465_s24  ;;  %v16091_v49 = vpop.permute.xlu0 %3868  ;;  %v4475_v27 = vsel %vm4408_vm3, %v15995_v26, %v4474_v40  ;;  %v17847_v44 = vrot.slane %v15509_v39, 4 }
 0x457   : > { %v4498_v61 = vsel %vm3047_vm1, %v4403_v38, %v17379_v58  ;;  %9780 = vmatprep.subr.bf16.mxu0 %v10557_v62  ;;  %10836 = vmatmul.mubr.msk.bf16.vlgmr.msra.gmra.mxu1 %vm9118_vm5, %v16098_v10  ;;  %v3937_v14 = vrot.slane %v16091_v49, 4 }
 0x458   : > { %9781 = vmatpush1.bf16.msra.mxu0 %v10556_v48  ;;  %v16103_v51 = vpop.permute.xlu1 %3894  ;;  %v4499_v38 = vsel %vm4408_vm3, %v16003_v2, %v4498_v61  ;;  %9892 = vmatprep.mubr.bf16.mxu1 %v12849_v60  ;;  %v17848_v48 = vrot.slane %v15517_v56, 4 }
 0x459   : > { %v3950_v26 = vrot.slane %v16103_v51, 4  ;;  %3820 = vrot.lane.b32.xlu0 %v16005_v12, %s11466_s25  ;;  %v10582_v62 = vcombine.low %v4475_v27, %v4499_v38  ;;  %v10583_v5 = vcombine.high %v4475_v27, %v4499_v38  ;;  %v4019_v40 = vsel %vm3047_vm1, %v17847_v44, %v3937_v14  ;;  %v3732_v38 = vld [vmem:[#allocation2 + $0x130] sm:$0xf] }
 0x45a   : > { %3846 = vrot.lane.b32.xlu1 %v16012_v53, %s11466_s25  ;;  %v16119_v61 = vpop.permute.xlu0 %4271  ;;  %v4020_v58 = vsel %vm3955_vm4, %v15509_v39, %v4019_v40 }
 0x45b   : > { %v4043_v2 = vsel %vm3047_vm1, %v17848_v48, %v3950_v26  ;;  %9860 = vmatprep.subr.bf16.mxu1 %v10583_v5  ;;  %v17386_v12 = vrot.slane %v16119_v61, 4  ;;  %v3745_v48 = vld [vmem:[#allocation2 + $0x198] sm:$0xf] }
 0x45c   : > { %9861 = vmatpush1.bf16.msra.mxu1 %v10582_v62  ;;  %v16124_v27 = vpop.permute.xlu1 %4297  ;;  %v4044_v44 = vsel %vm3955_vm4, %v15517_v56, %v4043_v2 }
 0x45d   : > { %v17383_v41 = vrot.slane %v16124_v27, 4  ;;  %3874 = vrot.lane.b32.xlu0 %v3732_v38, %s11466_s25  ;;  %v10532_v5 = vcombine.low %v4020_v58, %v4044_v44  ;;  %v10533_v0 = vcombine.high %v4020_v58, %v4044_v44  ;;  %v4426_v39 = vsel %vm3047_vm1, %v4364_v46, %v17386_v12 }
 0x45e   : > { %3900 = vrot.lane.b32.xlu1 %v3745_v48, %s11466_s25  ;;  %v16137_v40 = vpop.permute.xlu0 %3816  ;;  %v4427_v56 = vsel %vm4408_vm3, %v16051_v47, %v4426_v39  ;;  %v17849_v44 = vrot.slane %v15554_v54, 4  ;;  %v17850_v47 = vrot.slane %v15563_v34, 4 }
 0x45f   : > { %v4450_v62 = vsel %vm3047_vm1, %v4377_v7, %v17383_v41  ;;  %9782 = vmatprep.subr.bf16.mxu0 %v10533_v0  ;;  %v3911_v2 = vrot.slane %v16137_v40, 4 }
 0x460   : > { %9783 = vmatpush1.bf16.msra.mxu0 %v10532_v5  ;;  %v16142_v58 = vpop.permute.xlu1 %3842  ;;  %v4451_v46 = vsel %vm4408_vm3, %v16056_v28, %v4450_v62 }
 0x461   : > { %v3924_v38 = vrot.slane %v16142_v58, 4  ;;  %3419 = vrot.lane.b32.xlu0 %v15945_v20, %s11463_s19  ;;  %v10558_v7 = vcombine.low %v4427_v56, %v4451_v46  ;;  %v10559_v0 = vcombine.high %v4427_v56, %v4451_v46  ;;  %v3971_v48 = vsel %vm3047_vm1, %v17849_v44, %v3911_v2  ;;  %v3706_v56 = vld [vmem:[#allocation2 + $0x60] sm:$0xf]  ;;  %v3719_v44 = vld [vmem:[#allocation2 + $0xc8] sm:$0xf] }
 0x462   : > { %3445 = vrot.lane.b32.xlu1 %v15952_v17, %s11463_s19  ;;  %v16157_v28 = vpop.permute.xlu0 %3870  ;;  %v3972_v39 = vsel %vm3955_vm4, %v15554_v54, %v3971_v48 }
 0x463   : > { %v3995_v5 = vsel %vm3047_vm1, %v17850_v47, %v3924_v38  ;;  %9862 = vmatprep.subr.bf16.mxu1 %v10559_v0  ;;  %v17382_v20 = vrot.slane %v16157_v28, 4 }
 0x464   : > { %9863 = vmatpush1.bf16.msra.mxu1 %v10558_v7  ;;  %v16162_v62 = vpop.permute.xlu1 %3896  ;;  %v3996_v46 = vsel %vm3955_vm4, %v15563_v34, %v3995_v5 }
 0x465   : > { %v17381_v17 = vrot.slane %v16162_v62, 4  ;;  %3822 = vrot.lane.b32.xlu0 %v3706_v56, %s11466_s25  ;;  %v10508_v0 = vcombine.low %v3972_v39, %v3996_v46  ;;  %v10509_v47 = vcombine.high %v3972_v39, %v3996_v46  ;;  %v4021_v54 = vsel %vm3047_vm1, %v3937_v14, %v17382_v20 }
 0x466   : > { %3848 = vrot.lane.b32.xlu1 %v3719_v44, %s11466_s25  ;;  %v16175_v48 = vpop.permute.xlu0 %3415  ;;  %v4022_v34 = vsel %vm3955_vm4, %v16091_v49, %v4021_v54 }
 0x467   : > { %v4045_v7 = vsel %vm3047_vm1, %v3950_v26, %v17381_v17  ;;  %9784 = vmatprep.subr.bf16.mxu0 %v10509_v47  ;;  %v3484_v5 = vrot.slane %v16175_v48, 4  ;;  %v3279_v26 = vld [vmem:[#allocation2 + $0x130] sm:$0xf]  ;;  %v17851_v47 = vrot.slane %v15580_v1, 4 }
 0x468   : > { %9785 = vmatpush1.bf16.msra.mxu0 %v10508_v0  ;;  %v16180_v39 = vpop.permute.xlu1 %3441  ;;  %v4046_v14 = vsel %vm3955_vm4, %v16103_v51, %v4045_v7  ;;  %v17852_v0 = vrot.slane %v15596_v32, 4 }
 0x469   : > { %v3497_v56 = vrot.slane %v16180_v39, 4  ;;  %3393 = vrot.lane.b32.xlu0 %v16012_v53, %s11463_s19  ;;  %v10534_v46 = vcombine.low %v4022_v34, %v4046_v14  ;;  %v10535_v44 = vcombine.high %v4022_v34, %v4046_v14  ;;  %v3566_v49 = vsel %vm3047_vm1, %v17851_v47, %v3484_v5  ;;  %v17853_v53 = vld [vmem:[#allocation27_spill] sm:$0xff]  ;;  %v3292_v47 = vld [vmem:[#allocation2 + $0x198] sm:$0xf] }
 0x46a   : > { %3421 = vrot.lane.b32.xlu1 %v3279_v26, %s11463_s19  ;;  %v16194_v51 = vpop.permute.xlu0 %3818  ;;  %v3567_v7 = vsel %vm3502_vm6, %v15580_v1, %v3566_v49  ;;  %v3458_v17 = vrot.slane %v17853_v53, 4 }
 0x46b   : > { %v3590_v54 = vsel %vm3047_vm1, %v17852_v0, %v3497_v56  ;;  %9864 = vmatprep.subr.bf16.mxu1 %v10535_v44  ;;  %v17385_v34 = vrot.slane %v16194_v51, 4  ;;  %v3266_v44 = vld [vmem:[#allocation2 + $0xc8] sm:$0xf] }
 0x46c   : > { %9865 = vmatpush1.bf16.msra.mxu1 %v10534_v46  ;;  %v16200_v14 = vpop.permute.xlu1 %3844  ;;  %v3591_v26 = vsel %vm3502_vm6, %v15596_v32, %v3590_v54 }
 0x46d   : > { %v17384_v20 = vrot.slane %v16200_v14, 4  ;;  %3447 = vrot.lane.b32.xlu0 %v3292_v47, %s11463_s19  ;;  %v10484_v0 = vcombine.low %v3567_v7, %v3591_v26  ;;  %v10485_v41 = vcombine.high %v3567_v7, %v3591_v26  ;;  %v3973_v1 = vsel %vm3047_vm1, %v3911_v2, %v17385_v34 }
 0x46e   : > { %3395 = vrot.lane.b32.xlu1 %v3266_v44, %s11463_s19  ;;  %v3390_v49 = vpop.permute.xlu0 %3389  ;;  %v3974_v32 = vsel %vm3955_vm4, %v16137_v40, %v3973_v1  ;;  %v17854_v2 = vrot.slane %v17787_v4, 4  ;;  %v17856_v1 = vld [vmem:[#allocation36_spill] sm:$0xff]  ;;  %s16946_s19 = scalar_lea.vmem %s17032_s5, %s10198_s22 }
 0x46f   : > { %v3997_v46 = vsel %vm3047_vm1, %v3924_v38, %v17384_v20  ;;  %9786 = vmatprep.subr.bf16.mxu0 %v10485_v41  ;;  %v3471_v54 = vrot.slane %v3390_v49, 4  ;;  %v17855_v20 = vld [vmem:[#allocation53_spill] sm:$0xff] }
 0x470   : > { %9787 = vmatpush1.bf16.msra.mxu0 %v10484_v0  ;;  %v16215_v47 = vpop.permute.xlu1 %3417  ;;  %v3998_v7 = vsel %vm3955_vm4, %v16142_v58, %v3997_v46  ;;  %v3518_v26 = vsel %vm3047_vm1, %v17854_v2, %v3458_v17  ;;  %v17857_v0 = vrot.slane %v17856_v1, 4  ;;  %v5640_v58 = vld [vmem:[#allocation2 + $0x134] sm:$0xf]  ;;  %v5653_v46 = vld [vmem:[#allocation2 + $0x19c] sm:$0xf] }
 0x471   : > { %v17388_v44 = vrot.slane %v16215_v47, 4  ;;  %5780 = vrot.lane.b32.xlu0 %v15916_v59, %s11467_s27  ;;  %v10510_v41 = vcombine.low %v3974_v32, %v3998_v7  ;;  %v10511_v38 = vcombine.high %v3974_v32, %v3998_v7  ;;  %v3519_v12 = vsel %vm3502_vm6, %v17787_v4, %v3518_v26 }
 0x472   : > { %v3542_v34 = vsel %vm3047_vm1, %v17857_v0, %v3471_v54  ;;  %5806 = vrot.lane.b32.xlu1 %v15924_v33, %s11467_s27  ;;  %v16231_v2 = vpop.permute.xlu0 %3443  ;;  %v10926_v4 = vpack.i.bf16 %v5653_v46, %v5640_v58  ;;  %v5614_v58 = vld [vmem:[#allocation2 + $0x64] sm:$0xf]  ;;  %v5627_v46 = vld [vmem:[#allocation2 + $0xcc] sm:$0xf] }
 0x473   : > { %9866 = vmatprep.subr.bf16.mxu1 %v10511_v38  ;;  %v3543_v32 = vsel %vm3502_vm6, %v17856_v1, %v3542_v34  ;;  %v3568_v7 = vsel %vm3047_vm1, %v3484_v5, %v17388_v44  ;;  %v17387_v0 = vrot.slane %v16231_v2, 4  ;;  %v17859_v5 = vrot.slane %v17855_v20, 4 }
 0x474   : > { %9867 = vmatpush1.bf16.msra.mxu1 %v10510_v41  ;;  %v16241_v40 = vpop.permute.xlu1 %3391  ;;  %v10460_v16 = vcombine.low %v3519_v12, %v3543_v32  ;;  %v10461_v22 = vcombine.high %v3519_v12, %v3543_v32  ;;  %v3569_v1 = vsel %vm3502_vm6, %v16175_v48, %v3568_v7 }
 0x475   : > { %17858 = vst [vmem:[#allocation37_spill] sm:$0xff] %v16241_v40  ;;  %v17389_v38 = vrot.slane %v16241_v40, 4  ;;  %5728 = vrot.lane.b32.xlu0 %v15976_v30, %s11467_s27  ;;  %v3592_v34 = vsel %vm3047_vm1, %v3497_v56, %v17387_v0  ;;  %v3520_v26 = vsel %vm3047_vm1, %v3458_v17, %v17859_v5  ;;  %v17862_v0 = vld [vmem:[#allocation28_spill] sm:$0xff] }
 0x476   : > { %5754 = vrot.lane.b32.xlu1 %v15983_v23, %s11467_s27  ;;  %9788 = vmatprep.subr.bf16.mxu0 %v10461_v22  ;;  %v16257_v41 = vpop.permute.xlu0 %5776  ;;  %v3593_v56 = vsel %vm3502_vm6, %v16180_v39, %v3592_v34  ;;  %v17860_v22 = vld [vmem:[#allocation64_spill] sm:$0xff]  ;;  %v17863_v44 = vrot.slane %v17862_v0, 4 }
 0x477   : > { %v3544_v12 = vsel %vm3047_vm1, %v3471_v54, %v17389_v38  ;;  %9789 = vmatpush1.bf16.msra.mxu0 %v10460_v16  ;;  %v17861_v32 = vrot.slane %v17860_v22, 4  ;;  %v5845_v5 = vrot.slane %v16257_v41, 4  ;;  %v17864_v38 = vld [vmem:[#allocation50_spill] sm:$0xff]  ;;  %v17865_v16 = vld [vmem:[#allocation51_spill] sm:$0xff]  ;;  %v10486_v48 = vcombine.low %v3569_v1, %v3593_v56 }
 0x478   : > { %v16269_v54 = vpop.permute.xlu1 %5802  ;;  %v17866_v63 = vcombine.high %v17864_v38, %v17865_v16  ;;  %v10487_v7 = vcombine.high %v3569_v1, %v3593_v56  ;;  %v3545_v39 = vsel %vm3502_vm6, %v3390_v49, %v3544_v12  ;;  %v3521_v22 = vsel %vm3502_vm6, %v17853_v53, %v3520_v26 }
 0x479   : > { %v3139_v17 = vsel %vm3047_vm1, %v17863_v44, %v17861_v32  ;;  %v5858_v34 = vrot.slane %v16269_v54, 4  ;;  %10927 = vrot.lane.b32.xlu0 %v10926_v4, %s11467_s27  ;;  %v17867_v44 = vld [vmem:[#allocation59_spill] sm:$0xff]  ;;  %v10463_v49 = vcombine.high %v3521_v22, %v3545_v39  ;;  %v10931_v12 = vpack.i.bf16 %v5627_v46, %v5614_v58  ;;  %v17874_v46 = vld [vmem:[#allocation26_spill] sm:$0xff] }
 0x47a   : > { %9790 = vmatprep.subr.bf16.mxu0 %v17866_v63  ;;  %v17868_v32 = vrot.slane %v17867_v44, 4  ;;  %v5927_v63 = vsel %vm3047_vm1, %v17871_v21, %v5845_v5  ;;  %5327 = vrot.lane.b32.xlu1 %v15916_v59, %s11468_s28  ;;  %v17872_v4 = vrot.slane %v15715_v45, 4  ;;  %v16292_v26 = vpop.permute.xlu0 %5724  ;;  %v17873_v1 = vcombine.low %v17864_v38, %v17865_v16  ;;  %v17877_v16 = vld [vmem:[#allocation56_spill] sm:$0xff] }
 0x47b   : > { %9868 = vmatprep.subr.bf16.mxu1 %v10487_v7  ;;  %v5928_v21 = vsel %vm5863_vm8, %v15700_v52, %v5927_v63  ;;  %v17875_v7 = vld [vmem:[#allocation34_spill] sm:$0xff] }
 0x47c   : > { %v3115_v15 = vsel %vm3047_vm1, %v17870_v6, %v17868_v32  ;;  %v5951_v53 = vsel %vm3047_vm1, %v17872_v4, %v5858_v34  ;;  %9791 = vmatpush1.bf16.msra.mxu0 %v17873_v1  ;;  %9869 = vmatpush1.bf16.msra.mxu1 %v10486_v48  ;;  %v3140_v6 = vsel %vm3049_vm7, %v17862_v0, %v3139_v17  ;;  %v16302_v58 = vpop.permute.xlu1 %5750  ;;  %v17878_v48 = vrot.slane %v17877_v16, 4  ;;  %v17879_v32 = vld [vmem:[#allocation42_spill] sm:$0xff]  ;;  %v17881_v1 = vld [vmem:[#allocation47_spill] sm:$0xff]  ;;  %v5200_v0 = vld [vmem:[#allocation2 + $0x19c] sm:$0xf] }
 0x47d   : > { %v17876_v44 = vcombine.high %v17874_v46, %v17875_v7  ;;  %9870 = vmatprep.subr.bf16.mxu1 %v10463_v49  ;;  %v5952_v38 = vsel %vm5863_vm8, %v15715_v45, %v5951_v53  ;;  %v17880_v4 = vrot.slane %v17879_v32, 4  ;;  %v10462_v17 = vcombine.low %v3521_v22, %v3545_v39  ;;  %5353 = vrot.lane.b32.xlu0 %v15924_v33, %s11468_s28 }
 0x47e   : > { %v3116_v63 = vsel %vm3049_vm7, %v17869_v50, %v3115_v15  ;;  %v17882_v49 = vrot.slane %v17881_v1, 4  ;;  %v17885_v53 = vrot.slane %v16292_v26, 4  ;;  %v17886_v16 = vrot.slane %v15753_v36, 4  ;;  %10932 = vrot.lane.b32.xlu1 %v10931_v12, %s11467_s27  ;;  %v16335_v40 = vpop.permute.xlu0 %5778 }
 0x47f   : > { %9792 = vmatprep.subr.bf16.mxu0 %v17876_v44  ;;  %v3091_v52 = vsel %vm3047_vm1, %v17880_v4, %v17878_v48  ;;  %v17883_v44 = vld [vmem:[#allocation44_spill] sm:$0xff]  ;;  %v10773_v39 = vcombine.high %v5928_v21, %v5952_v38  ;;  %v10439_v22 = vcombine.high %v3116_v63, %v3140_v6  ;;  %v17887_v15 = vrot.slane %v16302_v58, 4 }
 0x480   : > { %v17884_v56 = vrot.slane %v17883_v44, 4  ;;  %v5879_v48 = vsel %vm3047_vm1, %v17886_v16, %v17885_v53  ;;  %v5187_v4 = vld [vmem:[#allocation2 + $0x134] sm:$0xf]  ;;  %v17888_v50 = vrot.slane %v15761_v57, 4  ;;  %9871 = vmatpush1.bf16.msra.mxu1 %v10462_v17  ;;  %v5846_v53 = vrot.slane %v16335_v40, 4  ;;  %v16345_v16 = vpop.permute.xlu1 %5804 }
 0x481   : > { %v5880_v12 = vsel %vm5863_vm8, %v15753_v36, %v5879_v48  ;;  %9872 = vmatprep.subr.bf16.mxu1 %v10439_v22  ;;  %v10772_v17 = vcombine.low %v5928_v21, %v5952_v38  ;;  %5275 = vrot.lane.b32.xlu0 %v15976_v30, %s11468_s28  ;;  %v10936_v36 = vpack.i.bf16 %v5200_v0, %v5187_v4  ;;  %v5174_v38 = vld [vmem:[#allocation2 + $0xcc] sm:$0xf] }
 0x482   : > { %v3067_v45 = vsel %vm3047_vm1, %v17884_v56, %v17882_v49  ;;  %v5903_v1 = vsel %vm3047_vm1, %v17888_v50, %v17887_v15  ;;  %v17889_v56 = vcombine.low %v17874_v46, %v17875_v7  ;;  %v3092_v49 = vsel %vm3049_vm7, %v17879_v32, %v3091_v52  ;;  %5301 = vrot.lane.b32.xlu1 %v15983_v23, %s11468_s28 }
 0x483   : > { %v5904_v15 = vsel %vm5863_vm8, %v15761_v57, %v5903_v1  ;;  %v3068_v46 = vsel %vm3049_vm7, %v17883_v44, %v3067_v45  ;;  %v5859_v7 = vrot.slane %v16345_v16, 4  ;;  %v10438_v50 = vcombine.low %v3116_v63, %v3140_v6  ;;  %v16362_v45 = vpop.permute.xlu0 %5323  ;;  %v5161_v6 = vld [vmem:[#allocation2 + $0x64] sm:$0xf] }
 0x484   : > { %9793 = vmatpush1.bf16.msra.mxu0 %v17889_v56  ;;  %v5929_v32 = vsel %vm3047_vm1, %v5845_v5, %v5846_v53  ;;  %v10749_v52 = vcombine.high %v5880_v12, %v5904_v15  ;;  %v10415_v57 = vcombine.high %v3068_v46, %v3092_v49  ;;  %v5392_v5 = vrot.slane %v16362_v45, 4  ;;  %v16367_v0 = vpop.permute.xlu1 %5349 }
 0x485   : > { %9794 = vmatprep.subr.bf16.mxu0 %v10773_v39  ;;  %v5953_v44 = vsel %vm3047_vm1, %v5858_v34, %v5859_v7  ;;  %9873 = vmatpush1.bf16.msra.mxu1 %v10438_v50  ;;  %v5930_v21 = vsel %vm5863_vm8, %v16257_v41, %v5929_v32  ;;  %v5405_v34 = vrot.slane %v16367_v0, 4  ;;  %v10748_v48 = vcombine.low %v5880_v12, %v5904_v15 }
 0x486   : > { %9874 = vmatprep.subr.bf16.mxu1 %v10415_v57  ;;  %v5954_v63 = vsel %vm5863_vm8, %v16269_v54, %v5953_v44  ;;  %v10414_v39 = vcombine.low %v3068_v46, %v3092_v49  ;;  %10937 = vrot.lane.b32.xlu0 %v10936_v36, %s11468_s28  ;;  %v17890_v41 = vrot.slane %v15791_v13, 4  ;;  %v10941_v1 = vpack.i.bf16 %v5174_v38, %v5161_v6  ;;  %v4734_v57 = vld [vmem:[#allocation2 + $0x134] sm:$0xf]  ;;  %v4747_v44 = vld [vmem:[#allocation2 + $0x19c] sm:$0xf] }
 0x487   : > { %4874 = vrot.lane.b32.xlu1 %v15916_v59, %s11469_s29  ;;  %v10775_v4 = vcombine.high %v5930_v21, %v5954_v63  ;;  %v17891_v54 = vrot.slane %v15799_v11, 4  ;;  %v16385_v12 = vpop.permute.xlu0 %5726  ;;  %v10774_v50 = vcombine.low %v5930_v21, %v5954_v63  ;;  %v4708_v38 = vld [vmem:[#allocation2 + $0x64] sm:$0xf]  ;;  %v4721_v63 = vld [vmem:[#allocation2 + $0xcc] sm:$0xf] }
 0x488   : > { %9795 = vmatpush2.bf16.msra.mxu0 %v10772_v17  ;;  %v5474_v22 = vsel %vm3047_vm1, %v17890_v41, %v5392_v5  ;;  %v5820_v15 = vrot.slane %v16385_v12, 4  ;;  %v16390_v46 = vpop.permute.xlu1 %5752 }
 0x489   : > { %9796 = vmatprep.subr.bf16.mxu0 %v10749_v52  ;;  %v5498_v56 = vsel %vm3047_vm1, %v17891_v54, %v5405_v34  ;;  %9875 = vmatpush1.bf16.msra.mxu1 %v10414_v39  ;;  %v5475_v49 = vsel %vm5410_vm9, %v15791_v13, %v5474_v22  ;;  %v17401_v17 = vrot.slane %v16390_v46, 4  ;;  %v17892_v13 = vrot.slane %v16292_v26, 4 }
 0x48a   : > { %9876 = vmatprep.subr.bf16.mxu1 %v10775_v4  ;;  %v5499_v59 = vsel %vm5410_vm9, %v15799_v11, %v5498_v56  ;;  %4900 = vrot.lane.b32.xlu0 %v15924_v33, %s11469_s29  ;;  %v17893_v11 = vrot.slane %v16302_v58, 4  ;;  %v10946_v54 = vpack.i.bf16 %v4747_v44, %v4734_v57 }
 0x48b   : > { %v10724_v36 = vcombine.low %v5475_v49, %v5499_v59  ;;  %v10725_v32 = vcombine.high %v5475_v49, %v5499_v59  ;;  %v5881_v52 = vsel %vm3047_vm1, %v17892_v13, %v5820_v15  ;;  %10942 = vrot.lane.b32.xlu1 %v10941_v1, %s11468_s28  ;;  %v16408_v33 = vpop.permute.xlu0 %5271  ;;  %v10951_v49 = vpack.i.bf16 %v4721_v63, %v4708_v38  ;;  %v6093_v59 = vld [vmem:[#allocation2 + $0x134] sm:$0xf]  ;;  %v6067_v13 = vld [vmem:[#allocation2 + $0x64] sm:$0xf] }
 0x48c   : > { %9797 = vmatpush2.bf16.msra.mxu0 %v10748_v48  ;;  %v5905_v21 = vsel %vm3047_vm1, %v17893_v11, %v17401_v17  ;;  %v5882_v6 = vsel %vm5863_vm8, %v16292_v26, %v5881_v52  ;;  %v5366_v48 = vrot.slane %v16408_v33, 4  ;;  %v16413_v39 = vpop.permute.xlu1 %5297  ;;  %v17894_v26 = vrot.slane %v15828_v31, 4  ;;  %v6080_v52 = vld [vmem:[#allocation2 + $0xcc] sm:$0xf] }
 0x48d   : > { %9798 = vmatprep.subr.bf16.mxu0 %v10725_v32  ;;  %9877 = vmatpush2.bf16.msra.mxu1 %v10774_v50  ;;  %v5906_v41 = vsel %vm5863_vm8, %v16302_v58, %v5905_v21  ;;  %v5379_v22 = vrot.slane %v16413_v39, 4  ;;  %v6106_v50 = vld [vmem:[#allocation2 + $0x19c] sm:$0xf]  ;;  %v17895_v58 = vrot.slane %v15836_v42, 4  ;;  %v10961_v63 = vpack.i.bf16 %v6080_v52, %v6067_v13 }
 0x48e   : > { %4822 = vrot.lane.b32.xlu0 %v15976_v30, %s11469_s29  ;;  %v10750_v4 = vcombine.low %v5882_v6, %v5906_v41  ;;  %v10751_v1 = vcombine.high %v5882_v6, %v5906_v41  ;;  %v5426_v56 = vsel %vm3047_vm1, %v17894_v26, %v5366_v48  ;;  %v10956_v38 = vpack.i.bf16 %v6106_v50, %v6093_v59 }
 0x48f   : > { %4848 = vrot.lane.b32.xlu1 %v15983_v23, %s11469_s29  ;;  %v16428_v32 = vpop.permute.xlu0 %5325  ;;  %v5427_v30 = vsel %vm5410_vm9, %v15828_v31, %v5426_v56  ;;  %v17897_v50 = vrot.slane %v15872_v55, 4  ;;  %v17905_v17 = vrot.slane %v16076_v24, 4 }
 0x490   : > { %9799 = vmatpush2.bf16.msra.mxu0 %v10724_v36  ;;  %v5450_v36 = vsel %vm3047_vm1, %v17895_v58, %v5379_v22  ;;  %9878 = vmatprep.subr.bf16.mxu1 %v10751_v1  ;;  %v17399_v57 = vrot.slane %v16428_v32, 4  ;;  %v16433_v44 = vpop.permute.xlu1 %5351 }
 0x491   : > { %9879 = vmatpush2.bf16.msra.mxu1 %v10750_v4  ;;  %v5451_v23 = vsel %vm5410_vm9, %v15836_v42, %v5450_v36  ;;  %v17398_v11 = vrot.slane %v16433_v44, 4 }
 0x492   : > { %10947 = vrot.lane.b32.xlu0 %v10946_v54, %s11469_s29  ;;  %v10700_v21 = vcombine.low %v5427_v30, %v5451_v23  ;;  %v10701_v6 = vcombine.high %v5427_v30, %v5451_v23  ;;  %v5476_v31 = vsel %vm3047_vm1, %v5392_v5, %v17399_v57 }
 0x493   : > { %10952 = vrot.lane.b32.xlu1 %v10951_v49, %s11469_s29  ;;  %v5500_v42 = vsel %vm3047_vm1, %v5405_v34, %v17398_v11  ;;  %v16450_v41 = vpop.permute.xlu0 %4870  ;;  %v5477_v4 = vsel %vm5410_vm9, %v16362_v45, %v5476_v31  ;;  %v17896_v49 = vrot.slane %v15862_v19, 4  ;;  %v6942_v45 = vld [vmem:[%s17030_s3] sm:$0xff] }
 0x494   : > { %9800 = vmatprep.subr.bf16.mxu0 %v10701_v6  ;;  %v4939_v1 = vrot.slane %v16450_v41, 4  ;;  %v16455_v54 = vpop.permute.xlu1 %4896  ;;  %v5501_v5 = vsel %vm5410_vm9, %v16367_v0, %v5500_v42 }
 0x495   : > { %9801 = vmatpush2.bf16.msra.mxu0 %v10700_v21  ;;  %v4952_v26 = vrot.slane %v16455_v54, 4  ;;  %v10726_v56 = vcombine.low %v5477_v4, %v5501_v5  ;;  %v10727_v34 = vcombine.high %v5477_v4, %v5501_v5 }
 0x496   : > { %10957 = vrot.lane.b32.xlu0 %v10956_v38, %s11464_s20  ;;  %v5021_v59 = vsel %vm3047_vm1, %v17896_v49, %v4939_v1  ;;  %v16475_v30 = vpop.f32.mrf.mxu0 }
 0x497   : > { %10962 = vrot.lane.b32.xlu1 %v10961_v63, %s11464_s20  ;;  %v5045_v0 = vsel %vm3047_vm1, %v17897_v50, %v4952_v26  ;;  %9880 = vmatprep.subr.bf16.mxu1 %v10727_v34  ;;  %v16471_v58 = vpop.permute.xlu0 %5273  ;;  %v5022_v36 = vsel %vm4957_vm10, %v15862_v19, %v5021_v59  ;;  %v17898_v50 = vrot.slane %v15884_v43, 4 }
 0x498   : > { %v17397_v13 = vrot.slane %v16471_v58, 4  ;;  %9881 = vmatpush2.bf16.msra.mxu1 %v10726_v56  ;;  %v16478_v52 = vpop.permute.xlu1 %5299  ;;  %v5046_v23 = vsel %vm4957_vm10, %v15872_v55, %v5045_v0  ;;  %v16483_v31 = vpop.f32.mrf.mxu0  ;;  %v17899_v0 = vrot.slane %v15891_v18, 4 }
 0x499   : > { %v17394_v21 = vrot.slane %v16478_v52, 4  ;;  %v10676_v6 = vcombine.low %v5022_v36, %v5046_v23  ;;  %v10677_v38 = vcombine.high %v5022_v36, %v5046_v23 }
 0x49a   : > { %6945 = vperm.xlu0 %10966, %v6942_v45   ;;  %v5428_v19 = vsel %vm3047_vm1, %v5366_v48, %v17397_v13  ;;  %v9488_v4 = vpop.f32.mrf.mxu0 }
 0x49b   : > { %v5452_v63 = vsel %vm3047_vm1, %v5379_v22, %v17394_v21  ;;  %9802 = vmatprep.subr.bf16.mxu0 %v10677_v38  ;;  %v4819_v42 = vpop.permute.xlu0 %4818  ;;  %v5429_v55 = vsel %vm5410_vm9, %v16408_v33, %v5428_v19 }
 0x49c   : > { %v4913_v5 = vrot.slane %v4819_v42, 4  ;;  %9803 = vmatpush2.bf16.msra.mxu0 %v10676_v6  ;;  %v4845_v56 = vpop.permute.xlu1 %4844  ;;  %v5453_v34 = vsel %vm5410_vm9, %v16413_v39, %v5452_v63  ;;  %v9489_v48 = vpop.f32.mrf.mxu0 }
 0x49d   : > { %v4926_v49 = vrot.slane %v4845_v56, 4  ;;  %v10702_v59 = vcombine.low %v5429_v55, %v5453_v34  ;;  %v10703_v45 = vcombine.high %v5429_v55, %v5453_v34 }
 0x49e   : > { %v4973_v22 = vsel %vm3047_vm1, %v17898_v50, %v4913_v5  ;;  %v16505_v6 = vpop.f32.mrf.mxu1  ;;  %v11022_v50 = vld [vmem:[#allocation2 + $0x118] ss:$104 sps:$4 sm:$0xff]  }
 0x49f   : > { %v4997_v36 = vsel %vm3047_vm1, %v17899_v0, %v4926_v49  ;;  %9882 = vmatprep.subr.bf16.mxu1 %v10703_v45  ;;  %v16501_v33 = vpop.permute.xlu0 %4872  ;;  %v4974_v23 = vsel %vm4957_vm10, %v15884_v43, %v4973_v22  ;;  %v16512_v63 = vpop.f32.mrf.mxu0 }
 0x4a0   : > { %v17392_v39 = vrot.slane %v16501_v33, 4  ;;  %9883 = vmatpush2.bf16.msra.mxu1 %v10702_v59  ;;  %v16508_v38 = vpop.permute.xlu1 %4898  ;;  %v4998_v19 = vsel %vm4957_vm10, %v15891_v18, %v4997_v36  ;;  %v16515_v45 = vpop.f32.mrf.mxu1 }
 0x4a1   : > { %v17393_v55 = vrot.slane %v16508_v38, 4  ;;  %v10652_v4 = vcombine.low %v4974_v23, %v4998_v19  ;;  %v10653_v34 = vcombine.high %v4974_v23, %v4998_v19  ;;  %v16520_v48 = vpop.f32.mrf.mxu0 }
 0x4a2   : > { %v5023_v43 = vsel %vm3047_vm1, %v4939_v1, %v17392_v39  ;;  %v9570_v0 = vpop.f32.mrf.mxu1 }
 0x4a3   : > { %v5047_v59 = vsel %vm3047_vm1, %v4952_v26, %v17393_v55  ;;  %9804 = vmatprep.subr.bf16.mxu0 %v10653_v34  ;;  %v16525_v18 = vpop.permute.xlu0 %4820  ;;  %v5024_v22 = vsel %vm4957_vm10, %v16450_v41, %v5023_v43  ;;  %v9611_v19 = vpop.f32.mrf.mxu0  ;;  %v11020_v43 = vld [vmem:[#allocation2 + $0x114] ss:$104 sps:$4 sm:$0xff]  }
 0x4a4   : > { %v17395_v36 = vrot.slane %v16525_v18, 4  ;;  %9805 = vmatpush2.bf16.msra.mxu0 %v10652_v4  ;;  %v16530_v23 = vpop.permute.xlu1 %4846  ;;  %v5048_v1 = vsel %vm4957_vm10, %v16455_v54, %v5047_v59  ;;  %v9571_v55 = vpop.f32.mrf.mxu1  ;;  %v11025_v54 = vld [vmem:[#allocation2 + $0x48] ss:$104 sps:$4 sm:$0xff]  }
 0x4a5   : > { %v17396_v39 = vrot.slane %v16530_v23, 4  ;;  %9806 = vmatprep.subr.bf16.mxu0 %v11022_v50  ;;  %v10678_v26 = vcombine.low %v5024_v22, %v5048_v1  ;;  %v10679_v34 = vcombine.high %v5024_v22, %v5048_v1  ;;  %v9612_v0 = vpop.f32.mrf.mxu0 }
 0x4a6   : > { %v4975_v41 = vsel %vm3047_vm1, %v4913_v5, %v17395_v36  ;;  %v17900_v0 = vrot.slane %v15961_v29, 4 }
 0x4a7   : > { %v4999_v4 = vsel %vm3047_vm1, %v4926_v49, %v17396_v39  ;;  %9884 = vmatprep.subr.bf16.mxu1 %v10679_v34  ;;  %v6232_v21 = vpop.permute.xlu0 %6231  ;;  %v4976_v59 = vsel %vm4957_vm10, %v4819_v42, %v4975_v41  ;;  %v11023_v49 = vld [vmem:[#allocation2 + $0x44] ss:$104 sps:$4 sm:$0xff]   ;;  %v17901_v34 = vrot.slane %v15974_v3, 4 }
 0x4a8   : > { %v6299_v19 = vrot.slane %v6232_v21, 4  ;;  %9807 = vmatpush2.bf16.msra.mxu0 %v11020_v43  ;;  %9885 = vmatpush2.bf16.msra.mxu1 %v10678_v26  ;;  %v6258_v50 = vpop.permute.xlu1 %6257  ;;  %v5000_v55 = vsel %vm4957_vm10, %v4845_v56, %v4999_v4  ;;  %v11028_v26 = vld [vmem:[#allocation2 + $0x120] ss:$104 sps:$4 sm:$0xff]  }
 0x4a9   : > { %v6312_v22 = vrot.slane %v6258_v50, 4  ;;  %9808 = vmatprep.subr.bf16.mxu0 %v11025_v54  ;;  %v10654_v5 = vcombine.low %v4976_v59, %v5000_v55  ;;  %v10655_v1 = vcombine.high %v4976_v59, %v5000_v55 }
 0x4aa   : > { %v6382_v36 = vsel %vm3047_vm1, %v17900_v0, %v6299_v19  ;;  %v16553_v41 = vpop.f32.mrf.mxu1 }
 0x4ab   : > { %v6406_v39 = vsel %vm3047_vm1, %v17901_v34, %v6312_v22  ;;  %9886 = vmatprep.subr.bf16.mxu1 %v10655_v1  ;;  %v16549_v42 = vpop.permute.xlu0 %6179  ;;  %v6383_v56 = vsel %vm6316_vm2, %v15961_v29, %v6382_v36  ;;  %v17902_v29 = vrot.slane %v16024_v8, 4  ;;  %v11026_v34 = vld [vmem:[#allocation2 + $0x11c] ss:$104 sps:$4 sm:$0xff]  }
 0x4ac   : > { %v6273_v43 = vrot.slane %v16549_v42, 4  ;;  %9809 = vmatpush2.bf16.msra.mxu0 %v11023_v49  ;;  %9887 = vmatpush2.bf16.msra.mxu1 %v10654_v5  ;;  %v16556_v4 = vpop.permute.xlu1 %6205  ;;  %v6407_v54 = vsel %vm6316_vm2, %v15974_v3, %v6406_v39  ;;  %v16561_v0 = vpop.f32.mrf.mxu1  ;;  %v17903_v49 = vrot.slane %v16030_v25, 4  ;;  %v11031_v39 = vld [vmem:[#allocation2 + $0x50] ss:$104 sps:$4 sm:$0xff]  }
 0x4ad   : > { %v6286_v59 = vrot.slane %v16556_v4, 4  ;;  %9888 = vmatprep.subr.bf16.mxu1 %v11028_v26  ;;  %v10822_v55 = vcombine.low %v6383_v56, %v6407_v54  ;;  %v10823_v1 = vcombine.high %v6383_v56, %v6407_v54 }
 0x4ae   : > { %v6334_v36 = vsel %vm3047_vm1, %v17902_v29, %v6273_v43  ;;  %v9693_v56 = vpop.f32.mrf.mxu1 }
 0x4af   : > { %v6358_v5 = vsel %vm3047_vm1, %v17903_v49, %v6286_v59  ;;  %9811 = vmatmul.mubr.bf16.vlgmr.msra.gmra.mxu0 %v17584_v37  ;;  %9913 = vmatprep.subr.bf16.mxu0 %v10823_v1  ;;  %v16570_v3 = vpop.permute.xlu0 %6233  ;;  %v6335_v26 = vsel %vm6316_vm2, %v16024_v8, %v6334_v36  ;;  %v11029_v36 = vld [vmem:[#allocation2 + $0x4c] ss:$104 sps:$4 sm:$0xff]  }
 0x4b0   : > { %v17400_v54 = vrot.slane %v16570_v3, 4  ;;  %9889 = vmatpush2.bf16.msra.mxu1 %v11026_v34  ;;  %9914 = vmatpush1.bf16.msra.mxu0 %v10822_v55  ;;  %v16575_v29 = vpop.permute.xlu1 %6259  ;;  %v6359_v13 = vsel %vm6316_vm2, %v16030_v25, %v6358_v5  ;;  %v9694_v57 = vpop.f32.mrf.mxu1 }
 0x4b1   : > { %v6313_v49 = vrot.slane %v16575_v29, 4  ;;  %9890 = vmatprep.subr.bf16.mxu1 %v11031_v39  ;;  %v10798_v1 = vcombine.low %v6335_v26, %v6359_v13  ;;  %v10799_v11 = vcombine.high %v6335_v26, %v6359_v13  ;;  %9933 = vmatprep.mubr.bf16.mxu0 %v17589_v35 }
 0x4b2   : > { %v6384_v8 = vsel %vm3047_vm1, %v6299_v19, %v17400_v54  ;;  %v17904_v19 = vrot.slane %v16071_v9, 4 }
 0x4b3   : > { %v6408_v55 = vsel %vm3047_vm1, %v6312_v22, %v6313_v49  ;;  %9915 = vmatprep.subr.bf16.mxu0 %v10799_v11  ;;  %v4326_v34 = vpop.permute.xlu0 %4325  ;;  %v6385_v25 = vsel %vm6316_vm2, %v6232_v21, %v6384_v8 }
 0x4b4   : > { %v4392_v5 = vrot.slane %v4326_v34, 4  ;;  %9891 = vmatpush2.bf16.msra.mxu1 %v11029_v36  ;;  %9916 = vmatpush1.bf16.msra.mxu0 %v10798_v1  ;;  %v4352_v13 = vpop.permute.xlu1 %4351  ;;  %v6409_v39 = vsel %vm6316_vm2, %v6258_v50, %v6408_v55 }
 0x4b5   : > { %v4405_v57 = vrot.slane %v4352_v13, 4  ;;  %v10824_v26 = vcombine.low %v6385_v25, %v6409_v39  ;;  %v10825_v56 = vcombine.high %v6385_v25, %v6409_v39 }
 0x4b6   : > { %v4476_v54 = vsel %vm3047_vm1, %v17904_v19, %v4392_v5 }
 0x4b7   : > { %v4500_v11 = vsel %vm3047_vm1, %v17905_v17, %v4405_v57  ;;  %9995 = vmatprep.subr.bf16.mxu1 %v10825_v56  ;;  %v16595_v22 = vpop.permute.xlu0 %6181  ;;  %9893 = vmatmul.mubr.bf16.vlgmr.msra.gmra.mxu1 %v17584_v37  ;;  %v4477_v21 = vsel %vm4408_vm3, %v16071_v9, %v4476_v54 }
 0x4b8   : > { %v17402_v50 = vrot.slane %v16595_v22, 4  ;;  %9996 = vmatpush1.bf16.msra.mxu1 %v10824_v26  ;;  %v16601_v1 = vpop.permute.xlu1 %6207  ;;  %v4501_v8 = vsel %vm4408_vm3, %v16076_v24, %v4500_v11  ;;  %10837 = vmatmul.mubr.msk.bf16.vlgmr.msra.gmra.mxu0 %vm9118_vm5, %v16098_v10 }
 0x4b9   : > { %v17403_v17 = vrot.slane %v16601_v1, 4  ;;  %v10584_v36 = vcombine.low %v4477_v21, %v4501_v8  ;;  %v10585_v55 = vcombine.high %v4477_v21, %v4501_v8  ;;  %10015 = vmatprep.mubr.bf16.mxu1 %v17589_v35  ;;  %9974 = vmatprep.mubr.bf16.mxu0 %v12849_v60 }
 0x4ba   : > { %v6336_v9 = vsel %vm3047_vm1, %v6273_v43, %v17402_v50  ;;  %v17906_v43 = vrot.slane %v16119_v61, 4 }
 0x4bb   : > { %v6360_v54 = vsel %vm3047_vm1, %v6286_v59, %v17403_v17  ;;  %9942 = vmatprep.subr.bf16.mxu0 %v10585_v55  ;;  %v4274_v24 = vpop.permute.xlu0 %4273  ;;  %v6337_v25 = vsel %vm6316_vm2, %v16549_v42, %v6336_v9  ;;  %v17907_v59 = vrot.slane %v16124_v27, 4 }
 0x4bc   : > { %v4366_v39 = vrot.slane %v4274_v24, 4  ;;  %9943 = vmatpush1.bf16.msra.mxu0 %v10584_v36  ;;  %v4300_v26 = vpop.permute.xlu1 %4299  ;;  %v6361_v56 = vsel %vm6316_vm2, %v16556_v4, %v6360_v54 }
 0x4bd   : > { %v4379_v19 = vrot.slane %v4300_v26, 4  ;;  %v10800_v11 = vcombine.low %v6337_v25, %v6361_v56  ;;  %v10801_v21 = vcombine.high %v6337_v25, %v6361_v56 }
 0x4be   : > { %v4428_v8 = vsel %vm3047_vm1, %v17906_v43, %v4366_v39 }
 0x4bf   : > { %v4452_v55 = vsel %vm3047_vm1, %v17907_v59, %v4379_v19  ;;  %9997 = vmatprep.subr.bf16.mxu1 %v10801_v21  ;;  %v4328_v50 = vpop.permute.xlu0 %4327  ;;  %v4429_v42 = vsel %vm4408_vm3, %v16119_v61, %v4428_v8 }
 0x4c0   : > { %v4393_v36 = vrot.slane %v4328_v50, 4  ;;  %9998 = vmatpush1.bf16.msra.mxu1 %v10800_v11  ;;  %v4354_v9 = vpop.permute.xlu1 %4353  ;;  %v4453_v4 = vsel %vm4408_vm3, %v16124_v27, %v4452_v55 }
 0x4c1   : > { %v4406_v54 = vrot.slane %v4354_v9, 4  ;;  %v10560_v25 = vcombine.low %v4429_v42, %v4453_v4  ;;  %v10561_v56 = vcombine.high %v4429_v42, %v4453_v4  ;;  %v17909_v42 = vrot.slane %v16162_v62, 4 }
 0x4c2   : > { %v4478_v43 = vsel %vm3047_vm1, %v4392_v5, %v4393_v36  ;;  %v17908_v5 = vrot.slane %v16157_v28, 4 }
 0x4c3   : > { %v4502_v17 = vsel %vm3047_vm1, %v4405_v57, %v4406_v54  ;;  %9944 = vmatprep.subr.bf16.mxu0 %v10561_v56  ;;  %v3873_v59 = vpop.permute.xlu0 %3872  ;;  %v4479_v21 = vsel %vm4408_vm3, %v4326_v34, %v4478_v43  ;;  %10838 = vmatmul.mubr.msk.bf16.vlgmr.msra.gmra.mxu1 %vm9118_vm5, %v16098_v10 }
 0x4c4   : > { %v3939_v61 = vrot.slane %v3873_v59, 4  ;;  %9945 = vmatpush1.bf16.msra.mxu0 %v10560_v25  ;;  %v3899_v50 = vpop.permute.xlu1 %3898  ;;  %v4503_v11 = vsel %vm4408_vm3, %v4352_v13, %v4502_v17  ;;  %10056 = vmatprep.mubr.bf16.mxu1 %v12849_v60 }
 0x4c5   : > { %v3952_v27 = vrot.slane %v3899_v50, 4  ;;  %v10586_v8 = vcombine.low %v4479_v21, %v4503_v11  ;;  %v10587_v55 = vcombine.high %v4479_v21, %v4503_v11 }
 0x4c6   : > { %v4023_v57 = vsel %vm3047_vm1, %v17908_v5, %v3939_v61 }
 0x4c7   : > { %v4047_v34 = vsel %vm3047_vm1, %v17909_v42, %v3952_v27  ;;  %10024 = vmatprep.subr.bf16.mxu1 %v10587_v55  ;;  %v4276_v10 = vpop.permute.xlu0 %4275  ;;  %v4024_v36 = vsel %vm3955_vm4, %v16157_v28, %v4023_v57 }
 0x4c8   : > { %v4367_v9 = vrot.slane %v4276_v10, 4  ;;  %10025 = vmatpush1.bf16.msra.mxu1 %v10586_v8  ;;  %v4302_v13 = vpop.permute.xlu1 %4301  ;;  %v4048_v60 = vsel %vm3955_vm4, %v16162_v62, %v4047_v34  ;;  %v17910_v62 = vrot.slane %v16194_v51, 4 }
 0x4c9   : > { %v4380_v17 = vrot.slane %v4302_v13, 4  ;;  %v10536_v4 = vcombine.low %v4024_v36, %v4048_v60  ;;  %v10537_v54 = vcombine.high %v4024_v36, %v4048_v60 }
 0x4ca   : > { %v4430_v25 = vsel %vm3047_vm1, %v4366_v39, %v4367_v9  ;;  %v17911_v39 = vrot.slane %v16200_v14, 4 }
 0x4cb   : > { %v4454_v56 = vsel %vm3047_vm1, %v4379_v19, %v4380_v17  ;;  %9946 = vmatprep.subr.bf16.mxu0 %v10537_v54  ;;  %v3821_v43 = vpop.permute.xlu0 %3820  ;;  %v4431_v21 = vsel %vm4408_vm3, %v4274_v24, %v4430_v25 }
 0x4cc   : > { %v3913_v11 = vrot.slane %v3821_v43, 4  ;;  %9947 = vmatpush1.bf16.msra.mxu0 %v10536_v4  ;;  %v3847_v28 = vpop.permute.xlu1 %3846  ;;  %v4455_v8 = vsel %vm4408_vm3, %v4300_v26, %v4454_v56 }
 0x4cd   : > { %v3926_v55 = vrot.slane %v3847_v28, 4  ;;  %v10562_v5 = vcombine.low %v4431_v21, %v4455_v8  ;;  %v10563_v57 = vcombine.high %v4431_v21, %v4455_v8 }
 0x4ce   : > { %v3975_v42 = vsel %vm3047_vm1, %v17910_v62, %v3913_v11 }
 0x4cf   : > { %v3999_v19 = vsel %vm3047_vm1, %v17911_v39, %v3926_v55  ;;  %10026 = vmatprep.subr.bf16.mxu1 %v10563_v57  ;;  %v3875_v34 = vpop.permute.xlu0 %3874  ;;  %v3976_v24 = vsel %vm3955_vm4, %v16194_v51, %v3975_v42  ;;  %v17914_v39 = vld [vmem:[#allocation54_spill] sm:$0xff] }
 0x4d0   : > { %v3940_v10 = vrot.slane %v3875_v34, 4  ;;  %10027 = vmatpush1.bf16.msra.mxu1 %v10562_v5  ;;  %v3901_v36 = vpop.permute.xlu1 %3900  ;;  %v4000_v26 = vsel %vm3955_vm4, %v16200_v14, %v3999_v19  ;;  %v17912_v14 = vrot.slane %v16215_v47, 4  ;;  %v3460_v19 = vrot.slane %v17914_v39, 4 }
 0x4d1   : > { %v3953_v9 = vrot.slane %v3901_v36, 4  ;;  %v10512_v13 = vcombine.low %v3976_v24, %v4000_v26  ;;  %v10513_v60 = vcombine.high %v3976_v24, %v4000_v26 }
 0x4d2   : > { %v4025_v17 = vsel %vm3047_vm1, %v3939_v61, %v3940_v10  ;;  %v17913_v61 = vrot.slane %v16231_v2, 4 }
 0x4d3   : > { %v4049_v4 = vsel %vm3047_vm1, %v3952_v27, %v3953_v9  ;;  %9948 = vmatprep.subr.bf16.mxu0 %v10513_v60  ;;  %v3420_v54 = vpop.permute.xlu0 %3419  ;;  %v4026_v25 = vsel %vm3955_vm4, %v3873_v59, %v4025_v17 }
 0x4d4   : > { %v3486_v56 = vrot.slane %v3420_v54, 4  ;;  %9949 = vmatpush1.bf16.msra.mxu0 %v10512_v13  ;;  %v3446_v51 = vpop.permute.xlu1 %3445  ;;  %v4050_v21 = vsel %vm3955_vm4, %v3899_v50, %v4049_v4 }
 0x4d5   : > { %v3499_v8 = vrot.slane %v3446_v51, 4  ;;  %v10538_v5 = vcombine.low %v4026_v25, %v4050_v21  ;;  %v10539_v57 = vcombine.high %v4026_v25, %v4050_v21 }
 0x4d6   : > { %v3570_v62 = vsel %vm3047_vm1, %v17912_v14, %v3486_v56 }
 0x4d7   : > { %v3594_v27 = vsel %vm3047_vm1, %v17913_v61, %v3499_v8  ;;  %10028 = vmatprep.subr.bf16.mxu1 %v10539_v57  ;;  %v3823_v42 = vpop.permute.xlu0 %3822  ;;  %v3571_v59 = vsel %vm3502_vm6, %v16215_v47, %v3570_v62  ;;  %v17915_v47 = vrot.slane %v17855_v20, 4  ;;  %v17916_v62 = vld [vmem:[#allocation55_spill] sm:$0xff]  ;;  %v17917_v61 = vld [vmem:[#allocation37_spill] sm:$0xff] }
 0x4d8   : > { %v3914_v34 = vrot.slane %v3823_v42, 4  ;;  %10029 = vmatpush1.bf16.msra.mxu1 %v10538_v5  ;;  %v3849_v50 = vpop.permute.xlu1 %3848  ;;  %v3595_v24 = vsel %vm3502_vm6, %v16231_v2, %v3594_v27  ;;  %v17919_v42 = vld [vmem:[#allocation35_spill] sm:$0xff] }
 0x4d9   : > { %v3927_v10 = vrot.slane %v3849_v50, 4  ;;  %v10488_v36 = vcombine.low %v3571_v59, %v3595_v24  ;;  %v10489_v26 = vcombine.high %v3571_v59, %v3595_v24  ;;  %v3522_v4 = vsel %vm3047_vm1, %v17915_v47, %v3460_v19 }
 0x4da   : > { %v3977_v9 = vsel %vm3047_vm1, %v3913_v11, %v3914_v34  ;;  %v3461_v11 = vrot.slane %v17916_v62, 4  ;;  %v3046_v59 = vrot.slane %v17919_v42, 4 }
 0x4db   : > { %v4001_v13 = vsel %vm3047_vm1, %v3926_v55, %v3927_v10  ;;  %9950 = vmatprep.subr.bf16.mxu0 %v10489_v26  ;;  %v3394_v60 = vpop.permute.xlu0 %3393  ;;  %v3978_v17 = vsel %vm3955_vm4, %v3821_v43, %v3977_v9  ;;  %v17918_v55 = vrot.slane %v17917_v61, 4  ;;  %v3523_v43 = vsel %vm3502_vm6, %v17855_v20, %v3522_v4  ;;  %v17921_v20 = vld [vmem:[#allocation63_spill] sm:$0xff] }
 0x4dc   : > { %v3473_v25 = vrot.slane %v3394_v60, 4  ;;  %9951 = vmatpush1.bf16.msra.mxu0 %v10488_v36  ;;  %v3422_v21 = vpop.permute.xlu1 %3421  ;;  %v4002_v2 = vsel %vm3955_vm4, %v3847_v28, %v4001_v13  ;;  %v3524_v13 = vsel %vm3047_vm1, %v3460_v19, %v3461_v11  ;;  %v3033_v4 = vrot.slane %v17921_v20, 4 }
 0x4dd   : > { %v3487_v5 = vrot.slane %v3422_v21, 4  ;;  %v10514_v57 = vcombine.low %v3978_v17, %v4002_v2  ;;  %v10515_v14 = vcombine.high %v3978_v17, %v4002_v2  ;;  %v17920_v17 = vld [vmem:[#allocation58_spill] sm:$0xff]  ;;  %v17922_v2 = vld [vmem:[#allocation65_spill] sm:$0xff] }
 0x4de   : > { %v3546_v27 = vsel %vm3047_vm1, %v17918_v55, %v3473_v25  ;;  %v3020_v47 = vrot.slane %v17920_v17, 4  ;;  %v17924_v55 = vld [vmem:[#allocation66_spill] sm:$0xff] }
 0x4df   : > { %10030 = vmatprep.subr.bf16.mxu1 %v10515_v14  ;;  %v3448_v34 = vpop.permute.xlu0 %3447  ;;  %v3547_v50 = vsel %vm3502_vm6, %v17917_v61, %v3546_v27  ;;  %v3572_v28 = vsel %vm3047_vm1, %v3486_v56, %v3487_v5  ;;  %v17923_v14 = vrot.slane %v17922_v2, 4 }
 0x4e0   : > { %v3500_v24 = vrot.slane %v3448_v34, 4  ;;  %10031 = vmatpush1.bf16.msra.mxu1 %v10514_v57  ;;  %v3396_v10 = vpop.permute.xlu1 %3395  ;;  %v10464_v36 = vcombine.low %v3523_v43, %v3547_v50  ;;  %v10465_v26 = vcombine.high %v3523_v43, %v3547_v50  ;;  %v3573_v57 = vsel %vm3502_vm6, %v3420_v54, %v3572_v28  ;;  %v17927_v54 = vld [vmem:[#allocation49_spill] sm:$0xff] }
 0x4e1   : > { %v3474_v9 = vrot.slane %v3396_v10, 4  ;;  %v3143_v62 = vsel %vm3047_vm1, %v17923_v14, %v3046_v59  ;;  %v3525_v34 = vsel %vm3502_vm6, %v17914_v39, %v3524_v13  ;;  %v3007_v50 = vrot.slane %v17927_v54, 4  ;;  %v17934_v14 = vld [vmem:[#allocation61_spill] sm:$0xff] }
 0x4e2   : > { %v3596_v21 = vsel %vm3047_vm1, %v3499_v8, %v3500_v24  ;;  %9952 = vmatprep.subr.bf16.mxu0 %v10465_v26  ;;  %v17925_v8 = vld [vmem:[#allocation67_spill] sm:$0xff]  ;;  %v3144_v13 = vsel %vm3049_vm7, %v17922_v2, %v3143_v62  ;;  %v17936_v62 = vld [vmem:[#allocation52_spill] sm:$0xff] }
 0x4e3   : > { %v3548_v56 = vsel %vm3047_vm1, %v3473_v25, %v3474_v9  ;;  %v16701_v5 = vpop.permute.xlu0 %5780  ;;  %9953 = vmatpush1.bf16.msra.mxu0 %v10464_v36  ;;  %v3597_v19 = vsel %vm3502_vm6, %v3446_v51, %v3596_v21  ;;  %v17926_v27 = vcombine.high %v17924_v55, %v17925_v8  ;;  %v17928_v51 = vld [vmem:[#allocation62_spill] sm:$0xff]  ;;  %v17930_v39 = vcombine.low %v17924_v55, %v17925_v8  ;;  %v17933_v21 = vld [vmem:[#allocation60_spill] sm:$0xff] }
 0x4e4   : > { %v5847_v11 = vrot.slane %v16701_v5, 4  ;;  %v16706_v61 = vpop.permute.xlu1 %5806  ;;  %v10490_v43 = vcombine.low %v3573_v57, %v3597_v19  ;;  %v10491_v42 = vcombine.high %v3573_v57, %v3597_v19  ;;  %v3549_v59 = vsel %vm3502_vm6, %v3394_v60, %v3548_v56 }
 0x4e5   : > { %9954 = vmatprep.subr.bf16.mxu0 %v17926_v27  ;;  %v5860_v25 = vrot.slane %v16706_v61, 4  ;;  %v17929_v28 = vrot.slane %v17928_v51, 4  ;;  %v10467_v36 = vcombine.high %v3525_v34, %v3549_v59  ;;  %v17935_v56 = vcombine.high %v17933_v21, %v17934_v14 }
 0x4e6   : > { %v5931_v10 = vsel %vm3047_vm1, %v5846_v53, %v5847_v11  ;;  %10032 = vmatprep.subr.bf16.mxu1 %v10491_v42  ;;  %v17931_v53 = vld [vmem:[#allocation57_spill] sm:$0xff]  ;;  %v10466_v19 = vcombine.low %v3525_v34, %v3549_v59  ;;  %v17939_v34 = vcombine.low %v17933_v21, %v17934_v14 }
 0x4e7   : > { %v3119_v24 = vsel %vm3047_vm1, %v17929_v28, %v3033_v4  ;;  %v5955_v60 = vsel %vm3047_vm1, %v5859_v7, %v5860_v25  ;;  %v16725_v26 = vpop.permute.xlu0 %5728  ;;  %9955 = vmatpush1.bf16.msra.mxu0 %v17930_v39  ;;  %10033 = vmatpush1.bf16.msra.mxu1 %v10490_v43  ;;  %v5932_v9 = vsel %vm5863_vm8, %v16335_v40, %v5931_v10  ;;  %v17932_v17 = vrot.slane %v17931_v53, 4 }
 0x4e8   : > { %v5821_v4 = vrot.slane %v16725_v26, 4  ;;  %v16738_v7 = vpop.permute.xlu1 %5754  ;;  %9956 = vmatprep.subr.bf16.mxu0 %v17935_v56  ;;  %10034 = vmatprep.subr.bf16.mxu1 %v10467_v36  ;;  %v5956_v57 = vsel %vm5863_vm8, %v16345_v16, %v5955_v60  ;;  %v3120_v2 = vsel %vm3049_vm7, %v17928_v51, %v3119_v24  ;;  %v17938_v16 = vrot.slane %v16390_v46, 4 }
 0x4e9   : > { %v3095_v20 = vsel %vm3047_vm1, %v17932_v17, %v3020_v47  ;;  %v5834_v40 = vrot.slane %v16738_v7, 4  ;;  %v17937_v47 = vrot.slane %v17936_v62, 4  ;;  %v10777_v27 = vcombine.high %v5932_v9, %v5956_v57 }
 0x4ea   : > { %v5883_v8 = vsel %vm3047_vm1, %v5820_v15, %v5821_v4  ;;  %v10443_v43 = vcombine.high %v3120_v2, %v3144_v13  ;;  %v10776_v36 = vcombine.low %v5932_v9, %v5956_v57  ;;  %v10442_v60 = vcombine.low %v3120_v2, %v3144_v13 }
 0x4eb   : > { %v3071_v55 = vsel %vm3047_vm1, %v17937_v47, %v3007_v50  ;;  %v5907_v42 = vsel %vm3047_vm1, %v17938_v16, %v5834_v40  ;;  %v10928_v59 = vpop.permute.xlu0 %10927  ;;  %9957 = vmatpush1.bf16.msra.mxu0 %v17939_v34  ;;  %10035 = vmatpush1.bf16.msra.mxu1 %v10466_v19  ;;  %v5884_v54 = vsel %vm5863_vm8, %v16385_v12, %v5883_v8  ;;  %v17940_v9 = vrot.slane %v16428_v32, 4 }
 0x4ec   : > { %v3096_v50 = vsel %vm3049_vm7, %v17931_v53, %v3095_v20  ;;  %v10930_v51 = vunpack.i.h.bf16 %v10928_v59  ;;  %v10929_v15 = vunpack.i.l.bf16 %v10928_v59  ;;  %v16766_v28 = vpop.permute.xlu1 %5327  ;;  %9958 = vmatprep.subr.bf16.mxu0 %v10777_v27  ;;  %10036 = vmatprep.subr.bf16.mxu1 %v10443_v43  ;;  %v5908_v24 = vsel %vm5863_vm8, %v16390_v46, %v5907_v42 }
 0x4ed   : > { %v5394_v10 = vrot.slane %v16766_v28, 4  ;;  %v3072_v39 = vsel %vm3049_vm7, %v17936_v62, %v3071_v55  ;;  %v10753_v21 = vcombine.high %v5884_v54, %v5908_v24  ;;  %v10752_v14 = vcombine.low %v5884_v54, %v5908_v24 }
 0x4ee   : > { %v5861_v12 = vrot.slane %v10930_v51, 4  ;;  %v5848_v17 = vrot.slane %v10929_v15, 4  ;;  %v10419_v53 = vcombine.high %v3072_v39, %v3096_v50  ;;  %v10418_v56 = vcombine.low %v3072_v39, %v3096_v50 }
 0x4ef   : > { %v16773_v20 = vpop.permute.xlu0 %5353  ;;  %9959 = vmatpush2.bf16.msra.mxu0 %v10776_v36  ;;  %10037 = vmatpush1.bf16.msra.mxu1 %v10442_v60  ;;  %v5478_v13 = vsel %vm3047_vm1, %v17940_v9, %v5394_v10 }
 0x4f0   : > { %v5933_v19 = vsel %vm3047_vm1, %v5847_v11, %v5848_v17  ;;  %v5957_v46 = vsel %vm3047_vm1, %v5860_v25, %v5861_v12  ;;  %v5407_v57 = vrot.slane %v16773_v20, 4  ;;  %v10933_v2 = vpop.permute.xlu1 %10932  ;;  %9960 = vmatprep.subr.bf16.mxu0 %v10753_v21  ;;  %10038 = vmatprep.subr.bf16.mxu1 %v10419_v53  ;;  %v17941_v25 = vrot.slane %v16433_v44, 4 }
 0x4f1   : > { %v10935_v62 = vunpack.i.h.bf16 %v10933_v2  ;;  %v10934_v47 = vunpack.i.l.bf16 %v10933_v2  ;;  %v5934_v55 = vsel %vm5863_vm8, %v16701_v5, %v5933_v19  ;;  %v5958_v11 = vsel %vm5863_vm8, %v16706_v61, %v5957_v46 }
 0x4f2   : > { %v5502_v8 = vsel %vm3047_vm1, %v17941_v25, %v5407_v57  ;;  %v10779_v27 = vcombine.high %v5934_v55, %v5958_v11  ;;  %v5479_v59 = vsel %vm5410_vm9, %v16428_v32, %v5478_v13  ;;  %v10778_v36 = vcombine.low %v5934_v55, %v5958_v11 }
 0x4f3   : > { %v5835_v43 = vrot.slane %v10935_v62, 4  ;;  %v5822_v16 = vrot.slane %v10934_v47, 4  ;;  %v16790_v42 = vpop.permute.xlu0 %5275  ;;  %9961 = vmatpush2.bf16.msra.mxu0 %v10752_v14  ;;  %10039 = vmatpush1.bf16.msra.mxu1 %v10418_v56  ;;  %v5503_v5 = vsel %vm5410_vm9, %v16433_v44, %v5502_v8  ;;  %v17942_v32 = vrot.slane %v16471_v58, 4 }
 0x4f4   : > { %v5368_v34 = vrot.slane %v16790_v42, 4  ;;  %v16797_v61 = vpop.permute.xlu1 %5301  ;;  %10040 = vmatprep.subr.bf16.mxu1 %v10779_v27  ;;  %v10728_v54 = vcombine.low %v5479_v59, %v5503_v5  ;;  %v10729_v50 = vcombine.high %v5479_v59, %v5503_v5 }
 0x4f5   : > { %v5909_v51 = vsel %vm3047_vm1, %v5834_v40, %v5835_v43  ;;  %v5885_v15 = vsel %vm3047_vm1, %v5821_v4, %v5822_v16  ;;  %v5381_v24 = vrot.slane %v16797_v61, 4  ;;  %v17943_v40 = vrot.slane %v16478_v52, 4 }
 0x4f6   : > { %v5430_v44 = vsel %vm3047_vm1, %v17942_v32, %v5368_v34  ;;  %9962 = vmatprep.subr.bf16.mxu0 %v10729_v50  ;;  %v5886_v60 = vsel %vm5863_vm8, %v16725_v26, %v5885_v15  ;;  %v5910_v39 = vsel %vm5863_vm8, %v16738_v7, %v5909_v51 }
 0x4f7   : > { %v5454_v12 = vsel %vm3047_vm1, %v17943_v40, %v5381_v24  ;;  %9963 = vmatpush2.bf16.msra.mxu0 %v10728_v54  ;;  %10041 = vmatpush2.bf16.msra.mxu1 %v10778_v36  ;;  %v10755_v4 = vcombine.high %v5886_v60, %v5910_v39  ;;  %v5431_v56 = vsel %vm5410_vm9, %v16471_v58, %v5430_v44 }
 0x4f8   : > { %v10938_v17 = vpop.permute.xlu0 %10937  ;;  %v5455_v26 = vsel %vm5410_vm9, %v16478_v52, %v5454_v12  ;;  %v10754_v19 = vcombine.low %v5886_v60, %v5910_v39  ;;  %v17944_v52 = vrot.slane %v16501_v33, 4  ;;  %v17946_v12 = vrot.slane %v16525_v18, 4 }
 0x4f9   : > { %v10940_v21 = vunpack.i.h.bf16 %v10938_v17  ;;  %v10939_v53 = vunpack.i.l.bf16 %v10938_v17  ;;  %v16814_v14 = vpop.permute.xlu1 %4874  ;;  %10042 = vmatprep.subr.bf16.mxu1 %v10755_v4  ;;  %v10704_v46 = vcombine.low %v5431_v56, %v5455_v26  ;;  %v10705_v9 = vcombine.high %v5431_v56, %v5455_v26 }
 0x4fa   : > { %v4941_v7 = vrot.slane %v16814_v14, 4  ;;  %v17947_v4 = vrot.slane %v16530_v23, 4 }
 0x4fb   : > { %v5408_v13 = vrot.slane %v10940_v21, 4  ;;  %v5395_v2 = vrot.slane %v10939_v53, 4  ;;  %9964 = vmatprep.subr.bf16.mxu0 %v10705_v9  ;;  %10043 = vmatpush2.bf16.msra.mxu1 %v10754_v19 }
 0x4fc   : > { %v16821_v62 = vpop.permute.xlu0 %4900  ;;  %v5025_v55 = vsel %vm3047_vm1, %v17944_v52, %v4941_v7  ;;  %9965 = vmatpush2.bf16.msra.mxu0 %v10704_v46 }
 0x4fd   : > { %v5504_v47 = vsel %vm3047_vm1, %v5407_v57, %v5408_v13  ;;  %v5480_v58 = vsel %vm3047_vm1, %v5394_v10, %v5395_v2  ;;  %v4954_v11 = vrot.slane %v16821_v62, 4  ;;  %v10943_v25 = vpop.permute.xlu1 %10942  ;;  %v17945_v10 = vrot.slane %v16508_v38, 4 }
 0x4fe   : > { %v10945_v8 = vunpack.i.h.bf16 %v10943_v25  ;;  %v10944_v27 = vunpack.i.l.bf16 %v10943_v25  ;;  %v5481_v43 = vsel %vm5410_vm9, %v16766_v28, %v5480_v58  ;;  %v5505_v57 = vsel %vm5410_vm9, %v16773_v20, %v5504_v47 }
 0x4ff   : > { %v5049_v16 = vsel %vm3047_vm1, %v17945_v10, %v4954_v11  ;;  %v10730_v59 = vcombine.low %v5481_v43, %v5505_v57  ;;  %v10731_v5 = vcombine.high %v5481_v43, %v5505_v57  ;;  %v5026_v15 = vsel %vm4957_vm10, %v16501_v33, %v5025_v55 }
 0x500   : > { %v5382_v54 = vrot.slane %v10945_v8, 4  ;;  %v5369_v50 = vrot.slane %v10944_v27, 4  ;;  %v16840_v51 = vpop.permute.xlu0 %4822  ;;  %v5050_v36 = vsel %vm4957_vm10, %v16508_v38, %v5049_v16  ;;  %v11034_v27 = vld [vmem:[#allocation2 + $0x128] ss:$104 sps:$4 sm:$0xff]  }
 0x501   : > { %v4915_v28 = vrot.slane %v16840_v51, 4  ;;  %v16847_v32 = vpop.permute.xlu1 %4848  ;;  %10044 = vmatprep.subr.bf16.mxu1 %v10731_v5  ;;  %v10680_v20 = vcombine.low %v5026_v15, %v5050_v36  ;;  %v10681_v44 = vcombine.high %v5026_v15, %v5050_v36 }
 0x502   : > { %v5456_v60 = vsel %vm3047_vm1, %v5381_v24, %v5382_v54  ;;  %v5432_v39 = vsel %vm3047_vm1, %v5368_v34, %v5369_v50  ;;  %v4928_v40 = vrot.slane %v16847_v32, 4  ;;  %10045 = vmatpush2.bf16.msra.mxu1 %v10730_v59 }
 0x503   : > { %v4977_v33 = vsel %vm3047_vm1, %v17946_v12, %v4915_v28  ;;  %9966 = vmatprep.subr.bf16.mxu0 %v10681_v44  ;;  %v5433_v38 = vsel %vm5410_vm9, %v16790_v42, %v5432_v39  ;;  %v5457_v17 = vsel %vm5410_vm9, %v16797_v61, %v5456_v60  ;;  %v16864_v26 = vpop.f32.mrf.mxu0 }
 0x504   : > { %v5001_v24 = vsel %vm3047_vm1, %v17947_v4, %v4928_v40  ;;  %v10948_v21 = vpop.permute.xlu0 %10947  ;;  %9967 = vmatpush2.bf16.msra.mxu0 %v10680_v20  ;;  %v10706_v34 = vcombine.low %v5433_v38, %v5457_v17  ;;  %v10707_v53 = vcombine.high %v5433_v38, %v5457_v17  ;;  %v4978_v56 = vsel %vm4957_vm10, %v16525_v18, %v4977_v33  ;;  %v11037_v33 = vld [vmem:[#allocation2 + $0x58] ss:$104 sps:$4 sm:$0xff]  }
 0x505   : > { %v10950_v19 = vunpack.i.h.bf16 %v10948_v21  ;;  %v10949_v46 = vunpack.i.l.bf16 %v10948_v21  ;;  %v10953_v9 = vpop.permute.xlu1 %10952  ;;  %v5002_v42 = vsel %vm4957_vm10, %v16530_v23, %v5001_v24  ;;  %v16868_v58 = vpop.f32.mrf.mxu0  ;;  %v17948_v17 = vrot.slane %v16570_v3, 4 }
 0x506   : > { %v10955_v61 = vunpack.i.h.bf16 %v10953_v9  ;;  %v10954_v13 = vunpack.i.l.bf16 %v10953_v9  ;;  %10046 = vmatprep.subr.bf16.mxu1 %v10707_v53  ;;  %v10656_v2 = vcombine.low %v4978_v56, %v5002_v42  ;;  %v10657_v47 = vcombine.high %v4978_v56, %v5002_v42 }
 0x507   : > { %v4955_v52 = vrot.slane %v10950_v19, 4  ;;  %v4942_v55 = vrot.slane %v10949_v46, 4  ;;  %10047 = vmatpush2.bf16.msra.mxu1 %v10706_v34  ;;  %v9652_v43 = vpop.f32.mrf.mxu0  ;;  %v17949_v34 = vrot.slane %v16601_v1, 4  ;;  %v17950_v56 = vrot.slane %v16595_v22, 4  ;;  %v11035_v46 = vld [vmem:[#allocation2 + $0x54] ss:$104 sps:$4 sm:$0xff]  }
 0x508   : > { %v4929_v18 = vrot.slane %v10955_v61, 4  ;;  %v4916_v25 = vrot.slane %v10954_v13, 4  ;;  %9968 = vmatprep.subr.bf16.mxu0 %v10657_v47  ;;  %v10958_v8 = vpop.permute.xlu0 %10957 }
 0x509   : > { %v5051_v23 = vsel %vm3047_vm1, %v4954_v11, %v4955_v52  ;;  %v5027_v57 = vsel %vm3047_vm1, %v4941_v7, %v4942_v55  ;;  %v10960_v10 = vunpack.i.h.bf16 %v10958_v8  ;;  %v10959_v16 = vunpack.i.l.bf16 %v10958_v8  ;;  %9969 = vmatpush2.bf16.msra.mxu0 %v10656_v2  ;;  %v10963_v59 = vpop.permute.xlu1 %10962  ;;  %v9653_v36 = vpop.f32.mrf.mxu0  ;;  %v11032_v11 = vld [vmem:[#allocation2 + $0x124] ss:$104 sps:$4 sm:$0xff]  }
 0x50a   : > { %v5003_v5 = vsel %vm3047_vm1, %v4928_v40, %v4929_v18  ;;  %v4979_v54 = vsel %vm3047_vm1, %v4915_v28, %v4916_v25  ;;  %v10965_v50 = vunpack.i.h.bf16 %v10963_v59  ;;  %v10964_v15 = vunpack.i.l.bf16 %v10963_v59  ;;  %9970 = vmatprep.subr.bf16.mxu0 %v11034_v27  ;;  %v11038_v27 = vld [vmem:[#allocation2 + $0x12c] ss:$104 sps:$4 sm:$0xff]  }
 0x50b   : > { %v6314_v20 = vrot.slane %v10960_v10, 4  ;;  %v6301_v44 = vrot.slane %v10959_v16, 4  ;;  %v5028_v60 = vsel %vm4957_vm10, %v16814_v14, %v5027_v57  ;;  %v5052_v7 = vsel %vm4957_vm10, %v16821_v62, %v5051_v23  ;;  %v16885_v28 = vpop.f32.mrf.mxu1  ;;  %v17952_v57 = vld [vmem:[#allocation10_spill] sm:$0xff]  ;;  %v17953_v16 = vld [vmem:[#allocation19_spill] sm:$0xff] }
 0x50c   : > { %v6288_v39 = vrot.slane %v10965_v50, 4  ;;  %v6275_v12 = vrot.slane %v10964_v15, 4  ;;  %v10682_v40 = vcombine.low %v5028_v60, %v5052_v7  ;;  %v10683_v38 = vcombine.high %v5028_v60, %v5052_v7  ;;  %v16897_v21 = vpop.f32.mrf.mxu0  ;;  %v11043_v50 = vld [vmem:[#allocation2 + $0x60] ss:$104 sps:$4 sm:$0xff]   ;;  %v17955_v15 = vld [vmem:[#allocation9_spill] sm:$0xff] }
 0x50d   : > { %v6386_v4 = vsel %vm3047_vm1, %v17948_v17, %v6301_v44  ;;  %v6410_v24 = vsel %vm3047_vm1, %v6313_v49, %v6314_v20  ;;  %9971 = vmatpush2.bf16.msra.mxu0 %v11032_v11  ;;  %v4980_v14 = vsel %vm4957_vm10, %v16840_v51, %v4979_v54  ;;  %v5004_v62 = vsel %vm4957_vm10, %v16847_v32, %v5003_v5  ;;  %v16905_v49 = vpop.f32.mrf.mxu1  ;;  %v17954_v5 = vld [vmem:[#allocation17_spill] sm:$0xff]  ;;  %v17956_v20 = vld [vmem:[#allocation15_spill] sm:$0xff]  ;;  %v17957_v44 = vld [vmem:[#allocation22_spill] sm:$0xff] }
 0x50e   : > { %v6362_v53 = vsel %vm3047_vm1, %v17949_v34, %v6288_v39  ;;  %v6338_v19 = vsel %vm3047_vm1, %v17950_v56, %v6275_v12  ;;  %9972 = vmatprep.subr.bf16.mxu0 %v11037_v33  ;;  %10048 = vmatprep.subr.bf16.mxu1 %v10683_v38  ;;  %v10659_v51 = vcombine.high %v4980_v14, %v5004_v62  ;;  %v16911_v42 = vpop.f32.mrf.mxu0  ;;  %v17958_v60 = vld [vmem:[#allocation11_spill] sm:$0xff]  ;;  %v17959_v39 = vld [vmem:[#allocation6_spill] sm:$0xff]  ;;  %v17960_v33 = vld [vmem:[#allocation45_spill] sm:$0xff] }
 0x50f   : > { %10049 = vmatpush2.bf16.msra.mxu1 %v10682_v40  ;;  %v6387_v32 = vsel %vm6316_vm2, %v16570_v3, %v6386_v4  ;;  %v6411_v9 = vsel %vm6316_vm2, %v16575_v29, %v6410_v24  ;;  %v9734_v13 = vpop.f32.mrf.mxu1  ;;  %v10658_v2 = vcombine.low %v4980_v14, %v5004_v62  ;;  %v6339_v47 = vsel %vm6316_vm2, %v16595_v22, %v6338_v19  ;;  %v11040_v29 = vld [vmem:[#allocation2 + $0x130] ss:$104 sps:$4 sm:$0xff]   ;;  %v17962_v4 = vld [vmem:[#allocation38_spill] sm:$0xff]  ;;  %v17963_v62 = vld [vmem:[#allocation43_spill] sm:$0xff] }
 0x510   : > { %v10827_v61 = vcombine.high %v6387_v32, %v6411_v9  ;;  %10050 = vmatprep.subr.bf16.mxu1 %v10659_v51  ;;  %v6363_v3 = vsel %vm6316_vm2, %v16601_v1, %v6362_v53  ;;  %v9775_v52 = vpop.f32.mrf.mxu0  ;;  %v10826_v18 = vcombine.low %v6387_v32, %v6411_v9  ;;  %v17951_v1 = vld [vmem:[#allocation20_spill] sm:$0xff]  ;;  %v17961_v38 = vld [vmem:[#allocation33_spill] sm:$0xff] }
 0x511   : > { %9973 = vmatpush2.bf16.msra.mxu0 %v11035_v46  ;;  %v9735_v55 = vpop.f32.mrf.mxu1  ;;  %v10803_v8 = vcombine.high %v6339_v47, %v6363_v3  ;;  %v10802_v22 = vcombine.low %v6339_v47, %v6363_v3  ;;  %v17964_v53 = vld [vmem:[#allocation24_spill] sm:$0xff]  ;;  %v17966_v51 = vld [vmem:[#allocation21_spill] sm:$0xff] }
 0x512   : > { %10077 = vmatprep.subr.bf16.mxu0 %v10827_v61  ;;  %v9776_v25 = vpop.f32.mrf.mxu0  ;;  %v17965_v19 = vld [vmem:[#allocation8_spill] sm:$0xff]  ;;  %v11041_v9 = vld [vmem:[#allocation2 + $0x5c] ss:$104 sps:$4 sm:$0xff]  }
 0x513   : > { %10051 = vmatpush2.bf16.msra.mxu1 %v10658_v2  ;;  %v11436_v25 = vld [vmem:[%s17029_s2 + $0x8] ss:$0 sps:$4 sm:$0xff]  }
 0x514   : > { %9975 = vmatmul.mubr.bf16.vlgmr.msra.gmra.mxu0 %v17584_v37  ;;  %10052 = vmatprep.subr.bf16.mxu1 %v11040_v29  ;;  %v17968_v29 = vld [vmem:[#allocation46_spill] sm:$0xff] }
 0x515   : > { %10078 = vmatpush1.bf16.msra.mxu0 %v10826_v18  ;;  %v16924_v43 = vpop.permute.xlu0 %6945  ;;  %10097 = vmatprep.mubr.bf16.mxu0 %v17589_v35 }
 0x516   : > { %v9157_v23 = vadd.f32 %v17951_v1, %v16924_v43  ;;  %v9159_v10 = vadd.f32 %v17952_v57, %v16924_v43  ;;  %v9239_v59 = vadd.f32 %v17953_v16, %v16924_v43  ;;  %v9241_v54 = vadd.f32 %v17954_v5, %v16924_v43  ;;  %10079 = vmatprep.subr.bf16.mxu0 %v10803_v8 }
 0x517   : > { %v9321_v36 = vadd.f32 %v17955_v15, %v16924_v43  ;;  %v9323_v35 = vadd.f32 %v17956_v20, %v16924_v43  ;;  %v9403_v11 = vadd.f32 %v17957_v44, %v16924_v43  ;;  %v9405_v7 = vadd.f32 %v17958_v60, %v16924_v43  ;;  %10053 = vmatpush2.bf16.msra.mxu1 %v11038_v27  ;;  %v9853_v14 = vpop.f32.mrf.mxu1 }
 0x518   : > { %v9198_v12 = vadd.f32 %v17959_v39, %v9157_v23  ;;  %v9200_v40 = vadd.f32 %v17960_v33, %v9159_v10  ;;  %v9280_v17 = vadd.f32 %v17961_v38, %v9239_v59  ;;  %v9282_v24 = vadd.f32 %v17962_v4, %v9241_v54  ;;  %10054 = vmatprep.subr.bf16.mxu1 %v11043_v50 }
 0x519   : > { %v9362_v34 = vadd.f32 %v17963_v62, %v9321_v36  ;;  %v9364_v56 = vadd.f32 %v17964_v53, %v9323_v35  ;;  %v9444_v46 = vadd.f32 %v17965_v19, %v9403_v11  ;;  %v9446_v32 = vadd.f32 %v17966_v51, %v9405_v7  ;;  %10080 = vmatpush1.bf16.msra.mxu0 %v10802_v22  ;;  %v9855_v3 = vpop.f32.mrf.mxu1 }
 0x51a   : > { %v9485_v61 = vadd.f32 %v16475_v30, %v16924_v43  ;;  %v9487_v13 = vadd.f32 %v16483_v31, %v16924_v43  ;;  %v9567_v2 = vadd.f32 %v16505_v6, %v16924_v43  ;;  %v9569_v47 = vadd.f32 %v16515_v45, %v16924_v43  ;;  %10106 = vst [vmem:[%s16946_s19] sm:$0xff] %v9198_v12  ;;  %v17967_v45 = vld [vmem:[#allocation13_spill] sm:$0xff] }
 0x51b   : > { %10107 = vst [vmem:[%s16946_s19 + $0x8] sm:$0xff] %v9200_v40  ;;  %10108 = vst [vmem:[%s16946_s19 + $0x10] sm:$0xff] %v9280_v17  ;;  %v9649_v52 = vadd.f32 %v16864_v26, %v16924_v43  ;;  %v9651_v30 = vadd.f32 %v16868_v58, %v16924_v43  ;;  %10055 = vmatpush2.bf16.msra.mxu1 %v11041_v9  ;;  %v9731_v31 = vadd.f32 %v16885_v28, %v16924_v43  ;;  %v9857_v28 = vpop.f32.mrf.mxu1 }
 0x51c   : > { %10109 = vst [vmem:[%s16946_s19 + $0x18] sm:$0xff] %v9282_v24  ;;  %10110 = vst [vmem:[%s16946_s19 + $0x20] sm:$0xff] %v9362_v34  ;;  %v9733_v6 = vadd.f32 %v16905_v49, %v16924_v43  ;;  %v9526_v26 = vadd.f32 %v17967_v45, %v9485_v61  ;;  %v9528_v55 = vadd.f32 %v17968_v29, %v9487_v13  ;;  %10839 = vmatmul.mubr.msk.bf16.vlgmr.msra.gmra.mxu0 %vm9118_vm5, %v11436_v25 }
 0x51d   : > { %10111 = vst [vmem:[%s16946_s19 + $0x28] sm:$0xff] %v9364_v56  ;;  %10112 = vst [vmem:[%s16946_s19 + $0x30] sm:$0xff] %v9444_v46  ;;  %v9608_v58 = vadd.f32 %v16512_v63, %v9567_v2  ;;  %v9610_v18 = vadd.f32 %v16520_v48, %v9569_v47  ;;  %v9690_v49 = vadd.f32 %v16553_v41, %v9649_v52  ;;  %v9858_v48 = vpop.f32.mrf.mxu1 }
 0x51e   : > { %10113 = vst [vmem:[%s16946_s19 + $0x38] sm:$0xff] %v9446_v32  ;;  %v9692_v8 = vadd.f32 %v16561_v0, %v9651_v30  ;;  %v9772_v27 = vadd.f32 %v16897_v21, %v9731_v31  ;;  %v9774_v63 = vadd.f32 %v16911_v42, %v9733_v6  ;;  %10114 = vst [vmem:[%s16946_s19 + $0x40] sm:$0xff] %v9526_v26  ;;  %10057 = vmatmul.mubr.bf16.vlgmr.msra.gmra.mxu1 %v17584_v37 }
 0x51f   : > { %10115 = vst [vmem:[%s16946_s19 + $0x48] sm:$0xff] %v9528_v55  ;;  %10116 = vst [vmem:[%s16946_s19 + $0x50] sm:$0xff] %v9608_v58 }
 0x520   : > { %10117 = vst [vmem:[%s16946_s19 + $0x58] sm:$0xff] %v9610_v18  ;;  %10118 = vst [vmem:[%s16946_s19 + $0x60] sm:$0xff] %v9690_v49 }
 0x521   : > { %10119 = vst [vmem:[%s16946_s19 + $0x68] sm:$0xff] %v9692_v8  ;;  %10120 = vst [vmem:[%s16946_s19 + $0x70] sm:$0xff] %v9772_v27 }
 0x522   : > { %10121 = vst [vmem:[%s16946_s19 + $0x78] sm:$0xff] %v9774_v63 }
 0x56f   : > { %v9812_v41 = vpop.f32.mrf.mxu0 }
 0x570   : > { %v9813_v0 = vadd.f32 %v9812_v41, %v16924_v43 }
 0x571   : > { %v9814_v22 = vpop.f32.mrf.mxu0 }
 0x572   : > { %v9854_v21 = vadd.f32 %v9853_v14, %v9813_v0  ;;  %v9815_v42 = vadd.f32 %v9814_v22, %v16924_v43 }
 0x573   : > { %v9816_v1 = vpop.f32.mrf.mxu0 }
 0x574   : > { %10122 = vst [vmem:[%s16946_s19 + $0x80] sm:$0xff] %v9854_v21  ;;  %v9856_v23 = vadd.f32 %v9855_v3, %v9815_v42 }
 0x575   : > { %v9817_v57 = vpop.f32.mrf.mxu0 }
 0x576   : > { %10123 = vst [vmem:[%s16946_s19 + $0x88] sm:$0xff] %v9856_v23 }
 0x577   : > { %v9894_v37 = vpop.f32.mrf.mxu1 }
 0x578   : > { %v9895_v10 = vadd.f32 %v9894_v37, %v16924_v43  ;;  %v9935_v16 = vpop.f32.mrf.mxu0 }
 0x579   : > { %v9896_v59 = vpop.f32.mrf.mxu1 }
 0x57a   : > { %v9936_v5 = vadd.f32 %v9935_v16, %v9895_v10  ;;  %v9897_v54 = vadd.f32 %v9896_v59, %v16924_v43  ;;  %v9937_v50 = vpop.f32.mrf.mxu0 }
 0x57b   : > { %v9898_v15 = vpop.f32.mrf.mxu1 }
 0x57c   : > { %10124 = vst [vmem:[%s16946_s19 + $0x90] sm:$0xff] %v9936_v5  ;;  %v9938_v36 = vadd.f32 %v9937_v50, %v9897_v54  ;;  %v9939_v20 = vpop.f32.mrf.mxu0 }
 0x57d   : > { %v9899_v35 = vpop.f32.mrf.mxu1 }
 0x57e   : > { %10125 = vst [vmem:[%s16946_s19 + $0x98] sm:$0xff] %v9938_v36  ;;  %v9940_v44 = vpop.f32.mrf.mxu0 }
 0x583   : > { %v10017_v11 = vpop.f32.mrf.mxu1 }
 0x585   : > { %v10019_v60 = vpop.f32.mrf.mxu1 }
 0x587   : > { %v10021_v7 = vpop.f32.mrf.mxu1 }
 0x589   : > { %v10022_v39 = vpop.f32.mrf.mxu1 }
 0x5d4   : > { %v9976_v12 = vpop.f32.mrf.mxu0 }
 0x5d5   : > { %v9977_v33 = vadd.f32 %v9976_v12, %v16924_v43 }
 0x5d6   : > { %v9978_v40 = vpop.f32.mrf.mxu0 }
 0x5d7   : > { %v10018_v38 = vadd.f32 %v10017_v11, %v9977_v33  ;;  %v9979_v17 = vadd.f32 %v9978_v40, %v16924_v43 }
 0x5d8   : > { %v9980_v4 = vpop.f32.mrf.mxu0 }
 0x5d9   : > { %10126 = vst [vmem:[%s16946_s19 + $0xa0] sm:$0xff] %v10018_v38  ;;  %v10020_v24 = vadd.f32 %v10019_v60, %v9979_v17 }
 0x5da   : > { %v9981_v14 = vpop.f32.mrf.mxu0 }
 0x5db   : > { %10127 = vst [vmem:[%s16946_s19 + $0xa8] sm:$0xff] %v10020_v24 }
 0x5dc   : > { %v10099_v62 = vpop.f32.mrf.mxu0 }
 0x5de   : > { %v10058_v34 = vpop.f32.mrf.mxu1  ;;  %v10101_v53 = vpop.f32.mrf.mxu0 }
 0x5df   : > { %v10059_v56 = vadd.f32 %v10058_v34, %v16924_v43 }
 0x5e0   : > { %v10060_v19 = vpop.f32.mrf.mxu1  ;;  %v10103_v46 = vpop.f32.mrf.mxu0 }
 0x5e1   : > { %v10100_v51 = vadd.f32 %v10099_v62, %v10059_v56  ;;  %v10061_v32 = vadd.f32 %v10060_v19, %v16924_v43 }
 0x5e2   : > { %v10062_v9 = vpop.f32.mrf.mxu1  ;;  %v10104_v61 = vpop.f32.mrf.mxu0 }
 0x5e3   : > { %10128 = vst [vmem:[%s16946_s19 + $0xb0] sm:$0xff] %v10100_v51  ;;  %v10102_v13 = vadd.f32 %v10101_v53, %v10061_v32 }
 0x5e4   : > { %v10063_v2 = vpop.f32.mrf.mxu1 }
 0x5e5   : > { %10129 = vst [vmem:[%s16946_s19 + $0xb8] sm:$0xff] %v10102_v13 }
 0x5e6 PF: > { %p13_p9 = scmp.ge.s32.totalorder %s11520_s23, 4   ;;  %s17969_s20 = smov %s11455_s21 }
 0x5e7   : > { %s17970_s21 = smov %s11529_s26  ;;  %s17971_s22 = smov %s11520_s23 }
 0x5e8   :  { %15 = sbr.rel (!%p13_p9) target bundleno = 4 (0x4), region = 98 }

</bundles_post_ra>
